<compile_context>
chip_gen: v6e
topology: v6e:2x2x1
jax: 0.10.0
libtpu: 0.0.40
codegen_flags: <defaults>
</compile_context>

<pallas_src>
import functools

import jax
import jax.numpy as jnp
from jax import lax
from jax.experimental import pallas as pl
from jax.experimental.pallas import tpu as pltpu

_NEG = -1e30  # -inf stand-in for pool padding; safe because pooled values are post-SiLU (>= -0.279).


def _round_up(v, m):
    return (v + m - 1) // m * m


def _maxpool5_slice(v):
    """Fallback 5x5/1/2 max pool (torch MaxPool2d(5,1,2)) on (H, W, C), pad+slice."""
    H, W, C = v.shape
    negw = jnp.full((H, 2, C), _NEG, v.dtype)
    p = jnp.concatenate([negw, v, negw], axis=1)          # (H,   W+4, C)
    negh = jnp.full((2, W + 4, C), _NEG, v.dtype)
    p = jnp.concatenate([negh, p, negh], axis=0)          # (H+4, W+4, C)
    t = p[:, 0:W, :]
    for dw in range(1, 5):
        t = jnp.maximum(t, p[:, dw:dw + W, :])            # (H+4, W, C)
    m = t[0:H, :, :]
    for dh in range(1, 5):
        m = jnp.maximum(m, t[dh:dh + H, :, :])            # (H,   W, C)
    return m


def _sppf_kernel(x_ref, w1_ref, s1_ref, b1_ref, w2_ref, s2_ref, b2_ref,
                 o_ref, pool_buf, *, H, W, CMP, TC2, use_roll):
    """One grid step = (image n, Cout tile j).

    x_ref:    (1, H*W, C1P)    bf16 input, channels lane-padded
    w1_ref:   (C1P, CMP)       bf16 conv1 weight (resident)
    s1/b1:    (1, CMP)         f32 folded BN1 scale / bias (resident)
    w2_ref:   (4*CMP, C2P)     bf16 conv2 weight, resident for the whole grid
    s2/b2:    (1, C2P)         f32 folded BN2 scale / bias (resident)
    o_ref:    (1, H*W, TC2)    bf16 output tile
    pool_buf: (H*W, 4*CMP)     bf16 VMEM scratch = virtual concat [y|m|m2|m3]
    """
    j = pl.program_id(1)
    HW = H * W

    # Pooled branches depend only on the image n, not on the Cout tile:
    # compute once (j == 0), keep in VMEM scratch, reuse for every Cout tile.
    @pl.when(j == 0)
    def _():
        # conv1: 1x1 conv == (H*W, Cin) @ (Cin, Cmid) on the MXU, f32 accumulate.
        a = jnp.dot(x_ref[0], w1_ref[...], preferred_element_type=jnp.float32)
        y = a * s1_ref[0] + b1_ref[0]                     # folded inference BN
        y = y * jax.nn.sigmoid(y)                         # SiLU (EUP)
        pool_buf[:, 0:CMP] = y.astype(jnp.bfloat16)

        if use_roll:
            # Roll-based separable 5x5/1/2 max pool on the flat (H*W, CMP) layout.
            # Shifts run on the otherwise-idle XLU; edge handling uses masks built
            # by rolling the row-index iota with the *same* shifts (sign/wrap proof).
            row = lax.broadcasted_iota(jnp.int32, (H, W, CMP), 0).reshape(HW, CMP)
            taps_w = []
            for s in (-2, -1, 1, 2):                      # W-direction taps
                sh = s % HW
                r = pltpu.roll(row, shift=sh, axis=0)
                taps_w.append((sh, r == row))             # valid iff same image row
            taps_h = []
            for k in (-2, -1, 1, 2):                      # H-direction taps
                sh = (k * W) % HW
                r = pltpu.roll(row, shift=sh, axis=0)
                d = r - row
                taps_h.append((sh, (d >= -2) & (d <= 2))) # valid iff |delta row| <= 2

            cur = y                                       # f32 (H*W, CMP)
            for b in range(1, 4):
                t = cur
                for sh, m in taps_w:
                    t = jnp.where(m, jnp.maximum(t, pltpu.roll(cur, shift=sh, axis=0)), t)
                nxt = t
                for sh, m in taps_h:
                    nxt = jnp.where(m, jnp.maximum(nxt, pltpu.roll(t, shift=sh, axis=0)), nxt)
                cur = nxt
                pool_buf[:, b * CMP:(b + 1) * CMP] = cur.astype(jnp.bfloat16)
        else:
            # Proven pad+slice fallback (also used if rolls fail to lower).
            cur = y.reshape(H, W, CMP)
            for b in range(1, 4):
                cur = _maxpool5_slice(cur)
                pool_buf[:, b * CMP:(b + 1) * CMP] = (
                    cur.reshape(HW, CMP).astype(jnp.bfloat16))

    # conv2 on the never-materialized concat: ONE matmul with K = 4*CMP.
    col0 = pl.multiple_of(j * TC2, 128)
    w2t = w2_ref[:, pl.ds(col0, TC2)]                     # (4*CMP, TC2), lane-aligned slice
    acc = jnp.dot(pool_buf[...], w2t, preferred_element_type=jnp.float32)
    z = acc * s2_ref[:, pl.ds(col0, TC2)] + b2_ref[:, pl.ds(col0, TC2)]
    z = z * jax.nn.sigmoid(z)                             # SiLU
    o_ref[0] = z.astype(o_ref.dtype)


def _pick_tc2(HW, C1P, CMP, C2P, budget_bytes=40 * 1024 * 1024):
    """Largest lane-dense Cout tile whose rough VMEM resident set fits the budget."""
    def need(tc2):
        return (2 * HW * C1P * 2          # x block, double-buffered bf16
                + 2 * HW * tc2 * 2        # out block, double-buffered bf16
                + 2 * 4 * CMP * C2P * 2   # resident w2 (2 buffers) bf16
                + 2 * C1P * CMP * 2       # resident w1 bf16
                + HW * 4 * CMP * 2        # pool_buf scratch bf16
                + 8 * HW * CMP * 4)       # headroom for in-kernel f32 pool temps/masks
    for tc2 in (C2P, 512, 256, 128):
        if tc2 <= C2P and C2P % tc2 == 0 and need(tc2) <= budget_bytes:
            return tc2
    return 128


def sppf_forward(x_nchw,
                 w1_oihw, gamma1, beta1, mean1, var1,
                 w2_oihw, gamma2, beta2, mean2, var2,
                 *, eps=1e-5, use_roll_pool=True):
    """Pallas implementation of SPPF.forward. Input/output NCHW f32."""
    N, Cin, H, W = x_nchw.shape
    Cmid = w1_oihw.shape[0]
    Cout = w2_oihw.shape[0]
    assert w1_oihw.shape == (Cmid, Cin, 1, 1)
    assert w2_oihw.shape == (Cout, 4 * Cmid, 1, 1)
    HW = H * W

    # Lane-dense (128-multiple) channel padding; Cout tile as large as VMEM allows.
    C1P = _round_up(Cin, 128)
    CMP = _round_up(Cmid, 128)
    C2P = _round_up(Cout, 128)
    TC2 = _pick_tc2(HW, C1P, CMP, C2P)
    use_roll = bool(use_roll_pool) and (HW % 8 == 0)

    # ---- glue (plain JAX, fused under jit): layout, padding, BN folding -----
    x = jnp.transpose(x_nchw, (0, 2, 3, 1)).reshape(N, HW, Cin)
    x = jnp.pad(x, ((0, 0), (0, 0), (0, C1P - Cin))).astype(jnp.bfloat16)

    w1 = jnp.transpose(w1_oihw[:, :, 0, 0], (1, 0))                 # (Cin, Cmid)
    w1 = jnp.pad(w1, ((0, C1P - Cin), (0, CMP - Cmid))).astype(jnp.bfloat16)

    # conv2 weight for the single K=4*CMP matmul: (4, Cmid, Cout) -> (4*CMP, C2P)
    w2 = jnp.transpose(w2_oihw[:, :, 0, 0], (1, 0)).reshape(4, Cmid, Cout)
    w2 = jnp.pad(w2, ((0, 0), (0, CMP - Cmid), (0, C2P - Cout)))
    w2 = w2.reshape(4 * CMP, C2P).astype(jnp.bfloat16)

    s1 = (gamma1 / jnp.sqrt(var1 + eps)).astype(jnp.float32)
    bb1 = (beta1 - mean1 * s1).astype(jnp.float32)
    s1 = jnp.pad(s1, (0, CMP - Cmid)).reshape(1, CMP)
    bb1 = jnp.pad(bb1, (0, CMP - Cmid)).reshape(1, CMP)

    s2 = (gamma2 / jnp.sqrt(var2 + eps)).astype(jnp.float32)
    bb2 = (beta2 - mean2 * s2).astype(jnp.float32)
    s2 = jnp.pad(s2, (0, C2P - Cout)).reshape(1, C2P)
    bb2 = jnp.pad(bb2, (0, C2P - Cout)).reshape(1, C2P)

    kernel = functools.partial(_sppf_kernel, H=H, W=W, CMP=CMP, TC2=TC2,
                               use_roll=use_roll)

    flops = 2 * N * HW * (C1P * CMP + 4 * CMP * C2P)
    transc = N * HW * (CMP + C2P)
    bytes_acc = (x.size * 2 + w1.size * 2 + w2.size * 2
                 + (s1.size + bb1.size + s2.size + bb2.size) * 4
                 + N * HW * C2P * 2)

    out = pl.pallas_call(
        kernel,
        out_shape=jax.ShapeDtypeStruct((N, HW, C2P), jnp.bfloat16),
        grid_spec=pltpu.PrefetchScalarGridSpec(
            num_scalar_prefetch=0,
            # N is "parallel" (megacore); Cout tiles are "arbitrary" because
            # they reuse the pooled branches cached in VMEM scratch at j == 0.
            grid=(N, C2P // TC2),
            in_specs=[
                pl.BlockSpec((1, HW, C1P), lambda n, j: (n, 0, 0)),
                pl.BlockSpec((C1P, CMP), lambda n, j: (0, 0)),
                pl.BlockSpec((1, CMP), lambda n, j: (0, 0)),
                pl.BlockSpec((1, CMP), lambda n, j: (0, 0)),
                pl.BlockSpec((4 * CMP, C2P), lambda n, j: (0, 0)),   # resident
                pl.BlockSpec((1, C2P), lambda n, j: (0, 0)),         # resident
                pl.BlockSpec((1, C2P), lambda n, j: (0, 0)),         # resident
            ],
            out_specs=pl.BlockSpec((1, HW, TC2), lambda n, j: (n, 0, j)),
            scratch_shapes=[pltpu.VMEM((HW, 4 * CMP), jnp.bfloat16)],
        ),
        compiler_params=pltpu.CompilerParams(
            dimension_semantics=("parallel", "arbitrary"),
            vmem_limit_bytes=64 * 1024 * 1024),
        cost_estimate=pl.CostEstimate(flops=flops, transcendentals=transc,
                                      bytes_accessed=bytes_acc),
    )(x, w1, s1, bb1, w2, s2, bb2)

    out = out[:, :, :Cout].reshape(N, H, W, Cout)
    return jnp.transpose(out, (0, 3, 1, 2)).astype(jnp.float32)     # back to NCHW


def _reference_sppf(x, w1, g1, b1, m1, v1, w2, g2, b2, m2, v2, eps=1e-5):
    def conv_bn_silu(z, w, g, b, mean, var):
        y = lax.conv_general_dilated(z, w, (1, 1), "VALID",
                                     dimension_numbers=("NCHW", "OIHW", "NCHW"))
        s = (g / jnp.sqrt(var + eps)).reshape(1, -1, 1, 1)
        y = y * s + (b - mean * g / jnp.sqrt(var + eps)).reshape(1, -1, 1, 1)
        return y * jax.nn.sigmoid(y)

    def maxpool5(z):
        return lax.reduce_window(z, -jnp.inf, lax.max, (1, 1, 5, 5),
                                 (1, 1, 1, 1),
                                 ((0, 0), (0, 0), (2, 2), (2, 2)))

    y = conv_bn_silu(x, w1, g1, b1, m1, v1)
    p1 = maxpool5(y)
    p2 = maxpool5(p1)
    p3 = maxpool5(p2)
    cat = jnp.concatenate([y, p1, p2, p3], axis=1)
    return conv_bn_silu(cat, w2, g2, b2, m2, v2)


if __name__ == "__main__":
    key = jax.random.PRNGKey(0)
    ks = jax.random.split(key, 11)

    N, Cin, H, W = 2, 4, 16, 16
    Cout = 8
    Cmid = Cin // 2

    x = jax.random.normal(ks[0], (N, Cin, H, W), jnp.float32)

    w1 = jax.random.normal(ks[1], (Cmid, Cin, 1, 1), jnp.float32) * 0.5
    gamma1 = jax.random.uniform(ks[2], (Cmid,), jnp.float32, 0.5, 1.5)
    beta1 = jax.random.normal(ks[3], (Cmid,), jnp.float32) * 0.1
    mean1 = jax.random.normal(ks[4], (Cmid,), jnp.float32) * 0.1
    var1 = jax.random.uniform(ks[5], (Cmid,), jnp.float32, 0.5, 1.5)

    w2 = jax.random.normal(ks[6], (Cout, 4 * Cmid, 1, 1), jnp.float32) * 0.3
    gamma2 = jax.random.uniform(ks[7], (Cout,), jnp.float32, 0.5, 1.5)
    beta2 = jax.random.normal(ks[8], (Cout,), jnp.float32) * 0.1
    mean2 = jax.random.normal(ks[9], (Cout,), jnp.float32) * 0.1
    var2 = jax.random.uniform(ks[10], (Cout,), jnp.float32, 0.5, 1.5)

    args = (x, w1, gamma1, beta1, mean1, var1, w2, gamma2, beta2, mean2, var2)
    ref = _reference_sppf(*args)

    def run(use_roll):
        fwd = jax.jit(functools.partial(sppf_forward, use_roll_pool=use_roll))
        return jax.block_until_ready(fwd(*args))

    # Prefer the roll-based (XLU) pooling path; fall back to the proven
    # pad+slice path if it fails to lower/validate on this backend.
    out, ok = None, False
    try:
        out = run(True)
        ok = bool(jnp.allclose(out, ref, atol=5e-2, rtol=5e-2))
    except Exception:
        ok = False
    if not ok:
        out = run(False)
        ok = bool(jnp.allclose(out, ref, atol=5e-2, rtol=5e-2))

    assert out.shape == (N, Cout, H, W), out.shape
    max_err = float(jnp.max(jnp.abs(out - ref)))
    # bf16 MXU operands / bf16 output with f32 accumulation -> modest tolerance.
    assert ok, max_err

    print("KERNEL_OK")
</pallas_src>

<mosaic_0001>
module attributes {stable_mosaic.version = 11 : i64} {
  func.func @_sppf_kernel(%arg0: i32, %arg1: i32, %arg2: memref<1x256x128xbf16, #tpu.memory_space<vmem>>, %arg3: memref<128x128xbf16, #tpu.memory_space<vmem>>, %arg4: memref<1x128xf32, #tpu.memory_space<vmem>>, %arg5: memref<1x128xf32, #tpu.memory_space<vmem>>, %arg6: memref<512x128xbf16, #tpu.memory_space<vmem>>, %arg7: memref<1x128xf32, #tpu.memory_space<vmem>>, %arg8: memref<1x128xf32, #tpu.memory_space<vmem>>, %arg9: memref<1x256x128xbf16, #tpu.memory_space<vmem>>, %arg10: memref<256x512xbf16, #tpu.memory_space<vmem>>) attributes {dimension_semantics = [#tpu.dimension_semantics<parallel>, #tpu.dimension_semantics<arbitrary>], iteration_bounds = array<i64: 2, 1>, scalar_prefetch = 0 : i64, scratch_operands = 1 : i64, tpu.core_type = #tpu.core_type<tc>, window_params = [{transform_indices = @transform_0, window_bounds = array<i64: 1, 256, 128>}, {pipeline_mode = #tpu.pipeline_mode<synchronous>, transform_indices = @transform_1, window_bounds = array<i64: 128, 128>}, {pipeline_mode = #tpu.pipeline_mode<synchronous>, transform_indices = @transform_2, window_bounds = array<i64: 1, 128>}, {pipeline_mode = #tpu.pipeline_mode<synchronous>, transform_indices = @transform_3, window_bounds = array<i64: 1, 128>}, {pipeline_mode = #tpu.pipeline_mode<synchronous>, transform_indices = @transform_4, window_bounds = array<i64: 512, 128>}, {pipeline_mode = #tpu.pipeline_mode<synchronous>, transform_indices = @transform_5, window_bounds = array<i64: 1, 128>}, {pipeline_mode = #tpu.pipeline_mode<synchronous>, transform_indices = @transform_6, window_bounds = array<i64: 1, 128>}, {transform_indices = @transform_7, window_bounds = array<i64: 1, 256, 128>}]} {
    %c0_i32 = arith.constant 0 : i32
    %0 = arith.cmpi eq, %arg1, %c0_i32 : i32
    %1 = arith.extui %0 : i1 to i32
    %c0_i32_0 = arith.constant 0 : i32
    %2 = arith.cmpi ne, %1, %c0_i32_0 : i32
    scf.if %2 {
      %c0_9 = arith.constant 0 : index
      %c0_10 = arith.constant 0 : index
      %c0_11 = arith.constant 0 : index
      %27 = vector.load %arg2[%c0_9, %c0_10, %c0_11] : memref<1x256x128xbf16, #tpu.memory_space<vmem>>, vector<1x256x128xbf16>
      %28 = vector.shape_cast %27 : vector<1x256x128xbf16> to vector<256x128xbf16>
      %c0_12 = arith.constant 0 : index
      %c0_13 = arith.constant 0 : index
      %29 = vector.load %arg3[%c0_12, %c0_13] : memref<128x128xbf16, #tpu.memory_space<vmem>>, vector<128x128xbf16>
      %cst_14 = arith.constant dense<0.000000e+00> : vector<256x128xf32>
      %30 = tpu.matmul %28, %29, %cst_14 {dimension_numbers = #tpu.dot_dimension_numbers<[1], [0], [0], [1], [0, 0, 1, 1], [], []>} : vector<256x128xbf16>, vector<128x128xbf16>, vector<256x128xf32> -> vector<256x128xf32>
      %c0_15 = arith.constant 0 : index
      %c0_16 = arith.constant 0 : index
      %31 = vector.load %arg4[%c0_15, %c0_16] : memref<1x128xf32, #tpu.memory_space<vmem>>, vector<1x128xf32>
      %32 = vector.shape_cast %31 : vector<1x128xf32> to vector<128xf32>
      %33 = vector.shape_cast %32 : vector<128xf32> to vector<1x128xf32>
      %34 = vector.broadcast %33 : vector<1x128xf32> to vector<256x128xf32>
      %35 = arith.mulf %30, %34 : vector<256x128xf32>
      %c0_17 = arith.constant 0 : index
      %c0_18 = arith.constant 0 : index
      %36 = vector.load %arg5[%c0_17, %c0_18] : memref<1x128xf32, #tpu.memory_space<vmem>>, vector<1x128xf32>
      %37 = vector.shape_cast %36 : vector<1x128xf32> to vector<128xf32>
      %38 = vector.shape_cast %37 : vector<128xf32> to vector<1x128xf32>
      %39 = vector.broadcast %38 : vector<1x128xf32> to vector<256x128xf32>
      %40 = arith.addf %35, %39 : vector<256x128xf32>
      %41 = arith.negf %40 : vector<256x128xf32>
      %42 = math.exp %41 : vector<256x128xf32>
      %cst_19 = arith.constant 1.000000e+00 : f32
      %43 = vector.broadcast %cst_19 : f32 to vector<256x128xf32>
      %44 = arith.addf %43, %42 : vector<256x128xf32>
      %45 = arith.divf %43, %44 : vector<256x128xf32>
      %46 = arith.mulf %40, %45 : vector<256x128xf32>
      %47 = arith.truncf %46 : vector<256x128xf32> to vector<256x128xbf16>
      %c0_20 = arith.constant 0 : index
      %c0_21 = arith.constant 0 : index
      %48 = vector.load %arg10[%c0_20, %c0_21] : memref<256x512xbf16, #tpu.memory_space<vmem>>, vector<256x128xbf16>
      tpu.vector_store %arg10[%c0_20, %c0_21], %47 {strides = array<i32>} : memref<256x512xbf16, #tpu.memory_space<vmem>>, vector<256x128xbf16>,
      %49 = tpu.iota {dimensions = array<i32: 0>} : vector<16x16x128xi32>
      %50 = vector.shape_cast %49 : vector<16x16x128xi32> to vector<256x128xi32>
      %c254_i32 = arith.constant 254 : i32
      %51 = tpu.dynamic_rotate %50 by %c254_i32 dim 0 : vector<256x128xi32>, i32 -> vector<256x128xi32>
      %52 = arith.cmpi eq, %51, %50 : vector<256x128xi32>
      %c255_i32 = arith.constant 255 : i32
      %53 = tpu.dynamic_rotate %50 by %c255_i32 dim 0 : vector<256x128xi32>, i32 -> vector<256x128xi32>
      %54 = arith.cmpi eq, %53, %50 : vector<256x128xi32>
      %c1_i32 = arith.constant 1 : i32
      %55 = tpu.dynamic_rotate %50 by %c1_i32 dim 0 : vector<256x128xi32>, i32 -> vector<256x128xi32>
      %56 = arith.cmpi eq, %55, %50 : vector<256x128xi32>
      %c2_i32 = arith.constant 2 : i32
      %57 = tpu.dynamic_rotate %50 by %c2_i32 dim 0 : vector<256x128xi32>, i32 -> vector<256x128xi32>
      %58 = arith.cmpi eq, %57, %50 : vector<256x128xi32>
      %c224_i32 = arith.constant 224 : i32
      %59 = tpu.dynamic_rotate %50 by %c224_i32 dim 0 : vector<256x128xi32>, i32 -> vector<256x128xi32>
      %60 = arith.subi %59, %50 : vector<256x128xi32>
      %c-2_i32 = arith.constant -2 : i32
      %61 = vector.broadcast %c-2_i32 : i32 to vector<256x128xi32>
      %62 = arith.cmpi sge, %60, %61 : vector<256x128xi32>
      %c2_i32_22 = arith.constant 2 : i32
      %63 = vector.broadcast %c2_i32_22 : i32 to vector<256x128xi32>
      %64 = arith.cmpi sle, %60, %63 : vector<256x128xi32>
      %65 = arith.andi %62, %64 : vector<256x128xi1>
      %c240_i32 = arith.constant 240 : i32
      %66 = tpu.dynamic_rotate %50 by %c240_i32 dim 0 : vector<256x128xi32>, i32 -> vector<256x128xi32>
      %67 = arith.subi %66, %50 : vector<256x128xi32>
      %c-2_i32_23 = arith.constant -2 : i32
      %68 = vector.broadcast %c-2_i32_23 : i32 to vector<256x128xi32>
      %69 = arith.cmpi sge, %67, %68 : vector<256x128xi32>
      %c2_i32_24 = arith.constant 2 : i32
      %70 = vector.broadcast %c2_i32_24 : i32 to vector<256x128xi32>
      %71 = arith.cmpi sle, %67, %70 : vector<256x128xi32>
      %72 = arith.andi %69, %71 : vector<256x128xi1>
      %c16_i32 = arith.constant 16 : i32
      %73 = tpu.dynamic_rotate %50 by %c16_i32 dim 0 : vector<256x128xi32>, i32 -> vector<256x128xi32>
      %74 = arith.subi %73, %50 : vector<256x128xi32>
      %c-2_i32_25 = arith.constant -2 : i32
      %75 = vector.broadcast %c-2_i32_25 : i32 to vector<256x128xi32>
      %76 = arith.cmpi sge, %74, %75 : vector<256x128xi32>
      %c2_i32_26 = arith.constant 2 : i32
      %77 = vector.broadcast %c2_i32_26 : i32 to vector<256x128xi32>
      %78 = arith.cmpi sle, %74, %77 : vector<256x128xi32>
      %79 = arith.andi %76, %78 : vector<256x128xi1>
      %c32_i32 = arith.constant 32 : i32
      %80 = tpu.dynamic_rotate %50 by %c32_i32 dim 0 : vector<256x128xi32>, i32 -> vector<256x128xi32>
      %81 = arith.subi %80, %50 : vector<256x128xi32>
      %c-2_i32_27 = arith.constant -2 : i32
      %82 = vector.broadcast %c-2_i32_27 : i32 to vector<256x128xi32>
      %83 = arith.cmpi sge, %81, %82 : vector<256x128xi32>
      %c2_i32_28 = arith.constant 2 : i32
      %84 = vector.broadcast %c2_i32_28 : i32 to vector<256x128xi32>
      %85 = arith.cmpi sle, %81, %84 : vector<256x128xi32>
      %86 = arith.andi %83, %85 : vector<256x128xi1>
      %c254_i32_29 = arith.constant 254 : i32
      %87 = tpu.dynamic_rotate %46 by %c254_i32_29 dim 0 : vector<256x128xf32>, i32 -> vector<256x128xf32>
      %88 = arith.maximumf %46, %87 : vector<256x128xf32>
      %89 = arith.select %52, %88, %46 : vector<256x128xi1>, vector<256x128xf32>
      %c255_i32_30 = arith.constant 255 : i32
      %90 = tpu.dynamic_rotate %46 by %c255_i32_30 dim 0 : vector<256x128xf32>, i32 -> vector<256x128xf32>
      %91 = arith.maximumf %89, %90 : vector<256x128xf32>
      %92 = arith.select %54, %91, %89 : vector<256x128xi1>, vector<256x128xf32>
      %c1_i32_31 = arith.constant 1 : i32
      %93 = tpu.dynamic_rotate %46 by %c1_i32_31 dim 0 : vector<256x128xf32>, i32 -> vector<256x128xf32>
      %94 = arith.maximumf %92, %93 : vector<256x128xf32>
      %95 = arith.select %56, %94, %92 : vector<256x128xi1>, vector<256x128xf32>
      %c2_i32_32 = arith.constant 2 : i32
      %96 = tpu.dynamic_rotate %46 by %c2_i32_32 dim 0 : vector<256x128xf32>, i32 -> vector<256x128xf32>
      %97 = arith.maximumf %95, %96 : vector<256x128xf32>
      %98 = arith.select %58, %97, %95 : vector<256x128xi1>, vector<256x128xf32>
      %c224_i32_33 = arith.constant 224 : i32
      %99 = tpu.dynamic_rotate %98 by %c224_i32_33 dim 0 : vector<256x128xf32>, i32 -> vector<256x128xf32>
      %100 = arith.maximumf %98, %99 : vector<256x128xf32>
      %101 = arith.select %65, %100, %98 : vector<256x128xi1>, vector<256x128xf32>
      %c240_i32_34 = arith.constant 240 : i32
      %102 = tpu.dynamic_rotate %98 by %c240_i32_34 dim 0 : vector<256x128xf32>, i32 -> vector<256x128xf32>
      %103 = arith.maximumf %101, %102 : vector<256x128xf32>
      %104 = arith.select %72, %103, %101 : vector<256x128xi1>, vector<256x128xf32>
      %c16_i32_35 = arith.constant 16 : i32
      %105 = tpu.dynamic_rotate %98 by %c16_i32_35 dim 0 : vector<256x128xf32>, i32 -> vector<256x128xf32>
      %106 = arith.maximumf %104, %105 : vector<256x128xf32>
      %107 = arith.select %79, %106, %104 : vector<256x128xi1>, vector<256x128xf32>
      %c32_i32_36 = arith.constant 32 : i32
      %108 = tpu.dynamic_rotate %98 by %c32_i32_36 dim 0 : vector<256x128xf32>, i32 -> vector<256x128xf32>
      %109 = arith.maximumf %107, %108 : vector<256x128xf32>
      %110 = arith.select %86, %109, %107 : vector<256x128xi1>, vector<256x128xf32>
      %111 = arith.truncf %110 : vector<256x128xf32> to vector<256x128xbf16>
      %c0_37 = arith.constant 0 : index
      %c128 = arith.constant 128 : index
      %112 = vector.load %arg10[%c0_37, %c128] : memref<256x512xbf16, #tpu.memory_space<vmem>>, vector<256x128xbf16>
      tpu.vector_store %arg10[%c0_37, %c128], %111 {strides = array<i32>} : memref<256x512xbf16, #tpu.memory_space<vmem>>, vector<256x128xbf16>,
      %c254_i32_38 = arith.constant 254 : i32
      %113 = tpu.dynamic_rotate %110 by %c254_i32_38 dim 0 : vector<256x128xf32>, i32 -> vector<256x128xf32>
      %114 = arith.maximumf %110, %113 : vector<256x128xf32>
      %115 = arith.select %52, %114, %110 : vector<256x128xi1>, vector<256x128xf32>
      %c255_i32_39 = arith.constant 255 : i32
      %116 = tpu.dynamic_rotate %110 by %c255_i32_39 dim 0 : vector<256x128xf32>, i32 -> vector<256x128xf32>
      %117 = arith.maximumf %115, %116 : vector<256x128xf32>
      %118 = arith.select %54, %117, %115 : vector<256x128xi1>, vector<256x128xf32>
      %c1_i32_40 = arith.constant 1 : i32
      %119 = tpu.dynamic_rotate %110 by %c1_i32_40 dim 0 : vector<256x128xf32>, i32 -> vector<256x128xf32>
      %120 = arith.maximumf %118, %119 : vector<256x128xf32>
      %121 = arith.select %56, %120, %118 : vector<256x128xi1>, vector<256x128xf32>
      %c2_i32_41 = arith.constant 2 : i32
      %122 = tpu.dynamic_rotate %110 by %c2_i32_41 dim 0 : vector<256x128xf32>, i32 -> vector<256x128xf32>
      %123 = arith.maximumf %121, %122 : vector<256x128xf32>
      %124 = arith.select %58, %123, %121 : vector<256x128xi1>, vector<256x128xf32>
      %c224_i32_42 = arith.constant 224 : i32
      %125 = tpu.dynamic_rotate %124 by %c224_i32_42 dim 0 : vector<256x128xf32>, i32 -> vector<256x128xf32>
      %126 = arith.maximumf %124, %125 : vector<256x128xf32>
      %127 = arith.select %65, %126, %124 : vector<256x128xi1>, vector<256x128xf32>
      %c240_i32_43 = arith.constant 240 : i32
      %128 = tpu.dynamic_rotate %124 by %c240_i32_43 dim 0 : vector<256x128xf32>, i32 -> vector<256x128xf32>
      %129 = arith.maximumf %127, %128 : vector<256x128xf32>
      %130 = arith.select %72, %129, %127 : vector<256x128xi1>, vector<256x128xf32>
      %c16_i32_44 = arith.constant 16 : i32
      %131 = tpu.dynamic_rotate %124 by %c16_i32_44 dim 0 : vector<256x128xf32>, i32 -> vector<256x128xf32>
      %132 = arith.maximumf %130, %131 : vector<256x128xf32>
      %133 = arith.select %79, %132, %130 : vector<256x128xi1>, vector<256x128xf32>
      %c32_i32_45 = arith.constant 32 : i32
      %134 = tpu.dynamic_rotate %124 by %c32_i32_45 dim 0 : vector<256x128xf32>, i32 -> vector<256x128xf32>
      %135 = arith.maximumf %133, %134 : vector<256x128xf32>
      %136 = arith.select %86, %135, %133 : vector<256x128xi1>, vector<256x128xf32>
      %137 = arith.truncf %136 : vector<256x128xf32> to vector<256x128xbf16>
      %c0_46 = arith.constant 0 : index
      %c256 = arith.constant 256 : index
      %138 = vector.load %arg10[%c0_46, %c256] : memref<256x512xbf16, #tpu.memory_space<vmem>>, vector<256x128xbf16>
      tpu.vector_store %arg10[%c0_46, %c256], %137 {strides = array<i32>} : memref<256x512xbf16, #tpu.memory_space<vmem>>, vector<256x128xbf16>,
      %c254_i32_47 = arith.constant 254 : i32
      %139 = tpu.dynamic_rotate %136 by %c254_i32_47 dim 0 : vector<256x128xf32>, i32 -> vector<256x128xf32>
      %140 = arith.maximumf %136, %139 : vector<256x128xf32>
      %141 = arith.select %52, %140, %136 : vector<256x128xi1>, vector<256x128xf32>
      %c255_i32_48 = arith.constant 255 : i32
      %142 = tpu.dynamic_rotate %136 by %c255_i32_48 dim 0 : vector<256x128xf32>, i32 -> vector<256x128xf32>
      %143 = arith.maximumf %141, %142 : vector<256x128xf32>
      %144 = arith.select %54, %143, %141 : vector<256x128xi1>, vector<256x128xf32>
      %c1_i32_49 = arith.constant 1 : i32
      %145 = tpu.dynamic_rotate %136 by %c1_i32_49 dim 0 : vector<256x128xf32>, i32 -> vector<256x128xf32>
      %146 = arith.maximumf %144, %145 : vector<256x128xf32>
      %147 = arith.select %56, %146, %144 : vector<256x128xi1>, vector<256x128xf32>
      %c2_i32_50 = arith.constant 2 : i32
      %148 = tpu.dynamic_rotate %136 by %c2_i32_50 dim 0 : vector<256x128xf32>, i32 -> vector<256x128xf32>
      %149 = arith.maximumf %147, %148 : vector<256x128xf32>
      %150 = arith.select %58, %149, %147 : vector<256x128xi1>, vector<256x128xf32>
      %c224_i32_51 = arith.constant 224 : i32
      %151 = tpu.dynamic_rotate %150 by %c224_i32_51 dim 0 : vector<256x128xf32>, i32 -> vector<256x128xf32>
      %152 = arith.maximumf %150, %151 : vector<256x128xf32>
      %153 = arith.select %65, %152, %150 : vector<256x128xi1>, vector<256x128xf32>
      %c240_i32_52 = arith.constant 240 : i32
      %154 = tpu.dynamic_rotate %150 by %c240_i32_52 dim 0 : vector<256x128xf32>, i32 -> vector<256x128xf32>
      %155 = arith.maximumf %153, %154 : vector<256x128xf32>
      %156 = arith.select %72, %155, %153 : vector<256x128xi1>, vector<256x128xf32>
      %c16_i32_53 = arith.constant 16 : i32
      %157 = tpu.dynamic_rotate %150 by %c16_i32_53 dim 0 : vector<256x128xf32>, i32 -> vector<256x128xf32>
      %158 = arith.maximumf %156, %157 : vector<256x128xf32>
      %159 = arith.select %79, %158, %156 : vector<256x128xi1>, vector<256x128xf32>
      %c32_i32_54 = arith.constant 32 : i32
      %160 = tpu.dynamic_rotate %150 by %c32_i32_54 dim 0 : vector<256x128xf32>, i32 -> vector<256x128xf32>
      %161 = arith.maximumf %159, %160 : vector<256x128xf32>
      %162 = arith.select %86, %161, %159 : vector<256x128xi1>, vector<256x128xf32>
      %163 = arith.truncf %162 : vector<256x128xf32> to vector<256x128xbf16>
      %c0_55 = arith.constant 0 : index
      %c384 = arith.constant 384 : index
      %164 = vector.load %arg10[%c0_55, %c384] : memref<256x512xbf16, #tpu.memory_space<vmem>>, vector<256x128xbf16>
      tpu.vector_store %arg10[%c0_55, %c384], %163 {strides = array<i32>} : memref<256x512xbf16, #tpu.memory_space<vmem>>, vector<256x128xbf16>,
    } else {
    }
    %c128_i32 = arith.constant 128 : i32
    %3 = arith.muli %arg1, %c128_i32 : i32
    %4 = tpu.assume_multiple %3, 128 : i32
    %c0 = arith.constant 0 : index
    %5 = arith.index_cast %4 : i32 to index
    %6 = vector.load %arg6[%c0, %5] : memref<512x128xbf16, #tpu.memory_space<vmem>>, vector<512x128xbf16>
    %c0_1 = arith.constant 0 : index
    %c0_2 = arith.constant 0 : index
    %7 = vector.load %arg10[%c0_1, %c0_2] : memref<256x512xbf16, #tpu.memory_space<vmem>>, vector<256x512xbf16>
    %cst = arith.constant dense<0.000000e+00> : vector<256x128xf32>
    %8 = tpu.matmul %7, %6, %cst {dimension_numbers = #tpu.dot_dimension_numbers<[1], [0], [0], [1], [0, 0, 1, 1], [], []>} : vector<256x512xbf16>, vector<512x128xbf16>, vector<256x128xf32> -> vector<256x128xf32>
    %c0_3 = arith.constant 0 : index
    %9 = arith.index_cast %4 : i32 to index
    %10 = vector.load %arg7[%c0_3, %9] : memref<1x128xf32, #tpu.memory_space<vmem>>, vector<1x128xf32>
    %11 = vector.broadcast %10 : vector<1x128xf32> to vector<256x128xf32>
    %12 = arith.mulf %8, %11 : vector<256x128xf32>
    %c0_4 = arith.constant 0 : index
    %13 = arith.index_cast %4 : i32 to index
    %14 = vector.load %arg8[%c0_4, %13] : memref<1x128xf32, #tpu.memory_space<vmem>>, vector<1x128xf32>
    %15 = vector.broadcast %14 : vector<1x128xf32> to vector<256x128xf32>
    %16 = arith.addf %12, %15 : vector<256x128xf32>
    %17 = arith.negf %16 : vector<256x128xf32>
    %18 = math.exp %17 : vector<256x128xf32>
    %cst_5 = arith.constant 1.000000e+00 : f32
    %19 = vector.broadcast %cst_5 : f32 to vector<256x128xf32>
    %20 = arith.addf %19, %18 : vector<256x128xf32>
    %21 = arith.divf %19, %20 : vector<256x128xf32>
    %22 = arith.mulf %16, %21 : vector<256x128xf32>
    %23 = arith.truncf %22 : vector<256x128xf32> to vector<256x128xbf16>
    %c0_6 = arith.constant 0 : index
    %c0_7 = arith.constant 0 : index
    %c0_8 = arith.constant 0 : index
    %24 = vector.load %arg9[%c0_6, %c0_7, %c0_8] : memref<1x256x128xbf16, #tpu.memory_space<vmem>>, vector<1x256x128xbf16>
    %25 = vector.shape_cast %24 : vector<1x256x128xbf16> to vector<256x128xbf16>
    %26 = vector.shape_cast %23 : vector<256x128xbf16> to vector<1x256x128xbf16>
    tpu.vector_store %arg9[%c0_6, %c0_7, %c0_8], %26 {strides = array<i32>} : memref<1x256x128xbf16, #tpu.memory_space<vmem>>, vector<1x256x128xbf16>,
    return
  }
  func.func @transform_0(%arg0: i32, %arg1: i32) -> (i32, i32, i32) {
    %c0_i32 = arith.constant 0 : i32
    %c0_i32_0 = arith.constant 0 : i32
    %c0_i32_1 = arith.constant 0 : i32
    return %arg0, %c0_i32, %c0_i32_0 : i32, i32, i32
  }
  func.func @transform_1(%arg0: i32, %arg1: i32) -> (i32, i32) {
    %c0_i32 = arith.constant 0 : i32
    %c0_i32_0 = arith.constant 0 : i32
    %c0_i32_1 = arith.constant 0 : i32
    return %c0_i32, %c0_i32_0 : i32, i32
  }
  func.func @transform_2(%arg0: i32, %arg1: i32) -> (i32, i32) {
    %c0_i32 = arith.constant 0 : i32
    %c0_i32_0 = arith.constant 0 : i32
    %c0_i32_1 = arith.constant 0 : i32
    return %c0_i32, %c0_i32_0 : i32, i32
  }
  func.func @transform_3(%arg0: i32, %arg1: i32) -> (i32, i32) {
    %c0_i32 = arith.constant 0 : i32
    %c0_i32_0 = arith.constant 0 : i32
    %c0_i32_1 = arith.constant 0 : i32
    return %c0_i32, %c0_i32_0 : i32, i32
  }
  func.func @transform_4(%arg0: i32, %arg1: i32) -> (i32, i32) {
    %c0_i32 = arith.constant 0 : i32
    %c0_i32_0 = arith.constant 0 : i32
    %c0_i32_1 = arith.constant 0 : i32
    return %c0_i32, %c0_i32_0 : i32, i32
  }
  func.func @transform_5(%arg0: i32, %arg1: i32) -> (i32, i32) {
    %c0_i32 = arith.constant 0 : i32
    %c0_i32_0 = arith.constant 0 : i32
    %c0_i32_1 = arith.constant 0 : i32
    return %c0_i32, %c0_i32_0 : i32, i32
  }
  func.func @transform_6(%arg0: i32, %arg1: i32) -> (i32, i32) {
    %c0_i32 = arith.constant 0 : i32
    %c0_i32_0 = arith.constant 0 : i32
    %c0_i32_1 = arith.constant 0 : i32
    return %c0_i32, %c0_i32_0 : i32, i32
  }
  func.func @transform_7(%arg0: i32, %arg1: i32) -> (i32, i32, i32) {
    %c0_i32 = arith.constant 0 : i32
    %c0_i32_0 = arith.constant 0 : i32
    return %arg0, %c0_i32, %arg1 : i32, i32, i32
  }
}

module attributes {stable_mosaic.version = 11 : i64} {
  func.func @_sppf_kernel(%arg0: i32, %arg1: i32, %arg2: memref<1x256x128xbf16, #tpu.memory_space<vmem>>, %arg3: memref<128x128xbf16, #tpu.memory_space<vmem>>, %arg4: memref<1x128xf32, #tpu.memory_space<vmem>>, %arg5: memref<1x128xf32, #tpu.memory_space<vmem>>, %arg6: memref<512x128xbf16, #tpu.memory_space<vmem>>, %arg7: memref<1x128xf32, #tpu.memory_space<vmem>>, %arg8: memref<1x128xf32, #tpu.memory_space<vmem>>, %arg9: memref<1x256x128xbf16, #tpu.memory_space<vmem>>, %arg10: memref<256x512xbf16, #tpu.memory_space<vmem>>) attributes {dimension_semantics = [#tpu.dimension_semantics<parallel>, #tpu.dimension_semantics<arbitrary>], iteration_bounds = array<i64: 2, 1>, scalar_prefetch = 0 : i64, scratch_operands = 1 : i64, tpu.core_type = #tpu.core_type<tc>, window_params = [{transform_indices = @transform_0, window_bounds = array<i64: 1, 256, 128>}, {pipeline_mode = #tpu.pipeline_mode<synchronous>, transform_indices = @transform_1, window_bounds = array<i64: 128, 128>}, {pipeline_mode = #tpu.pipeline_mode<synchronous>, transform_indices = @transform_2, window_bounds = array<i64: 1, 128>}, {pipeline_mode = #tpu.pipeline_mode<synchronous>, transform_indices = @transform_3, window_bounds = array<i64: 1, 128>}, {pipeline_mode = #tpu.pipeline_mode<synchronous>, transform_indices = @transform_4, window_bounds = array<i64: 512, 128>}, {pipeline_mode = #tpu.pipeline_mode<synchronous>, transform_indices = @transform_5, window_bounds = array<i64: 1, 128>}, {pipeline_mode = #tpu.pipeline_mode<synchronous>, transform_indices = @transform_6, window_bounds = array<i64: 1, 128>}, {transform_indices = @transform_7, window_bounds = array<i64: 1, 256, 128>}]} {
    %c0_i32 = arith.constant 0 : i32
    %0 = arith.cmpi eq, %arg1, %c0_i32 : i32
    %1 = arith.extui %0 : i1 to i32
    %c0_i32_0 = arith.constant 0 : i32
    %2 = arith.cmpi ne, %1, %c0_i32_0 : i32
    scf.if %2 {
      %c0_9 = arith.constant 0 : index
      %c0_10 = arith.constant 0 : index
      %c0_11 = arith.constant 0 : index
      %27 = vector.load %arg2[%c0_9, %c0_10, %c0_11] : memref<1x256x128xbf16, #tpu.memory_space<vmem>>, vector<1x256x128xbf16>
      %28 = vector.shape_cast %27 : vector<1x256x128xbf16> to vector<256x128xbf16>
      %c0_12 = arith.constant 0 : index
      %c0_13 = arith.constant 0 : index
      %29 = vector.load %arg3[%c0_12, %c0_13] : memref<128x128xbf16, #tpu.memory_space<vmem>>, vector<128x128xbf16>
      %cst_14 = arith.constant dense<0.000000e+00> : vector<256x128xf32>
      %30 = tpu.matmul %28, %29, %cst_14 {dimension_numbers = #tpu.dot_dimension_numbers<[1], [0], [0], [1], [0, 0, 1, 1], [], []>} : vector<256x128xbf16>, vector<128x128xbf16>, vector<256x128xf32> -> vector<256x128xf32>
      %c0_15 = arith.constant 0 : index
      %c0_16 = arith.constant 0 : index
      %31 = vector.load %arg4[%c0_15, %c0_16] : memref<1x128xf32, #tpu.memory_space<vmem>>, vector<1x128xf32>
      %32 = vector.shape_cast %31 : vector<1x128xf32> to vector<128xf32>
      %33 = vector.shape_cast %32 : vector<128xf32> to vector<1x128xf32>
      %34 = vector.broadcast %33 : vector<1x128xf32> to vector<256x128xf32>
      %35 = arith.mulf %30, %34 : vector<256x128xf32>
      %c0_17 = arith.constant 0 : index
      %c0_18 = arith.constant 0 : index
      %36 = vector.load %arg5[%c0_17, %c0_18] : memref<1x128xf32, #tpu.memory_space<vmem>>, vector<1x128xf32>
      %37 = vector.shape_cast %36 : vector<1x128xf32> to vector<128xf32>
      %38 = vector.shape_cast %37 : vector<128xf32> to vector<1x128xf32>
      %39 = vector.broadcast %38 : vector<1x128xf32> to vector<256x128xf32>
      %40 = arith.addf %35, %39 : vector<256x128xf32>
      %41 = arith.negf %40 : vector<256x128xf32>
      %42 = math.exp %41 : vector<256x128xf32>
      %cst_19 = arith.constant 1.000000e+00 : f32
      %43 = vector.broadcast %cst_19 : f32 to vector<256x128xf32>
      %44 = arith.addf %43, %42 : vector<256x128xf32>
      %45 = arith.divf %43, %44 : vector<256x128xf32>
      %46 = arith.mulf %40, %45 : vector<256x128xf32>
      %47 = arith.truncf %46 : vector<256x128xf32> to vector<256x128xbf16>
      %c0_20 = arith.constant 0 : index
      %c0_21 = arith.constant 0 : index
      %48 = vector.load %arg10[%c0_20, %c0_21] : memref<256x512xbf16, #tpu.memory_space<vmem>>, vector<256x128xbf16>
      tpu.vector_store %arg10[%c0_20, %c0_21], %47 {strides = array<i32>} : memref<256x512xbf16, #tpu.memory_space<vmem>>, vector<256x128xbf16>,
      %49 = vector.shape_cast %46 : vector<256x128xf32> to vector<16x16x128xf32>
      %cst_22 = arith.constant -1.000000e+30 : f32
      %50 = vector.broadcast %cst_22 : f32 to vector<16x2x128xf32>
      %51 = tpu.concatenate %50, %49, %50 in 1 : vector<16x2x128xf32>, vector<16x16x128xf32>, vector<16x2x128xf32> -> vector<16x20x128xf32>
      %cst_23 = arith.constant -1.000000e+30 : f32
      %52 = vector.broadcast %cst_23 : f32 to vector<2x20x128xf32>
      %53 = tpu.concatenate %52, %51, %52 in 0 : vector<2x20x128xf32>, vector<16x20x128xf32>, vector<2x20x128xf32> -> vector<20x20x128xf32>
      %54 = vector.extract_strided_slice %53 {offsets = [0, 0, 0], sizes = [20, 16, 128], strides = [1, 1, 1]} : vector<20x20x128xf32> to vector<20x16x128xf32>
      %55 = vector.extract_strided_slice %53 {offsets = [0, 1, 0], sizes = [20, 16, 128], strides = [1, 1, 1]} : vector<20x20x128xf32> to vector<20x16x128xf32>
      %56 = arith.maximumf %54, %55 : vector<20x16x128xf32>
      %57 = vector.extract_strided_slice %53 {offsets = [0, 2, 0], sizes = [20, 16, 128], strides = [1, 1, 1]} : vector<20x20x128xf32> to vector<20x16x128xf32>
      %58 = arith.maximumf %56, %57 : vector<20x16x128xf32>
      %59 = vector.extract_strided_slice %53 {offsets = [0, 3, 0], sizes = [20, 16, 128], strides = [1, 1, 1]} : vector<20x20x128xf32> to vector<20x16x128xf32>
      %60 = arith.maximumf %58, %59 : vector<20x16x128xf32>
      %61 = vector.extract_strided_slice %53 {offsets = [0, 4, 0], sizes = [20, 16, 128], strides = [1, 1, 1]} : vector<20x20x128xf32> to vector<20x16x128xf32>
      %62 = arith.maximumf %60, %61 : vector<20x16x128xf32>
      %63 = vector.extract_strided_slice %62 {offsets = [0, 0, 0], sizes = [16, 16, 128], strides = [1, 1, 1]} : vector<20x16x128xf32> to vector<16x16x128xf32>
      %64 = vector.extract_strided_slice %62 {offsets = [1, 0, 0], sizes = [16, 16, 128], strides = [1, 1, 1]} : vector<20x16x128xf32> to vector<16x16x128xf32>
      %65 = arith.maximumf %63, %64 : vector<16x16x128xf32>
      %66 = vector.extract_strided_slice %62 {offsets = [2, 0, 0], sizes = [16, 16, 128], strides = [1, 1, 1]} : vector<20x16x128xf32> to vector<16x16x128xf32>
      %67 = arith.maximumf %65, %66 : vector<16x16x128xf32>
      %68 = vector.extract_strided_slice %62 {offsets = [3, 0, 0], sizes = [16, 16, 128], strides = [1, 1, 1]} : vector<20x16x128xf32> to vector<16x16x128xf32>
      %69 = arith.maximumf %67, %68 : vector<16x16x128xf32>
      %70 = vector.extract_strided_slice %62 {offsets = [4, 0, 0], sizes = [16, 16, 128], strides = [1, 1, 1]} : vector<20x16x128xf32> to vector<16x16x128xf32>
      %71 = arith.maximumf %69, %70 : vector<16x16x128xf32>
      %72 = vector.shape_cast %71 : vector<16x16x128xf32> to vector<256x128xf32>
      %73 = arith.truncf %72 : vector<256x128xf32> to vector<256x128xbf16>
      %c0_24 = arith.constant 0 : index
      %c128 = arith.constant 128 : index
      %74 = vector.load %arg10[%c0_24, %c128] : memref<256x512xbf16, #tpu.memory_space<vmem>>, vector<256x128xbf16>
      tpu.vector_store %arg10[%c0_24, %c128], %73 {strides = array<i32>} : memref<256x512xbf16, #tpu.memory_space<vmem>>, vector<256x128xbf16>,
      %cst_25 = arith.constant -1.000000e+30 : f32
      %75 = vector.broadcast %cst_25 : f32 to vector<16x2x128xf32>
      %76 = tpu.concatenate %75, %71, %75 in 1 : vector<16x2x128xf32>, vector<16x16x128xf32>, vector<16x2x128xf32> -> vector<16x20x128xf32>
      %cst_26 = arith.constant -1.000000e+30 : f32
      %77 = vector.broadcast %cst_26 : f32 to vector<2x20x128xf32>
      %78 = tpu.concatenate %77, %76, %77 in 0 : vector<2x20x128xf32>, vector<16x20x128xf32>, vector<2x20x128xf32> -> vector<20x20x128xf32>
      %79 = vector.extract_strided_slice %78 {offsets = [0, 0, 0], sizes = [20, 16, 128], strides = [1, 1, 1]} : vector<20x20x128xf32> to vector<20x16x128xf32>
      %80 = vector.extract_strided_slice %78 {offsets = [0, 1, 0], sizes = [20, 16, 128], strides = [1, 1, 1]} : vector<20x20x128xf32> to vector<20x16x128xf32>
      %81 = arith.maximumf %79, %80 : vector<20x16x128xf32>
      %82 = vector.extract_strided_slice %78 {offsets = [0, 2, 0], sizes = [20, 16, 128], strides = [1, 1, 1]} : vector<20x20x128xf32> to vector<20x16x128xf32>
      %83 = arith.maximumf %81, %82 : vector<20x16x128xf32>
      %84 = vector.extract_strided_slice %78 {offsets = [0, 3, 0], sizes = [20, 16, 128], strides = [1, 1, 1]} : vector<20x20x128xf32> to vector<20x16x128xf32>
      %85 = arith.maximumf %83, %84 : vector<20x16x128xf32>
      %86 = vector.extract_strided_slice %78 {offsets = [0, 4, 0], sizes = [20, 16, 128], strides = [1, 1, 1]} : vector<20x20x128xf32> to vector<20x16x128xf32>
      %87 = arith.maximumf %85, %86 : vector<20x16x128xf32>
      %88 = vector.extract_strided_slice %87 {offsets = [0, 0, 0], sizes = [16, 16, 128], strides = [1, 1, 1]} : vector<20x16x128xf32> to vector<16x16x128xf32>
      %89 = vector.extract_strided_slice %87 {offsets = [1, 0, 0], sizes = [16, 16, 128], strides = [1, 1, 1]} : vector<20x16x128xf32> to vector<16x16x128xf32>
      %90 = arith.maximumf %88, %89 : vector<16x16x128xf32>
      %91 = vector.extract_strided_slice %87 {offsets = [2, 0, 0], sizes = [16, 16, 128], strides = [1, 1, 1]} : vector<20x16x128xf32> to vector<16x16x128xf32>
      %92 = arith.maximumf %90, %91 : vector<16x16x128xf32>
      %93 = vector.extract_strided_slice %87 {offsets = [3, 0, 0], sizes = [16, 16, 128], strides = [1, 1, 1]} : vector<20x16x128xf32> to vector<16x16x128xf32>
      %94 = arith.maximumf %92, %93 : vector<16x16x128xf32>
      %95 = vector.extract_strided_slice %87 {offsets = [4, 0, 0], sizes = [16, 16, 128], strides = [1, 1, 1]} : vector<20x16x128xf32> to vector<16x16x128xf32>
      %96 = arith.maximumf %94, %95 : vector<16x16x128xf32>
      %97 = vector.shape_cast %96 : vector<16x16x128xf32> to vector<256x128xf32>
      %98 = arith.truncf %97 : vector<256x128xf32> to vector<256x128xbf16>
      %c0_27 = arith.constant 0 : index
      %c256 = arith.constant 256 : index
      %99 = vector.load %arg10[%c0_27, %c256] : memref<256x512xbf16, #tpu.memory_space<vmem>>, vector<256x128xbf16>
      tpu.vector_store %arg10[%c0_27, %c256], %98 {strides = array<i32>} : memref<256x512xbf16, #tpu.memory_space<vmem>>, vector<256x128xbf16>,
      %cst_28 = arith.constant -1.000000e+30 : f32
      %100 = vector.broadcast %cst_28 : f32 to vector<16x2x128xf32>
      %101 = tpu.concatenate %100, %96, %100 in 1 : vector<16x2x128xf32>, vector<16x16x128xf32>, vector<16x2x128xf32> -> vector<16x20x128xf32>
      %cst_29 = arith.constant -1.000000e+30 : f32
      %102 = vector.broadcast %cst_29 : f32 to vector<2x20x128xf32>
      %103 = tpu.concatenate %102, %101, %102 in 0 : vector<2x20x128xf32>, vector<16x20x128xf32>, vector<2x20x128xf32> -> vector<20x20x128xf32>
      %104 = vector.extract_strided_slice %103 {offsets = [0, 0, 0], sizes = [20, 16, 128], strides = [1, 1, 1]} : vector<20x20x128xf32> to vector<20x16x128xf32>
      %105 = vector.extract_strided_slice %103 {offsets = [0, 1, 0], sizes = [20, 16, 128], strides = [1, 1, 1]} : vector<20x20x128xf32> to vector<20x16x128xf32>
      %106 = arith.maximumf %104, %105 : vector<20x16x128xf32>
      %107 = vector.extract_strided_slice %103 {offsets = [0, 2, 0], sizes = [20, 16, 128], strides = [1, 1, 1]} : vector<20x20x128xf32> to vector<20x16x128xf32>
      %108 = arith.maximumf %106, %107 : vector<20x16x128xf32>
      %109 = vector.extract_strided_slice %103 {offsets = [0, 3, 0], sizes = [20, 16, 128], strides = [1, 1, 1]} : vector<20x20x128xf32> to vector<20x16x128xf32>
      %110 = arith.maximumf %108, %109 : vector<20x16x128xf32>
      %111 = vector.extract_strided_slice %103 {offsets = [0, 4, 0], sizes = [20, 16, 128], strides = [1, 1, 1]} : vector<20x20x128xf32> to vector<20x16x128xf32>
      %112 = arith.maximumf %110, %111 : vector<20x16x128xf32>
      %113 = vector.extract_strided_slice %112 {offsets = [0, 0, 0], sizes = [16, 16, 128], strides = [1, 1, 1]} : vector<20x16x128xf32> to vector<16x16x128xf32>
      %114 = vector.extract_strided_slice %112 {offsets = [1, 0, 0], sizes = [16, 16, 128], strides = [1, 1, 1]} : vector<20x16x128xf32> to vector<16x16x128xf32>
      %115 = arith.maximumf %113, %114 : vector<16x16x128xf32>
      %116 = vector.extract_strided_slice %112 {offsets = [2, 0, 0], sizes = [16, 16, 128], strides = [1, 1, 1]} : vector<20x16x128xf32> to vector<16x16x128xf32>
      %117 = arith.maximumf %115, %116 : vector<16x16x128xf32>
      %118 = vector.extract_strided_slice %112 {offsets = [3, 0, 0], sizes = [16, 16, 128], strides = [1, 1, 1]} : vector<20x16x128xf32> to vector<16x16x128xf32>
      %119 = arith.maximumf %117, %118 : vector<16x16x128xf32>
      %120 = vector.extract_strided_slice %112 {offsets = [4, 0, 0], sizes = [16, 16, 128], strides = [1, 1, 1]} : vector<20x16x128xf32> to vector<16x16x128xf32>
      %121 = arith.maximumf %119, %120 : vector<16x16x128xf32>
      %122 = vector.shape_cast %121 : vector<16x16x128xf32> to vector<256x128xf32>
      %123 = arith.truncf %122 : vector<256x128xf32> to vector<256x128xbf16>
      %c0_30 = arith.constant 0 : index
      %c384 = arith.constant 384 : index
      %124 = vector.load %arg10[%c0_30, %c384] : memref<256x512xbf16, #tpu.memory_space<vmem>>, vector<256x128xbf16>
      tpu.vector_store %arg10[%c0_30, %c384], %123 {strides = array<i32>} : memref<256x512xbf16, #tpu.memory_space<vmem>>, vector<256x128xbf16>,
    } else {
    }
    %c128_i32 = arith.constant 128 : i32
    %3 = arith.muli %arg1, %c128_i32 : i32
    %4 = tpu.assume_multiple %3, 128 : i32
    %c0 = arith.constant 0 : index
    %5 = arith.index_cast %4 : i32 to index
    %6 = vector.load %arg6[%c0, %5] : memref<512x128xbf16, #tpu.memory_space<vmem>>, vector<512x128xbf16>
    %c0_1 = arith.constant 0 : index
    %c0_2 = arith.constant 0 : index
    %7 = vector.load %arg10[%c0_1, %c0_2] : memref<256x512xbf16, #tpu.memory_space<vmem>>, vector<256x512xbf16>
    %cst = arith.constant dense<0.000000e+00> : vector<256x128xf32>
    %8 = tpu.matmul %7, %6, %cst {dimension_numbers = #tpu.dot_dimension_numbers<[1], [0], [0], [1], [0, 0, 1, 1], [], []>} : vector<256x512xbf16>, vector<512x128xbf16>, vector<256x128xf32> -> vector<256x128xf32>
    %c0_3 = arith.constant 0 : index
    %9 = arith.index_cast %4 : i32 to index
    %10 = vector.load %arg7[%c0_3, %9] : memref<1x128xf32, #tpu.memory_space<vmem>>, vector<1x128xf32>
    %11 = vector.broadcast %10 : vector<1x128xf32> to vector<256x128xf32>
    %12 = arith.mulf %8, %11 : vector<256x128xf32>
    %c0_4 = arith.constant 0 : index
    %13 = arith.index_cast %4 : i32 to index
    %14 = vector.load %arg8[%c0_4, %13] : memref<1x128xf32, #tpu.memory_space<vmem>>, vector<1x128xf32>
    %15 = vector.broadcast %14 : vector<1x128xf32> to vector<256x128xf32>
    %16 = arith.addf %12, %15 : vector<256x128xf32>
    %17 = arith.negf %16 : vector<256x128xf32>
    %18 = math.exp %17 : vector<256x128xf32>
    %cst_5 = arith.constant 1.000000e+00 : f32
    %19 = vector.broadcast %cst_5 : f32 to vector<256x128xf32>
    %20 = arith.addf %19, %18 : vector<256x128xf32>
    %21 = arith.divf %19, %20 : vector<256x128xf32>
    %22 = arith.mulf %16, %21 : vector<256x128xf32>
    %23 = arith.truncf %22 : vector<256x128xf32> to vector<256x128xbf16>
    %c0_6 = arith.constant 0 : index
    %c0_7 = arith.constant 0 : index
    %c0_8 = arith.constant 0 : index
    %24 = vector.load %arg9[%c0_6, %c0_7, %c0_8] : memref<1x256x128xbf16, #tpu.memory_space<vmem>>, vector<1x256x128xbf16>
    %25 = vector.shape_cast %24 : vector<1x256x128xbf16> to vector<256x128xbf16>
    %26 = vector.shape_cast %23 : vector<256x128xbf16> to vector<1x256x128xbf16>
    tpu.vector_store %arg9[%c0_6, %c0_7, %c0_8], %26 {strides = array<i32>} : memref<1x256x128xbf16, #tpu.memory_space<vmem>>, vector<1x256x128xbf16>,
    return
  }
  func.func @transform_0(%arg0: i32, %arg1: i32) -> (i32, i32, i32) {
    %c0_i32 = arith.constant 0 : i32
    %c0_i32_0 = arith.constant 0 : i32
    %c0_i32_1 = arith.constant 0 : i32
    return %arg0, %c0_i32, %c0_i32_0 : i32, i32, i32
  }
  func.func @transform_1(%arg0: i32, %arg1: i32) -> (i32, i32) {
    %c0_i32 = arith.constant 0 : i32
    %c0_i32_0 = arith.constant 0 : i32
    %c0_i32_1 = arith.constant 0 : i32
    return %c0_i32, %c0_i32_0 : i32, i32
  }
  func.func @transform_2(%arg0: i32, %arg1: i32) -> (i32, i32) {
    %c0_i32 = arith.constant 0 : i32
    %c0_i32_0 = arith.constant 0 : i32
    %c0_i32_1 = arith.constant 0 : i32
    return %c0_i32, %c0_i32_0 : i32, i32
  }
  func.func @transform_3(%arg0: i32, %arg1: i32) -> (i32, i32) {
    %c0_i32 = arith.constant 0 : i32
    %c0_i32_0 = arith.constant 0 : i32
    %c0_i32_1 = arith.constant 0 : i32
    return %c0_i32, %c0_i32_0 : i32, i32
  }
  func.func @transform_4(%arg0: i32, %arg1: i32) -> (i32, i32) {
    %c0_i32 = arith.constant 0 : i32
    %c0_i32_0 = arith.constant 0 : i32
    %c0_i32_1 = arith.constant 0 : i32
    return %c0_i32, %c0_i32_0 : i32, i32
  }
  func.func @transform_5(%arg0: i32, %arg1: i32) -> (i32, i32) {
    %c0_i32 = arith.constant 0 : i32
    %c0_i32_0 = arith.constant 0 : i32
    %c0_i32_1 = arith.constant 0 : i32
    return %c0_i32, %c0_i32_0 : i32, i32
  }
  func.func @transform_6(%arg0: i32, %arg1: i32) -> (i32, i32) {
    %c0_i32 = arith.constant 0 : i32
    %c0_i32_0 = arith.constant 0 : i32
    %c0_i32_1 = arith.constant 0 : i32
    return %c0_i32, %c0_i32_0 : i32, i32
  }
  func.func @transform_7(%arg0: i32, %arg1: i32) -> (i32, i32, i32) {
    %c0_i32 = arith.constant 0 : i32
    %c0_i32_0 = arith.constant 0 : i32
    return %arg0, %c0_i32, %arg1 : i32, i32, i32
  }
}

</mosaic_0001>

<bundles_post_ra>
// kernel: sppf_forward.1
= control target key start
LH: loop header
LB: loop body
LE: loop exit
PB: predicated region body
PF: predicated region fallthrough
CT: control target
= control target key end

     0   :  { %s6639_s24 = smov 0   ;;  %s6641_s25 = smov 0   ;;  %s11257_s0 = inlined_call_operand.vmem [shape: bf16[2,256,128], index: 0, kind: input, shape index: {}]   ;;  %s11258_s1 = inlined_call_operand.vmem [shape: bf16[128,128], index: 1, kind: input, shape index: {}]   ;;  %s11259_s2 = inlined_call_operand.vmem [shape: f32[1,128], index: 2, kind: input, shape index: {}]   ;;  %s11260_s3 = inlined_call_operand.vmem [shape: f32[1,128], index: 3, kind: input, shape index: {}]   ;;  %s11261_s4 = inlined_call_operand.vmem [shape: bf16[512,128], index: 4, kind: input, shape index: {}]   ;;  %s11262_s5 = inlined_call_operand.vmem [shape: f32[1,128], index: 5, kind: input, shape index: {}]   ;;  %s11263_s6 = inlined_call_operand.vmem [shape: f32[1,128], index: 6, kind: input, shape index: {}]   ;;  %s11264_s7 = inlined_call_operand.vmem [shape: bf16[2,256,128], index: 7, kind: output, shape index: {}]  }
   0x1   :  { %s6643_s26 = smov 0  }
   0x2 LB: > { %s29_s27 = sadd.s32 1, %s6578_s25  ;;  %p5185_p0 = scmp.ge.s32.totalorder %s6582_s26, 1  ;;  %s6582_s26 = sphi %s6643_s26, %s17_s26   ;;  %s6578_s25 = sphi %s6641_s25, %s12128_s25   ;;  %s6574_s24 = sphi %s6639_s24, %s12127_s24  }
   0x3   : > { %p31_p1 = scmp.ge.s32.totalorder %s29_s27, 2  ;;  %p251_p2 = scmp.lt.s32.totalorder %s6582_s26, 3 }
   0x5   : > { %s12130_s27 = smov (%p31_p1, %s29_s27), 0  ;;  %p252_p3 = pnand %p5185_p0, %p251_p2 }
   0x7   : > { %255 = sbr.rel (%p252_p3) target bundleno = 1113 (0x459), region = 48 }
   0xc   : > { %v6150_v0 = vld [vmem:[%s11258_s1 + $0x38] sm:$0xff]   ;;  %p286_p4 = scmp.lt.s32.totalorder %s6574_s24, 1  ;;  %v6151_v1 = vld [vmem:[%s11258_s1 + $0x30] sm:$0xff]   ;;  %v6152_v2 = vld [vmem:[%s11258_s1 + $0x28] sm:$0xff]   ;;  %v1119_v43 = vlaneseq }
   0xd   : > { %6047 = vmatprep.subr.bf16.mxu0 %v6150_v0  ;;  %6095 = vmatprep.subr.bf16.mxu1 %v6150_v0  ;;  %v6153_v3 = vld [vmem:[%s11258_s1 + $0x20] sm:$0xff]   ;;  %v6154_v6 = vld [vmem:[%s11258_s1 + $0x18] sm:$0xff]   ;;  %v6155_v7 = vld [vmem:[%s11258_s1 + $0x10] sm:$0xff]  }
   0xe   : > { %s12132_s24 = smov (!%p286_p4, %s6574_s24), 1  ;;  %6048 = vmatpush3.bf16.msra.mxu0 %v6150_v0  ;;  %6103 = vmatpush3.bf16.msra.mxu1 %v6150_v0  ;;  %v6156_v8 = vld [vmem:[%s11258_s1 + $0x8] sm:$0xff]   ;;  %v6157_v9 = vld [vmem:[%s11258_s1] sm:$0xff]  }
   0xf   : > { %6049 = vmatprep.subr.bf16.mxu0 %v6151_v1  ;;  %6096 = vmatprep.subr.bf16.mxu1 %v6151_v1  ;;  %s5542_s11 = sshll.u32 %s12132_s24, 7  ;;  %v6710_v24 = vld [vmem:[%s11259_s2] ss:$0 sm:$0xff] }
  0x10   : > { %s6674_s14 = scalar_lea.vmem %s11257_s0, %s5542_s11  ;;  %11551 = vst [vmem:[#allocation3_spill] sm:$0xff] %v6710_v24  ;;  %v6715_v26 = vld [vmem:[%s11260_s3] ss:$0 sm:$0xff]  ;;  %s11039_s13 = scalar_lea.vmem %s11264_s7, %s5542_s11 }
  0x11   : > { %v6158_v4 = vld [vmem:[%s6674_s14] sm:$0xff]   ;;  %v6160_v10 = vld [vmem:[%s6674_s14 + $0x8] sm:$0xff]   ;;  %v6162_v12 = vld [vmem:[%s6674_s14 + $0x10] sm:$0xff]   ;;  %11552 = vst [vmem:[#allocation4_spill] sm:$0xff] %v6715_v26 }
  0x12   : > { %6050 = vmatpush3.bf16.msra.mxu0 %v6151_v1  ;;  %6104 = vmatpush3.bf16.msra.mxu1 %v6151_v1  ;;  %v6159_v5 = vld [vmem:[%s6674_s14 + $0x40] sm:$0xff]   ;;  %v6161_v11 = vld [vmem:[%s6674_s14 + $0x48] sm:$0xff]   ;;  %v6163_v13 = vld [vmem:[%s6674_s14 + $0x50] sm:$0xff]  }
  0x13   : > { %6051 = vmatprep.subr.bf16.mxu0 %v6152_v2  ;;  %6097 = vmatprep.subr.bf16.mxu1 %v6152_v2  ;;  %v6164_v14 = vld [vmem:[%s6674_s14 + $0x18] sm:$0xff]   ;;  %v6166_v16 = vld [vmem:[%s6674_s14 + $0x20] sm:$0xff]   ;;  %v6168_v18 = vld [vmem:[%s6674_s14 + $0x28] sm:$0xff]  }
  0x14   : > { %6063 = vmatprep.mubr.bf16.mxu0 %v6158_v4  ;;  %6079 = vmatprep.mubr.bf16.mxu1 %v6159_v5  ;;  %v6165_v15 = vld [vmem:[%s6674_s14 + $0x58] sm:$0xff]   ;;  %v6167_v17 = vld [vmem:[%s6674_s14 + $0x60] sm:$0xff]   ;;  %v6169_v19 = vld [vmem:[%s6674_s14 + $0x68] sm:$0xff]  }
  0x15   : > { %v6170_v20 = vld [vmem:[%s6674_s14 + $0x30] sm:$0xff]   ;;  %v6172_v22 = vld [vmem:[%s6674_s14 + $0x38] sm:$0xff]  }
  0x16   : > { %6052 = vmatpush3.bf16.msra.mxu0 %v6152_v2  ;;  %6105 = vmatpush3.bf16.msra.mxu1 %v6152_v2  ;;  %v6171_v21 = vld [vmem:[%s6674_s14 + $0x70] sm:$0xff]   ;;  %v6173_v23 = vld [vmem:[%s6674_s14 + $0x78] sm:$0xff]  }
  0x17   : > { %6053 = vmatprep.subr.bf16.mxu0 %v6153_v3  ;;  %6098 = vmatprep.subr.bf16.mxu1 %v6153_v3 }
  0x1a   : > { %6054 = vmatpush3.bf16.msra.mxu0 %v6153_v3  ;;  %6106 = vmatpush3.bf16.msra.mxu1 %v6153_v3  ;;  %v6765_v3 = vshrl.u32 %v1119_v43, 7 }
  0x1b   : > { %6055 = vmatprep.subr.bf16.mxu0 %v6154_v6  ;;  %6099 = vmatprep.subr.bf16.mxu1 %v6154_v6 }
  0x1c   : > { %vm1268_vm0 = vcmp.lt.s32.totalorder %v6765_v3, 2  ;;  %vm1219_vm1 = vcmp.lt.s32.totalorder %v6765_v3, 1  ;;  %vm1121_vm2 = vcmp.lt.s32.totalorder %v6765_v3, 6  ;;  %vm1170_vm3 = vcmp.lt.s32.totalorder %v6765_v3, 7 }
  0x1d   : > { %vm7026_vm5 = vmneg %vm1219_vm1 }
  0x1e   : > { %6056 = vmatpush3.bf16.msra.mxu0 %v6154_v6  ;;  %6107 = vmatpush3.bf16.msra.mxu1 %v6154_v6  ;;  %vm7055_vm7 = vmneg %vm1268_vm0 }
  0x1f   : > { %6057 = vmatprep.subr.bf16.mxu0 %v6155_v7  ;;  %6100 = vmatprep.subr.bf16.mxu1 %v6155_v7 }
  0x22   : > { %6058 = vmatpush3.bf16.msra.mxu0 %v6155_v7  ;;  %6108 = vmatpush3.bf16.msra.mxu1 %v6155_v7 }
  0x23   : > { %6059 = vmatprep.subr.bf16.mxu0 %v6156_v8  ;;  %6101 = vmatprep.subr.bf16.mxu1 %v6156_v8 }
  0x26   : > { %6060 = vmatpush3.bf16.msra.mxu0 %v6156_v8  ;;  %6109 = vmatpush3.bf16.msra.mxu1 %v6156_v8 }
  0x27   : > { %6061 = vmatprep.subr.bf16.mxu0 %v6157_v9  ;;  %6102 = vmatprep.subr.bf16.mxu1 %v6157_v9 }
  0x2a   : > { %6062 = vmatpush3.bf16.msra.mxu0 %v6157_v9  ;;  %6110 = vmatpush3.bf16.msra.mxu1 %v6157_v9 }
  0x2d   : > { %6064 = vmatmul.mubr.bf16.vlgmr.msra.gmra.mxu0 %v6160_v10  ;;  %6080 = vmatmul.mubr.bf16.vlgmr.msra.gmra.mxu1 %v6161_v11 }
  0x2e   : > { %6067 = vmatprep.mubr.bf16.mxu0 %v6162_v12  ;;  %6083 = vmatprep.mubr.bf16.mxu1 %v6163_v13 }
  0x35   : > { %6068 = vmatmul.mubr.bf16.gmra.mxu0 %v6164_v14  ;;  %6084 = vmatmul.mubr.bf16.gmra.mxu1 %v6165_v15 }
  0x36   : > { %6071 = vmatprep.mubr.bf16.mxu0 %v6166_v16  ;;  %6087 = vmatprep.mubr.bf16.mxu1 %v6167_v17 }
  0x3d   : > { %6072 = vmatmul.mubr.bf16.gmra.mxu0 %v6168_v18  ;;  %6088 = vmatmul.mubr.bf16.gmra.mxu1 %v6169_v19 }
  0x3e   : > { %6075 = vmatprep.mubr.bf16.mxu0 %v6170_v20  ;;  %6091 = vmatprep.mubr.bf16.mxu1 %v6171_v21 }
  0x45   : > { %6076 = vmatmul.mubr.bf16.gmra.mxu0 %v6172_v22  ;;  %6092 = vmatmul.mubr.bf16.gmra.mxu1 %v6173_v23 }
  0xed   : > { %v6065_v25 = vpop.f32.mrf.mxu0  ;;  %v6081_v27 = vpop.f32.mrf.mxu1 }
  0xee   : > { %v666_v28 = vmul.f32 %v6065_v25, %v6710_v24  ;;  %v682_v29 = vmul.f32 %v6081_v27, %v6710_v24 }
  0xef   : > { %v530_v30 = vpop.f32.mrf.mxu0  ;;  %v594_v31 = vpop.f32.mrf.mxu1 }
  0xf0   : > { %v6720_v32 = vadd.f32 %v6715_v26, %v666_v28  ;;  %v6723_v33 = vadd.f32 %v6715_v26, %v682_v29  ;;  %v664_v34 = vmul.f32 %v6710_v24, %v530_v30  ;;  %v680_v35 = vmul.f32 %v6710_v24, %v594_v31 }
  0xf1   : > { %v6066_v36 = vpop.f32.mrf.mxu0  ;;  %v6082_v37 = vpop.f32.mrf.mxu1 }
  0xf2   : > { %v5218_v38 = vmul.f32 -1.442695, %v6720_v32  ;;  %v5234_v39 = vmul.f32 -1.442695, %v6723_v33  ;;  %v6730_v40 = vadd.f32 %v6715_v26, %v664_v34  ;;  %v6733_v41 = vadd.f32 %v6715_v26, %v680_v35 }
  0xf3   : > { %v667_v42 = vmul.f32 %v6066_v36, %v6710_v24  ;;  %v683_v44 = vmul.f32 %v6082_v37, %v6710_v24  ;;  %v533_v45 = vpop.f32.mrf.mxu0  ;;  %v597_v46 = vpop.f32.mrf.mxu1  ;;  %v6584_v37 = vmov 9  }
  0xf4   : > { %6302 = vpow2.f32 %v5218_v38  ;;  %v5216_v47 = vmul.f32 -1.442695, %v6730_v40  ;;  %v5232_v48 = vmul.f32 -1.442695, %v6733_v41  ;;  %v665_v49 = vmul.f32 %v6710_v24, %v533_v45 }
  0xf5   : > { %6304 = vpow2.f32 %v5234_v39  ;;  %v6741_v50 = vadd.f32 %v6715_v26, %v667_v42  ;;  %v6744_v51 = vadd.f32 %v6715_v26, %v683_v44  ;;  %v681_v52 = vmul.f32 %v6710_v24, %v597_v46  ;;  %v6069_v53 = vpop.f32.mrf.mxu0  ;;  %v6085_v54 = vpop.f32.mrf.mxu1 }
  0xf6   : > { %6306 = vpow2.f32 %v5216_v47  ;;  %v6748_v55 = vadd.f32 %v6715_v26, %v665_v49  ;;  %v670_v56 = vmul.f32 %v6069_v53, %v6710_v24  ;;  %v686_v57 = vmul.f32 %v6085_v54, %v6710_v24 }
  0xf7   : > { %6308 = vpow2.f32 %v5232_v48  ;;  %v5219_v58 = vmul.f32 -1.442695, %v6741_v50  ;;  %v5235_v59 = vmul.f32 -1.442695, %v6744_v51  ;;  %v6755_v60 = vadd.f32 %v6715_v26, %v681_v52  ;;  %v546_v61 = vpop.f32.mrf.mxu0  ;;  %v610_v62 = vpop.f32.mrf.mxu1 }
  0xf8   : > { %v5217_v63 = vmul.f32 -1.442695, %v6748_v55  ;;  %v6759_v0 = vadd.f32 %v6715_v26, %v670_v56  ;;  %v6762_v1 = vadd.f32 %v6715_v26, %v686_v57  ;;  %v668_v2 = vmul.f32 %v6710_v24, %v546_v61 }
  0xf9   : > { %6310 = vpow2.f32 %v5219_v58  ;;  %v5233_v4 = vmul.f32 -1.442695, %v6755_v60  ;;  %v684_v5 = vmul.f32 %v6710_v24, %v610_v62  ;;  %v6070_v6 = vpop.f32.mrf.mxu0  ;;  %v6086_v7 = vpop.f32.mrf.mxu1  ;;  %v6802_v38 = vsel %vm1219_vm1, 8, %v6584_v37 }
  0xfa   : > { %6312 = vpow2.f32 %v5235_v59  ;;  %v5222_v8 = vmul.f32 -1.442695, %v6759_v0  ;;  %v5238_v9 = vmul.f32 -1.442695, %v6762_v1  ;;  %v6772_v10 = vadd.f32 %v6715_v26, %v668_v2  ;;  %11553 = vst [vmem:[#allocation5_spill] sm:$0xff] %v6802_v38 }
  0xfb   : > { %6314 = vpow2.f32 %v5217_v63  ;;  %v6775_v11 = vadd.f32 %v6715_v26, %v684_v5  ;;  %v671_v12 = vmul.f32 %v6070_v6, %v6710_v24  ;;  %v687_v13 = vmul.f32 %v6086_v7, %v6710_v24  ;;  %v549_v14 = vpop.f32.mrf.mxu0  ;;  %v613_v15 = vpop.f32.mrf.mxu1 }
  0xfc   : > { %6316 = vpow2.f32 %v5233_v4  ;;  %v5220_v16 = vmul.f32 -1.442695, %v6772_v10  ;;  %v669_v17 = vmul.f32 %v6710_v24, %v549_v14  ;;  %v685_v18 = vmul.f32 %v6710_v24, %v613_v15 }
  0xfd   : > { %6318 = vpow2.f32 %v5222_v8  ;;  %v5236_v19 = vmul.f32 -1.442695, %v6775_v11  ;;  %v6784_v20 = vadd.f32 %v6715_v26, %v671_v12  ;;  %v6787_v21 = vadd.f32 %v6715_v26, %v687_v13  ;;  %v6073_v22 = vpop.f32.mrf.mxu0  ;;  %v6089_v28 = vpop.f32.mrf.mxu1 }
  0xfe   : > { %6320 = vpow2.f32 %v5238_v9  ;;  %v6790_v23 = vadd.f32 %v6715_v26, %v669_v17  ;;  %v6796_v30 = vadd.f32 %v6715_v26, %v685_v18  ;;  %v6807_v49 = vsel %vm1268_vm0, 8, %v6584_v37 }
  0xff   : > { %6322 = vpow2.f32 %v5220_v16  ;;  %v5223_v25 = vmul.f32 -1.442695, %v6784_v20  ;;  %v5239_v27 = vmul.f32 -1.442695, %v6787_v21  ;;  %v562_v31 = vpop.f32.mrf.mxu0  ;;  %v626_v43 = vpop.f32.mrf.mxu1  ;;  %11554 = vst [vmem:[#allocation6_spill] sm:$0xff] %v6807_v49  ;;  %v6585_v52 = vmov 3  }
 0x100   : > { %6324 = vpow2.f32 %v5236_v19  ;;  %v5221_v29 = vmul.f32 -1.442695, %v6790_v23  ;;  %v5237_v46 = vmul.f32 -1.442695, %v6796_v30  ;;  %v6811_v53 = vsel %vm1219_vm1, 2, %v6585_v52 }
 0x101   : > { %v6303_v34 = vpop.eup %6302  ;;  %6326 = vpow2.f32 %v5223_v25  ;;  %v6074_v47 = vpop.f32.mrf.mxu0  ;;  %11555 = vst [vmem:[#allocation7_spill] sm:$0xff] %v6811_v53  ;;  %v6586_v56 = vmov 2   ;;  %v6819_v58 = vsel %vm1268_vm0, 2, %v6585_v52  ;;  %v6587_v63 = vmov 11  }
 0x102   : > { %v6305_v35 = vpop.eup %6304  ;;  %v833_v36 = vadd.f32 1.0, %v6303_v34  ;;  %6328 = vpow2.f32 %v5239_v27  ;;  %v6815_v57 = vsel %vm1219_vm1, 1, %v6586_v56  ;;  %11557 = vst [vmem:[#allocation9_spill] sm:$0xff] %v6819_v58  ;;  %v6823_v59 = vsel %vm1268_vm0, 1, %v6586_v56  ;;  %v6090_v6 = vpop.f32.mrf.mxu1 }
 0x103   : > { %v6307_v39 = vpop.eup %6306  ;;  %v849_v42 = vadd.f32 1.0, %v6305_v35  ;;  %6330 = vpow2.f32 %v5221_v29  ;;  %11556 = vst [vmem:[#allocation8_spill] sm:$0xff] %v6815_v57  ;;  %11558 = vst [vmem:[#allocation10_spill] sm:$0xff] %v6823_v59  ;;  %v6827_v2 = vsel %vm1219_vm1, 10, %v6587_v63  ;;  %v6588_v4 = vmov 10   ;;  %v565_v13 = vpop.f32.mrf.mxu0 }
 0x104   : > { %v6309_v44 = vpop.eup %6308  ;;  %6332 = vrcp.f32 %v833_v36  ;;  %v831_v45 = vadd.f32 1.0, %v6307_v39  ;;  %11559 = vst [vmem:[#allocation11_spill] sm:$0xff] %v6827_v2  ;;  %v6831_v5 = vsel %vm1219_vm1, 9, %v6588_v4  ;;  %v674_v9 = vmul.f32 %v6073_v22, %v6710_v24  ;;  %v629_v39 = vpop.f32.mrf.mxu1 }
 0x105   : > { %6334 = vrcp.f32 %v849_v42  ;;  %v847_v48 = vadd.f32 1.0, %v6309_v44  ;;  %11560 = vst [vmem:[#allocation12_spill] sm:$0xff] %v6831_v5  ;;  %v690_v12 = vmul.f32 %v6089_v28, %v6710_v24  ;;  %v672_v16 = vmul.f32 %v6710_v24, %v562_v31 }
 0x106   : > { %v6311_v54 = vpop.eup %6310  ;;  %6336 = vrcp.f32 %v831_v45  ;;  %v688_v17 = vmul.f32 %v6710_v24, %v626_v43  ;;  %v675_v25 = vmul.f32 %v6074_v47, %v6710_v24  ;;  %v691_v27 = vmul.f32 %v6090_v6, %v6710_v24 }
 0x107   : > { %v6313_v61 = vpop.eup %6312  ;;  %6338 = vrcp.f32 %v847_v48  ;;  %v834_v62 = vadd.f32 1.0, %v6311_v54  ;;  %v6841_v28 = vsel %vm1268_vm0, 10, %v6587_v63  ;;  %v673_v34 = vmul.f32 %v6710_v24, %v565_v13 }
 0x108   : > { %v6315_v7 = vpop.eup %6314  ;;  %v850_v8 = vadd.f32 1.0, %v6313_v61  ;;  %6340 = vpow2.f32 %v5237_v46  ;;  %11561 = vst [vmem:[#allocation13_spill] sm:$0xff] %v6841_v28  ;;  %v6845_v36 = vadd.f32 %v6715_v26, %v674_v9  ;;  %v6848_v37 = vadd.f32 %v6715_v26, %v690_v12 }
 0x109   : > { %v6317_v14 = vpop.eup %6316  ;;  %6342 = vrcp.f32 %v834_v62  ;;  %v832_v15 = vadd.f32 1.0, %v6315_v7  ;;  %v6851_v44 = vadd.f32 %v6715_v26, %v672_v16  ;;  %v6854_v45 = vadd.f32 %v6715_v26, %v688_v17 }
 0x10a   : > { %v6319_v18 = vpop.eup %6318  ;;  %6344 = vrcp.f32 %v850_v8  ;;  %v848_v19 = vadd.f32 1.0, %v6317_v14  ;;  %11562 = vst [vmem:[#allocation14_spill] sm:$0xff] %v6848_v37  ;;  %v6858_v48 = vsel %vm1268_vm0, 9, %v6588_v4  ;;  %v6861_v52 = vadd.f32 %v6715_v26, %v675_v25 }
 0x10b   : > { %v6321_v29 = vpop.eup %6320  ;;  %6346 = vrcp.f32 %v832_v15  ;;  %v837_v22 = vadd.f32 1.0, %v6319_v18  ;;  %11563 = vst [vmem:[#allocation15_spill] sm:$0xff] %v6851_v44  ;;  %11564 = vst [vmem:[#allocation16_spill] sm:$0xff] %v6854_v45  ;;  %v6864_v54 = vadd.f32 %v6715_v26, %v691_v27  ;;  %v6867_v62 = vadd.f32 %v6715_v26, %v673_v34 }
 0x10c   : > { %v6323_v35 = vpop.eup %6322  ;;  %6348 = vrcp.f32 %v848_v19  ;;  %v853_v31 = vadd.f32 1.0, %v6321_v29  ;;  %11565 = vst [vmem:[#allocation17_spill] sm:$0xff] %v6858_v48  ;;  %11566 = vst [vmem:[#allocation18_spill] sm:$0xff] %v6861_v52  ;;  %v689_v63 = vmul.f32 %v6710_v24, %v629_v39  ;;  %v5226_v4 = vmul.f32 -1.442695, %v6845_v36 }
 0x10d   : > { %v6325_v42 = vpop.eup %6324  ;;  %6350 = vrcp.f32 %v837_v22  ;;  %v835_v43 = vadd.f32 1.0, %v6323_v35  ;;  %11567 = vst [vmem:[#allocation19_spill] sm:$0xff] %v6864_v54  ;;  %11568 = vst [vmem:[#allocation20_spill] sm:$0xff] %v6867_v62  ;;  %v6872_v8 = vmul.f32 -1.442695, %v6848_v37  ;;  %vm11361_vm4 = vcmp.eq.s32.totalorder %v6802_v38, 9 }
 0x10e   : > { %v6327_v46 = vpop.eup %6326  ;;  %v851_v47 = vadd.f32 1.0, %v6325_v42  ;;  %6352 = vrcp.f32 %v853_v31  ;;  %v6876_v13 = vmul.f32 -1.442695, %v6851_v44  ;;  %v6879_v14 = vmul.f32 -1.442695, %v6854_v45 }
 0x10f   : > { %v6329_v56 = vpop.eup %6328  ;;  %v838_v61 = vadd.f32 1.0, %v6327_v46  ;;  %6354 = vrcp.f32 %v835_v43  ;;  %v6886_v17 = vmul.f32 -1.442695, %v6861_v52  ;;  %v6889_v18 = vmul.f32 -1.442695, %v6864_v54 }
 0x110   : > { %v6331_v6 = vpop.eup %6330  ;;  %v854_v7 = vadd.f32 1.0, %v6329_v56  ;;  %6356 = vrcp.f32 %v851_v47  ;;  %v6895_v27 = vmul.f32 -1.442695, %v6867_v62  ;;  %vm11350_vm6 = vcmp.eq.s32.totalorder %v6807_v49, 9 }
 0x111   : > { %v6333_v9 = vpop.eup %6332  ;;  %v836_v12 = vadd.f32 1.0, %v6331_v6  ;;  %6358 = vrcp.f32 %v838_v61  ;;  %vm1242_vm8 = vcmp.eq.s32.totalorder %v6811_v53, 3  ;;  %vm11445_vm9 = vcmp.eq.s32.totalorder %v6815_v57, 2  ;;  %v11655_v38 = vld [vmem:[#allocation14_spill] sm:$0xff] }
 0x112   : > { %v6335_v15 = vpop.eup %6334  ;;  %v6882_v16 = vmul.f32 %v6333_v9, %v6720_v32  ;;  %6360 = vrcp.f32 %v854_v7  ;;  %v6898_v32 = vadd.f32 %v6715_v26, %v689_v63  ;;  %vm11353_vm10 = vcmp.eq.s32.totalorder %v6819_v58, 3  ;;  %v11656_v53 = vld [vmem:[#allocation15_spill] sm:$0xff] }
 0x113   : > { %v6337_v19 = vpop.eup %6336  ;;  %v6892_v25 = vmul.f32 %v6335_v15, %v6723_v33  ;;  %6362 = vrcp.f32 %v836_v12  ;;  %vm11359_vm11 = vcmp.eq.s32.totalorder %v6823_v59, 2  ;;  %vm11450_vm12 = vcmp.eq.s32.totalorder %v6827_v2, 11 }
 0x114   : > { %11569 = vst [vmem:[#allocation21_spill] sm:$0xff] %v6898_v32  ;;  %v6339_v29 = vpop.eup %6338  ;;  %v5546_v22 = vpack.c.bf16 %v6882_v16, %v6882_v16  ;;  %v11270_v34 = vrot.slane %v6882_v16, 2  ;;  %v11267_v35 = vrot.slane %v6882_v16, 1  ;;  %v11269_v39 = vrot.slane %v6882_v16, 6 }
 0x115   : > { %v6341_v31 = vpop.eup %6340  ;;  %v5562_v42 = vpack.c.bf16 %v6892_v25, %v6892_v25  ;;  %v11273_v43 = vrot.slane %v6892_v25, 2  ;;  %v11276_v47 = vrot.slane %v6892_v25, 1  ;;  %v6912_v61 = vmul.f32 %v6337_v19, %v6730_v40 }
 0x116   : > { %v6343_v46 = vpop.eup %6342  ;;  %1089 = vst [vmem:[#allocation2 + $0x20] sm:$0xf] %v5546_v22  ;;  %v6915_v63 = vmul.f32 %v6339_v29, %v6733_v41  ;;  %v6921_v12 = vadd.f32 1.0, %v6341_v31  ;;  %6364 = vpow2.f32 %v5226_v4  ;;  %v11575_v52 = vrot.slane %v6882_v16, 1 }
 0x117   : > { %11570 = vst [vmem:[#allocation22_spill] sm:$0xff] %v6912_v61  ;;  %v6345_v6 = vpop.eup %6344  ;;  %1105 = vst [vmem:[#allocation2 + $0x120] sm:$0xf] %v5562_v42  ;;  %v6919_v9 = vmul.f32 %v6343_v46, %v6741_v50  ;;  %v5544_v22 = vpack.c.bf16 %v6912_v61, %v6912_v61  ;;  %v11581_v44 = vrot.slane %v6912_v61, 7  ;;  %vm11363_vm13 = vcmp.eq.s32.totalorder %v6831_v5, 10 }
 0x118   : > { %11571 = vst [vmem:[#allocation23_spill] sm:$0xff] %v6915_v63  ;;  %v6347_v15 = vpop.eup %6346  ;;  %v5560_v50 = vpack.c.bf16 %v6915_v63, %v6915_v63  ;;  %v6942_v4 = vmul.f32 %v6345_v6, %v6744_v51  ;;  %6366 = vrcp.f32 %v6921_v12  ;;  %vm11349_vm14 = vcmp.eq.s32.totalorder %v6841_v28, 11 }
 0x119   : > { %v6349_v29 = vpop.eup %6348  ;;  %1087 = vst [vmem:[#allocation2] sm:$0xf] %v5544_v22  ;;  %v5547_v19 = vpack.c.bf16 %v6919_v9, %v6919_v9  ;;  %v11266_v41 = vrot.slane %v6919_v9, 2  ;;  %v11265_v42 = vrot.slane %v6919_v9, 1  ;;  %v11268_v31 = vrot.slane %v6919_v9, 6 }
 0x11a   : > { %v6351_v46 = vpop.eup %6350  ;;  %1103 = vst [vmem:[#allocation2 + $0x100] sm:$0xf] %v5560_v50  ;;  %v928_v50 = vmul.f32 %v6347_v15, %v6748_v55  ;;  %v6954_v56 = vmul.f32 %v6349_v29, %v6755_v60  ;;  %v5563_v60 = vpack.c.bf16 %v6942_v4, %v6942_v4  ;;  %v11275_v15 = vrot.slane %v6942_v4, 1 }
 0x11b   : > { %v6944_v22 = vpop.eup %6352  ;;  %1090 = vst [vmem:[#allocation2 + $0x30] sm:$0xf] %v5547_v19  ;;  %v1377_v33 = vsel %vm1121_vm2, %v11270_v34, %v11266_v41  ;;  %v6957_v40 = vmul.f32 %v6351_v46, %v6759_v0  ;;  %v1505_v19 = vsel %vm1170_vm3, %v11267_v35, %v11265_v42  ;;  %v6974_v55 = vsel %vm1268_vm0, %v11269_v39, %v11268_v31 }
 0x11c   : > { %v6959_v51 = vpop.eup %6354  ;;  %v1383_v6 = vmax.f32 %v6882_v16, %v1377_v33  ;;  %v11272_v33 = vrot.slane %v6942_v4, 2  ;;  %v11278_v46 = vrot.slane %v6942_v4, 6  ;;  %1106 = vst [vmem:[#allocation2 + $0x130] sm:$0xf] %v5563_v60  ;;  %v5545_v35 = vpack.c.bf16 %v928_v50, %v928_v50 }
 0x11d   : > { %v6978_v0 = vpop.eup %6356  ;;  %v1318_v31 = vrot.slane %v928_v50, 2  ;;  %v1446_v39 = vrot.slane %v928_v50, 1  ;;  %v1574_v29 = vrot.slane %v928_v50, 7  ;;  %v1702_v24 = vrot.slane %v928_v50, 6 }
 0x11e   : > { %v6984_v42 = vpop.eup %6358  ;;  %v1511_v41 = vmax.f32 %v1383_v6, %v1505_v19  ;;  %v1361_v7 = vsel %vm1121_vm2, %v11273_v43, %v11272_v33  ;;  %v1489_v6 = vsel %vm1170_vm3, %v11276_v47, %v11275_v15  ;;  %v11572_v19 = vrot.slane %v6892_v25, 6  ;;  %1088 = vst [vmem:[#allocation2 + $0x10] sm:$0xf] %v5545_v35 }
 0x11f   : > { %v6986_v34 = vpop.eup %6360  ;;  %v1399_v33 = vmax.f32 %v6892_v25, %v1361_v7  ;;  %v11573_v43 = vrot.slane %v6882_v16, 2  ;;  %v11574_v15 = vrot.slane %v6912_v61, 2  ;;  %v11576_v35 = vmov 0 }
 0x120   : > { %v7006_v60 = vsel %vm1268_vm0, %v11572_v19, %v11278_v46  ;;  %v7008_v62 = vpop.eup %6362  ;;  %v1506_v19 = vsel %vm1170_vm3, %v1446_v39, %v11575_v52  ;;  %v11577_v35 = vsel %vm7026_vm5, 4294967295, %v11576_v35  ;;  %v11579_v46 = vrot.slane %v6912_v61, 1 }
 0x121   : > { %v1378_v54 = vsel %vm1121_vm2, %v1318_v31, %v11573_v43  ;;  %v1379_v47 = vsel %vm1121_vm2, %v11574_v15, %v1318_v31  ;;  %11578 = vst [vmem:[#allocation24_spill] sm:$0xff] %v11577_v35  ;;  %v11580_v15 = vrot.slane %v6882_v16, 7  ;;  %v1527_v45 = vmax.f32 %v1399_v33, %v1489_v6 }
 0x122   : > { %v1381_v43 = vmax.f32 %v6912_v61, %v1379_v47  ;;  %v1382_v7 = vmax.f32 %v928_v50, %v1378_v54  ;;  %v1507_v31 = vsel %vm1170_vm3, %v11579_v46, %v1446_v39  ;;  %v1635_v37 = vsel %vm1219_vm1, %v11581_v44, %v1574_v29 }
 0x123   : > { %v1634_v52 = vsel %vm1219_vm1, %v1574_v29, %v11580_v15  ;;  %v7043_v47 = vpop.eup %6364  ;;  %v5561_v39 = vpack.c.bf16 %v6954_v56, %v6954_v56  ;;  %v1334_v33 = vrot.slane %v6954_v56, 2  ;;  %v11583_v44 = vmov 0 }
 0x124   : > { %v1639_v26 = vmax.f32 %v1511_v41, %v1634_v52  ;;  %v1414_v54 = vsel %vm1121_vm2, %v1382_v7, %v928_v50  ;;  %v7047_v32 = vmax.f32 %v1381_v43, %v1507_v31  ;;  %v11584_v44 = vsel %vm7055_vm7, 4294967295, %v11583_v44 }
 0x125   : > { %11585 = vst [vmem:[#allocation26_spill] sm:$0xff] %v11584_v44  ;;  %v1510_v29 = vmax.f32 %v1414_v54, %v1506_v19  ;;  %v11586_v50 = vrot.slane %v6882_v16, 6  ;;  %v11587_v43 = vrot.slane %v6912_v61, 6  ;;  %1104 = vst [vmem:[#allocation2 + $0x110] sm:$0xf] %v5561_v39  ;;  %v11588_v15 = vrot.slane %v6892_v25, 2 }
 0x126   : > { %11582 = vst [vmem:[#allocation25_spill] sm:$0xff] %v7047_v32  ;;  %v1671_v46 = vsel %vm7026_vm5, %v1639_v26, %v1511_v41  ;;  %v11589_v52 = vrot.slane %v6915_v63, 2  ;;  %v1462_v41 = vrot.slane %v6954_v56, 1  ;;  %v1590_v39 = vrot.slane %v6954_v56, 7 }
 0x127   : > { %v1762_v6 = vsel %vm1268_vm0, %v1702_v24, %v11586_v50  ;;  %v1763_v7 = vsel %vm1268_vm0, %v11587_v43, %v1702_v24  ;;  %v1362_v19 = vsel %vm1121_vm2, %v1334_v33, %v11588_v15  ;;  %v1542_v50 = vsel %vm1170_vm3, %v1510_v29, %v1414_v54 }
 0x128   : > { %v1767_v31 = vmax.f32 %v1671_v46, %v1762_v6  ;;  %v1363_v26 = vsel %vm1121_vm2, %v11589_v52, %v1334_v33  ;;  %v1398_v24 = vmax.f32 %v6954_v56, %v1362_v19  ;;  %v1638_v6 = vmax.f32 %v1542_v50, %v1635_v37 }
 0x129   : > { %v1397_v35 = vmax.f32 %v6915_v63, %v1363_v26  ;;  %v11590_v15 = vrot.slane %v6892_v25, 1  ;;  %v11591_v52 = vrot.slane %v6915_v63, 1  ;;  %v11593_v37 = vrot.slane %v6892_v25, 7 }
 0x12a   : > { %v7085_v43 = vsel %vm7055_vm7, %v1767_v31, %v1671_v46  ;;  %v1430_v29 = vsel %vm1121_vm2, %v1398_v24, %v6954_v56  ;;  %v11594_v31 = vrot.slane %v6915_v63, 7  ;;  %v7108_v50 = vmax.f32 %v1638_v6, %v1763_v7 }
 0x12b   : > { %v1490_v33 = vsel %vm1170_vm3, %v1462_v41, %v11590_v15  ;;  %v1491_v54 = vsel %vm1170_vm3, %v11591_v52, %v1462_v41  ;;  %v1618_v46 = vsel %vm1219_vm1, %v1590_v39, %v11593_v37  ;;  %v1718_v52 = vrot.slane %v6954_v56, 6 }
 0x12c   : > { %v7098_v19 = vmax.f32 %v1397_v35, %v1491_v54  ;;  %v1619_v26 = vsel %vm1219_vm1, %v11594_v31, %v1590_v39  ;;  %v1526_v15 = vmax.f32 %v1430_v29, %v1490_v33  ;;  %v1655_v41 = vmax.f32 %v1527_v45, %v1618_v46 }
 0x12d   : > { %v5550_v35 = vpack.c.bf16 %v6957_v40, %v6957_v40  ;;  %v1323_v24 = vrot.slane %v6957_v40, 2  ;;  %v1451_v54 = vrot.slane %v6957_v40, 1  ;;  %v11595_v39 = vrot.slane %v6892_v25, 6 }
 0x12e   : > { %11592 = vst [vmem:[#allocation27_spill] sm:$0xff] %v7098_v19  ;;  %v1558_v44 = vsel %vm1170_vm3, %v1526_v15, %v1430_v29  ;;  %v1687_v7 = vsel %vm11361_vm4, %v1655_v41, %v1527_v45  ;;  %v11596_v6 = vrot.slane %v6915_v63, 6  ;;  %v1707_v37 = vrot.slane %v6957_v40, 6 }
 0x12f   : > { %v1746_v56 = vsel %vm1268_vm0, %v1718_v52, %v11595_v39  ;;  %v1654_v46 = vmax.f32 %v1558_v44, %v1619_v26  ;;  %1093 = vst [vmem:[#allocation2 + $0x60] sm:$0xf] %v5550_v35  ;;  %v7131_v29 = vmul.f32 %v6944_v22, %v6762_v1  ;;  %v7135_v45 = vmul.f32 %v6959_v51, %v6772_v10 }
 0x130   : > { %v1747_v33 = vsel %vm1268_vm0, %v11596_v6, %v1718_v52  ;;  %v1783_v31 = vmax.f32 %v1687_v7, %v1746_v56  ;;  %v11597_v15 = vrot.slane %v6919_v9, 7  ;;  %v11598_v41 = vrot.slane %v6882_v16, 7 }
 0x131   : > { %v7145_v44 = vmul.f32 %v6978_v0, %v6775_v11  ;;  %v11599_v26 = vrot.slane %v6942_v4, 7  ;;  %v11600_v1 = vrot.slane %v6892_v25, 7  ;;  %v7155_v10 = vmax.f32 %v1654_v46, %v1747_v33 }
 0x132   : > { %v1633_v52 = vsel %vm1219_vm1, %v11598_v41, %v11597_v15  ;;  %v7159_v16 = vsel %vm11350_vm6, %v1783_v31, %v1687_v7  ;;  %v5566_v51 = vpack.c.bf16 %v7131_v29, %v7131_v29  ;;  %v1339_v11 = vrot.slane %v7131_v29, 2 }
 0x133   : > { %v7153_v22 = vsel %vm1219_vm1, %v11600_v1, %v11599_v26  ;;  %v5548_v39 = vpack.c.bf16 %v7135_v45, %v7135_v45  ;;  %v11291_v56 = vrot.slane %v7135_v45, 2  ;;  %v11292_v7 = vrot.slane %v7135_v45, 1 }
 0x134   : > { %1109 = vst [vmem:[#allocation2 + $0x160] sm:$0xf] %v5566_v51  ;;  %v11293_v6 = vrot.slane %v7135_v45, 7  ;;  %v11294_v33 = vrot.slane %v7135_v45, 6  ;;  %v5564_v46 = vpack.c.bf16 %v7145_v44, %v7145_v44  ;;  %v11295_v31 = vrot.slane %v7145_v44, 2 }
 0x135   : > { %1091 = vst [vmem:[#allocation2 + $0x40] sm:$0xf] %v5548_v39  ;;  %v11304_v15 = vrot.slane %v7145_v44, 1  ;;  %v11296_v41 = vrot.slane %v7145_v44, 7  ;;  %v11601_v26 = vrot.slane %v6919_v9, 2  ;;  %v11602_v51 = vrot.slane %v6919_v9, 1 }
 0x136   : > { %v11603_v35 = vrot.slane %v6919_v9, 7  ;;  %v11604_v0 = vrot.slane %v6919_v9, 6  ;;  %1107 = vst [vmem:[#allocation2 + $0x140] sm:$0xf] %v5564_v46  ;;  %vm11348_vm15 = vcmp.eq.s32.totalorder %v6858_v48, 10  ;;  %v6593_v49 = vmov 8  }
 0x137   : > { %v1376_v1 = vsel %vm1121_vm2, %v11601_v26, %v11291_v56  ;;  %v1504_v39 = vsel %vm1170_vm3, %v11602_v51, %v11292_v7  ;;  %v11605_v51 = vrot.slane %v6942_v4, 2  ;;  %v6594_v59 = vmov 0  }
 0x138   : > { %v7196_v25 = vsel %vm1219_vm1, %v11603_v35, %v11293_v6  ;;  %v7204_v26 = vsel %vm1268_vm0, %v11604_v0, %v11294_v33  ;;  %v1384_v56 = vmax.f32 %v6919_v9, %v1376_v1  ;;  %v11606_v35 = vrot.slane %v6942_v4, 1 }
 0x139   : > { %v1360_v7 = vsel %vm1121_vm2, %v11605_v51, %v11295_v31  ;;  %v11607_v0 = vrot.slane %v6942_v4, 7  ;;  %v11301_v33 = vrot.slane %v7145_v44, 6  ;;  %v7231_v51 = vmul.f32 %v6984_v42, %v6784_v20 }
 0x13a   : > { %v1488_v6 = vsel %vm1170_vm3, %v11606_v35, %v11304_v15  ;;  %v1400_v1 = vmax.f32 %v6942_v4, %v1360_v7  ;;  %v7235_v31 = vmul.f32 %v6986_v34, %v6787_v21  ;;  %v1416_v35 = vsel %vm1121_vm2, %v1384_v56, %v6919_v9 }
 0x13b   : > { %v7225_v46 = vsel %vm1219_vm1, %v11607_v0, %v11296_v41  ;;  %v932_v0 = vmul.f32 %v7008_v62, %v6790_v23  ;;  %v841_v7 = vadd.f32 1.0, %v7043_v47  ;;  %v1512_v41 = vmax.f32 %v1416_v35, %v1504_v39 }
 0x13c   : > { %v1432_v20 = vsel %vm1121_vm2, %v1400_v1, %v6942_v4  ;;  %v11608_v21 = vrot.slane %v6942_v4, 6  ;;  %v5551_v23 = vpack.c.bf16 %v7231_v51, %v7231_v51  ;;  %v11300_v9 = vrot.slane %v7231_v51, 2 }
 0x13d   : > { %v1528_v62 = vmax.f32 %v1432_v20, %v1488_v6  ;;  %v11299_v12 = vrot.slane %v7231_v51, 1  ;;  %v11306_v42 = vrot.slane %v7231_v51, 7  ;;  %v1544_v47 = vsel %vm1170_vm3, %v1512_v41, %v1416_v35 }
 0x13e   : > { %v7253_v34 = vsel %vm1268_vm0, %v11608_v21, %v11301_v33  ;;  %1094 = vst [vmem:[#allocation2 + $0x70] sm:$0xf] %v5551_v23  ;;  %v11297_v4 = vrot.slane %v7231_v51, 6  ;;  %v5567_v56 = vpack.c.bf16 %v7235_v31, %v7235_v31  ;;  %v11298_v39 = vrot.slane %v7235_v31, 2 }
 0x13f   : > { %v1640_v6 = vmax.f32 %v1544_v47, %v1633_v52  ;;  %v1560_v1 = vsel %vm1170_vm3, %v1528_v62, %v1432_v20  ;;  %v1373_v41 = vsel %vm1121_vm2, %v1323_v24, %v11300_v9  ;;  %v1501_v35 = vsel %vm1170_vm3, %v1451_v54, %v11299_v12 }
 0x140   : > { %v1656_v21 = vmax.f32 %v1560_v1, %v7153_v22  ;;  %v1387_v52 = vmax.f32 %v6957_v40, %v1373_v41  ;;  %v7289_v20 = vsel %vm1268_vm0, %v1707_v37, %v11297_v4  ;;  %1110 = vst [vmem:[#allocation2 + $0x170] sm:$0xf] %v5567_v56  ;;  %v1357_v23 = vsel %vm1121_vm2, %v1339_v11, %v11298_v39 }
 0x141   : > { %v7298_v22 = vmax.f32 %v1640_v6, %v6974_v55  ;;  %v1403_v62 = vmax.f32 %v7131_v29, %v1357_v23  ;;  %v11303_v47 = vrot.slane %v7235_v31, 1  ;;  %v11305_v1 = vrot.slane %v7235_v31, 7 }
 0x142   : > { %v7306_v56 = vmax.f32 %v1656_v21, %v7006_v60  ;;  %v1515_v41 = vmax.f32 %v1387_v52, %v1501_v35  ;;  %v11302_v4 = vrot.slane %v7235_v31, 6  ;;  %v5549_v39 = vpack.c.bf16 %v932_v0, %v932_v0 }
 0x143   : > { %v11609_v55 = vrot.slane %v7131_v29, 1  ;;  %v1322_v23 = vrot.slane %v932_v0, 2  ;;  %v1450_v12 = vrot.slane %v932_v0, 1  ;;  %v1578_v9 = vrot.slane %v932_v0, 7 }
 0x144   : > { %v11610_v60 = vrot.slane %v7131_v29, 6  ;;  %1092 = vst [vmem:[#allocation2 + $0x50] sm:$0xf] %v5549_v39  ;;  %v1706_v21 = vrot.slane %v932_v0, 6  ;;  %6368 = vrcp.f32 %v841_v7  ;;  %v11612_v39 = vrot.slane %v7135_v45, 1 }
 0x145   : > { %v1485_v6 = vsel %vm1170_vm3, %v11609_v55, %v11303_v47  ;;  %v1374_v52 = vsel %vm1121_vm2, %v1322_v23, %v1323_v24  ;;  %v11613_v24 = vrot.slane %v6957_v40, 7  ;;  %6370 = vpow2.f32 %v6872_v8 }
 0x146   : > { %v7315_v33 = vmax.f32 %v1403_v62, %v1485_v6  ;;  %v7323_v35 = vsel %vm1268_vm0, %v11610_v60, %v11302_v4  ;;  %v11611_v62 = vrot.slane %v7135_v45, 2  ;;  %v1502_v6 = vsel %vm1170_vm3, %v1450_v12, %v1451_v54 }
 0x147   : > { %v1503_v7 = vsel %vm1170_vm3, %v11612_v39, %v1450_v12  ;;  %v1386_v4 = vmax.f32 %v932_v0, %v1374_v52  ;;  %v1630_v47 = vsel %vm1219_vm1, %v1578_v9, %v11613_v24  ;;  %v1758_v54 = vsel %vm1268_vm0, %v1706_v21, %v1707_v37 }
 0x148   : > { %v1375_v55 = vsel %vm1121_vm2, %v11611_v62, %v1322_v23  ;;  %v11614_v23 = vrot.slane %v7135_v45, 7  ;;  %v1643_v15 = vmax.f32 %v1515_v41, %v1630_v47  ;;  %v11615_v12 = vrot.slane %v7135_v45, 6 }
 0x149   : > { %v1385_v60 = vmax.f32 %v7135_v45, %v1375_v55  ;;  %v6367_v55 = vpop.eup %6366  ;;  %v1418_v39 = vsel %vm1121_vm2, %v1386_v4, %v932_v0  ;;  %6372 = vpow2.f32 %v6876_v13  ;;  %v11616_v37 = vmov %v11613_v24 }
 0x14a   : > { %v1631_v62 = vsel %vm1219_vm1, %v11614_v23, %v1578_v9  ;;  %v1759_v52 = vsel %vm1268_vm0, %v11615_v12, %v1706_v21  ;;  %v7370_v45 = vsel %vm1219_vm1, %v11616_v37, %v11306_v42  ;;  %v1514_v47 = vmax.f32 %v1418_v39, %v1502_v6 }
 0x14b   : > { %v1513_v9 = vmax.f32 %v1385_v60, %v1503_v7  ;;  %v1675_v21 = vsel %vm1242_vm8, %v1643_v15, %v1515_v41  ;;  %v948_v8 = vmul.f32 %v6367_v55, %v6796_v30  ;;  %6374 = vpow2.f32 %v6879_v14 }
 0x14c   : > { %v1771_v0 = vmax.f32 %v1675_v21, %v1758_v54  ;;  %v11617_v40 = vrot.slane %v7131_v29, 7  ;;  %6376 = vpow2.f32 %v6886_v17  ;;  %v1546_v30 = vsel %vm1170_vm3, %v1514_v47, %v1418_v39 }
 0x14d   : > { %v1641_v13 = vmax.f32 %v1513_v9, %v7196_v25  ;;  %v5565_v15 = vpack.c.bf16 %v948_v8, %v948_v8  ;;  %v1338_v14 = vrot.slane %v948_v8, 2  ;;  %v1466_v41 = vrot.slane %v948_v8, 1 }
 0x14e   : > { %v7385_v4 = vsel %vm1219_vm1, %v11617_v40, %v11305_v1  ;;  %v1642_v25 = vmax.f32 %v1546_v30, %v1631_v62  ;;  %v7394_v7 = vsel %vm11353_vm10, %v1771_v0, %v1675_v21  ;;  %v1594_v60 = vrot.slane %v948_v8, 7 }
 0x14f   : > { %v1673_v6 = vsel %vm11445_vm9, %v1641_v13, %v1513_v9  ;;  %11618 = vst [vmem:[#allocation28_spill] sm:$0xff] %v7394_v7  ;;  %1108 = vst [vmem:[#allocation2 + $0x150] sm:$0xf] %v5565_v15  ;;  %v1358_v17 = vsel %vm1121_vm2, %v1338_v14, %v1339_v11  ;;  %v11619_v23 = vrot.slane %v7145_v44, 2  ;;  %v11620_v54 = vrot.slane %v7131_v29, 1 }
 0x150   : > { %v1769_v24 = vmax.f32 %v1673_v6, %v7204_v26  ;;  %v7410_v55 = vmax.f32 %v1642_v25, %v1759_v52  ;;  %v1402_v39 = vmax.f32 %v948_v8, %v1358_v17  ;;  %v11622_v9 = vrot.slane %v7145_v44, 1 }
 0x151   : > { %v1359_v62 = vsel %vm1121_vm2, %v11619_v23, %v1338_v14  ;;  %v1486_v12 = vsel %vm1170_vm3, %v1466_v41, %v11620_v54  ;;  %v11623_v47 = vmov %v11617_v40  ;;  %v11624_v52 = vrot.slane %v7145_v44, 7  ;;  %v6369_v25 = vpop.eup %6368 }
 0x152   : > { %11621 = vst [vmem:[#allocation29_spill] sm:$0xff] %v7410_v55  ;;  %v1401_v26 = vmax.f32 %v7145_v44, %v1359_v62  ;;  %v1487_v11 = vsel %vm1170_vm3, %v11622_v9, %v1466_v41  ;;  %v7419_v37 = vsel %vm11359_vm11, %v1769_v24, %v1673_v6  ;;  %v1614_v21 = vsel %vm1219_vm1, %v1594_v60, %v11623_v47  ;;  %v6077_v41 = vpop.f32.mrf.mxu0  ;;  %v6371_v9 = vpop.eup %6370  ;;  %v11629_v47 = vld [vmem:[#allocation3_spill] sm:$0xff] }
 0x153   : > { %v1615_v13 = vsel %vm1219_vm1, %v11624_v52, %v1594_v60  ;;  %v1722_v0 = vrot.slane %v948_v8, 6  ;;  %v1830_v40 = vmax.f32 %v7108_v50, %v7410_v55  ;;  %v1434_v30 = vsel %vm1121_vm2, %v1402_v39, %v948_v8 }
 0x154   : > { %v1529_v15 = vmax.f32 %v1401_v26, %v1487_v11  ;;  %v1659_v14 = vmax.f32 %v7315_v33, %v1614_v21  ;;  %v1530_v6 = vmax.f32 %v1434_v30, %v1486_v12  ;;  %v11625_v24 = vrot.slane %v7131_v29, 6  ;;  %v6093_v12 = vpop.f32.mrf.mxu1  ;;  %v578_v21 = vpop.f32.mrf.mxu0 }
 0x155   : > { %v11626_v60 = vrot.slane %v7145_v44, 6  ;;  %6378 = vpow2.f32 %v6889_v18  ;;  %v7444_v8 = vmax.f32 %v1830_v40, %v7298_v22  ;;  %v7451_v29 = vmul.f32 %v6369_v25, %v6845_v36  ;;  %v11628_v18 = vld [vmem:[#allocation21_spill] sm:$0xff] }
 0x156   : > { %v1742_v17 = vsel %vm1268_vm0, %v1722_v0, %v11625_v24  ;;  %v1657_v62 = vmax.f32 %v1529_v15, %v7225_v46  ;;  %v1691_v54 = vsel %vm11450_vm12, %v1659_v14, %v7315_v33  ;;  %v1562_v44 = vsel %vm1170_vm3, %v1530_v6, %v1434_v30  ;;  %v6373_v52 = vpop.eup %6372  ;;  %v642_v14 = vpop.f32.mrf.mxu1  ;;  %v11633_v24 = vld [vmem:[#allocation4_spill] sm:$0xff] }
 0x157   : > { %v1743_v23 = vsel %vm1268_vm0, %v11626_v60, %v1722_v0  ;;  %11627 = vst [vmem:[#allocation30_spill] sm:$0xff] %v7444_v8  ;;  %v1787_v26 = vmax.f32 %v1691_v54, %v1742_v17  ;;  %6380 = vpow2.f32 %v6895_v27  ;;  %v5241_v39 = vmul.f32 -1.442695, %v11628_v18  ;;  %v6078_v60 = vpop.f32.mrf.mxu0 }
 0x158   : > { %v1658_v11 = vmax.f32 %v1562_v44, %v1615_v13  ;;  %v1689_v46 = vsel %vm11363_vm13, %v1657_v62, %v1529_v15  ;;  %v5554_v33 = vpack.c.bf16 %v7451_v29, %v7451_v29  ;;  %v678_v36 = vmul.f32 %v6077_v41, %v11629_v47  ;;  %v6375_v27 = vpop.eup %6374 }
 0x159   : > { %v1785_v0 = vmax.f32 %v1689_v46, %v7253_v34  ;;  %v7465_v40 = vsel %vm11349_vm14, %v1787_v26, %v1691_v54  ;;  %v857_v13 = vadd.f32 1.0, %v6371_v9  ;;  %v6377_v15 = vpop.eup %6376  ;;  %v839_v41 = vadd.f32 1.0, %v6373_v52 }
 0x15a   : > { %11630 = vst [vmem:[#allocation21_spill] sm:$0xff] %v7465_v40  ;;  %v7467_v30 = vmax.f32 %v1658_v11, %v1743_v23  ;;  %1097 = vst [vmem:[#allocation2 + $0xa0] sm:$0xf] %v5554_v33  ;;  %v855_v6 = vadd.f32 1.0, %v6375_v27  ;;  %6382 = vpow2.f32 %v5241_v39  ;;  %v842_v34 = vadd.f32 1.0, %v6377_v15 }
 0x15b   : > { %v7471_v25 = vsel %vm11348_vm15, %v1785_v0, %v1689_v46  ;;  %6384 = vrcp.f32 %v857_v13  ;;  %v7474_v17 = vadd.f32 %v11633_v24, %v678_v36  ;;  %v694_v23 = vmul.f32 %v6093_v12, %v11629_v47  ;;  %v6094_v36 = vpop.f32.mrf.mxu1 }
 0x15c   : > { %11631 = vst [vmem:[#allocation3_spill] sm:$0xff] %v7467_v30  ;;  %11632 = vst [vmem:[#allocation31_spill] sm:$0xff] %v7471_v25  ;;  %6386 = vrcp.f32 %v839_v41  ;;  %v676_v62 = vmul.f32 %v11629_v47, %v578_v21  ;;  %v692_v54 = vmul.f32 %v11629_v47, %v642_v14  ;;  %v6589_v44 = vmov 5  }
 0x15d   : > { %6388 = vrcp.f32 %v855_v6  ;;  %v7481_v26 = vsel %vm1219_vm1, 4, %v6589_v44  ;;  %v6590_v39 = vmov 4   ;;  %v7489_v11 = vsel %vm1268_vm0, 4, %v6589_v44  ;;  %v7530_v44 = vld [vmem:[%s11259_s2] ss:$0 sm:$0xff] }
 0x15e   : > { %11634 = vst [vmem:[#allocation4_spill] sm:$0xff] %v7481_v26  ;;  %v7485_v9 = vsel %vm1219_vm1, 3, %v6590_v39  ;;  %11636 = vst [vmem:[#allocation33_spill] sm:$0xff] %v7489_v11  ;;  %6390 = vrcp.f32 %v842_v34  ;;  %v7493_v12 = vsel %vm1268_vm0, 3, %v6590_v39  ;;  %v7496_v46 = vadd.f32 %v11633_v24, %v694_v23 }
 0x15f   : > { %11635 = vst [vmem:[#allocation32_spill] sm:$0xff] %v7485_v9  ;;  %11637 = vst [vmem:[#allocation34_spill] sm:$0xff] %v7493_v12  ;;  %v679_v33 = vmul.f32 %v6078_v60, %v11629_v47  ;;  %v6591_v21 = vmov 13   ;;  %v6592_v0 = vmov 12   ;;  %v5230_v13 = vmul.f32 -1.442695, %v7474_v17 }
 0x160   : > { %11638 = vst [vmem:[#allocation35_spill] sm:$0xff] %v7496_v46  ;;  %v7501_v52 = vsel %vm1219_vm1, 12, %v6591_v21  ;;  %v7505_v27 = vsel %vm1219_vm1, 11, %v6592_v0  ;;  %v7509_v14 = vadd.f32 %v11633_v24, %v676_v62  ;;  %v7513_v15 = vsel %vm1268_vm0, 12, %v6591_v21  ;;  %11645 = vst [vmem:[#allocation42_spill] sm:$0xff] %v7530_v44 }
 0x161   : > { %11639 = vst [vmem:[#allocation36_spill] sm:$0xff] %v7501_v52  ;;  %11640 = vst [vmem:[#allocation37_spill] sm:$0xff] %v7505_v27  ;;  %v7517_v47 = vsel %vm1268_vm0, 11, %v6592_v0  ;;  %v5246_v41 = vmul.f32 -1.442695, %v7496_v46  ;;  %v7521_v6 = vadd.f32 %v11633_v24, %v692_v54  ;;  %v1847_v60 = vmax.f32 %v7159_v16, %v7465_v40 }
 0x162   : > { %11641 = vst [vmem:[#allocation38_spill] sm:$0xff] %v7509_v14  ;;  %11642 = vst [vmem:[#allocation39_spill] sm:$0xff] %v7513_v15  ;;  %v6379_v34 = vpop.eup %6378  ;;  %v695_v39 = vmul.f32 %v7530_v44, %v6094_v36  ;;  %v1846_v21 = vmax.f32 %v7155_v10, %v7467_v30  ;;  %v7538_v54 = vld [vmem:[%s11260_s3] ss:$0 sm:$0xff]  ;;  %v1831_v62 = vmax.f32 %v7085_v43, %v7394_v7  ;;  %6392 = vpow2.f32 %v5230_v13 }
 0x163   : > { %11643 = vst [vmem:[#allocation40_spill] sm:$0xff] %v7517_v47  ;;  %11644 = vst [vmem:[#allocation41_spill] sm:$0xff] %v7521_v6  ;;  %v858_v24 = vadd.f32 1.0, %v6379_v34  ;;  %v7541_v0 = vadd.f32 %v7538_v54, %v679_v33  ;;  %v5228_v1 = vmul.f32 -1.442695, %v7509_v14  ;;  %6394 = vpow2.f32 %v5246_v41 }
 0x164   : > { %v6381_v23 = vpop.eup %6380  ;;  %v7547_v36 = vadd.f32 %v7538_v54, %v695_v39  ;;  %v5244_v48 = vmul.f32 -1.442695, %v7521_v6  ;;  %v7553_v33 = vmax.f32 %v1831_v62, %v7419_v37  ;;  %v7558_v39 = vsel %vm1219_vm1, 7, %v6593_v49 }
 0x165   : > { %11646 = vst [vmem:[#allocation43_spill] sm:$0xff] %v7541_v0  ;;  %v840_v42 = vadd.f32 1.0, %v6381_v23  ;;  %6396 = vrcp.f32 %v858_v24  ;;  %v5231_v13 = vmul.f32 -1.442695, %v7541_v0  ;;  %11649 = vst [vmem:[#allocation46_spill] sm:$0xff] %v7558_v39  ;;  %v7561_v34 = vmax.f32 %v1846_v21, %v7306_v56  ;;  %v581_v24 = vpop.f32.mrf.mxu0  ;;  %v11675_v0 = vld [vmem:[#allocation19_spill] sm:$0xff] }
 0x166   : > { %11647 = vst [vmem:[#allocation44_spill] sm:$0xff] %v7547_v36  ;;  %11648 = vst [vmem:[#allocation45_spill] sm:$0xff] %v7553_v33  ;;  %v7565_v23 = vsel %vm1268_vm0, 7, %v6593_v49  ;;  %v7568_v62 = vmax.f32 %v1847_v60, %v7471_v25  ;;  %v7573_v21 = vsel %vm1219_vm1, 15, %v6594_v59  ;;  %v11658_v33 = vld [vmem:[#allocation18_spill] sm:$0xff]  ;;  %vm11362_vm15 = vcmp.eq.s32.totalorder %v7481_v26, 5 }
 0x167   : > { %6398 = vrcp.f32 %v840_v42  ;;  %11650 = vst [vmem:[#allocation47_spill] sm:$0xff] %v7561_v34  ;;  %v6383_v41 = vpop.eup %6382  ;;  %11651 = vst [vmem:[#allocation48_spill] sm:$0xff] %v7565_v23  ;;  %v5247_v42 = vmul.f32 -1.442695, %v7547_v36  ;;  %vm1244_vm14 = vcmp.eq.s32.totalorder %v7485_v9, 4  ;;  %vm11474_vm6 = vcmp.eq.s32.totalorder %v7489_v11, 5 }
 0x168   : > { %6400 = vpow2.f32 %v5228_v1  ;;  %11652 = vst [vmem:[#allocation49_spill] sm:$0xff] %v7568_v62  ;;  %v6385_v28 = vpop.eup %6384  ;;  %v856_v58 = vadd.f32 1.0, %v6383_v41  ;;  %11653 = vst [vmem:[#allocation50_spill] sm:$0xff] %v7573_v21  ;;  %v7577_v1 = vsel %vm1268_vm0, 15, %v6594_v59  ;;  %v7590_v59 = vmul.f32 %v7530_v44, %v581_v24  ;;  %v11657_v24 = vld [vmem:[#allocation16_spill] sm:$0xff] }
 0x169   : > { %6402 = vpow2.f32 %v5244_v48  ;;  %11654 = vst [vmem:[#allocation51_spill] sm:$0xff] %v7577_v1  ;;  %v6387_v49 = vpop.eup %6386  ;;  %v7580_v5 = vmul.f32 %v6385_v28, %v11655_v38  ;;  %vm11473_vm10 = vcmp.eq.s32.totalorder %v7493_v12, 4  ;;  %vm11416_vm11 = vcmp.eq.s32.totalorder %v7501_v52, 13 }
 0x16a   : > { %v6389_v48 = vpop.eup %6388  ;;  %v7586_v57 = vmul.f32 %v6387_v49, %v11656_v53  ;;  %6404 = vpow2.f32 %v5231_v13  ;;  %vm11419_vm4 = vcmp.eq.s32.totalorder %v7505_v27, 12  ;;  %vm11396_vm13 = vcmp.eq.s32.totalorder %v7513_v15, 13  ;;  %v11724_v27 = vld [vmem:[#allocation41_spill] sm:$0xff] }
 0x16b   : > { %v6391_v32 = vpop.eup %6390  ;;  %v5570_v38 = vpack.c.bf16 %v7580_v5, %v7580_v5  ;;  %6406 = vpow2.f32 %v5247_v42  ;;  %v7601_v49 = vmul.f32 %v6389_v48, %v11657_v24  ;;  %v11660_v48 = vrot.slane %v7231_v51, 1 }
 0x16c   : > { %v5552_v28 = vpack.c.bf16 %v7586_v57, %v7586_v57  ;;  %v11330_v41 = vrot.slane %v7586_v57, 2  ;;  %v11331_v2 = vrot.slane %v7586_v57, 1  ;;  %6408 = vrcp.f32 %v856_v58 }
 0x16d   : > { %1113 = vst [vmem:[#allocation2 + $0x1a0] sm:$0xf] %v5570_v38  ;;  %v11332_v53 = vrot.slane %v7586_v57, 7  ;;  %v11334_v13 = vrot.slane %v7586_v57, 6  ;;  %v7604_v60 = vmul.f32 %v6391_v32, %v11658_v33  ;;  %v11659_v58 = vrot.slane %v7231_v51, 2 }
 0x16e   : > { %1095 = vst [vmem:[#allocation2 + $0x80] sm:$0xf] %v5552_v28  ;;  %v1500_v32 = vsel %vm1170_vm3, %v11660_v48, %v11331_v2  ;;  %v11661_v28 = vrot.slane %v7231_v51, 7  ;;  %v5568_v48 = vpack.c.bf16 %v7601_v49, %v7601_v49  ;;  %v11663_v42 = vrot.slane %v7601_v49, 2  ;;  %v11734_v26 = vld [vmem:[#allocation48_spill] sm:$0xff] }
 0x16f   : > { %v1372_v38 = vsel %vm1121_vm2, %v11659_v58, %v11330_v41  ;;  %v11662_v58 = vrot.slane %v7231_v51, 6  ;;  %v11665_v21 = vrot.slane %v7601_v49, 1  ;;  %v11668_v2 = vrot.slane %v7235_v31, 7 }
 0x170   : > { %v1388_v33 = vmax.f32 %v7231_v51, %v1372_v38  ;;  %v7627_v24 = vsel %vm1219_vm1, %v11661_v28, %v11332_v53  ;;  %v6393_v38 = vpop.eup %6392  ;;  %1111 = vst [vmem:[#allocation2 + $0x180] sm:$0xf] %v5568_v48  ;;  %v11664_v28 = vrot.slane %v7235_v31, 2  ;;  %v11667_v48 = vrot.slane %v7601_v49, 7 }
 0x171   : > { %v7635_v41 = vsel %vm1268_vm0, %v11662_v58, %v11334_v13  ;;  %v7643_v53 = vpop.eup %6394  ;;  %v5555_v58 = vpack.c.bf16 %v7604_v60, %v7604_v60  ;;  %v845_v23 = vadd.f32 1.0, %v6393_v38  ;;  %v11678_v38 = vrot.slane %v7451_v29, 6 }
 0x172   : > { %v1420_v62 = vsel %vm1121_vm2, %v1388_v33, %v7231_v51  ;;  %v6397_v1 = vpop.eup %6396  ;;  %v1356_v34 = vsel %vm1121_vm2, %v11664_v28, %v11663_v42  ;;  %v11666_v51 = vrot.slane %v7235_v31, 1  ;;  %v11669_v42 = vrot.slane %v7601_v49, 6 }
 0x173   : > { %v1516_v8 = vmax.f32 %v1420_v62, %v1500_v32  ;;  %v7670_v32 = vsel %vm1219_vm1, %v11668_v2, %v11667_v48  ;;  %v1404_v61 = vmax.f32 %v7235_v31, %v1356_v34  ;;  %v11670_v28 = vrot.slane %v7235_v31, 6  ;;  %1098 = vst [vmem:[#allocation2 + $0xb0] sm:$0xf] %v5555_v58 }
 0x174   : > { %v1484_v33 = vsel %vm1170_vm3, %v11666_v51, %v11665_v21  ;;  %v6399_v13 = vpop.eup %6398  ;;  %v11671_v21 = vrot.slane %v7604_v60, 2  ;;  %v11672_v51 = vrot.slane %v7451_v29, 2  ;;  %v11673_v48 = vrot.slane %v7604_v60, 1 }
 0x175   : > { %v7679_v19 = vsel %vm1268_vm0, %v11670_v28, %v11669_v42  ;;  %v11674_v34 = vrot.slane %v7451_v29, 1  ;;  %v7693_v36 = vpop.eup %6400  ;;  %v1548_v42 = vsel %vm1170_vm3, %v1516_v8, %v1420_v62  ;;  %v11351_v28 = vrot.slane %v7604_v60, 6 }
 0x176   : > { %v1369_v2 = vsel %vm1121_vm2, %v11672_v51, %v11671_v21  ;;  %v7699_v39 = vpop.eup %6402  ;;  %v1644_v21 = vmax.f32 %v1548_v42, %v7370_v45  ;;  %v1436_v51 = vsel %vm1121_vm2, %v1404_v61, %v7235_v31  ;;  %v11356_v8 = vrot.slane %v7580_v5, 6 }
 0x177   : > { %v1497_v63 = vsel %vm1170_vm3, %v11674_v34, %v11673_v48  ;;  %v1391_v58 = vmax.f32 %v7451_v29, %v1369_v2  ;;  %v7706_v48 = vmul.f32 %v6397_v1, %v11675_v0  ;;  %v11677_v34 = vld [vmem:[#allocation20_spill] sm:$0xff]  ;;  %v1532_v62 = vmax.f32 %v1436_v51, %v1484_v33  ;;  %v7719_v61 = vpop.eup %6404 }
 0x178   : > { %v936_v6 = vmul.f32 %v6399_v13, %v11677_v34  ;;  %v7716_v45 = vsel %vm1268_vm0, %v11678_v38, %v11351_v28  ;;  %v7722_v31 = vmax.f32 %v1644_v21, %v7289_v20  ;;  %v7728_v13 = vpop.eup %6406  ;;  %6410 = vrcp.f32 %v845_v23 }
 0x179   : > { %11676 = vst [vmem:[#allocation14_spill] sm:$0xff] %v7706_v48  ;;  %v1519_v2 = vmax.f32 %v1391_v58, %v1497_v63  ;;  %11679 = vst [vmem:[#allocation15_spill] sm:$0xff] %v7716_v45  ;;  %v5571_v0 = vpack.c.bf16 %v7706_v48, %v7706_v48  ;;  %v11352_v63 = vrot.slane %v7706_v48, 2  ;;  %v11354_v1 = vrot.slane %v7706_v48, 1  ;;  %v6409_v20 = vpop.eup %6408 }
 0x17a   : > { %v1564_v33 = vsel %vm1170_vm3, %v1532_v62, %v1436_v51  ;;  %v11355_v42 = vrot.slane %v7706_v48, 6  ;;  %v5553_v58 = vpack.c.bf16 %v936_v6, %v936_v6  ;;  %v1832_v21 = vmax.f32 %v7298_v22, %v7722_v31 }
 0x17b   : > { %v1660_v34 = vmax.f32 %v1564_v33, %v7385_v4  ;;  %1114 = vst [vmem:[#allocation2 + $0x1b0] sm:$0xf] %v5571_v0  ;;  %v11680_v38 = vrot.slane %v7580_v5, 2  ;;  %v11681_v62 = vrot.slane %v7580_v5, 1  ;;  %v1326_v0 = vrot.slane %v936_v6, 2 }
 0x17c   : > { %v7757_v4 = vsel %vm1268_vm0, %v11356_v8, %v11355_v42  ;;  %1096 = vst [vmem:[#allocation2 + $0x90] sm:$0xf] %v5553_v58  ;;  %v1454_v33 = vrot.slane %v936_v6, 1  ;;  %v11684_v45 = vrot.slane %v7451_v29, 2  ;;  %v11685_v58 = vrot.slane %v7586_v57, 2 }
 0x17d   : > { %v1353_v51 = vsel %vm1121_vm2, %v11680_v38, %v11352_v63  ;;  %v1481_v23 = vsel %vm1170_vm3, %v11681_v62, %v11354_v1  ;;  %11682 = vst [vmem:[#allocation16_spill] sm:$0xff] %v7757_v4  ;;  %v1860_v38 = vmax.f32 %v1832_v21, %v7410_v55  ;;  %v7761_v63 = vmax.f32 %v1660_v34, %v7323_v35 }
 0x17e   : > { %v1407_v28 = vmax.f32 %v7580_v5, %v1353_v51  ;;  %v1582_v62 = vrot.slane %v936_v6, 7  ;;  %v1710_v51 = vrot.slane %v936_v6, 6  ;;  %v1370_v42 = vsel %vm1121_vm2, %v1326_v0, %v11684_v45 }
 0x17f   : > { %11683 = vst [vmem:[#allocation18_spill] sm:$0xff] %v7761_v63  ;;  %v1371_v8 = vsel %vm1121_vm2, %v11685_v58, %v1326_v0  ;;  %v11686_v21 = vrot.slane %v7451_v29, 1  ;;  %v7779_v34 = vmax.f32 %v1860_v38, %v7108_v50  ;;  %v1390_v4 = vmax.f32 %v936_v6, %v1370_v42 }
 0x180   : > { %v7764_v1 = vmax.f32 %v1407_v28, %v1481_v23  ;;  %v1389_v23 = vmax.f32 %v7586_v57, %v1371_v8  ;;  %v11688_v45 = vrot.slane %v7586_v57, 1  ;;  %v11689_v0 = vrot.slane %v7451_v29, 7 }
 0x181   : > { %v1498_v35 = vsel %vm1170_vm3, %v1454_v33, %v11686_v21  ;;  %11687 = vst [vmem:[#allocation19_spill] sm:$0xff] %v7779_v34  ;;  %v11690_v21 = vrot.slane %v7586_v57, 7  ;;  %v11691_v28 = vrot.slane %v7451_v29, 6  ;;  %v1422_v42 = vsel %vm1121_vm2, %v1390_v4, %v936_v6 }
 0x182   : > { %v1499_v14 = vsel %vm1170_vm3, %v11688_v45, %v1454_v33  ;;  %v1626_v58 = vsel %vm1219_vm1, %v1582_v62, %v11689_v0  ;;  %v11365_v45 = vmov 7   ;;  %v1518_v44 = vmax.f32 %v1422_v42, %v1498_v35 }
 0x183   : > { %v1627_v38 = vsel %vm1219_vm1, %v11690_v21, %v1582_v62  ;;  %v1754_v8 = vsel %vm1268_vm0, %v1710_v51, %v11691_v28  ;;  %v1517_v46 = vmax.f32 %v1389_v23, %v1499_v14  ;;  %v1647_v33 = vmax.f32 %v1519_v2, %v1626_v58 }
 0x184   : > { %v7805_v0 = vsel %vm1219_vm1, 6, %v11365_v45  ;;  %v11692_v62 = vrot.slane %v7586_v57, 6  ;;  %v952_v28 = vmul.f32 %v6409_v20, %v11628_v18  ;;  %v7815_v14 = vadd.f32 %v7538_v54, %v7590_v59 }
 0x185   : > { %v11364_v6 = vrot.slane %v7580_v5, 7  ;;  %v1645_v4 = vmax.f32 %v1517_v46, %v7627_v24  ;;  %v1679_v35 = vsel %vm11362_vm15, %v1647_v33, %v1519_v2  ;;  %v11693_v57 = vrot.slane %v7604_v60, 7 }
 0x186   : > { %v1755_v21 = vsel %vm1268_vm0, %v11692_v62, %v1710_v51  ;;  %v11694_v23 = vrot.slane %v7451_v29, 7  ;;  %v1550_v20 = vsel %vm1170_vm3, %v1518_v44, %v1422_v42  ;;  %v1775_v59 = vmax.f32 %v1679_v35, %v1754_v8  ;;  %v6411_v42 = vpop.eup %6410 }
 0x187   : > { %v5569_v51 = vpack.c.bf16 %v952_v28, %v952_v28  ;;  %v1342_v58 = vrot.slane %v952_v28, 2  ;;  %v1646_v62 = vmax.f32 %v1550_v20, %v1627_v38  ;;  %v1677_v24 = vsel %vm1244_vm14, %v1645_v4, %v1517_v46 }
 0x188   : > { %v7827_v18 = vsel %vm1219_vm1, %v11694_v23, %v11693_v57  ;;  %vm11405_vm15 = vcmp.eq.s32.totalorder %v7517_v47, 12  ;;  %v1470_v2 = vrot.slane %v952_v28, 1  ;;  %v1598_v29 = vrot.slane %v952_v28, 7  ;;  %v11717_v47 = vld [vmem:[#allocation38_spill] sm:$0xff] }
 0x189   : > { %v1773_v33 = vmax.f32 %v1677_v24, %v7635_v41  ;;  %v7838_v57 = vsel %vm11474_vm6, %v1775_v59, %v1679_v35  ;;  %1112 = vst [vmem:[#allocation2 + $0x190] sm:$0xf] %v5569_v51  ;;  %v11696_v44 = vrot.slane %v7580_v5, 2  ;;  %v11697_v46 = vrot.slane %v7601_v49, 2 }
 0x18a   : > { %11695 = vst [vmem:[#allocation20_spill] sm:$0xff] %v7838_v57  ;;  %v7848_v4 = vmax.f32 %v1646_v62, %v1755_v21  ;;  %v1835_v41 = vmax.f32 %v7394_v7, %v7838_v57  ;;  %v11699_v59 = vrot.slane %v7580_v5, 1  ;;  %v1610_v62 = vsel %vm1219_vm1, %v1598_v29, %v11364_v6 }
 0x18b   : > { %v1354_v38 = vsel %vm1121_vm2, %v1342_v58, %v11696_v44  ;;  %v1355_v8 = vsel %vm1121_vm2, %v11697_v46, %v1342_v58  ;;  %v7855_v20 = vsel %vm11473_vm10, %v1773_v33, %v1677_v24  ;;  %v11700_v58 = vrot.slane %v7601_v49, 1 }
 0x18c   : > { %v1405_v35 = vmax.f32 %v7601_v49, %v1355_v8  ;;  %v1406_v23 = vmax.f32 %v952_v28, %v1354_v38  ;;  %11698 = vst [vmem:[#allocation52_spill] sm:$0xff] %v7855_v20  ;;  %v1482_v51 = vsel %vm1170_vm3, %v1470_v2, %v11699_v59  ;;  %v1834_v44 = vmax.f32 %v7410_v55, %v7848_v4 }
 0x18d   : > { %v1483_v21 = vsel %vm1170_vm3, %v11700_v58, %v1470_v2  ;;  %v1863_v24 = vmax.f32 %v1835_v41, %v7855_v20  ;;  %v11701_v8 = vrot.slane %v7601_v49, 7  ;;  %v1663_v59 = vmax.f32 %v7764_v1, %v1610_v62 }
 0x18e   : > { %v1438_v33 = vsel %vm1121_vm2, %v1406_v23, %v952_v28  ;;  %v1533_v38 = vmax.f32 %v1405_v35, %v1483_v21  ;;  %v1726_v58 = vrot.slane %v952_v28, 6  ;;  %v1862_v6 = vmax.f32 %v1834_v44, %v7722_v31 }
 0x18f   : > { %v1534_v46 = vmax.f32 %v1438_v33, %v1482_v51  ;;  %v1611_v2 = vsel %vm1219_vm1, %v11701_v8, %v1598_v29  ;;  %v1891_v45 = vmax.f32 %v1863_v24, %v7419_v37  ;;  %v7883_v41 = vmul.f32 %v6411_v42, %v7474_v17 }
 0x190   : > { %v1661_v11 = vmax.f32 %v1533_v38, %v7670_v32  ;;  %v1695_v23 = vsel %vm11416_vm11, %v1663_v59, %v7764_v1  ;;  %v11702_v29 = vrot.slane %v7580_v5, 6  ;;  %v11703_v51 = vrot.slane %v7601_v49, 6 }
 0x191   : > { %v1566_v35 = vsel %vm1170_vm3, %v1534_v46, %v1438_v33  ;;  %v1890_v17 = vmax.f32 %v1862_v6, %v7298_v22  ;;  %v7900_v42 = vmax.f32 %v1891_v45, %v7085_v43  ;;  %v5558_v24 = vpack.c.bf16 %v7883_v41, %v7883_v41 }
 0x192   : > { %v1738_v28 = vsel %vm1268_vm0, %v1726_v58, %v11702_v29  ;;  %v1739_v32 = vsel %vm1268_vm0, %v11703_v51, %v1726_v58  ;;  %v1662_v21 = vmax.f32 %v1566_v35, %v1611_v2  ;;  %v1693_v62 = vsel %vm11419_vm4, %v1661_v11, %v1533_v38 }
 0x193   : > { %11704 = vst [vmem:[#allocation53_spill] sm:$0xff] %v7900_v42  ;;  %v1789_v1 = vmax.f32 %v1693_v62, %v7679_v19  ;;  %v1791_v44 = vmax.f32 %v1695_v23, %v1738_v28  ;;  %v861_v49 = vadd.f32 1.0, %v7643_v53  ;;  %v11370_v33 = vrot.slane %v7706_v48, 7  ;;  %1101 = vst [vmem:[#allocation2 + $0xe0] sm:$0xf] %v5558_v24 }
 0x194   : > { %v7910_v46 = vmax.f32 %v1890_v17, %v7108_v50  ;;  %v843_v45 = vadd.f32 1.0, %v7693_v36  ;;  %v6596_v6 = vmov 6   ;;  %v1848_v19 = vmax.f32 %v7306_v56, %v7761_v63 }
 0x195   : > { %v7915_v8 = vsel %vm1219_vm1, 5, %v6596_v6  ;;  %v7919_v11 = vmax.f32 %v1662_v21, %v1739_v32  ;;  %v7923_v53 = vsel %vm11405_vm15, %v1789_v1, %v1693_v62  ;;  %v7927_v50 = vsel %vm11396_vm13, %v1791_v44, %v1695_v23 }
 0x196   : > { %11705 = vst [vmem:[#allocation54_spill] sm:$0xff] %v7910_v46  ;;  %11707 = vst [vmem:[#allocation56_spill] sm:$0xff] %v7923_v53  ;;  %v1851_v36 = vmax.f32 %v7465_v40, %v7927_v50  ;;  %v7932_v38 = vmul.f32 -1.442695, %v7815_v14  ;;  %v11709_v2 = vmov 7   ;;  %v7941_v58 = vsel %vm1268_vm0, 5, %v6596_v6 }
 0x197   : > { %11706 = vst [vmem:[#allocation55_spill] sm:$0xff] %v7919_v11  ;;  %11708 = vst [vmem:[#allocation57_spill] sm:$0xff] %v7927_v50  ;;  %v7937_v59 = vsel %vm1268_vm0, 6, %v11709_v2  ;;  %v1849_v35 = vmax.f32 %v7471_v25, %v7923_v53  ;;  %v1850_v23 = vmax.f32 %v7467_v30, %v7919_v11  ;;  %6412 = vrcp.f32 %v861_v49 }
 0x198   : > { %v859_v29 = vadd.f32 1.0, %v7699_v39  ;;  %v1879_v28 = vmax.f32 %v1851_v36, %v7923_v53  ;;  %6414 = vrcp.f32 %v843_v45  ;;  %v11710_v51 = vrot.slane %v7580_v5, 7 }
 0x199   : > { %v846_v17 = vadd.f32 1.0, %v7719_v61  ;;  %v7959_v21 = vmax.f32 %v1848_v19, %v7467_v30  ;;  %v1878_v62 = vmax.f32 %v1850_v23, %v7761_v63  ;;  %v862_v44 = vadd.f32 1.0, %v7728_v13 }
 0x19a   : > { %v7955_v32 = vsel %vm1219_vm1, %v11710_v51, %v11370_v33  ;;  %6416 = vrcp.f32 %v859_v29  ;;  %v1907_v1 = vmax.f32 %v1879_v28, %v7471_v25  ;;  %v1833_v5 = vmax.f32 %v7419_v37, %v7855_v20  ;;  %v11714_v28 = vld [vmem:[#allocation42_spill] sm:$0xff] }
 0x19b   : > { %6418 = vrcp.f32 %v846_v17  ;;  %v11369_v24 = vrot.slane %v7900_v42, 2  ;;  %v1906_v61 = vmax.f32 %v1878_v62, %v7306_v56  ;;  %v7970_v49 = vmax.f32 %v1849_v35, %v7465_v40  ;;  %v645_v17 = vpop.f32.mrf.mxu1 }
 0x19c   : > { %v11368_v45 = vrot.slane %v7910_v46, 2  ;;  %v11371_v6 = vrot.slane %v7900_v42, 1  ;;  %v11375_v19 = vrot.slane %v7900_v42, 7  ;;  %v7976_v36 = vmax.f32 %v1907_v1, %v7159_v16 }
 0x19d   : > { %v7979_v13 = vmax.f32 %v1833_v5, %v7394_v7  ;;  %v11383_v2 = vrot.slane %v7900_v42, 6  ;;  %v7983_v23 = vmax.f32 %v1906_v61, %v7155_v10  ;;  %v11372_v29 = vrot.slane %v7910_v46, 1  ;;  %v11738_v7 = vld [vmem:[#allocation23_spill] sm:$0xff] }
 0x19e   : > { %11711 = vst [vmem:[#allocation58_spill] sm:$0xff] %v7976_v36  ;;  %v2158_v35 = vsel %vm1121_vm2, %v11368_v45, %v11369_v24  ;;  %6420 = vrcp.f32 %v862_v44  ;;  %v11373_v62 = vrot.slane %v7976_v36, 2  ;;  %v11376_v33 = vrot.slane %v7910_v46, 7 }
 0x19f   : > { %11712 = vst [vmem:[#allocation59_spill] sm:$0xff] %v7983_v23  ;;  %v11374_v61 = vrot.slane %v7983_v23, 2  ;;  %v2170_v24 = vmax.f32 %v7910_v46, %v2158_v35  ;;  %v2286_v44 = vsel %vm1170_vm3, %v11372_v29, %v11371_v6  ;;  %v11384_v1 = vrot.slane %v7910_v46, 6  ;;  %v11715_v6 = vld [vmem:[#allocation35_spill] sm:$0xff] }
 0x1a0   : > { %v11390_v39 = vrot.slane %v7976_v36, 6  ;;  %6422 = vpow2.f32 %v7932_v38  ;;  %vm11448_vm15 = vcmp.eq.s32.totalorder %v11734_v26, 8  ;;  %v11739_v20 = vrot.slane %v11738_v7, 2 }
 0x1a1   : > { %v2142_v5 = vsel %vm1121_vm2, %v11374_v61, %v11373_v62  ;;  %v2202_v29 = vsel %vm1121_vm2, %v2170_v24, %v7910_v46  ;;  %v693_v62 = vmul.f32 %v11714_v28, %v645_v17  ;;  %v11719_v28 = vrot.slane %v7983_v23, 1 }
 0x1a2   : > { %v2186_v51 = vmax.f32 %v7983_v23, %v2142_v5  ;;  %v2298_v45 = vmax.f32 %v2202_v29, %v2286_v44  ;;  %v8034_v5 = vsel %vm1219_vm1, %v11376_v33, %v11375_v19  ;;  %v8048_v44 = vsel %vm1268_vm0, %v11384_v1, %v11383_v2 }
 0x1a3   : > { %11713 = vst [vmem:[#allocation60_spill] sm:$0xff] %v8048_v44  ;;  %v11385_v33 = vrot.slane %v7976_v36, 7  ;;  %v11718_v2 = vrot.slane %v7976_v36, 1  ;;  %v11741_v44 = vrot.slane %v11738_v7, 1 }
 0x1a4   : > { %v6413_v35 = vpop.eup %6412  ;;  %v8040_v24 = vsel %vm1121_vm2, %v2186_v51, %v7983_v23  ;;  %v8058_v51 = vsel %vm1170_vm3, %v2298_v45, %v2202_v29 }
 0x1a5   : > { %v6415_v19 = vpop.eup %6414  ;;  %v8054_v61 = vmul.f32 %v6413_v35, %v11715_v6  ;;  %v8069_v17 = vsel %vm1170_vm3, %v11719_v28, %v11718_v2  ;;  %v11721_v2 = vrot.slane %v7983_v23, 6 }
 0x1a6   : > { %v8061_v52 = vmul.f32 %v6415_v19, %v11717_v47  ;;  %v11720_v19 = vrot.slane %v7983_v23, 7  ;;  %v8098_v47 = vadd.f32 %v7538_v54, %v693_v62  ;;  %v11727_v54 = vrot.slane %v7604_v60, 2 }
 0x1a7   : > { %11716 = vst [vmem:[#allocation42_spill] sm:$0xff] %v8054_v61  ;;  %v6417_v15 = vpop.eup %6416  ;;  %v5574_v45 = vpack.c.bf16 %v8054_v61, %v8054_v61  ;;  %v8091_v38 = vsel %vm1268_vm0, %v11721_v2, %v11390_v39  ;;  %v11726_v2 = vld [vmem:[#allocation43_spill] sm:$0xff] }
 0x1a8   : > { %v6419_v6 = vpop.eup %6418  ;;  %v8083_v29 = vsel %vm1219_vm1, %v11720_v19, %v11385_v33  ;;  %11722 = vst [vmem:[#allocation35_spill] sm:$0xff] %v8091_v38  ;;  %v5556_v35 = vpack.c.bf16 %v8061_v52, %v8061_v52  ;;  %v11395_v28 = vrot.slane %v8061_v52, 2  ;;  %v11397_v1 = vrot.slane %v8061_v52, 1  ;;  %11723 = vst [vmem:[#allocation38_spill] sm:$0xff] %v8098_v47 }
 0x1a9   : > { %1117 = vst [vmem:[#allocation2 + $0x1e0] sm:$0xf] %v5574_v45  ;;  %v11398_v19 = vrot.slane %v8061_v52, 7  ;;  %v11399_v33 = vrot.slane %v8061_v52, 6  ;;  %v8103_v40 = vmul.f32 %v6417_v15, %v11724_v27  ;;  %v942_v39 = vmul.f32 %v6419_v6, %v11726_v2 }
 0x1aa   : > { %1099 = vst [vmem:[#allocation2 + $0xc0] sm:$0xf] %v5556_v35  ;;  %v1368_v62 = vsel %vm1121_vm2, %v11727_v54, %v11395_v28  ;;  %v11728_v45 = vrot.slane %v7604_v60, 1  ;;  %v11729_v35 = vrot.slane %v7604_v60, 7  ;;  %v11730_v54 = vrot.slane %v7604_v60, 6 }
 0x1ab   : > { %11725 = vst [vmem:[#allocation41_spill] sm:$0xff] %v8103_v40  ;;  %v6421_v15 = vpop.eup %6420  ;;  %v1392_v6 = vmax.f32 %v7604_v60, %v1368_v62  ;;  %v11732_v62 = vld [vmem:[#allocation46_spill] sm:$0xff]  ;;  %v1460_v47 = vrot.slane %v942_v39, 1  ;;  %v11733_v38 = vrot.slane %v7706_v48, 2 }
 0x1ac   : > { %v1496_v27 = vsel %vm1170_vm3, %v11728_v45, %v11397_v1  ;;  %v8127_v2 = vsel %vm1219_vm1, %v11729_v35, %v11398_v19  ;;  %v8135_v28 = vsel %vm1268_vm0, %v11730_v54, %v11399_v33  ;;  %v5572_v45 = vpack.c.bf16 %v8103_v40, %v8103_v40  ;;  %v11735_v19 = vld [vmem:[#allocation44_spill] sm:$0xff] }
 0x1ad   : > { %11731 = vst [vmem:[#allocation43_spill] sm:$0xff] %v8135_v28  ;;  %vm11472_vm13 = vcmp.eq.s32.totalorder %v11732_v62, 8  ;;  %v11412_v35 = vrot.slane %v8103_v40, 2  ;;  %v1424_v53 = vsel %vm1121_vm2, %v1392_v6, %v7604_v60  ;;  %v5559_v54 = vpack.c.bf16 %v942_v39, %v942_v39 }
 0x1ae   : > { %1115 = vst [vmem:[#allocation2 + $0x1c0] sm:$0xf] %v5572_v45  ;;  %v1332_v33 = vrot.slane %v942_v39, 2  ;;  %v1520_v12 = vmax.f32 %v1424_v53, %v1496_v27  ;;  %v8156_v9 = vmul.f32 %v6421_v15, %v11735_v19  ;;  %v11736_v6 = vrot.slane %v8103_v40, 1 }
 0x1af   : > { %v1352_v50 = vsel %vm1121_vm2, %v11733_v38, %v11412_v35  ;;  %v11737_v27 = vrot.slane %v7706_v48, 1  ;;  %1102 = vst [vmem:[#allocation2 + $0xf0] sm:$0xf] %v5559_v54  ;;  %v11740_v35 = vrot.slane %v7883_v41, 2  ;;  %v1492_v54 = vsel %vm1170_vm3, %v1460_v47, %v11741_v44  ;;  %v8192_v44 = vpop.eup %6422 }
 0x1b0   : > { %v1408_v60 = vmax.f32 %v7706_v48, %v1352_v50  ;;  %v1364_v38 = vsel %vm1121_vm2, %v1332_v33, %v11739_v20  ;;  %v1552_v50 = vsel %vm1170_vm3, %v1520_v12, %v1424_v53  ;;  %v1588_v12 = vrot.slane %v942_v39, 7 }
 0x1b1   : > { %v1480_v45 = vsel %vm1170_vm3, %v11737_v27, %v11736_v6  ;;  %v1365_v19 = vsel %vm1121_vm2, %v11740_v35, %v1332_v33  ;;  %v1396_v1 = vmax.f32 %v942_v39, %v1364_v38  ;;  %v1648_v6 = vmax.f32 %v1552_v50, %v7827_v18  ;;  %v11743_v18 = vld [vmem:[#allocation15_spill] sm:$0xff] }
 0x1b2   : > { %v1395_v15 = vmax.f32 %v7883_v41, %v1365_v19  ;;  %v1440_v20 = vsel %vm1121_vm2, %v1408_v60, %v7706_v48  ;;  %v11742_v27 = vrot.slane %v7883_v41, 1  ;;  %v1716_v19 = vrot.slane %v942_v39, 6 }
 0x1b3   : > { %v1536_v53 = vmax.f32 %v1440_v20, %v1480_v45  ;;  %v1428_v35 = vsel %vm1121_vm2, %v1396_v1, %v942_v39  ;;  %v8195_v50 = vmax.f32 %v1648_v6, %v11743_v18  ;;  %v11744_v60 = vrot.slane %v11738_v7, 7  ;;  %v11746_v39 = vld [vmem:[#allocation27_spill] sm:$0xff] }
 0x1b4   : > { %v1493_v33 = vsel %vm1170_vm3, %v11742_v27, %v1460_v47  ;;  %v1524_v57 = vmax.f32 %v1428_v35, %v1492_v54  ;;  %v11745_v47 = vrot.slane %v7883_v41, 7  ;;  %v11747_v27 = vrot.slane %v11738_v7, 6 }
 0x1b5   : > { %v8190_v38 = vmax.f32 %v1395_v15, %v1493_v33  ;;  %v1620_v28 = vsel %vm1219_vm1, %v1588_v12, %v11744_v60  ;;  %v1568_v1 = vsel %vm1170_vm3, %v1536_v53, %v1440_v20  ;;  %v11748_v6 = vrot.slane %v7883_v41, 6 }
 0x1b6   : > { %v1621_v45 = vsel %vm1219_vm1, %v11745_v47, %v1588_v12  ;;  %v1653_v15 = vmax.f32 %v11746_v39, %v1620_v28  ;;  %v1748_v54 = vsel %vm1268_vm0, %v1716_v19, %v11747_v27  ;;  %v1836_v18 = vmax.f32 %v7722_v31, %v8195_v50  ;;  %v11749_v27 = vld [vmem:[#allocation16_spill] sm:$0xff] }
 0x1b7   : > { %v1749_v33 = vsel %vm1268_vm0, %v11748_v6, %v1716_v19  ;;  %v1664_v12 = vmax.f32 %v1568_v1, %v7955_v32  ;;  %v1556_v20 = vsel %vm1170_vm3, %v1524_v57, %v1428_v35  ;;  %v5575_v28 = vpack.c.bf16 %v8156_v9, %v8156_v9 }
 0x1b8   : > { %v1652_v7 = vmax.f32 %v1556_v20, %v1621_v45  ;;  %v1685_v53 = vsel %vm11472_vm13, %v1653_v15, %v11746_v39  ;;  %v1348_v60 = vrot.slane %v8156_v9, 2  ;;  %v1476_v19 = vrot.slane %v8156_v9, 1  ;;  %v11752_v39 = vld [vmem:[#allocation22_spill] sm:$0xff] }
 0x1b9   : > { %v1864_v47 = vmax.f32 %v1836_v18, %v7848_v4  ;;  %v8230_v6 = vmax.f32 %v1664_v12, %v11749_v27  ;;  %v1781_v32 = vmax.f32 %v1685_v53, %v1748_v54  ;;  %1118 = vst [vmem:[#allocation2 + $0x1f0] sm:$0xf] %v5575_v28  ;;  %v1604_v57 = vrot.slane %v8156_v9, 7 }
 0x1ba   : > { %v8233_v35 = vmax.f32 %v1652_v7, %v1749_v33  ;;  %v11751_v45 = vrot.slane %v8054_v61, 2  ;;  %v11753_v15 = vrot.slane %v11752_v39, 2  ;;  %v11754_v18 = vrot.slane %v8054_v61, 1  ;;  %v11755_v7 = vld [vmem:[#allocation50_spill] sm:$0xff] }
 0x1bb   : > { %11750 = vst [vmem:[#allocation44_spill] sm:$0xff] %v8230_v6  ;;  %v1892_v12 = vmax.f32 %v1864_v47, %v7410_v55  ;;  %v1852_v33 = vmax.f32 %v7761_v63, %v8230_v6  ;;  %v8252_v28 = vsel %vm11448_vm15, %v1781_v32, %v1685_v53  ;;  %vm11446_vm11 = vcmp.eq.s32.totalorder %v11755_v7, 0 }
 0x1bc   : > { %v1349_v1 = vsel %vm1121_vm2, %v11751_v45, %v1348_v60  ;;  %v1380_v20 = vsel %vm1121_vm2, %v1348_v60, %v11753_v15  ;;  %v1477_v54 = vsel %vm1170_vm3, %v11754_v18, %v1476_v19  ;;  %v11756_v15 = vld [vmem:[#allocation47_spill] sm:$0xff]  ;;  %v11757_v47 = vmax.f32 %v8040_v24, %v8069_v17 }
 0x1bd   : > { %v1411_v27 = vmax.f32 %v8054_v61, %v1349_v1  ;;  %v8270_v32 = vmax.f32 %v1892_v12, %v7298_v22  ;;  %v11758_v1 = vrot.slane %v8103_v40, 7  ;;  %v11759_v60 = vrot.slane %v7706_v48, 7  ;;  %v11770_v48 = vld [vmem:[#allocation49_spill] sm:$0xff] }
 0x1be   : > { %v8267_v53 = vsel %vm1170_vm3, %v11757_v47, %v8040_v24  ;;  %v1880_v18 = vmax.f32 %v1852_v33, %v7919_v11  ;;  %v11761_v17 = vmax.f32 %v7959_v21, %v7155_v10  ;;  %v1844_v22 = vmax.f32 %v8233_v35, %v7306_v56  ;;  %v11765_v47 = vld [vmem:[#allocation51_spill] sm:$0xff] }
 0x1bf   : > { %v8278_v45 = vsel %vm1219_vm1, %v11759_v60, %v11758_v1  ;;  %v11763_v24 = vmax.f32 %v7970_v49, %v7159_v16  ;;  %vm11443_vm4 = vcmp.eq.s32.totalorder %v11765_v47, 0  ;;  %v1412_v60 = vmax.f32 %v8156_v9, %v1380_v20 }
 0x1c0   : > { %11760 = vst [vmem:[#allocation23_spill] sm:$0xff] %v8278_v45  ;;  %v8285_v63 = vmax.f32 %v11761_v17, %v8233_v35  ;;  %v8297_v33 = vmax.f32 %v1411_v27, %v1477_v54  ;;  %v1908_v1 = vmax.f32 %v1880_v18, %v7467_v30  ;;  %v11767_v11 = vrot.slane %v8054_v61, 7 }
 0x1c1   : > { %v8293_v12 = vmax.f32 %v11763_v24, %v8252_v28  ;;  %v1444_v27 = vsel %vm1121_vm2, %v1412_v60, %v8156_v9  ;;  %v11769_v18 = vrot.slane %v11752_v39, 7  ;;  %v1732_v17 = vrot.slane %v8156_v9, 6 }
 0x1c2   : > { %11762 = vst [vmem:[#allocation15_spill] sm:$0xff] %v8285_v63  ;;  %11766 = vst [vmem:[#allocation16_spill] sm:$0xff] %v8297_v33  ;;  %v1605_v45 = vsel %vm1219_vm1, %v11767_v11, %v1604_v57  ;;  %v8311_v54 = vmax.f32 %v1908_v1, %v7306_v56  ;;  %v1845_v21 = vmax.f32 %v8252_v28, %v7471_v25  ;;  %v11771_v56 = vrot.slane %v7983_v23, 2 }
 0x1c3   : > { %11764 = vst [vmem:[#allocation27_spill] sm:$0xff] %v8293_v12  ;;  %v2121_v49 = vrot.slane %v8293_v12, 2  ;;  %v2249_v24 = vrot.slane %v8293_v12, 1  ;;  %v1636_v11 = vsel %vm1219_vm1, %v1604_v57, %v11769_v18  ;;  %v11772_v60 = vrot.slane %v8285_v63, 2 }
 0x1c4   : > { %11768 = vst [vmem:[#allocation22_spill] sm:$0xff] %v8311_v54  ;;  %v11773_v18 = vrot.slane %v7983_v23, 1  ;;  %v11774_v20 = vrot.slane %v11752_v39, 1  ;;  %v11775_v40 = vrot.slane %v8285_v63, 1  ;;  %v11778_v62 = vrot.slane %v8293_v12, 7 }
 0x1c5   : > { %v2143_v1 = vsel %vm1121_vm2, %v2121_v49, %v11771_v56  ;;  %v2144_v30 = vsel %vm1121_vm2, %v11772_v60, %v2121_v49  ;;  %v11780_v56 = vrot.slane %v8293_v12, 6  ;;  %v11782_v26 = vrot.slane %v11752_v39, 6 }
 0x1c6   : > { %v2184_v57 = vmax.f32 %v8285_v63, %v2144_v30  ;;  %v2185_v9 = vmax.f32 %v8293_v12, %v2143_v1  ;;  %v2271_v25 = vsel %vm1170_vm3, %v2249_v24, %v11773_v18  ;;  %v1508_v33 = vsel %vm1170_vm3, %v1476_v19, %v11774_v20  ;;  %v11776_v1 = vld [vmem:[#allocation25_spill] sm:$0xff] }
 0x1c7   : > { %v8348_v49 = vsel %vm1170_vm3, %v11775_v40, %v2249_v24  ;;  %v1540_v30 = vmax.f32 %v1444_v27, %v1508_v33  ;;  %v1637_v60 = vmax.f32 %v11776_v1, %v1636_v11  ;;  %v11777_v18 = vrot.slane %v7983_v23, 7 }
 0x1c8   : > { %v11779_v20 = vrot.slane %v7983_v23, 6  ;;  %v11781_v33 = vrot.slane %v8054_v61, 6  ;;  %v8371_v11 = vsel %vm1121_vm2, %v2184_v57, %v8285_v63  ;;  %v844_v23 = vadd.f32 1.0, %v8192_v44 }
 0x1c9   : > { %v2399_v19 = vsel %vm1219_vm1, %v11778_v62, %v11777_v18  ;;  %v1572_v62 = vsel %vm1170_vm3, %v1540_v30, %v1444_v27  ;;  %v1669_v18 = vsel %vm11446_vm11, %v1637_v60, %v11776_v1  ;;  %v8387_v55 = vmax.f32 %v1844_v22, %v7155_v10  ;;  %v11786_v22 = vld [vmem:[#allocation45_spill] sm:$0xff] }
 0x1ca   : > { %v2527_v40 = vsel %vm1268_vm0, %v11780_v56, %v11779_v20  ;;  %v1733_v24 = vsel %vm1268_vm0, %v11781_v33, %v1732_v17  ;;  %v1764_v56 = vsel %vm1268_vm0, %v1732_v17, %v11782_v26  ;;  %v8382_v20 = vmax.f32 %v2185_v9, %v2271_v25 }
 0x1cb   : > { %v1668_v33 = vmax.f32 %v1572_v62, %v1605_v45  ;;  %v1765_v61 = vmax.f32 %v1669_v18, %v1764_v56  ;;  %v2442_v57 = vmax.f32 %v8267_v53, %v2399_v19  ;;  %v11434_v27 = vrot.slane %v8270_v32, 2  ;;  %v11798_v19 = vld [vmem:[#allocation30_spill] sm:$0xff] }
 0x1cc   : > { %v11783_v30 = vrot.slane %v8311_v54, 2  ;;  %v11784_v39 = vrot.slane %v7976_v36, 2  ;;  %6424 = vrcp.f32 %v844_v23  ;;  %v11788_v9 = vmax.f32 %v7979_v13, %v7085_v43 }
 0x1cd   : > { %v8398_v25 = vmax.f32 %v1668_v33, %v1733_v24  ;;  %v1797_v44 = vsel %vm11443_vm4, %v1765_v61, %v1669_v18  ;;  %v11790_v60 = vrot.slane %v7900_v42, 2  ;;  %v11791_v13 = vrot.slane %v8311_v54, 1 }
 0x1ce   : > { %v8396_v26 = vsel %vm1121_vm2, %v11784_v39, %v11783_v30  ;;  %v1829_v53 = vmax.f32 %v1797_v44, %v7419_v37  ;;  %v8406_v17 = vmax.f32 %v11786_v22, %v1797_v44  ;;  %v8411_v1 = vmax.f32 %v11788_v9, %v1797_v44 }
 0x1cf   : > { %11785 = vst [vmem:[#allocation47_spill] sm:$0xff] %v8398_v25  ;;  %v8419_v23 = vsel %vm1121_vm2, %v11790_v60, %v11434_v27  ;;  %v11792_v62 = vrot.slane %v7976_v36, 1  ;;  %v8433_v56 = vmax.f32 %v2442_v57, %v2527_v40  ;;  %v8443_v9 = vmax.f32 %v1845_v21, %v7159_v16 }
 0x1d0   : > { %11787 = vst [vmem:[#allocation49_spill] sm:$0xff] %v8406_v17  ;;  %11789 = vst [vmem:[#allocation25_spill] sm:$0xff] %v8411_v1  ;;  %v8436_v33 = vmax.f32 %v1829_v53, %v7085_v43  ;;  %v2103_v30 = vrot.slane %v8406_v17, 2  ;;  %v2105_v39 = vrot.slane %v8411_v1, 2  ;;  %v2231_v44 = vrot.slane %v8406_v17, 1 }
 0x1d1   : > { %v2269_v18 = vsel %vm1170_vm3, %v11792_v62, %v11791_v13  ;;  %11793 = vst [vmem:[#allocation45_spill] sm:$0xff] %v8433_v56  ;;  %v2233_v22 = vrot.slane %v8411_v1, 1  ;;  %v11795_v13 = vrot.slane %v7910_v46, 2  ;;  %v11796_v43 = vrot.slane %v7779_v34, 2 }
 0x1d2   : > { %11794 = vst [vmem:[#allocation61_spill] sm:$0xff] %v8436_v33  ;;  %v2361_v21 = vrot.slane %v8411_v1, 7  ;;  %v11799_v27 = vrot.slane %v11798_v19, 2  ;;  %v11801_v60 = vrot.slane %v7779_v34, 1  ;;  %v11444_v6 = vrot.slane %v8436_v33, 7 }
 0x1d3   : > { %v2159_v40 = vsel %vm1121_vm2, %v2105_v39, %v11795_v13  ;;  %v2160_v57 = vsel %vm1121_vm2, %v11796_v43, %v2105_v39  ;;  %v11797_v53 = vmov %v11796_v43  ;;  %v11800_v43 = vrot.slane %v7910_v46, 1 }
 0x1d4   : > { %v2161_v62 = vsel %vm1121_vm2, %v2103_v30, %v11797_v53  ;;  %v2162_v61 = vsel %vm1121_vm2, %v11799_v27, %v2103_v30  ;;  %v2168_v13 = vmax.f32 %v7779_v34, %v2160_v57  ;;  %v2169_v45 = vmax.f32 %v8411_v1, %v2159_v40 }
 0x1d5   : > { %v2167_v24 = vmax.f32 %v8406_v17, %v2161_v62  ;;  %v2166_v39 = vmax.f32 %v11798_v19, %v2162_v61  ;;  %v2287_v53 = vsel %vm1170_vm3, %v2233_v22, %v11800_v43  ;;  %v2288_v47 = vsel %vm1170_vm3, %v11801_v60, %v2233_v22 }
 0x1d6   : > { %v2359_v27 = vrot.slane %v8406_v17, 7  ;;  %v2200_v30 = vsel %vm1121_vm2, %v2168_v13, %v7779_v34  ;;  %v11802_v40 = vmov %v11801_v60  ;;  %v11803_v57 = vrot.slane %v11798_v19, 1 }
 0x1d7   : > { %v2289_v61 = vsel %vm1170_vm3, %v2231_v44, %v11802_v40  ;;  %v2487_v43 = vrot.slane %v8406_v17, 6  ;;  %v2198_v22 = vsel %vm1121_vm2, %v2166_v39, %v11798_v19  ;;  %v2296_v7 = vmax.f32 %v2200_v30, %v2288_v47 }
 0x1d8   : > { %v2290_v62 = vsel %vm1170_vm3, %v11803_v57, %v2231_v44  ;;  %v8491_v60 = vmax.f32 %v2167_v24, %v2289_v61  ;;  %v2297_v13 = vmax.f32 %v2169_v45, %v2287_v53  ;;  %v11805_v40 = vrot.slane %v7910_v46, 7 }
 0x1d9   : > { %v2294_v25 = vmax.f32 %v2198_v22, %v2290_v62  ;;  %v11806_v44 = vrot.slane %v7779_v34, 7  ;;  %v2328_v39 = vsel %vm1170_vm3, %v2296_v7, %v2200_v30  ;;  %v11808_v45 = vrot.slane %v11798_v19, 7 }
 0x1da   : > { %11804 = vst [vmem:[#allocation62_spill] sm:$0xff] %v8491_v60  ;;  %v2415_v54 = vsel %vm1219_vm1, %v2361_v21, %v11805_v40  ;;  %vm1250_vm4 = vcmp.eq.s32.totalorder %v7805_v0, 7  ;;  %vm1299_vm11 = vcmp.eq.s32.totalorder %v7937_v59, 7  ;;  %vm1297_vm15 = vcmp.eq.s32.totalorder %v7941_v58, 6 }
 0x1db   : > { %v2416_v57 = vsel %vm1219_vm1, %v11806_v44, %v2361_v21  ;;  %v11807_v24 = vmov %v11806_v44  ;;  %v8512_v53 = vsel %vm1219_vm1, %v11808_v45, %v2359_v27  ;;  %v2326_v62 = vsel %vm1170_vm3, %v2294_v25, %v2198_v22  ;;  %v6425_v44 = vpop.eup %6424 }
 0x1dc   : > { %v2417_v47 = vsel %vm1219_vm1, %v2359_v27, %v11807_v24  ;;  %11809 = vst [vmem:[#allocation63_spill] sm:$0xff] %v8512_v53  ;;  %v2425_v61 = vmax.f32 %v2297_v13, %v2416_v57  ;;  %v11810_v21 = vmov %v11808_v45  ;;  %v2426_v57 = vmax.f32 %v8058_v51, %v2415_v54 }
 0x1dd   : > { %v2419_v7 = vsel %vm1219_vm1, %v11444_v6, %v11810_v21  ;;  %v2424_v40 = vmax.f32 %v2328_v39, %v2417_v47  ;;  %v11447_v22 = vrot.slane %v8436_v33, 6  ;;  %v2489_v45 = vrot.slane %v8411_v1, 6 }
 0x1de   : > { %v2422_v27 = vmax.f32 %v2326_v62, %v2419_v7  ;;  %v8528_v25 = vsel %vm11445_vm9, %v2425_v61, %v2297_v13  ;;  %v11812_v21 = vrot.slane %v7779_v34, 6  ;;  %v11813_v39 = vrot.slane %v11798_v19, 6 }
 0x1df   : > { %v940_v51 = vmul.f32 %v6425_v44, %v7815_v14  ;;  %vm1248_vm9 = vcmp.eq.s32.totalorder %v7915_v8, 6  ;;  %v11817_v62 = vrot.slane %v8270_v32, 1  ;;  %v11819_v7 = vmax.f32 %v7976_v36, %v8396_v26 }
 0x1e0   : > { %v2545_v6 = vsel %vm1268_vm0, %v2487_v43, %v11812_v21  ;;  %v8540_v47 = vsel %vm1268_vm0, %v11813_v39, %v2487_v43  ;;  %v11815_v54 = vmov %v11813_v39  ;;  %v11818_v43 = vrot.slane %v7900_v42, 1 }
 0x1e1   : > { %11814 = vst [vmem:[#allocation64_spill] sm:$0xff] %v8540_v47  ;;  %v2547_v13 = vsel %vm1268_vm0, %v11447_v22, %v11815_v54  ;;  %v8549_v61 = vmax.f32 %v2424_v40, %v2545_v6  ;;  %v2315_v44 = vmax.f32 %v11819_v7, %v2269_v18  ;;  %v11820_v21 = vrot.slane %v7910_v46, 6 }
 0x1e2   : > { %v2285_v14 = vsel %vm1170_vm3, %v11818_v43, %v11817_v62  ;;  %v11821_v40 = vrot.slane %v7779_v34, 6  ;;  %v8572_v54 = vmax.f32 %v2422_v27, %v2547_v13  ;;  %v5557_v22 = vpack.c.bf16 %v940_v51, %v940_v51  ;;  %v6179_v34 = vld [vmem:[%s11261_s4 + $0x28] sm:$0xff]  }
 0x1e3   : > { %11816 = vst [vmem:[#allocation65_spill] sm:$0xff] %v8549_v61  ;;  %v2543_v6 = vsel %vm1268_vm0, %v2489_v45, %v11820_v21  ;;  %v1330_v26 = vrot.slane %v940_v51, 2  ;;  %v1458_v18 = vrot.slane %v940_v51, 1  ;;  %v1586_v21 = vrot.slane %v940_v51, 7 }
 0x1e4   : > { %v8570_v39 = vsel %vm1268_vm0, %v11821_v40, %v2489_v45  ;;  %11822 = vst [vmem:[#allocation66_spill] sm:$0xff] %v8572_v54  ;;  %v8576_v43 = vmax.f32 %v2426_v57, %v2543_v6  ;;  %1100 = vst [vmem:[#allocation2 + $0xd0] sm:$0xf] %v5557_v22  ;;  %v1714_v30 = vrot.slane %v940_v51, 6  ;;  %v11824_v45 = vmax.f32 %v7900_v42, %v8419_v23 }
 0x1e5   : > { %v11825_v13 = vrot.slane %v7883_v41, 2  ;;  %v11826_v57 = vrot.slane %v8061_v52, 2  ;;  %v11827_v22 = vrot.slane %v7883_v41, 1  ;;  %v11828_v62 = vrot.slane %v8061_v52, 1 }
 0x1e6   : > { %11823 = vst [vmem:[#allocation67_spill] sm:$0xff] %v8576_v43  ;;  %v2299_v27 = vmax.f32 %v11824_v45, %v2285_v14  ;;  %v11831_v54 = vrot.slane %v7883_v41, 6  ;;  %v11854_v19 = vrot.slane %v8270_v32, 1  ;;  %v6598_v58 = vmov 14  }
 0x1e7   : > { %v1366_v40 = vsel %vm1121_vm2, %v1330_v26, %v11825_v13  ;;  %v1367_v6 = vsel %vm1121_vm2, %v11826_v57, %v1330_v26  ;;  %v1494_v7 = vsel %vm1170_vm3, %v1458_v18, %v11827_v22  ;;  %v1495_v23 = vsel %vm1170_vm3, %v11828_v62, %v1458_v18 }
 0x1e8   : > { %v1393_v14 = vmax.f32 %v8061_v52, %v1367_v6  ;;  %v1394_v45 = vmax.f32 %v940_v51, %v1366_v40  ;;  %v11829_v13 = vrot.slane %v7883_v41, 7  ;;  %v11830_v26 = vrot.slane %v8061_v52, 7 }
 0x1e9   : > { %v1750_v62 = vsel %vm1268_vm0, %v1714_v30, %v11831_v54  ;;  %v11832_v18 = vrot.slane %v8061_v52, 6  ;;  %v11451_v6 = vrot.slane %v8270_v32, 7  ;;  %v11833_v52 = vrot.slane %v7900_v42, 7 }
 0x1ea   : > { %v1622_v24 = vsel %vm1219_vm1, %v1586_v21, %v11829_v13  ;;  %v1623_v57 = vsel %vm1219_vm1, %v11830_v26, %v1586_v21  ;;  %v1426_v13 = vsel %vm1121_vm2, %v1394_v45, %v940_v51  ;;  %v1521_v47 = vmax.f32 %v1393_v14, %v1495_v23 }
 0x1eb   : > { %v1651_v22 = vmax.f32 %v8190_v38, %v1622_v24  ;;  %v1751_v40 = vsel %vm1268_vm0, %v11832_v18, %v1714_v30  ;;  %v11453_v21 = vrot.slane %v8285_v63, 7  ;;  %v2427_v24 = vmax.f32 %v2299_v27, %v8034_v5 }
 0x1ec   : > { %v1522_v26 = vmax.f32 %v1426_v13, %v1494_v7  ;;  %v8631_v30 = vsel %vm1219_vm1, %v11833_v52, %v11451_v6  ;;  %v2443_v51 = vmax.f32 %v2315_v44, %v8083_v29  ;;  %v1649_v54 = vmax.f32 %v1521_v47, %v8127_v2 }
 0x1ed   : > { %v1683_v41 = vsel %vm1250_vm4, %v1651_v22, %v8190_v38  ;;  %v11834_v5 = vrot.slane %v8293_v12, 7  ;;  %v8643_v14 = vsel %vm1242_vm8, %v2427_v24, %v2299_v27  ;;  %v11837_v27 = vmax.f32 %v8371_v11, %v8348_v49  ;;  %v11838_v24 = vld [vmem:[#allocation43_spill] sm:$0xff]  ;;  %v11841_v49 = vld [vmem:[#allocation12_spill] sm:$0xff] }
 0x1ee   : > { %v1779_v23 = vmax.f32 %v1683_v41, %v1750_v62  ;;  %v1554_v45 = vsel %vm1170_vm3, %v1522_v26, %v1426_v13  ;;  %v8650_v2 = vsel %vm11450_vm12, %v2443_v51, %v2315_v44  ;;  %v11452_v62 = vrot.slane %v8270_v32, 6  ;;  %v11839_v26 = vld [vmem:[#allocation20_spill] sm:$0xff] }
 0x1ef   : > { %v2400_v38 = vsel %vm1219_vm1, %v11453_v21, %v11834_v5  ;;  %v1650_v18 = vmax.f32 %v1554_v45, %v1623_v57  ;;  %v1681_v52 = vsel %vm1248_vm9, %v1649_v54, %v1521_v47  ;;  %v8663_v13 = vsel %vm1170_vm3, %v11837_v27, %v8371_v11 }
 0x1f0   : > { %v2441_v22 = vmax.f32 %v8382_v20, %v2400_v38  ;;  %v1811_v5 = vsel %vm1299_vm11, %v1779_v23, %v1683_v41  ;;  %v1777_v44 = vmax.f32 %v1681_v52, %v11838_v24  ;;  %v11840_v41 = vmax.f32 %v11770_v48, %v8252_v28 }
 0x1f1   : > { %v1839_v51 = vmax.f32 %v11839_v26, %v1811_v5  ;;  %v1843_v57 = vmax.f32 %v1811_v5, %v7159_v16  ;;  %v1901_v38 = vmax.f32 %v8443_v9, %v1811_v5  ;;  %v1778_v47 = vmax.f32 %v1650_v18, %v1751_v40  ;;  %v11844_v40 = vld [vmem:[#allocation60_spill] sm:$0xff] }
 0x1f2   : > { %v8672_v54 = vmax.f32 %v11840_v41, %v1811_v5  ;;  %vm11842_vm12 = vcmp.eq.s32.totalorder %v11841_v49, 10  ;;  %v1809_v45 = vsel %vm1297_vm15, %v1777_v44, %v1681_v52  ;;  %v11843_v9 = vrot.slane %v7900_v42, 6 }
 0x1f3   : > { %v8677_v23 = vsel %vm11842_vm12, %v2441_v22, %v8382_v20  ;;  %v1871_v16 = vmax.f32 %v1843_v57, %v8252_v28  ;;  %v11845_v20 = vld [vmem:[#allocation52_spill] sm:$0xff]  ;;  %v1838_v27 = vmax.f32 %v7848_v4, %v1778_v47  ;;  %v1841_v24 = vmax.f32 %v1809_v45, %v8252_v28 }
 0x1f4   : > { %v8689_v48 = vsel %vm1268_vm0, %v11843_v9, %v11452_v62  ;;  %v1837_v22 = vmax.f32 %v11845_v20, %v1809_v45  ;;  %v1842_v52 = vmax.f32 %v1778_v47, %v7155_v10  ;;  %v1867_v44 = vmax.f32 %v1839_v51, %v1809_v45 }
 0x1f5   : > { %v11846_v57 = vmax.f32 %v8195_v50, %v8233_v35  ;;  %v1899_v6 = vmax.f32 %v1871_v16, %v1809_v45  ;;  %v1900_v9 = vmax.f32 %v8387_v55, %v1778_v47  ;;  %v1866_v18 = vmax.f32 %v1838_v27, %v8195_v50  ;;  %v11847_v16 = vld [vmem:[#allocation28_spill] sm:$0xff] }
 0x1f6   : > { %v1865_v62 = vmax.f32 %v1837_v22, %v11839_v26  ;;  %v1869_v21 = vmax.f32 %v1841_v24, %v1811_v5  ;;  %v1870_v11 = vmax.f32 %v1842_v52, %v8233_v35  ;;  %v1895_v29 = vmax.f32 %v1867_v44, %v11845_v20 }
 0x1f7   : > { %v1868_v41 = vmax.f32 %v11846_v57, %v1778_v47  ;;  %v8707_v10 = vmax.f32 %v1899_v6, %v11839_v26  ;;  %v8710_v51 = vmax.f32 %v1900_v9, %v8195_v50  ;;  %v1894_v55 = vmax.f32 %v1866_v18, %v7722_v31  ;;  %v11849_v18 = vld [vmem:[#allocation29_spill] sm:$0xff] }
 0x1f8   : > { %v1893_v57 = vmax.f32 %v1865_v62, %v11847_v16  ;;  %v1897_v22 = vmax.f32 %v1869_v21, %v11839_v26  ;;  %v1898_v5 = vmax.f32 %v1870_v11, %v8195_v50  ;;  %v8717_v27 = vmax.f32 %v1895_v29, %v11847_v16 }
 0x1f9   : > { %v1896_v28 = vmax.f32 %v1868_v41, %v7848_v4  ;;  %v8722_v52 = vmax.f32 %v1901_v38, %v1809_v45  ;;  %v11848_v6 = vmax.f32 %v11756_v15, %v8233_v35  ;;  %v8733_v21 = vmax.f32 %v1894_v55, %v11849_v18 }
 0x1fa   : > { %v8730_v62 = vmax.f32 %v1893_v57, %v7419_v37  ;;  %v8736_v50 = vmax.f32 %v1897_v22, %v11845_v20  ;;  %v8739_v29 = vmax.f32 %v1898_v5, %v7848_v4  ;;  %v2115_v35 = vrot.slane %v8707_v10, 2 }
 0x1fb   : > { %v8720_v24 = vmax.f32 %v1896_v28, %v7722_v31  ;;  %v8727_v44 = vmax.f32 %v11848_v6, %v1778_v47  ;;  %v2111_v31 = vrot.slane %v8717_v27, 2  ;;  %v2116_v15 = vrot.slane %v8710_v51, 2 }
 0x1fc   : > { %v2109_v37 = vrot.slane %v8730_v62, 2  ;;  %v2110_v38 = vrot.slane %v8733_v21, 2  ;;  %v2113_v47 = vrot.slane %v8736_v50, 2  ;;  %v2114_v11 = vrot.slane %v8739_v29, 2 }
 0x1fd   : > { %v2112_v26 = vrot.slane %v8720_v24, 2  ;;  %v2117_v45 = vrot.slane %v8722_v52, 2  ;;  %v2118_v4 = vrot.slane %v8727_v44, 2  ;;  %v2119_v20 = vrot.slane %v8672_v54, 2 }
 0x1fe   : > { %v8754_v41 = vsel %vm1121_vm2, %v2115_v35, %v2116_v15  ;;  %v2150_v9 = vsel %vm1121_vm2, %v2114_v11, %v2115_v35  ;;  %v8760_v28 = vsel %vm1121_vm2, %v2113_v47, %v2114_v11  ;;  %v11850_v55 = vrot.slane %v8285_v63, 2 }
 0x1ff   : > { %v2152_v16 = vsel %vm1121_vm2, %v2112_v26, %v2113_v47  ;;  %v8766_v57 = vsel %vm1121_vm2, %v2111_v31, %v2112_v26  ;;  %v2146_v5 = vsel %vm1121_vm2, %v2118_v4, %v2119_v20  ;;  %v8778_v6 = vsel %vm1121_vm2, %v2117_v45, %v2118_v4  ;;  %v6174_v26 = vld [vmem:[%s11261_s4 + $0x78] sm:$0xff]  }
 0x200   : > { %v8772_v22 = vsel %vm1121_vm2, %v2119_v20, %v11850_v55  ;;  %v2148_v18 = vsel %vm1121_vm2, %v2116_v15, %v2117_v45  ;;  %v2154_v35 = vsel %vm1121_vm2, %v2110_v38, %v2111_v31  ;;  %v2155_v47 = vsel %vm1121_vm2, %v2109_v37, %v2110_v38  ;;  %v6175_v15 = vld [vmem:[%s11261_s4 + $0x38] sm:$0xff]   ;;  %5823 = vmatprep.subr.bf16.mxu1 %v6174_v26 }
 0x201   : > { %v11851_v11 = vrot.slane %v8270_v32, 2  ;;  %v2175_v4 = vmax.f32 %v8717_v27, %v8766_v57  ;;  %v2173_v55 = vmax.f32 %v8730_v62, %v2155_v47  ;;  %v2174_v31 = vmax.f32 %v8733_v21, %v2154_v35  ;;  %5824 = vmatpush3.bf16.msra.mxu1 %v6175_v15  ;;  %v6177_v35 = vld [vmem:[%s11261_s4 + $0x30] sm:$0xff]  }
 0x202   : > { %v2176_v38 = vmax.f32 %v8720_v24, %v2152_v16  ;;  %v2177_v49 = vmax.f32 %v8736_v50, %v8760_v28  ;;  %v2180_v57 = vmax.f32 %v8710_v51, %v2148_v18  ;;  %v11853_v7 = vrot.slane %v8285_v63, 6  ;;  %v6176_v18 = vld [vmem:[%s11261_s4 + $0x70] sm:$0xff]  }
 0x203   : > { %v2156_v20 = vsel %vm1121_vm2, %v11851_v11, %v2109_v37  ;;  %v2178_v37 = vmax.f32 %v8739_v29, %v2150_v9  ;;  %v11852_v11 = vrot.slane %v8293_v12, 6  ;;  %v2179_v16 = vmax.f32 %v8707_v10, %v8754_v41  ;;  %5825 = vmatprep.subr.bf16.mxu1 %v6176_v18  ;;  %v6178_v18 = vld [vmem:[%s11261_s4 + $0x68] sm:$0xff]  }
 0x204   : > { %v2172_v45 = vmax.f32 %v8270_v32, %v2156_v20  ;;  %v2181_v26 = vmax.f32 %v8722_v52, %v8778_v6  ;;  %v2182_v28 = vmax.f32 %v8727_v44, %v2146_v5  ;;  %v2206_v41 = vsel %vm1121_vm2, %v2174_v31, %v8733_v21 }
 0x205   : > { %v8812_v20 = vsel %vm1268_vm0, %v11853_v7, %v11852_v11  ;;  %v2183_v7 = vmax.f32 %v8672_v54, %v8772_v22  ;;  %v2208_v6 = vsel %vm1121_vm2, %v2176_v38, %v8720_v24  ;;  %v2210_v5 = vsel %vm1121_vm2, %v2178_v37, %v8739_v29  ;;  %5826 = vmatpush3.bf16.msra.mxu1 %v6177_v35 }
 0x206   : > { %v2204_v9 = vsel %vm1121_vm2, %v2172_v45, %v8270_v32  ;;  %v2212_v22 = vsel %vm1121_vm2, %v2180_v57, %v8710_v51  ;;  %v2237_v47 = vrot.slane %v8730_v62, 1  ;;  %v2238_v15 = vrot.slane %v8733_v21, 1  ;;  %5827 = vmatprep.subr.bf16.mxu1 %v6178_v18 }
 0x207   : > { %v2239_v45 = vrot.slane %v8717_v27, 1  ;;  %v2240_v31 = vrot.slane %v8720_v24, 1  ;;  %v2241_v38 = vrot.slane %v8736_v50, 1  ;;  %v2242_v37 = vrot.slane %v8739_v29, 1 }
 0x208   : > { %v2243_v11 = vrot.slane %v8707_v10, 1  ;;  %v2244_v12 = vrot.slane %v8710_v51, 1  ;;  %v2245_v57 = vrot.slane %v8722_v52, 1  ;;  %v2246_v53 = vrot.slane %v8727_v44, 1 }
 0x209   : > { %v2247_v60 = vrot.slane %v8672_v54, 1  ;;  %v2214_v42 = vsel %vm1121_vm2, %v2182_v28, %v8727_v44  ;;  %v2279_v46 = vsel %vm1170_vm3, %v2241_v38, %v2242_v37  ;;  %v2280_v35 = vsel %vm1170_vm3, %v2240_v31, %v2241_v38  ;;  %5828 = vmatpush3.bf16.msra.mxu1 %v6179_v34  ;;  %v6181_v34 = vld [vmem:[%s11261_s4 + $0x20] sm:$0xff]  }
 0x20a   : > { %v2281_v1 = vsel %vm1170_vm3, %v2239_v45, %v2240_v31  ;;  %v2275_v17 = vsel %vm1170_vm3, %v2245_v57, %v2246_v53  ;;  %v2276_v28 = vsel %vm1170_vm3, %v2244_v12, %v2245_v57  ;;  %v2278_v61 = vsel %vm1170_vm3, %v2242_v37, %v2243_v11 }
 0x20b   : > { %v2274_v36 = vsel %vm1170_vm3, %v2246_v53, %v2247_v60  ;;  %v2277_v31 = vsel %vm1170_vm3, %v2243_v11, %v2244_v12  ;;  %v2282_v38 = vsel %vm1170_vm3, %v2238_v15, %v2239_v45  ;;  %v2283_v33 = vsel %vm1170_vm3, %v2237_v47, %v2238_v15  ;;  %v6180_v12 = vld [vmem:[%s11261_s4 + $0x60] sm:$0xff]  }
 0x20c   : > { %v2284_v53 = vsel %vm1170_vm3, %v11854_v19, %v2237_v47  ;;  %v8886_v56 = vmax.f32 %v2173_v55, %v2283_v33  ;;  %v2302_v37 = vmax.f32 %v2206_v41, %v2282_v38  ;;  %v8888_v18 = vmax.f32 %v2175_v4, %v2281_v1  ;;  %5829 = vmatprep.subr.bf16.mxu1 %v6180_v12 }
 0x20d   : > { %v2300_v57 = vmax.f32 %v2204_v9, %v2284_v53  ;;  %v2304_v45 = vmax.f32 %v2208_v6, %v2280_v35  ;;  %v8893_v11 = vmax.f32 %v2177_v49, %v2279_v46  ;;  %v2306_v15 = vmax.f32 %v2210_v5, %v2278_v61  ;;  %5830 = vmatpush3.bf16.msra.mxu1 %v6181_v34 }
 0x20e   : > { %v8895_v43 = vmax.f32 %v2179_v16, %v2277_v31  ;;  %v11855_v19 = vrot.slane %v8285_v63, 1  ;;  %v2308_v33 = vmax.f32 %v2212_v22, %v2276_v28  ;;  %v2309_v4 = vmax.f32 %v2181_v26, %v2275_v17  ;;  %v6182_v26 = vld [vmem:[%s11261_s4 + $0x58] sm:$0xff]  }
 0x20f   : > { %v2310_v55 = vmax.f32 %v2214_v42, %v2274_v36  ;;  %v8908_v46 = vsel %vm1170_vm3, %v2300_v57, %v2204_v9  ;;  %v8912_v61 = vsel %vm1170_vm3, %v2302_v37, %v2206_v41  ;;  %v8916_v49 = vsel %vm1170_vm3, %v2304_v45, %v2208_v6  ;;  %5831 = vmatprep.subr.bf16.mxu1 %v6182_v26 }
 0x210   : > { %v2273_v1 = vsel %vm1170_vm3, %v2247_v60, %v11855_v19  ;;  %v8920_v17 = vsel %vm1170_vm3, %v2306_v15, %v2210_v5  ;;  %v8924_v36 = vsel %vm1170_vm3, %v2308_v33, %v2212_v22  ;;  %v2365_v60 = vrot.slane %v8730_v62, 7  ;;  %v6183_v5 = vld [vmem:[%s11261_s4 + $0x18] sm:$0xff]   ;;  %v6184_v19 = vld [vmem:[%s11261_s4 + $0x50] sm:$0xff]  }
 0x211   : > { %v8904_v47 = vmax.f32 %v2183_v7, %v2273_v1  ;;  %v2366_v16 = vrot.slane %v8733_v21, 7  ;;  %v2367_v9 = vrot.slane %v8717_v27, 7  ;;  %v2368_v7 = vrot.slane %v8720_v24, 7  ;;  %5832 = vmatpush3.bf16.msra.mxu1 %v6183_v5 }
 0x212   : > { %v2369_v41 = vrot.slane %v8736_v50, 7  ;;  %v2370_v6 = vrot.slane %v8739_v29, 7  ;;  %v2371_v22 = vrot.slane %v8707_v10, 7  ;;  %v2372_v35 = vrot.slane %v8710_v51, 7  ;;  %5833 = vmatprep.subr.bf16.mxu1 %v6184_v19  ;;  %v6186_v19 = vld [vmem:[%s11261_s4 + $0x48] sm:$0xff]  }
 0x213   : > { %v2373_v28 = vrot.slane %v8722_v52, 7  ;;  %v2374_v31 = vrot.slane %v8727_v44, 7  ;;  %v2375_v38 = vrot.slane %v8672_v54, 7  ;;  %v8951_v37 = vsel %vm1219_vm1, %v2367_v9, %v2368_v7 }
 0x214   : > { %v8945_v53 = vsel %vm1219_vm1, %v2369_v41, %v2370_v6  ;;  %v2408_v57 = vsel %vm1219_vm1, %v2368_v7, %v2369_v41  ;;  %v8955_v12 = vsel %vm1170_vm3, %v2310_v55, %v2214_v42  ;;  %v8965_v34 = vsel %vm1219_vm1, %v2371_v22, %v2372_v35  ;;  %v6185_v7 = vld [vmem:[%s11261_s4 + $0x10] sm:$0xff]  }
 0x215   : > { %v8959_v45 = vsel %vm1219_vm1, %v2373_v28, %v2374_v31  ;;  %v2404_v15 = vsel %vm1219_vm1, %v2372_v35, %v2373_v28  ;;  %v11856_v1 = vrot.slane %v8285_v63, 7  ;;  %v2406_v33 = vsel %vm1219_vm1, %v2370_v6, %v2371_v22  ;;  %5834 = vmatpush3.bf16.msra.mxu1 %v6185_v7 }
 0x216   : > { %v2410_v55 = vsel %vm1219_vm1, %v2366_v16, %v2367_v9  ;;  %v2411_v26 = vsel %vm1219_vm1, %v2365_v60, %v2366_v16  ;;  %v11857_v41 = vrot.slane %v8270_v32, 7  ;;  %v2428_v35 = vmax.f32 %v8908_v46, %v8631_v30  ;;  %5835 = vmatprep.subr.bf16.mxu1 %v6186_v19 }
 0x217   : > { %v8974_v42 = vsel %vm1219_vm1, %v2375_v38, %v11856_v1  ;;  %v2430_v6 = vmax.f32 %v8912_v61, %v2411_v26  ;;  %v2431_v22 = vmax.f32 %v8888_v18, %v2410_v55  ;;  %v2432_v16 = vmax.f32 %v8916_v49, %v8951_v37 }
 0x218   : > { %v2412_v5 = vsel %vm1219_vm1, %v11857_v41, %v2365_v60  ;;  %v2433_v28 = vmax.f32 %v8893_v11, %v2408_v57  ;;  %v2434_v1 = vmax.f32 %v8920_v17, %v8945_v53  ;;  %v2402_v60 = vsel %vm1219_vm1, %v2374_v31, %v2375_v38  ;;  %v11859_v31 = vld [vmem:[#allocation4_spill] sm:$0xff] }
 0x219   : > { %v2429_v9 = vmax.f32 %v8886_v56, %v2412_v5  ;;  %v2435_v30 = vmax.f32 %v8895_v43, %v2406_v33  ;;  %v2436_v46 = vmax.f32 %v8924_v36, %v8965_v34  ;;  %v2437_v61 = vmax.f32 %v2309_v4, %v2404_v15  ;;  %v6187_v36 = vld [vmem:[%s11261_s4 + $0x8] sm:$0xff]  }
 0x21a   : > { %v2438_v49 = vmax.f32 %v8955_v12, %v8959_v45  ;;  %v2439_v57 = vmax.f32 %v8904_v47, %v2402_v60  ;;  %vm11860_vm12 = vcmp.eq.s32.totalorder %v11859_v31, 5  ;;  %v2440_v37 = vmax.f32 %v8663_v13, %v8974_v42  ;;  %5836 = vmatpush3.bf16.msra.mxu1 %v6187_v36 }
 0x21b   : > { %v2461_v53 = vsel %vm1244_vm14, %v2429_v9, %v8886_v56  ;;  %v2463_v38 = vsel %vm11860_vm12, %v2431_v22, %v8888_v18  ;;  %v2465_v12 = vsel %vm1248_vm9, %v2433_v28, %v8893_v11  ;;  %v2467_v45 = vsel %vm1250_vm4, %v2435_v30, %v8895_v43  ;;  %v6189_v22 = vld [vmem:[%s11261_s4] sm:$0xff]   ;;  %v11862_v9 = vld [vmem:[#allocation5_spill] sm:$0xff] }
 0x21c   : > { %v2469_v15 = vsel %vm11472_vm13, %v2437_v61, %v2309_v4  ;;  %v2493_v18 = vrot.slane %v8730_v62, 6  ;;  %v2494_v34 = vrot.slane %v8733_v21, 6  ;;  %v2495_v33 = vrot.slane %v8717_v27, 6  ;;  %v6188_v4 = vld [vmem:[%s11261_s4 + $0x40] sm:$0xff]  }
 0x21d   : > { %v2496_v13 = vrot.slane %v8720_v24, 6  ;;  %v2497_v42 = vrot.slane %v8736_v50, 6  ;;  %v2498_v11 = vrot.slane %v8739_v29, 6  ;;  %v2499_v55 = vrot.slane %v8707_v10, 6  ;;  %5837 = vmatprep.subr.bf16.mxu1 %v6188_v4 }
 0x21e   : > { %v2500_v43 = vrot.slane %v8710_v51, 6  ;;  %v2501_v26 = vrot.slane %v8722_v52, 6  ;;  %v2502_v7 = vrot.slane %v8727_v44, 6  ;;  %v2503_v41 = vrot.slane %v8672_v54, 6  ;;  %5838 = vmatpush3.bf16.msra.mxu1 %v6189_v22 }
 0x21f   : > { %v2537_v5 = vsel %vm1268_vm0, %v2495_v33, %v2496_v13  ;;  %vm11863_vm12 = vcmp.eq.s32.totalorder %v11862_v9, 9  ;;  %v2535_v30 = vsel %vm1268_vm0, %v2497_v42, %v2498_v11  ;;  %v2536_v61 = vsel %vm1268_vm0, %v2496_v13, %v2497_v42 }
 0x220   : > { %v2471_v28 = vsel %vm11863_vm12, %v2439_v57, %v8904_v47  ;;  %v2533_v60 = vsel %vm1268_vm0, %v2499_v55, %v2500_v43  ;;  %v11864_v19 = vrot.slane %v8285_v63, 6  ;;  %v2530_v56 = vsel %vm1268_vm0, %v2502_v7, %v2503_v41 }
 0x221   : > { %v2531_v47 = vsel %vm1268_vm0, %v2501_v26, %v2502_v7  ;;  %v2534_v57 = vsel %vm1268_vm0, %v2498_v11, %v2499_v55  ;;  %v2538_v9 = vsel %vm1268_vm0, %v2494_v34, %v2495_v33  ;;  %v2539_v13 = vsel %vm1268_vm0, %v2493_v18, %v2494_v34 }
 0x222   : > { %v2529_v36 = vsel %vm1268_vm0, %v2503_v41, %v11864_v19  ;;  %v11865_v42 = vrot.slane %v8270_v32, 6  ;;  %v9076_v41 = vmax.f32 %v2428_v35, %v8689_v48  ;;  %v9078_v7 = vmax.f32 %v2430_v6, %v2539_v13  ;;  %v11868_v6 = vld [vmem:[#allocation35_spill] sm:$0xff] }
 0x223   : > { %v2559_v31 = vmax.f32 %v2463_v38, %v2538_v9  ;;  %v9080_v11 = vmax.f32 %v2432_v16, %v2537_v5  ;;  %v2532_v33 = vsel %vm1268_vm0, %v2500_v43, %v2501_v26  ;;  %v2561_v55 = vmax.f32 %v2465_v12, %v2536_v61  ;;  %v11870_v26 = vld [vmem:[#allocation10_spill] sm:$0xff]  ;;  %v11892_v9 = vld [vmem:[#allocation41_spill] sm:$0xff] }
 0x224   : > { %v2540_v4 = vsel %vm1268_vm0, %v11865_v42, %v2493_v18  ;;  %v9084_v22 = vmax.f32 %v2434_v1, %v2535_v30  ;;  %v2563_v34 = vmax.f32 %v2467_v45, %v2534_v57  ;;  %v9086_v17 = vmax.f32 %v2436_v46, %v2533_v60 }
 0x225   : > { %v2557_v19 = vmax.f32 %v2461_v53, %v2540_v4  ;;  %v2565_v63 = vmax.f32 %v2469_v15, %v2532_v33  ;;  %v9088_v18 = vmax.f32 %v2438_v49, %v2531_v47  ;;  %v2567_v48 = vmax.f32 %v2471_v28, %v2530_v56  ;;  %v11873_v49 = vld [vmem:[#allocation9_spill] sm:$0xff] }
 0x226   : > { %11866 = vst [vmem:[#allocation43_spill] sm:$0xff] %v9086_v17  ;;  %v2569_v35 = vmax.f32 %v8677_v23, %v8812_v20  ;;  %v2571_v16 = vmax.f32 %v8650_v2, %v11868_v6  ;;  %v11869_v43 = vmax.f32 %v8528_v25, %v8570_v39  ;;  %vm11871_vm12 = vcmp.eq.s32.totalorder %v11870_v26, 2  ;;  %v11891_v33 = vld [vmem:[#allocation45_spill] sm:$0xff] }
 0x227   : > { %11867 = vst [vmem:[#allocation20_spill] sm:$0xff] %v9088_v18  ;;  %v11872_v46 = vmax.f32 %v8643_v14, %v11844_v40  ;;  %vm11874_vm13 = vcmp.eq.s32.totalorder %v11873_v49, 3  ;;  %v9112_v5 = vsel %vm11473_vm10, %v2557_v19, %v2461_v53  ;;  %v2591_v60 = vsel %vm11474_vm6, %v2559_v31, %v2463_v38  ;;  %v11878_v40 = vld [vmem:[#allocation48_spill] sm:$0xff]  ;;  %v11884_v53 = vld [vmem:[#allocation13_spill] sm:$0xff] }
 0x228   : > { %v9100_v1 = vsel %vm11871_vm12, %v11869_v43, %v8528_v25  ;;  %v2593_v39 = vsel %vm1297_vm15, %v2561_v55, %v2465_v12  ;;  %v2595_v25 = vsel %vm1299_vm11, %v2563_v34, %v2467_v45  ;;  %v9120_v30 = vmax.f32 %v2440_v37, %v2529_v36  ;;  %v11887_v38 = vld [vmem:[#allocation17_spill] sm:$0xff]  ;;  %v11890_v37 = vld [vmem:[#allocation67_spill] sm:$0xff] }
 0x229   : > { %v9108_v56 = vsel %vm11874_vm13, %v11872_v46, %v8643_v14  ;;  %vm11879_vm12 = vcmp.eq.s32.totalorder %v11878_v40, 8  ;;  %v11881_v14 = vld [vmem:[#allocation6_spill] sm:$0xff]  ;;  %vm11885_vm10 = vcmp.eq.s32.totalorder %v11884_v53, 11  ;;  %vm11888_vm6 = vcmp.eq.s32.totalorder %v11887_v38, 10 }
 0x22a   : > { %11877 = vst [vmem:[#allocation60_spill] sm:$0xff] %v9120_v30  ;;  %v9124_v61 = vsel %vm11879_vm12, %v2565_v63, %v2469_v15  ;;  %vm11882_vm13 = vcmp.eq.s32.totalorder %v11881_v14, 9  ;;  %v9133_v31 = vsel %vm11885_vm10, %v2571_v16, %v8650_v2  ;;  %v9138_v12 = vsel %vm11888_vm6, %v2569_v35, %v8677_v23 }
 0x22b   : > { %11880 = vst [vmem:[#allocation52_spill] sm:$0xff] %v9124_v61  ;;  %v9128_v47 = vsel %vm11882_vm13, %v2567_v48, %v2471_v28  ;;  %11886 = vst [vmem:[#allocation29_spill] sm:$0xff] %v9133_v31  ;;  %v2618_v45 = vmax.f32 %v11890_v37, %v9078_v7  ;;  %v2619_v63 = vmax.f32 %v9108_v56, %v2591_v60  ;;  %v9419_v59 = vsel %vm1219_vm1, 13, %v6598_v58 }
 0x22c   : > { %11883 = vst [vmem:[#allocation28_spill] sm:$0xff] %v9128_v47  ;;  %11889 = vst [vmem:[#allocation35_spill] sm:$0xff] %v9138_v12  ;;  %v2620_v15 = vmax.f32 %v9076_v41, %v9080_v11  ;;  %v2621_v28 = vmax.f32 %v9112_v5, %v2593_v39  ;;  %v2622_v36 = vmax.f32 %v9078_v7, %v9084_v22  ;;  %vm1264_vm6 = vcmp.eq.s32.totalorder %v9419_v59, 14 }
 0x22d   : > { %v2623_v2 = vmax.f32 %v2591_v60, %v2595_v25  ;;  %v2624_v57 = vmax.f32 %v9080_v11, %v9086_v17  ;;  %v2625_v23 = vmax.f32 %v2593_v39, %v9124_v61  ;;  %v2626_v13 = vmax.f32 %v9084_v22, %v9088_v18 }
 0x22e   : > { %v2627_v42 = vmax.f32 %v2595_v25, %v9128_v47  ;;  %v2628_v4 = vmax.f32 %v9086_v17, %v9120_v30  ;;  %v2629_v19 = vmax.f32 %v9124_v61, %v9138_v12  ;;  %v2630_v55 = vmax.f32 %v9088_v18, %v11891_v33 }
 0x22f   : > { %v2631_v34 = vmax.f32 %v9128_v47, %v9133_v31  ;;  %v9163_v48 = vmax.f32 %v2618_v45, %v9076_v41  ;;  %v9166_v35 = vmax.f32 %v2619_v63, %v9112_v5  ;;  %v2648_v6 = vmax.f32 %v2620_v15, %v9078_v7 }
 0x230   : > { %v9169_v16 = vmax.f32 %v2621_v28, %v2591_v60  ;;  %v2650_v43 = vmax.f32 %v2622_v36, %v9080_v11  ;;  %v2651_v46 = vmax.f32 %v2623_v2, %v2593_v39  ;;  %v2652_v53 = vmax.f32 %v2624_v57, %v9084_v22  ;;  %v11894_v28 = vld [vmem:[#allocation14_spill] sm:$0xff] }
 0x231   : > { %v2653_v38 = vmax.f32 %v2625_v23, %v2595_v25  ;;  %v2654_v14 = vmax.f32 %v2626_v13, %v9086_v17  ;;  %v2655_v40 = vmax.f32 %v2627_v42, %v9124_v61  ;;  %v2656_v45 = vmax.f32 %v2628_v4, %v9088_v18  ;;  %v11899_v23 = vld [vmem:[#allocation61_spill] sm:$0xff] }
 0x232   : > { %v2657_v26 = vmax.f32 %v2629_v19, %v9128_v47  ;;  %v2658_v63 = vmax.f32 %v2630_v55, %v9120_v30  ;;  %v11893_v15 = vrot.slane %v11892_v9, 6  ;;  %v11895_v31 = vrot.slane %v11894_v28, 6 }
 0x233   : > { %v2659_v2 = vmax.f32 %v2631_v34, %v9138_v12  ;;  %v2676_v57 = vmax.f32 %v2648_v6, %v11890_v37  ;;  %v2678_v13 = vmax.f32 %v2650_v43, %v9076_v41  ;;  %v2679_v42 = vmax.f32 %v2651_v46, %v9112_v5  ;;  %v6198_v34 = vld [vmem:[%s11261_s4 + $0xf8] sm:$0xff]  }
 0x234   : > { %v9184_v36 = vsel %vm1268_vm0, %v11895_v31, %v11893_v15  ;;  %v2680_v4 = vmax.f32 %v2652_v53, %v9078_v7  ;;  %v2681_v19 = vmax.f32 %v2653_v38, %v2591_v60  ;;  %v2682_v55 = vmax.f32 %v2654_v14, %v9080_v11  ;;  %v11897_v6 = vld [vmem:[#allocation30_spill] sm:$0xff]  ;;  %5935 = vmatprep.subr.bf16.mxu0 %v6198_v34 }
 0x235   : > { %11896 = vst [vmem:[#allocation9_spill] sm:$0xff] %v9184_v36  ;;  %v2683_v28 = vmax.f32 %v2655_v40, %v2593_v39  ;;  %v2684_v31 = vmax.f32 %v2656_v45, %v9084_v22  ;;  %v2685_v15 = vmax.f32 %v2657_v26, %v2595_v25  ;;  %v11898_v47 = vrot.slane %v11897_v6, 2  ;;  %v11901_v40 = vld [vmem:[#allocation65_spill] sm:$0xff]  ;;  %v6200_v26 = vld [vmem:[%s11261_s4 + $0xb8] sm:$0xff]  }
 0x236   : > { %v11900_v18 = vrot.slane %v11899_v23, 2  ;;  %v2686_v53 = vmax.f32 %v2658_v63, %v9086_v17  ;;  %v2687_v14 = vmax.f32 %v2659_v2, %v9124_v61  ;;  %v9209_v38 = vmax.f32 %v2676_v57, %v11901_v40  ;;  %5936 = vmatpush3.bf16.msra.mxu0 %v6200_v26 }
 0x237   : > { %v9215_v46 = vmax.f32 %v2678_v13, %v11890_v37  ;;  %v9218_v45 = vmax.f32 %v2679_v42, %v9108_v56  ;;  %v9227_v63 = vmax.f32 %v2682_v55, %v9078_v7  ;;  %v9229_v2 = vmax.f32 %v2683_v28, %v2591_v60  ;;  %v6203_v7 = vld [vmem:[%s11261_s4 + $0xf0] sm:$0xff]  }
 0x238   : > { %v9204_v43 = vsel %vm1121_vm2, %v11900_v18, %v11898_v47  ;;  %v9221_v18 = vmax.f32 %v2680_v4, %v9076_v41  ;;  %v9224_v47 = vmax.f32 %v2681_v19, %v9112_v5  ;;  %v9232_v57 = vmax.f32 %v2684_v31, %v9080_v11  ;;  %5937 = vmatprep.subr.bf16.mxu0 %v6203_v7 }
 0x239   : > { %11902 = vst [vmem:[#allocation67_spill] sm:$0xff] %v9218_v45  ;;  %11905 = vst [vmem:[#allocation61_spill] sm:$0xff] %v9227_v63  ;;  %v9234_v13 = vmax.f32 %v2685_v15, %v2593_v39  ;;  %v9237_v42 = vmax.f32 %v2686_v53, %v9084_v22  ;;  %v9239_v4 = vmax.f32 %v2687_v14, %v2595_v25  ;;  %v2898_v60 = vrot.slane %v9227_v63, 2  ;;  %v6204_v22 = vld [vmem:[%s11261_s4 + $0xb0] sm:$0xff]   ;;  %v6205_v25 = vld [vmem:[%s11261_s4 + $0xe8] sm:$0xff]  }
 0x23a   : > { %11903 = vst [vmem:[#allocation14_spill] sm:$0xff] %v9221_v18  ;;  %11904 = vst [vmem:[#allocation30_spill] sm:$0xff] %v9224_v47  ;;  %v11482_v19 = vrot.slane %v9221_v18, 2  ;;  %v2897_v34 = vrot.slane %v9224_v47, 2  ;;  %v2899_v11 = vrot.slane %v9229_v2, 2  ;;  %v2900_v39 = vrot.slane %v9232_v57, 2  ;;  %5938 = vmatpush3.bf16.msra.mxu0 %v6204_v22 }
 0x23b   : > { %11906 = vst [vmem:[#allocation65_spill] sm:$0xff] %v9229_v2  ;;  %11907 = vst [vmem:[#allocation68_spill] sm:$0xff] %v9232_v57  ;;  %v11483_v55 = vrot.slane %v9234_v13, 2  ;;  %v3025_v53 = vrot.slane %v9224_v47, 1  ;;  %5939 = vmatprep.subr.bf16.mxu0 %v6205_v25  ;;  %v3028_v22 = vrot.slane %v9232_v57, 1  ;;  %v3153_v36 = vrot.slane %v9224_v47, 7 }
 0x23c   : > { %11908 = vst [vmem:[#allocation69_spill] sm:$0xff] %v9234_v13  ;;  %11909 = vst [vmem:[#allocation70_spill] sm:$0xff] %v9237_v42  ;;  %v2936_v31 = vsel %vm1121_vm2, %v11482_v19, %v2897_v34  ;;  %v2933_v26 = vsel %vm1121_vm2, %v2899_v11, %v2900_v39  ;;  %v2934_v28 = vsel %vm1121_vm2, %v2898_v60, %v2899_v11  ;;  %v6207_v19 = vld [vmem:[%s11261_s4 + $0xa8] sm:$0xff]   ;;  %v6210_v11 = vld [vmem:[%s11261_s4 + $0xe0] sm:$0xff]   ;;  %v3283_v9 = vrot.slane %v9229_v2, 6 }
 0x23d   : > { %11910 = vst [vmem:[#allocation71_spill] sm:$0xff] %v9239_v4  ;;  %v2932_v14 = vsel %vm1121_vm2, %v2900_v39, %v11483_v55  ;;  %v2935_v17 = vsel %vm1121_vm2, %v2897_v34, %v2898_v60  ;;  %v2960_v7 = vmax.f32 %v9221_v18, %v2936_v31  ;;  %v2962_v55 = vmax.f32 %v9227_v63, %v2934_v28  ;;  %v6220_v4 = vld [vmem:[#allocation2 + $0xa0] ss:$16 sps:$4 sm:$0xff]  }
 0x23e   : > { %v2961_v15 = vmax.f32 %v9224_v47, %v2935_v17  ;;  %v2963_v42 = vmax.f32 %v9229_v2, %v2933_v26  ;;  %v2964_v34 = vmax.f32 %v9232_v57, %v2932_v14  ;;  %v3026_v60 = vrot.slane %v9227_v63, 1  ;;  %5940 = vmatpush3.bf16.msra.mxu0 %v6207_v19  ;;  %v6212_v19 = vld [vmem:[%s11261_s4 + $0xd8] sm:$0xff]  }
 0x23f   : > { %v3027_v39 = vrot.slane %v9229_v2, 1  ;;  %v2992_v28 = vsel %vm1121_vm2, %v2960_v7, %v9221_v18  ;;  %v2994_v25 = vsel %vm1121_vm2, %v2962_v55, %v9227_v63  ;;  %v11492_v31 = vrot.slane %v9234_v13, 1  ;;  %v6211_v55 = vld [vmem:[%s11261_s4 + $0xa0] sm:$0xff]   ;;  %5941 = vmatprep.subr.bf16.mxu0 %v6210_v11  ;;  %v6214_v11 = vld [vmem:[%s11261_s4 + $0x98] sm:$0xff]  }
 0x240   : > { %v2996_v14 = vsel %vm1121_vm2, %v2964_v34, %v9232_v57  ;;  %v3063_v61 = vsel %vm1170_vm3, %v3025_v53, %v3026_v60  ;;  %v11911_v34 = vrot.slane %v9221_v18, 1  ;;  %v11493_v13 = vrot.slane %v9218_v45, 7 }
 0x241   : > { %v3061_v26 = vsel %vm1170_vm3, %v3027_v39, %v3028_v22  ;;  %v3062_v17 = vsel %vm1170_vm3, %v3026_v60, %v3027_v39  ;;  %v3060_v7 = vsel %vm1170_vm3, %v3028_v22, %v11492_v31  ;;  %v3089_v12 = vmax.f32 %v2961_v15, %v3063_v61 }
 0x242   : > { %v3064_v33 = vsel %vm1170_vm3, %v11911_v34, %v3025_v53  ;;  %v3090_v39 = vmax.f32 %v2994_v25, %v3062_v17  ;;  %v3091_v30 = vmax.f32 %v2963_v42, %v3061_v26  ;;  %v3092_v20 = vmax.f32 %v2996_v14, %v3060_v7  ;;  %5942 = vmatpush3.bf16.msra.mxu0 %v6211_v55 }
 0x243   : > { %v3088_v60 = vmax.f32 %v2992_v28, %v3064_v33  ;;  %v3152_v31 = vrot.slane %v9221_v18, 7  ;;  %v3154_v61 = vrot.slane %v9227_v63, 7  ;;  %v3155_v33 = vrot.slane %v9229_v2, 7  ;;  %5943 = vmatprep.subr.bf16.mxu0 %v6212_v19  ;;  %v11957_v2 = vld [vmem:[#allocation23_spill] sm:$0xff] }
 0x244   : > { %v3122_v22 = vsel %vm1170_vm3, %v3090_v39, %v2994_v25  ;;  %v3124_v53 = vsel %vm1170_vm3, %v3092_v20, %v2996_v14  ;;  %v11495_v42 = vrot.slane %v9232_v57, 7  ;;  %v6217_v14 = vld [vmem:[%s11261_s4 + $0xd0] sm:$0xff]   ;;  %vm11944_vm10 = vcmp.eq.s32.totalorder %v11873_v49, 3 }
 0x245   : > { %v3120_v15 = vsel %vm1170_vm3, %v3088_v60, %v2992_v28  ;;  %v3191_v17 = vsel %vm1219_vm1, %v3153_v36, %v3154_v61  ;;  %v3192_v25 = vsel %vm1219_vm1, %v3152_v31, %v3153_v36  ;;  %v3193_v20 = vsel %vm1219_vm1, %v11493_v13, %v3152_v31 }
 0x246   : > { %v3189_v26 = vsel %vm1219_vm1, %v3155_v33, %v11495_v42  ;;  %v3190_v36 = vsel %vm1219_vm1, %v3154_v61, %v3155_v33  ;;  %v3216_v55 = vmax.f32 %v3120_v15, %v3193_v20  ;;  %v3217_v7 = vmax.f32 %v3089_v12, %v3192_v25  ;;  %5944 = vmatpush3.bf16.msra.mxu0 %v6214_v11  ;;  %v6218_v61 = vld [vmem:[%s11261_s4 + $0x90] sm:$0xff]   ;;  %v6219_v11 = vld [vmem:[%s11261_s4 + $0xc8] sm:$0xff]  }
 0x247   : > { %v3218_v34 = vmax.f32 %v3122_v22, %v3191_v17  ;;  %v3219_v39 = vmax.f32 %v3091_v30, %v3190_v36  ;;  %v3220_v31 = vmax.f32 %v3124_v53, %v3189_v26  ;;  %v3280_v60 = vrot.slane %v9221_v18, 6  ;;  %5945 = vmatprep.subr.bf16.mxu0 %v6217_v14 }
 0x248   : > { %v3249_v19 = vsel %vm1248_vm9, %v3217_v7, %v3089_v12  ;;  %v3281_v13 = vrot.slane %v9224_v47, 6  ;;  %v3282_v28 = vrot.slane %v9227_v63, 6  ;;  %v11494_v15 = vrot.slane %v9232_v57, 6  ;;  %v11913_v12 = vld [vmem:[#allocation38_spill] sm:$0xff]  ;;  %v6206_v57 = vld [vmem:[#allocation2 + $0x60] ss:$16 sps:$4 sm:$0xff]  }
 0x249   : > { %v3251_v22 = vsel %vm1250_vm4, %v3219_v39, %v3091_v30  ;;  %v11912_v53 = vrot.slane %v9218_v45, 6  ;;  %v5245_v33 = vmul.f32 -1.442695, %v11913_v12 }
 0x24a   : > { %v3318_v17 = vsel %vm1268_vm0, %v3282_v28, %v3283_v9  ;;  %v3319_v0 = vsel %vm1268_vm0, %v3281_v13, %v3282_v28  ;;  %v3320_v30 = vsel %vm1268_vm0, %v3280_v60, %v3281_v13  ;;  %v3317_v20 = vsel %vm1268_vm0, %v3283_v9, %v11494_v15  ;;  %5946 = vmatpush3.bf16.msra.mxu0 %v6218_v61  ;;  %v6221_v28 = vld [vmem:[%s11261_s4 + $0x88] sm:$0xff]   ;;  %v11926_v61 = vld [vmem:[#allocation25_spill] sm:$0xff] }
 0x24b   : > { %v3321_v8 = vsel %vm1268_vm0, %v11912_v53, %v3280_v60  ;;  %v3345_v14 = vmax.f32 %v3249_v19, %v3320_v30  ;;  %v9385_v26 = vmax.f32 %v3218_v34, %v3319_v0  ;;  %v3347_v36 = vmax.f32 %v3251_v22, %v3318_v17  ;;  %5947 = vmatprep.subr.bf16.mxu0 %v6219_v11 }
 0x24c   : > { %v9379_v25 = vmax.f32 %v3216_v55, %v3321_v8  ;;  %v9387_v7 = vmax.f32 %v3220_v31, %v3317_v20  ;;  %6426 = vpow2.f32 %v5245_v33  ;;  %v11917_v55 = vmax.f32 %v9169_v16, %v9108_v56  ;;  %v6224_v31 = vld [vmem:[%s11261_s4 + $0xc0] sm:$0xff]   ;;  %v11920_v33 = vld [vmem:[#allocation22_spill] sm:$0xff]  ;;  %v11921_v20 = vld [vmem:[#allocation49_spill] sm:$0xff] }
 0x24d   : > { %11915 = vst [vmem:[#allocation72_spill] sm:$0xff] %v9385_v26  ;;  %v9402_v34 = vsel %vm1297_vm15, %v3345_v14, %v3249_v19  ;;  %v9406_v39 = vsel %vm1299_vm11, %v3347_v36, %v3251_v22  ;;  %v6597_v16 = vmov 15   ;;  %v9427_v22 = vsel %vm1268_vm0, 13, %v6598_v58  ;;  %v6225_v36 = vld [vmem:[%s11261_s4 + $0x80] sm:$0xff]   ;;  %v11923_v58 = vld [vmem:[#allocation58_spill] sm:$0xff] }
 0x24e   : > { %11914 = vst [vmem:[#allocation38_spill] sm:$0xff] %v9379_v25  ;;  %11916 = vst [vmem:[#allocation73_spill] sm:$0xff] %v9387_v7  ;;  %v9398_v9 = vmax.f32 %v11917_v55, %v9100_v1  ;;  %v9415_v53 = vsel %vm1219_vm1, 14, %v6597_v16  ;;  %v9423_v19 = vsel %vm1268_vm0, 14, %v6597_v16  ;;  %v11502_v8 = vrot.slane %v11899_v23, 1  ;;  %5948 = vmatpush3.bf16.msra.mxu0 %v6221_v28  ;;  %v11925_v28 = vld [vmem:[#allocation19_spill] sm:$0xff] }
 0x24f   : > { %11918 = vst [vmem:[#allocation74_spill] sm:$0xff] %v9402_v34  ;;  %11919 = vst [vmem:[#allocation75_spill] sm:$0xff] %v9406_v39  ;;  %v11496_v11 = vrot.slane %v11920_v33, 7  ;;  %v11501_v17 = vrot.slane %v11920_v33, 6  ;;  %v5576_v0 = vpack.c.bf16 %v11899_v23, %v11899_v23  ;;  %v5577_v30 = vpack.c.bf16 %v11897_v6, %v11897_v6  ;;  %5949 = vmatprep.subr.bf16.mxu0 %v6224_v31  ;;  %v11930_v31 = vld [vmem:[#allocation53_spill] sm:$0xff] }
 0x250   : > { %v5578_v14 = vpack.c.bf16 %v11921_v20, %v11921_v20  ;;  %v11922_v55 = vrot.slane %v11897_v6, 1  ;;  %v11924_v15 = vrot.slane %v11923_v58, 7  ;;  %v5579_v20 = vpack.c.bf16 %v11925_v28, %v11925_v28  ;;  %v11929_v28 = vld [vmem:[#allocation54_spill] sm:$0xff] }
 0x251   : > { %v5580_v60 = vpack.c.bf16 %v11926_v61, %v11926_v61  ;;  %v11927_v6 = vmax.f32 %v11899_v23, %v9204_v43  ;;  %2069 = vst [vmem:[#allocation2 + $0x4] sm:$0xf] %v5576_v0  ;;  %2070 = vst [vmem:[#allocation2 + $0x14] sm:$0xf] %v5577_v30  ;;  %v5581_v61 = vpack.c.bf16 %v11929_v28, %v11929_v28  ;;  %vm1266_vm4 = vcmp.eq.s32.totalorder %v9415_v53, 15 }
 0x252   : > { %v2291_v16 = vsel %vm1170_vm3, %v11502_v8, %v11922_v55  ;;  %v9453_v42 = vsel %vm1219_vm1, %v11924_v15, %v11496_v11  ;;  %v11928_v55 = vrot.slane %v11923_v58, 6  ;;  %2071 = vst [vmem:[#allocation2 + $0x24] sm:$0xf] %v5578_v14  ;;  %v5582_v11 = vpack.c.bf16 %v11930_v31, %v11930_v31  ;;  %2072 = vst [vmem:[#allocation2 + $0x34] sm:$0xf] %v5579_v20  ;;  %v11931_v14 = vld [vmem:[#allocation62_spill] sm:$0xff] }
 0x253   : > { %v9462_v13 = vmax.f32 %v11927_v6, %v2291_v16  ;;  %2073 = vst [vmem:[#allocation2 + $0x44] sm:$0xf] %v5580_v60  ;;  %v5583_v43 = vpack.c.bf16 %v8270_v32, %v8270_v32  ;;  %v5584_v16 = vpack.c.bf16 %v8730_v62, %v8730_v62  ;;  %v5585_v6 = vpack.c.bf16 %v8733_v21, %v8733_v21  ;;  %v11932_v62 = vld [vmem:[#allocation63_spill] sm:$0xff] }
 0x254   : > { %v9470_v15 = vsel %vm1268_vm0, %v11928_v55, %v11501_v17  ;;  %v5586_v0 = vpack.c.bf16 %v8717_v27, %v8717_v27  ;;  %2074 = vst [vmem:[#allocation2 + $0x54] sm:$0xf] %v5581_v61  ;;  %2075 = vst [vmem:[#allocation2 + $0x64] sm:$0xf] %v5582_v11  ;;  %v5587_v30 = vpack.c.bf16 %v8720_v24, %v8720_v24  ;;  %5950 = vmatpush3.bf16.msra.mxu0 %v6225_v36  ;;  %v11935_v27 = vld [vmem:[#allocation64_spill] sm:$0xff]  ;;  %v11936_v11 = vld [vmem:[#allocation66_spill] sm:$0xff] }
 0x255   : > { %v5588_v60 = vpack.c.bf16 %v8736_v50, %v8736_v50  ;;  %v5589_v32 = vpack.c.bf16 %v8739_v29, %v8739_v29  ;;  %v11933_v20 = vmax.f32 %v11931_v14, %v11932_v62  ;;  %2076 = vst [vmem:[#allocation2 + $0x74] sm:$0xf] %v5583_v43  ;;  %2077 = vst [vmem:[#allocation2 + $0x84] sm:$0xf] %v5584_v16  ;;  %v6195_v62 = vld [vmem:[#allocation2 + $0x20] ss:$16 sps:$4 sm:$0xff]  }
 0x256   : > { %2078 = vst [vmem:[#allocation2 + $0x94] sm:$0xf] %v5585_v6  ;;  %2079 = vst [vmem:[#allocation2 + $0xa4] sm:$0xf] %v5586_v0  ;;  %v2614_v50 = vmax.f32 %v11936_v11, %v11890_v37  ;;  %v2616_v29 = vmax.f32 %v11901_v40, %v9076_v41  ;;  %v11937_v36 = vmax.f32 %v9100_v1, %v9112_v5  ;;  %v2892_v41 = vrot.slane %v9209_v38, 2 }
 0x257   : > { %v2455_v55 = vsel %vm7026_vm5, %v11933_v20, %v11931_v14  ;;  %2080 = vst [vmem:[#allocation2 + $0xb4] sm:$0xf] %v5587_v30  ;;  %2081 = vst [vmem:[#allocation2 + $0xc4] sm:$0xf] %v5588_v60  ;;  %v2674_v61 = vmax.f32 %v9163_v48, %v11901_v40  ;;  %v5590_v31 = vpack.c.bf16 %v8707_v10, %v8707_v10  ;;  %v2893_v30 = vrot.slane %v9398_v9, 2 }
 0x258   : > { %v2551_v24 = vmax.f32 %v2455_v55, %v11935_v27  ;;  %v9505_v28 = vmax.f32 %v11937_v36, %v9108_v56  ;;  %2082 = vst [vmem:[#allocation2 + $0xd4] sm:$0xf] %v5589_v32  ;;  %v5591_v43 = vpack.c.bf16 %v8710_v51, %v8710_v51  ;;  %v9519_v5 = vmax.f32 %v2614_v50, %v11901_v40  ;;  %v6190_v40 = vld [vmem:[#allocation2] ss:$16 sps:$4 sm:$0xff]   ;;  %v6192_v27 = vld [vmem:[#allocation2 + $0x4] ss:$16 sps:$4 sm:$0xff]  }
 0x259   : > { %v2644_v0 = vmax.f32 %v2616_v29, %v11890_v37  ;;  %v9528_v51 = vmax.f32 %v2674_v61, %v11936_v11  ;;  %v11939_v60 = vmax.f32 %v9166_v35, %v9100_v1  ;;  %2083 = vst [vmem:[#allocation2 + $0xe4] sm:$0xf] %v5590_v31  ;;  %v6427_v37 = vpop.eup %6426  ;;  %v5592_v61 = vpack.c.bf16 %v8722_v52, %v8722_v52  ;;  %v6193_v31 = vld [vmem:[#allocation2 + $0x24] ss:$16 sps:$4 sm:$0xff]  }
 0x25a   : > { %v9516_v6 = vsel %vm7055_vm7, %v2551_v24, %v2455_v55  ;;  %2084 = vst [vmem:[#allocation2 + $0xf4] sm:$0xf] %v5591_v43  ;;  %v860_v55 = vadd.f32 1.0, %v6427_v37  ;;  %4346 = vmatprep.mubr.bf16.mxu1 %v6192_v27  ;;  %v3020_v20 = vrot.slane %v9209_v38, 1  ;;  %vm1315_vm9 = vcmp.eq.s32.totalorder %v9423_v19, 15 }
 0x25b   : > { %v2615_v48 = vmax.f32 %v9516_v6, %v9108_v56  ;;  %v9534_v32 = vmax.f32 %v11939_v60, %v9516_v6  ;;  %v9537_v14 = vmax.f32 %v2644_v0, %v11936_v11  ;;  %v5609_v56 = vpack.c.bf16 %v9519_v5, %v9519_v5  ;;  %4347 = vmatmul.mubr.bf16.vlgmr.msra.gmra.mxu1 %v6190_v40  ;;  %v11942_v60 = vld [vmem:[#allocation59_spill] sm:$0xff] }
 0x25c   : > { %v11498_v24 = vrot.slane %v9528_v51, 2  ;;  %v2940_v11 = vsel %vm1121_vm2, %v2892_v41, %v2893_v30  ;;  %6428 = vrcp.f32 %v860_v55  ;;  %v5593_v0 = vpack.c.bf16 %v8727_v44, %v8727_v44  ;;  %2085 = vst [vmem:[#allocation2 + $0x104] sm:$0xf] %v5592_v61  ;;  %4354 = vmatprep.mubr.bf16.mxu1 %v6193_v31  ;;  %v6201_v8 = vld [vmem:[#allocation2 + $0x64] ss:$16 sps:$4 sm:$0xff]  }
 0x25d   : > { %v9544_v35 = vmax.f32 %v2615_v48, %v9100_v1  ;;  %2854 = vst [vmem:[#allocation2 + $0x18] sm:$0xf] %v5609_v56  ;;  %v5611_v29 = vpack.c.bf16 %v9537_v14, %v9537_v14  ;;  %v2956_v36 = vmax.f32 %v9209_v38, %v2940_v11  ;;  %v2891_v43 = vrot.slane %v9534_v32, 2 }
 0x25e   : > { %v5613_v48 = vpack.c.bf16 %v9528_v51, %v9528_v51  ;;  %v11497_v37 = vrot.slane %v9528_v51, 1  ;;  %v5594_v56 = vpack.c.bf16 %v8672_v54, %v8672_v54  ;;  %v3019_v40 = vrot.slane %v9534_v32, 1  ;;  %2086 = vst [vmem:[#allocation2 + $0x114] sm:$0xf] %v5593_v0 }
 0x25f   : > { %2856 = vst [vmem:[#allocation2 + $0x38] sm:$0xf] %v5611_v29  ;;  %v2988_v52 = vsel %vm1121_vm2, %v2956_v36, %v9209_v38  ;;  %v2942_v44 = vsel %vm1121_vm2, %v11498_v24, %v2891_v43  ;;  %v2941_v27 = vsel %vm1121_vm2, %v2891_v43, %v2892_v41  ;;  %v11940_v36 = vld [vmem:[#allocation15_spill] sm:$0xff]  ;;  %v11500_v55 = vrot.slane %v9528_v51, 7 }
 0x260   : > { %2858 = vst [vmem:[#allocation2 + $0x58] sm:$0xf] %v5613_v48  ;;  %v2954_v11 = vmax.f32 %v9528_v51, %v2942_v44  ;;  %v2955_v54 = vmax.f32 %v9534_v32, %v2941_v27  ;;  %v5595_v61 = vpack.c.bf16 %v11940_v36, %v11940_v36  ;;  %2087 = vst [vmem:[#allocation2 + $0x124] sm:$0xf] %v5594_v56  ;;  %v11941_v44 = vld [vmem:[#allocation27_spill] sm:$0xff]  ;;  %v11499_v29 = vrot.slane %v9528_v51, 6 }
 0x261   : > { %v3070_v31 = vsel %vm1170_vm3, %v11497_v37, %v3019_v40  ;;  %v5614_v41 = vpack.c.bf16 %v9534_v32, %v9534_v32  ;;  %v5615_v43 = vpack.c.bf16 %v9209_v38, %v9209_v38  ;;  %v5596_v27 = vpack.c.bf16 %v11941_v44, %v11941_v44 }
 0x262   : > { %v2986_v0 = vsel %vm1121_vm2, %v2954_v11, %v9528_v51  ;;  %2088 = vst [vmem:[#allocation2 + $0x134] sm:$0xf] %v5595_v61  ;;  %v5597_v37 = vpack.c.bf16 %v11942_v60, %v11942_v60  ;;  %v3021_v11 = vrot.slane %v9398_v9, 1  ;;  %v3147_v48 = vrot.slane %v9534_v32, 7 }
 0x263   : > { %v3082_v36 = vmax.f32 %v2986_v0, %v3070_v31  ;;  %2859 = vst [vmem:[#allocation2 + $0x68] sm:$0xf] %v5614_v41  ;;  %2860 = vst [vmem:[#allocation2 + $0x78] sm:$0xf] %v5615_v43  ;;  %v3148_v61 = vrot.slane %v9209_v38, 7  ;;  %v3275_v56 = vrot.slane %v9534_v32, 6  ;;  %v3069_v41 = vsel %vm1170_vm3, %v3019_v40, %v3020_v20  ;;  %4355 = vmatmul.mubr.bf16.gmra.mxu1 %v6195_v62 }
 0x264   : > { %2089 = vst [vmem:[#allocation2 + $0x144] sm:$0xf] %v5596_v27  ;;  %v6196_v31 = vld [vmem:[#allocation2 + $0x44] ss:$16 sps:$4 sm:$0xff]   ;;  %v11505_v60 = vrot.slane %v9209_v38, 6  ;;  %v2894_v43 = vrot.slane %v9215_v46, 2  ;;  %v3068_v50 = vsel %vm1170_vm3, %v3020_v20, %v3021_v11  ;;  %v3083_v24 = vmax.f32 %v2955_v54, %v3069_v41 }
 0x265   : > { %v9608_v44 = vsel %vm1170_vm3, %v3082_v36, %v2986_v0  ;;  %2090 = vst [vmem:[#allocation2 + $0x154] sm:$0xf] %v5597_v37  ;;  %v3197_v32 = vsel %vm1219_vm1, %v3147_v48, %v3148_v61  ;;  %v3198_v0 = vsel %vm1219_vm1, %v11500_v55, %v3147_v48  ;;  %4362 = vmatprep.mubr.bf16.mxu1 %v6196_v31  ;;  %v11506_v20 = vrot.slane %v9218_v45, 2 }
 0x266   : > { %v3084_v40 = vmax.f32 %v2988_v52, %v3068_v50  ;;  %v3325_v37 = vsel %vm1268_vm0, %v3275_v56, %v11505_v60  ;;  %v3326_v62 = vsel %vm1268_vm0, %v11499_v29, %v3275_v56  ;;  %v3211_v54 = vmax.f32 %v3083_v24, %v3198_v0 }
 0x267   : > { %v2939_v50 = vsel %vm1121_vm2, %v2893_v30, %v2894_v43  ;;  %v3022_v48 = vrot.slane %v9215_v46, 1  ;;  %v11503_v27 = vrot.slane %v9218_v45, 1  ;;  %v2938_v56 = vsel %vm1121_vm2, %v2894_v43, %v11506_v20 }
 0x268   : > { %v3116_v36 = vsel %vm1170_vm3, %v3084_v40, %v2988_v52  ;;  %v2957_v31 = vmax.f32 %v9398_v9, %v2939_v50  ;;  %v3149_v41 = vrot.slane %v9398_v9, 7  ;;  %v3243_v30 = vsel %vm1242_vm8, %v3211_v54, %v3083_v24  ;;  %v6199_v24 = vld [vmem:[#allocation2 + $0x40] ss:$16 sps:$4 sm:$0xff]  }
 0x269   : > { %v6429_v0 = vpop.eup %6428  ;;  %v3212_v29 = vmax.f32 %v3116_v36, %v3197_v32  ;;  %v2958_v10 = vmax.f32 %v9215_v46, %v2938_v56  ;;  %v3066_v52 = vsel %vm1170_vm3, %v3022_v48, %v11503_v27  ;;  %v3339_v43 = vmax.f32 %v3243_v30, %v3326_v62 }
 0x26a   : > { %v956_v40 = vmul.f32 %v6429_v0, %v11913_v12  ;;  %v3067_v32 = vsel %vm1170_vm3, %v3021_v11, %v3022_v48  ;;  %v11504_v55 = vrot.slane %v9215_v46, 7  ;;  %v3196_v12 = vsel %vm1219_vm1, %v3148_v61, %v3149_v41  ;;  %v11946_v61 = vld [vmem:[#allocation42_spill] sm:$0xff] }
 0x26b   : > { %v9659_v54 = vmax.f32 %v3212_v29, %v3325_v37  ;;  %v2990_v50 = vsel %vm1121_vm2, %v2958_v10, %v9215_v46  ;;  %v3085_v36 = vmax.f32 %v2957_v31, %v3067_v32  ;;  %vm1313_vm8 = vcmp.eq.s32.totalorder %v9427_v22, 14  ;;  %4363 = vmatmul.mubr.bf16.gmra.mxu1 %v6199_v24  ;;  %v11948_v32 = vld [vmem:[#allocation41_spill] sm:$0xff] }
 0x26c   : > { %v5573_v56 = vpack.c.bf16 %v956_v40, %v956_v40  ;;  %v1346_v0 = vrot.slane %v956_v40, 2  ;;  %v1474_v17 = vrot.slane %v956_v40, 1  ;;  %v1602_v62 = vrot.slane %v956_v40, 7  ;;  %4370 = vmatprep.mubr.bf16.mxu1 %v6201_v8 }
 0x26d   : > { %v1730_v11 = vrot.slane %v956_v40, 6  ;;  %v9669_v29 = vsel %vm11944_vm10, %v3339_v43, %v3243_v30  ;;  %v3086_v37 = vmax.f32 %v2990_v50, %v3066_v52  ;;  %v3195_v10 = vsel %vm1219_vm1, %v3149_v41, %v11504_v55 }
 0x26e   : > { %11945 = vst [vmem:[#allocation22_spill] sm:$0xff] %v9669_v29  ;;  %1116 = vst [vmem:[#allocation2 + $0x1d0] sm:$0xf] %v5573_v56  ;;  %v11947_v48 = vrot.slane %v11946_v61, 2  ;;  %v11949_v27 = vrot.slane %v11948_v32, 2  ;;  %v11950_v49 = vrot.slane %v11946_v61, 1 }
 0x26f   : > { %v11951_v52 = vrot.slane %v11948_v32, 1  ;;  %v11955_v20 = vrot.slane %v11946_v61, 6  ;;  %v11993_v7 = vrot.slane %v11920_v33, 1  ;;  %v11994_v58 = vrot.slane %v11899_v23, 1 }
 0x270   : > { %v1350_v31 = vsel %vm1121_vm2, %v1346_v0, %v11947_v48  ;;  %v1351_v24 = vsel %vm1121_vm2, %v11949_v27, %v1346_v0  ;;  %v1478_v30 = vsel %vm1170_vm3, %v1474_v17, %v11950_v49  ;;  %v11952_v48 = vrot.slane %v11946_v61, 7  ;;  %v11954_v49 = vld [vmem:[#allocation16_spill] sm:$0xff] }
 0x271   : > { %v1479_v41 = vsel %vm1170_vm3, %v11951_v52, %v1474_v17  ;;  %v1409_v43 = vmax.f32 %v11948_v32, %v1351_v24  ;;  %v1410_v56 = vmax.f32 %v956_v40, %v1350_v31  ;;  %v11953_v27 = vrot.slane %v11948_v32, 7 }
 0x272   : > { %v1606_v55 = vsel %vm1219_vm1, %v1602_v62, %v11952_v48  ;;  %v1734_v8 = vsel %vm1268_vm0, %v1730_v11, %v11955_v20  ;;  %v11956_v17 = vrot.slane %v11948_v32, 6  ;;  %v3118_v24 = vsel %vm1170_vm3, %v3086_v37, %v2990_v50 }
 0x273   : > { %v1607_v0 = vsel %vm1219_vm1, %v11953_v27, %v1602_v62  ;;  %v1667_v60 = vmax.f32 %v11954_v49, %v1606_v55  ;;  %v1442_v52 = vsel %vm1121_vm2, %v1410_v56, %v956_v40  ;;  %v1537_v48 = vmax.f32 %v1409_v43, %v1479_v41  ;;  %4371 = vmatmul.mubr.bf16.gmra.mxu1 %v6206_v57 }
 0x274   : > { %v1735_v31 = vsel %vm1268_vm0, %v11956_v17, %v1730_v11  ;;  %v3213_v62 = vmax.f32 %v3085_v36, %v3196_v12  ;;  %v3214_v27 = vmax.f32 %v3118_v24, %v3195_v10  ;;  %v1538_v55 = vmax.f32 %v1442_v52, %v1478_v30  ;;  %v6208_v30 = vld [vmem:[#allocation2 + $0x84] ss:$16 sps:$4 sm:$0xff]  }
 0x275   : > { %v1699_v61 = vsel %vm1266_vm4, %v1667_v60, %v11954_v49  ;;  %v3277_v20 = vrot.slane %v9398_v9, 6  ;;  %v3278_v32 = vrot.slane %v9215_v46, 6  ;;  %v1665_v11 = vmax.f32 %v1537_v48, %v11957_v2  ;;  %4378 = vmatprep.mubr.bf16.mxu1 %v6208_v30 }
 0x276   : > { %v1795_v17 = vmax.f32 %v1699_v61, %v1734_v8  ;;  %v3245_v37 = vsel %vm1244_vm14, %v3213_v62, %v3085_v36  ;;  %v11959_v40 = vrot.slane %v9221_v18, 2  ;;  %v11960_v12 = vrot.slane %v9218_v45, 2 }
 0x277   : > { %v1570_v60 = vsel %vm1170_vm3, %v1538_v55, %v1442_v52  ;;  %v3323_v41 = vsel %vm1268_vm0, %v3277_v20, %v3278_v32  ;;  %v11961_v2 = vrot.slane %v9209_v38, 6  ;;  %v1697_v49 = vsel %vm1264_vm6, %v1665_v11, %v1537_v48  ;;  %v11962_v52 = vld [vmem:[#allocation9_spill] sm:$0xff]  ;;  %v11967_v11 = vld [vmem:[#allocation34_spill] sm:$0xff] }
 0x278   : > { %v2937_v10 = vsel %vm1121_vm2, %v11960_v12, %v11959_v40  ;;  %v1666_v56 = vmax.f32 %v1570_v60, %v1607_v0  ;;  %v1827_v8 = vsel %vm1315_vm9, %v1795_v17, %v1699_v61  ;;  %v1793_v62 = vmax.f32 %v1697_v49, %v11962_v52  ;;  %v11963_v55 = vld [vmem:[#allocation57_spill] sm:$0xff]  ;;  %v11976_v52 = vld [vmem:[#allocation47_spill] sm:$0xff] }
 0x279   : > { %v3324_v43 = vsel %vm1268_vm0, %v11961_v2, %v3277_v20  ;;  %v2959_v36 = vmax.f32 %v9218_v45, %v2937_v10  ;;  %v1855_v50 = vmax.f32 %v11963_v55, %v1827_v8  ;;  %v9742_v38 = vmax.f32 %v3214_v27, %v3323_v41  ;;  %v11973_v41 = vld [vmem:[#allocation56_spill] sm:$0xff] }
 0x27a   : > { %v3341_v24 = vmax.f32 %v3245_v37, %v3324_v43  ;;  %v11965_v20 = vrot.slane %v9221_v18, 1  ;;  %v11966_v40 = vrot.slane %v9218_v45, 1  ;;  %v1794_v48 = vmax.f32 %v1666_v56, %v1735_v31  ;;  %v11974_v43 = vld [vmem:[#allocation55_spill] sm:$0xff] }
 0x27b   : > { %11964 = vst [vmem:[#allocation49_spill] sm:$0xff] %v9742_v38  ;;  %vm11968_vm11 = vcmp.eq.s32.totalorder %v11967_v11, 4  ;;  %v11970_v17 = vrot.slane %v9218_v45, 7  ;;  %v11971_v12 = vrot.slane %v9215_v46, 7  ;;  %v1825_v10 = vsel %vm1313_vm8, %v1793_v62, %v1697_v49 }
 0x27c   : > { %v3065_v0 = vsel %vm1170_vm3, %v11966_v40, %v11965_v20  ;;  %v9752_v61 = vsel %vm11968_vm11, %v3341_v24, %v3245_v37  ;;  %v11972_v60 = vrot.slane %v9218_v45, 6  ;;  %v3404_v37 = vmax.f32 %v9659_v54, %v9379_v25  ;;  %v11975_v24 = vld [vmem:[#allocation44_spill] sm:$0xff] }
 0x27d   : > { %11969 = vst [vmem:[#allocation19_spill] sm:$0xff] %v9752_v61  ;;  %v3087_v57 = vmax.f32 %v2959_v36, %v3065_v0  ;;  %v3194_v27 = vsel %vm1219_vm1, %v11971_v12, %v11970_v17  ;;  %v5616_v30 = vpack.c.bf16 %v9398_v9, %v9398_v9  ;;  %v1853_v2 = vmax.f32 %v11973_v41, %v1825_v10  ;;  %v6213_v12 = vld [vmem:[#allocation2 + $0x80] ss:$16 sps:$4 sm:$0xff]  }
 0x27e   : > { %v9766_v31 = vsel %vm1268_vm0, %v3278_v32, %v11972_v60  ;;  %v1854_v36 = vmax.f32 %v11974_v43, %v1794_v48  ;;  %v1883_v56 = vmax.f32 %v1855_v50, %v1825_v10  ;;  %v11977_v49 = vmax.f32 %v11975_v24, %v11976_v52  ;;  %4379 = vmatmul.mubr.bf16.gmra.mxu1 %v6213_v12 }
 0x27f   : > { %v1885_v20 = vmax.f32 %v1825_v10, %v1827_v8  ;;  %v1886_v40 = vmax.f32 %v1794_v48, %v11976_v52  ;;  %v3215_v32 = vmax.f32 %v3087_v57, %v3194_v27  ;;  %v9779_v0 = vmax.f32 %v3404_v37, %v9742_v38  ;;  %2861 = vst [vmem:[#allocation2 + $0x88] sm:$0xf] %v5616_v30  ;;  %v11981_v27 = vld [vmem:[#allocation4_spill] sm:$0xff]  ;;  %v11983_v30 = vld [vmem:[#allocation21_spill] sm:$0xff] }
 0x280   : > { %v1884_v62 = vmax.f32 %v11977_v49, %v1794_v48  ;;  %v1881_v11 = vmax.f32 %v1853_v2, %v11963_v55  ;;  %v1882_v9 = vmax.f32 %v1854_v36, %v11975_v24  ;;  %v1911_v17 = vmax.f32 %v1883_v56, %v11973_v41  ;;  %v6215_v48 = vld [vmem:[#allocation2 + $0xa4] ss:$16 sps:$4 sm:$0xff]   ;;  %v11984_v36 = vld [vmem:[#allocation18_spill] sm:$0xff] }
 0x281   : > { %11978 = vst [vmem:[#allocation25_spill] sm:$0xff] %v9779_v0  ;;  %v9786_v60 = vmax.f32 %v1885_v20, %v11963_v55  ;;  %v9789_v8 = vmax.f32 %v1886_v40, %v11975_v24  ;;  %vm11982_vm14 = vcmp.eq.s32.totalorder %v11981_v27, 5  ;;  %v5617_v37 = vpack.c.bf16 %v9215_v46, %v9215_v46  ;;  %4386 = vmatprep.mubr.bf16.mxu1 %v6215_v48  ;;  %v11990_v40 = vld [vmem:[#allocation3_spill] sm:$0xff] }
 0x282   : > { %v1912_v50 = vmax.f32 %v1884_v62, %v11974_v43  ;;  %v9793_v10 = vsel %vm11982_vm14, %v3215_v32, %v3087_v57  ;;  %v1909_v2 = vmax.f32 %v1881_v11, %v11983_v30  ;;  %v1910_v56 = vmax.f32 %v1882_v9, %v11984_v36  ;;  %v11989_v62 = vld [vmem:[#allocation31_spill] sm:$0xff] }
 0x283   : > { %11979 = vst [vmem:[#allocation54_spill] sm:$0xff] %v9786_v60  ;;  %11980 = vst [vmem:[#allocation53_spill] sm:$0xff] %v9789_v8  ;;  %v9800_v52 = vmax.f32 %v1911_v17, %v11983_v30  ;;  %v9807_v24 = vmax.f32 %v9786_v60, %v11973_v41  ;;  %v9811_v57 = vmax.f32 %v9789_v8, %v11974_v43  ;;  %v2131_v46 = vrot.slane %v9786_v60, 2  ;;  %v6229_v0 = vld [vmem:[#allocation2 + $0xc0] ss:$16 sps:$4 sm:$0xff]  }
 0x284   : > { %v9803_v55 = vmax.f32 %v1912_v50, %v11984_v36  ;;  %v2132_v49 = vrot.slane %v9789_v8, 2  ;;  %2862 = vst [vmem:[#allocation2 + $0x98] sm:$0xf] %v5617_v37  ;;  %v9816_v20 = vmax.f32 %v1909_v2, %v11989_v62  ;;  %v9819_v32 = vmax.f32 %v1910_v56, %v11990_v40  ;;  %v6230_v38 = vld [vmem:[#allocation2 + $0xe4] ss:$16 sps:$4 sm:$0xff]  }
 0x285   : > { %11985 = vst [vmem:[#allocation62_spill] sm:$0xff] %v9800_v52  ;;  %11987 = vst [vmem:[#allocation24_spill] sm:$0xff] %v9807_v24  ;;  %v2127_v11 = vrot.slane %v9800_v52, 2  ;;  %v2129_v9 = vrot.slane %v9807_v24, 2  ;;  %v2130_v43 = vrot.slane %v9811_v57, 2  ;;  %v11991_v50 = vrot.slane %v11899_v23, 2 }
 0x286   : > { %11986 = vst [vmem:[#allocation63_spill] sm:$0xff] %v9803_v55  ;;  %11988 = vst [vmem:[#allocation64_spill] sm:$0xff] %v9811_v57  ;;  %v2128_v41 = vrot.slane %v9803_v55, 2  ;;  %v2133_v17 = vsel %vm1121_vm2, %v2131_v46, %v2132_v49  ;;  %v2125_v48 = vrot.slane %v9816_v20, 2  ;;  %v2126_v27 = vrot.slane %v9819_v32, 2  ;;  %4387 = vmatmul.mubr.bf16.gmra.mxu1 %v6220_v4 }
 0x287   : > { %v2164_v12 = vsel %vm1121_vm2, %v2132_v49, %v11991_v50  ;;  %v2195_v30 = vmax.f32 %v9786_v60, %v2133_v17  ;;  %v2134_v2 = vsel %vm1121_vm2, %v2130_v43, %v2131_v46  ;;  %v2135_v36 = vsel %vm1121_vm2, %v2129_v9, %v2130_v43 }
 0x288   : > { %v2137_v37 = vsel %vm1121_vm2, %v2127_v11, %v2128_v41  ;;  %v2136_v56 = vsel %vm1121_vm2, %v2128_v41, %v2129_v9  ;;  %v2138_v62 = vsel %vm1121_vm2, %v2126_v27, %v2127_v11  ;;  %v2139_v40 = vsel %vm1121_vm2, %v2125_v48, %v2126_v27  ;;  %v6222_v11 = vld [vmem:[#allocation2 + $0xc4] ss:$16 sps:$4 sm:$0xff]  }
 0x289   : > { %v2191_v49 = vmax.f32 %v9800_v52, %v2137_v37  ;;  %v11992_v50 = vrot.slane %v11920_v33, 2  ;;  %v2192_v46 = vmax.f32 %v9803_v55, %v2136_v56  ;;  %v2189_v41 = vmax.f32 %v9816_v20, %v2139_v40  ;;  %4394 = vmatprep.mubr.bf16.mxu1 %v6222_v11 }
 0x28a   : > { %v2190_v9 = vmax.f32 %v9819_v32, %v2138_v62  ;;  %v2193_v37 = vmax.f32 %v9807_v24, %v2135_v36  ;;  %v2194_v63 = vmax.f32 %v9811_v57, %v2134_v2  ;;  %v2196_v27 = vmax.f32 %v9789_v8, %v2164_v12 }
 0x28b   : > { %v2140_v17 = vsel %vm1121_vm2, %v11992_v50, %v2125_v48  ;;  %v2224_v48 = vsel %vm1121_vm2, %v2192_v46, %v9803_v55  ;;  %v2253_v56 = vrot.slane %v9816_v20, 1  ;;  %v2254_v62 = vrot.slane %v9819_v32, 1 }
 0x28c   : > { %v2188_v43 = vmax.f32 %v11920_v33, %v2140_v17  ;;  %v2222_v36 = vsel %vm1121_vm2, %v2190_v9, %v9819_v32  ;;  %v2255_v2 = vrot.slane %v9800_v52, 1  ;;  %v2226_v12 = vsel %vm1121_vm2, %v2194_v63, %v9811_v57 }
 0x28d   : > { %v2228_v4 = vsel %vm1121_vm2, %v2196_v27, %v9789_v8  ;;  %v2256_v50 = vrot.slane %v9803_v55, 1  ;;  %v2257_v17 = vrot.slane %v9807_v24, 1  ;;  %v2258_v46 = vrot.slane %v9811_v57, 1 }
 0x28e   : > { %v2220_v40 = vsel %vm1121_vm2, %v2188_v43, %v11920_v33  ;;  %v2259_v43 = vrot.slane %v9786_v60, 1  ;;  %v2260_v9 = vrot.slane %v9789_v8, 1  ;;  %v2266_v11 = vsel %vm1170_vm3, %v2254_v62, %v2255_v2  ;;  %4395 = vmatmul.mubr.bf16.gmra.mxu1 %v6229_v0 }
 0x28f   : > { %v2264_v63 = vsel %vm1170_vm3, %v2256_v50, %v2257_v17  ;;  %v2265_v47 = vsel %vm1170_vm3, %v2255_v2, %v2256_v50  ;;  %v2267_v27 = vsel %vm1170_vm3, %v2253_v56, %v2254_v62  ;;  %v2268_v39 = vsel %vm1170_vm3, %v11993_v7, %v2253_v56  ;;  %4402 = vmatprep.mubr.bf16.mxu1 %v6230_v38 }
 0x290   : > { %v2261_v18 = vsel %vm1170_vm3, %v2259_v43, %v2260_v9  ;;  %v2262_v45 = vsel %vm1170_vm3, %v2258_v46, %v2259_v43  ;;  %v2263_v25 = vsel %vm1170_vm3, %v2257_v17, %v2258_v46  ;;  %v2292_v2 = vsel %vm1170_vm3, %v2260_v9, %v11994_v58 }
 0x291   : > { %v2316_v62 = vmax.f32 %v2220_v40, %v2268_v39  ;;  %v2317_v50 = vmax.f32 %v2189_v41, %v2267_v27  ;;  %v2318_v26 = vmax.f32 %v2222_v36, %v2266_v11  ;;  %v2319_v34 = vmax.f32 %v2191_v49, %v2265_v47 }
 0x292   : > { %v2320_v7 = vmax.f32 %v2224_v48, %v2264_v63  ;;  %v2321_v56 = vmax.f32 %v2193_v37, %v2263_v25  ;;  %v2322_v61 = vmax.f32 %v2226_v12, %v2262_v45  ;;  %v2323_v29 = vmax.f32 %v2195_v30, %v2261_v18 }
 0x293   : > { %v2324_v16 = vmax.f32 %v2228_v4, %v2292_v2  ;;  %v2348_v43 = vsel %vm1170_vm3, %v2316_v62, %v2220_v40  ;;  %v9907_v17 = vsel %vm1170_vm3, %v2318_v26, %v2222_v36  ;;  %v2381_v58 = vrot.slane %v9816_v20, 7 }
 0x294   : > { %v9912_v47 = vsel %vm1170_vm3, %v2320_v7, %v2224_v48  ;;  %v9916_v45 = vsel %vm1170_vm3, %v2322_v61, %v2226_v12  ;;  %v2382_v18 = vrot.slane %v9819_v32, 7  ;;  %v2383_v25 = vrot.slane %v9800_v52, 7  ;;  %v6234_v7 = vld [vmem:[#allocation2 + $0xe0] ss:$16 sps:$4 sm:$0xff]  }
 0x295   : > { %v9922_v26 = vsel %vm1170_vm3, %v2324_v16, %v2228_v4  ;;  %v2384_v39 = vrot.slane %v9803_v55, 7  ;;  %v2385_v0 = vrot.slane %v9807_v24, 7  ;;  %v2386_v30 = vrot.slane %v9811_v57, 7 }
 0x296   : > { %v2387_v49 = vrot.slane %v9786_v60, 7  ;;  %v2388_v61 = vrot.slane %v9789_v8, 7  ;;  %v2394_v41 = vsel %vm1219_vm1, %v2382_v18, %v2383_v25  ;;  %v2395_v38 = vsel %vm1219_vm1, %v2381_v58, %v2382_v18  ;;  %4403 = vmatmul.mubr.bf16.gmra.mxu1 %v6234_v7 }
 0x297   : > { %v2391_v16 = vsel %vm1219_vm1, %v2385_v0, %v2386_v30  ;;  %v2392_v37 = vsel %vm1219_vm1, %v2384_v39, %v2385_v0  ;;  %v2393_v48 = vsel %vm1219_vm1, %v2383_v25, %v2384_v39  ;;  %v11995_v40 = vrot.slane %v11920_v33, 7  ;;  %v6236_v0 = vld [vmem:[#allocation2 + $0x104] ss:$16 sps:$4 sm:$0xff]  }
 0x298   : > { %v2389_v12 = vsel %vm1219_vm1, %v2387_v49, %v2388_v61  ;;  %v2390_v4 = vsel %vm1219_vm1, %v2386_v30, %v2387_v49  ;;  %v11996_v46 = vrot.slane %v11899_v23, 7  ;;  %v2444_v11 = vmax.f32 %v2348_v43, %v9453_v42  ;;  %v11997_v49 = vld [vmem:[#allocation50_spill] sm:$0xff]  ;;  %v11999_v43 = vld [vmem:[#allocation37_spill] sm:$0xff]  ;;  %4410 = vmatprep.mubr.bf16.mxu1 %v6236_v0 }
 0x299   : > { %v2396_v36 = vsel %vm1219_vm1, %v11995_v40, %v2381_v58  ;;  %v2446_v2 = vmax.f32 %v9907_v17, %v2395_v38  ;;  %v2447_v62 = vmax.f32 %v2319_v34, %v2394_v41  ;;  %v2448_v58 = vmax.f32 %v9912_v47, %v2393_v48  ;;  %v12001_v17 = vld [vmem:[#allocation36_spill] sm:$0xff] }
 0x29a   : > { %v2420_v9 = vsel %vm1219_vm1, %v2388_v61, %v11996_v46  ;;  %v2445_v27 = vmax.f32 %v2317_v50, %v2396_v36  ;;  %v2449_v18 = vmax.f32 %v2321_v56, %v2392_v37  ;;  %v2450_v25 = vmax.f32 %v9916_v45, %v2391_v16 }
 0x29b   : > { %v2421_v63 = vmax.f32 %v9462_v13, %v2420_v9  ;;  %v2451_v39 = vmax.f32 %v2323_v29, %v2390_v4  ;;  %v2452_v30 = vmax.f32 %v9922_v26, %v2389_v12  ;;  %vm11998_vm15 = vcmp.eq.s32.totalorder %v11997_v49, 0 }
 0x29c   : > { %vm12000_vm12 = vcmp.eq.s32.totalorder %v11999_v43, 12  ;;  %vm12002_vm13 = vcmp.eq.s32.totalorder %v12001_v17, 13  ;;  %v2481_v47 = vsel %vm1264_vm6, %v2449_v18, %v2321_v56  ;;  %v2509_v26 = vrot.slane %v9816_v20, 6 }
 0x29d   : > { %v9960_v42 = vsel %vm11998_vm15, %v2421_v63, %v9462_v13  ;;  %v2477_v61 = vsel %vm12000_vm12, %v2445_v27, %v2317_v50  ;;  %v2479_v41 = vsel %vm12002_vm13, %v2447_v62, %v2319_v34  ;;  %v2483_v45 = vsel %vm1266_vm4, %v2451_v39, %v2323_v29  ;;  %vm12016_vm14 = vmmov %vm12002_vm13 }
 0x29e   : > { %v2510_v38 = vrot.slane %v9819_v32, 6  ;;  %v2511_v13 = vrot.slane %v9800_v52, 6  ;;  %v2512_v16 = vrot.slane %v9803_v55, 6  ;;  %v2513_v50 = vrot.slane %v9807_v24, 6 }
 0x29f   : > { %v2514_v34 = vrot.slane %v9811_v57, 6  ;;  %v2515_v37 = vrot.slane %v9786_v60, 6  ;;  %v2516_v56 = vrot.slane %v9789_v8, 6  ;;  %v12003_v48 = vrot.slane %v11920_v33, 6  ;;  %v12013_v8 = vld [vmem:[#allocation20_spill] sm:$0xff] }
 0x2a0   : > { %v2523_v29 = vsel %vm1268_vm0, %v2509_v26, %v2510_v38  ;;  %v2520_v12 = vsel %vm1268_vm0, %v2512_v16, %v2513_v50  ;;  %v2521_v4 = vsel %vm1268_vm0, %v2511_v13, %v2512_v16  ;;  %v2522_v46 = vsel %vm1268_vm0, %v2510_v38, %v2511_v13  ;;  %v6240_v38 = vld [vmem:[#allocation2 + $0x100] ss:$16 sps:$4 sm:$0xff]   ;;  %v12014_v57 = vld [vmem:[#allocation28_spill] sm:$0xff] }
 0x2a1   : > { %v2524_v40 = vsel %vm1268_vm0, %v12003_v48, %v2509_v26  ;;  %v2519_v36 = vsel %vm1268_vm0, %v2513_v50, %v2514_v34  ;;  %v2517_v9 = vsel %vm1268_vm0, %v2515_v37, %v2516_v56  ;;  %v2518_v63 = vsel %vm1268_vm0, %v2514_v34, %v2515_v37  ;;  %v6242_v34 = vld [vmem:[#allocation2 + $0x124] ss:$16 sps:$4 sm:$0xff]   ;;  %4411 = vmatmul.mubr.bf16.gmra.mxu1 %v6240_v38 }
 0x2a2   : > { %v12004_v27 = vrot.slane %v11899_v23, 6  ;;  %v2572_v7 = vmax.f32 %v2444_v11, %v9470_v15  ;;  %v2573_v39 = vmax.f32 %v2477_v61, %v2524_v40  ;;  %v2574_v0 = vmax.f32 %v2446_v2, %v2523_v29  ;;  %v12005_v23 = vld [vmem:[#allocation40_spill] sm:$0xff]  ;;  %v12010_v29 = vld [vmem:[#allocation35_spill] sm:$0xff]  ;;  %v12011_v40 = vld [vmem:[#allocation45_spill] sm:$0xff]  ;;  %4418 = vmatprep.mubr.bf16.mxu1 %v6242_v34 }
 0x2a3   : > { %v2575_v26 = vmax.f32 %v2479_v41, %v2522_v46  ;;  %v2576_v13 = vmax.f32 %v2448_v58, %v2521_v4  ;;  %v2577_v16 = vmax.f32 %v2481_v47, %v2520_v12  ;;  %v2578_v50 = vmax.f32 %v2450_v25, %v2519_v36  ;;  %v12009_v15 = vld [vmem:[#allocation60_spill] sm:$0xff] }
 0x2a4   : > { %v10000_v62 = vsel %vm1268_vm0, %v2516_v56, %v12004_v27  ;;  %v2579_v48 = vmax.f32 %v2483_v45, %v2518_v63  ;;  %v2580_v37 = vmax.f32 %v2452_v30, %v2517_v9  ;;  %vm12006_vm10 = vcmp.eq.s32.totalorder %v12005_v23, 12  ;;  %v12007_v56 = vld [vmem:[#allocation39_spill] sm:$0xff]  ;;  %v12012_v30 = vld [vmem:[#allocation29_spill] sm:$0xff] }
 0x2a5   : > { %v2605_v43 = vsel %vm12006_vm10, %v2573_v39, %v2477_v61  ;;  %vm12008_vm11 = vcmp.eq.s32.totalorder %v12007_v56, 13  ;;  %v2632_v11 = vmax.f32 %v12009_v15, %v2572_v7  ;;  %v2609_v2 = vsel %vm1313_vm8, %v2577_v16, %v2481_v47 }
 0x2a6   : > { %v2607_v27 = vsel %vm12008_vm11, %v2575_v26, %v2479_v41  ;;  %v2611_v58 = vsel %vm1315_vm9, %v2579_v48, %v2483_v45  ;;  %v2633_v25 = vmax.f32 %v12010_v29, %v2605_v43  ;;  %v2634_v36 = vmax.f32 %v12011_v40, %v2574_v0 }
 0x2a7   : > { %v2635_v12 = vmax.f32 %v12012_v30, %v2607_v27  ;;  %v2636_v61 = vmax.f32 %v2572_v7, %v2576_v13  ;;  %v2637_v4 = vmax.f32 %v2605_v43, %v2609_v2  ;;  %v2638_v46 = vmax.f32 %v2574_v0, %v2578_v50 }
 0x2a8   : > { %v2639_v41 = vmax.f32 %v2607_v27, %v2611_v58  ;;  %v2640_v9 = vmax.f32 %v2576_v13, %v2580_v37  ;;  %v10018_v63 = vmax.f32 %v2632_v11, %v12011_v40  ;;  %v2661_v47 = vmax.f32 %v2633_v25, %v12012_v30  ;;  %v6246_v11 = vld [vmem:[#allocation2 + $0x120] ss:$16 sps:$4 sm:$0xff]  }
 0x2a9   : > { %v2662_v39 = vmax.f32 %v2634_v36, %v2572_v7  ;;  %v2663_v26 = vmax.f32 %v2635_v12, %v2605_v43  ;;  %v2664_v45 = vmax.f32 %v2636_v61, %v2574_v0  ;;  %v2665_v38 = vmax.f32 %v2637_v4, %v2607_v27  ;;  %v6248_v61 = vld [vmem:[#allocation2 + $0x144] ss:$16 sps:$4 sm:$0xff]   ;;  %4419 = vmatmul.mubr.bf16.gmra.mxu1 %v6246_v11 }
 0x2aa   : > { %v2666_v16 = vmax.f32 %v2638_v46, %v2576_v13  ;;  %v2667_v48 = vmax.f32 %v2639_v41, %v2609_v2  ;;  %v2668_v18 = vmax.f32 %v2640_v9, %v2578_v50  ;;  %v2669_v34 = vmax.f32 %v2609_v2, %v2611_v58  ;;  %4426 = vmatprep.mubr.bf16.mxu1 %v6248_v61 }
 0x2ab   : > { %v2670_v23 = vmax.f32 %v2578_v50, %v2580_v37  ;;  %v2689_v24 = vmax.f32 %v2661_v47, %v12014_v57  ;;  %v2690_v55 = vmax.f32 %v2662_v39, %v12009_v15  ;;  %v2691_v52 = vmax.f32 %v2663_v26, %v12010_v29  ;;  %v12015_v37 = vld [vmem:[#allocation52_spill] sm:$0xff] }
 0x2ac   : > { %v2692_v25 = vmax.f32 %v2664_v45, %v12011_v40  ;;  %v2693_v36 = vmax.f32 %v2665_v38, %v12012_v30  ;;  %v2694_v12 = vmax.f32 %v2666_v16, %v2572_v7  ;;  %v2695_v4 = vmax.f32 %v2667_v48, %v2605_v43  ;;  %v6252_v48 = vld [vmem:[#allocation2 + $0x140] ss:$16 sps:$4 sm:$0xff]  }
 0x2ad   : > { %v2696_v46 = vmax.f32 %v2668_v18, %v2574_v0  ;;  %v10028_v2 = vmax.f32 %v2669_v34, %v2607_v27  ;;  %v10030_v50 = vmax.f32 %v2670_v23, %v2576_v13  ;;  %v10033_v58 = vmax.f32 %v2689_v24, %v12015_v37 }
 0x2ae   : > { %v10036_v41 = vmax.f32 %v2690_v55, %v12013_v8  ;;  %v10039_v9 = vmax.f32 %v2691_v52, %v12014_v57  ;;  %v10042_v47 = vmax.f32 %v2692_v25, %v12009_v15  ;;  %v10045_v18 = vmax.f32 %v2693_v36, %v12010_v29 }
 0x2af   : > { %v10048_v13 = vmax.f32 %v2694_v12, %v12011_v40  ;;  %v10051_v23 = vmax.f32 %v2695_v4, %v12012_v30  ;;  %v10053_v24 = vmax.f32 %v2696_v46, %v2572_v7  ;;  %v10056_v55 = vmax.f32 %v10028_v2, %v2605_v43 }
 0x2b0   : > { %v10059_v52 = vmax.f32 %v10030_v50, %v2574_v0  ;;  %v2915_v57 = vrot.slane %v10028_v2, 2  ;;  %v11533_v27 = vrot.slane %v10030_v50, 2  ;;  %v3043_v16 = vrot.slane %v10028_v2, 1 }
 0x2b1   : > { %v11549_v15 = vrot.slane %v10051_v23, 2  ;;  %v2912_v29 = vrot.slane %v10053_v24, 2  ;;  %v11534_v40 = vrot.slane %v10051_v23, 1  ;;  %v3040_v30 = vrot.slane %v10053_v24, 1  ;;  %4427 = vmatmul.mubr.bf16.gmra.mxu1 %v6252_v48 }
 0x2b2   : > { %v2913_v7 = vrot.slane %v10056_v55, 2  ;;  %v2914_v43 = vrot.slane %v10059_v52, 2  ;;  %v2917_v0 = vsel %vm1121_vm2, %v2915_v57, %v11533_v27  ;;  %v3041_v39 = vrot.slane %v10056_v55, 1 }
 0x2b3   : > { %v2921_v26 = vsel %vm1121_vm2, %v11549_v15, %v2912_v29  ;;  %v2979_v45 = vmax.f32 %v10028_v2, %v2917_v0  ;;  %v3042_v38 = vrot.slane %v10059_v52, 1  ;;  %v11535_v46 = vrot.slane %v10030_v50, 1 }
 0x2b4   : > { %v10083_v34 = vsel %vm1121_vm2, %v2914_v43, %v2915_v57  ;;  %v2919_v11 = vsel %vm1121_vm2, %v2913_v7, %v2914_v43  ;;  %v10089_v25 = vsel %vm1121_vm2, %v2912_v29, %v2913_v7  ;;  %v2975_v36 = vmax.f32 %v10051_v23, %v2921_v26 }
 0x2b5   : > { %v2977_v61 = vmax.f32 %v10056_v55, %v2919_v11  ;;  %v10100_v37 = vsel %vm1170_vm3, %v3042_v38, %v3043_v16  ;;  %v3047_v57 = vsel %vm1170_vm3, %v3041_v39, %v3042_v38  ;;  %v10106_v29 = vsel %vm1170_vm3, %v3040_v30, %v3041_v39 }
 0x2b6   : > { %v3049_v7 = vsel %vm1170_vm3, %v11534_v40, %v3040_v30  ;;  %v3045_v43 = vsel %vm1170_vm3, %v3043_v16, %v11535_v46  ;;  %v11543_v48 = vrot.slane %v10048_v13, 7  ;;  %v11538_v38 = vrot.slane %v10051_v23, 7 }
 0x2b7   : > { %v3103_v0 = vmax.f32 %v2975_v36, %v3049_v7  ;;  %v3105_v26 = vmax.f32 %v2977_v61, %v3047_v57  ;;  %v3107_v11 = vmax.f32 %v2979_v45, %v3045_v43  ;;  %v11537_v39 = vrot.slane %v10053_v24, 7 }
 0x2b8   : > { %v11536_v27 = vrot.slane %v10056_v55, 7  ;;  %v11540_v4 = vrot.slane %v10059_v52, 7  ;;  %v11539_v30 = vrot.slane %v10028_v2, 7  ;;  %v11548_v12 = vrot.slane %v10048_v13, 6 }
 0x2b9   : > { %v11547_v40 = vrot.slane %v10051_v23, 6  ;;  %v3178_v16 = vsel %vm1219_vm1, %v11543_v48, %v11538_v38  ;;  %v11542_v36 = vrot.slane %v10053_v24, 6  ;;  %v11541_v61 = vrot.slane %v10056_v55, 6 }
 0x2ba   : > { %v3176_v45 = vsel %vm1219_vm1, %v11537_v39, %v11536_v27  ;;  %v3174_v57 = vsel %vm1219_vm1, %v11540_v4, %v11539_v30  ;;  %v3231_v7 = vmax.f32 %v3103_v0, %v3178_v16  ;;  %v11546_v46 = vrot.slane %v10059_v52, 6  ;;  %v12018_v4 = vld [vmem:[#allocation51_spill] sm:$0xff] }
 0x2bb   : > { %v3233_v43 = vmax.f32 %v3105_v26, %v3176_v45  ;;  %v3235_v27 = vmax.f32 %v3107_v11, %v3174_v57  ;;  %v11544_v39 = vrot.slane %v10028_v2, 6  ;;  %v3304_v38 = vsel %vm1268_vm0, %v11542_v36, %v11541_v61 }
 0x2bc   : > { %v3306_v16 = vsel %vm1268_vm0, %v11548_v12, %v11547_v40  ;;  %v3263_v45 = vsel %vm12016_vm14, %v3231_v7, %v3103_v0  ;;  %v12017_v30 = vmax.f32 %v9960_v42, %v10000_v62  ;;  %vm12019_vm15 = vcmp.eq.s32.totalorder %v12018_v4, 0 }
 0x2bd   : > { %v3265_v57 = vsel %vm1264_vm6, %v3233_v43, %v3105_v26  ;;  %v3172_v36 = vrot.slane %v10030_v50, 7  ;;  %v3267_v48 = vsel %vm1266_vm4, %v3235_v27, %v3107_v11  ;;  %v3302_v59 = vsel %vm1268_vm0, %v11546_v46, %v11544_v39  ;;  %vm12021_vm4 = vmmov %vm12008_vm11 }
 0x2be   : > { %v2581_v61 = vsel %vm12019_vm15, %v12017_v30, %v9960_v42  ;;  %v3359_v17 = vmax.f32 %v3263_v45, %v3306_v16  ;;  %v3361_v0 = vmax.f32 %v3265_v57, %v3304_v38  ;;  %v3363_v26 = vmax.f32 %v3267_v48, %v3302_v59 }
 0x2bf   : > { %v2613_v62 = vmax.f32 %v2581_v61, %v9100_v1  ;;  %v10179_v7 = vmax.f32 %v9544_v35, %v2581_v61  ;;  %v12020_v42 = vmax.f32 %v9505_v28, %v9516_v6  ;;  %v3300_v38 = vrot.slane %v10030_v50, 6 }
 0x2c0   : > { %v10188_v27 = vsel %vm12021_vm4, %v3359_v17, %v3263_v45  ;;  %v10192_v11 = vsel %vm1313_vm8, %v3361_v0, %v3265_v57  ;;  %v10199_v35 = vsel %vm1315_vm9, %v3363_v26, %v3267_v48  ;;  %v12023_v57 = vrot.slane %v9537_v14, 2 }
 0x2c1   : > { %v10184_v53 = vmax.f32 %v12020_v42, %v2581_v61  ;;  %v10202_v28 = vmax.f32 %v2613_v62, %v9516_v6  ;;  %v2887_v56 = vrot.slane %v10179_v7, 2  ;;  %v3015_v61 = vrot.slane %v10179_v7, 1 }
 0x2c2   : > { %v3143_v16 = vrot.slane %v10179_v7, 7  ;;  %v12022_v6 = vrot.slane %v9528_v51, 2  ;;  %v12024_v17 = vmov %v12023_v57  ;;  %v12025_v26 = vrot.slane %v9519_v5, 2 }
 0x2c3   : > { %v2889_v30 = vrot.slane %v10184_v53, 2  ;;  %v3017_v43 = vrot.slane %v10184_v53, 1  ;;  %v5608_v19 = vpack.c.bf16 %v10202_v28, %v10202_v28  ;;  %v11545_v48 = vrot.slane %v10202_v28, 2 }
 0x2c4   : > { %v2945_v0 = vsel %vm1121_vm2, %v2887_v56, %v12024_v17  ;;  %v2946_v62 = vsel %vm1121_vm2, %v12025_v26, %v2887_v56  ;;  %v11550_v22 = vrot.slane %v10202_v28, 1  ;;  %v3141_v15 = vrot.slane %v10202_v28, 7 }
 0x2c5   : > { %v2943_v45 = vsel %vm1121_vm2, %v2889_v30, %v12022_v6  ;;  %v2944_v59 = vsel %vm1121_vm2, %v12023_v57, %v2889_v30  ;;  %2853 = vst [vmem:[#allocation2 + $0x8] sm:$0xf] %v5608_v19  ;;  %v12026_v6 = vmov %v12025_v26  ;;  %v2950_v57 = vmax.f32 %v9519_v5, %v2946_v62 }
 0x2c6   : > { %v2952_v42 = vmax.f32 %v9537_v14, %v2944_v59  ;;  %v2953_v39 = vmax.f32 %v10184_v53, %v2943_v45  ;;  %v2947_v30 = vsel %vm1121_vm2, %v11545_v48, %v12026_v6  ;;  %v2951_v17 = vmax.f32 %v10179_v7, %v2945_v0 }
 0x2c7   : > { %v2949_v56 = vmax.f32 %v10202_v28, %v2947_v30  ;;  %v12027_v19 = vrot.slane %v9528_v51, 1  ;;  %v12028_v26 = vrot.slane %v9537_v14, 1  ;;  %v2982_v0 = vsel %vm1121_vm2, %v2950_v57, %v9519_v5 }
 0x2c8   : > { %v2984_v45 = vsel %vm1121_vm2, %v2952_v42, %v9537_v14  ;;  %v12030_v42 = vrot.slane %v9519_v5, 1  ;;  %v12032_v60 = vrot.slane %v9537_v14, 7  ;;  %vm12036_vm6 = vcmp.eq.s32.totalorder %v11997_v49, 0 }
 0x2c9   : > { %v3071_v59 = vsel %vm1170_vm3, %v3017_v43, %v12027_v19  ;;  %v3072_v62 = vsel %vm1170_vm3, %v12028_v26, %v3017_v43  ;;  %v12029_v6 = vmov %v12028_v26  ;;  %v12037_v1 = vrot.slane %v9519_v5, 6 }
 0x2ca   : > { %v3073_v30 = vsel %vm1170_vm3, %v3015_v61, %v12029_v6  ;;  %v3074_v48 = vsel %vm1170_vm3, %v12030_v42, %v3015_v61  ;;  %v12031_v19 = vmov %v12030_v42  ;;  %v3080_v40 = vmax.f32 %v2984_v45, %v3072_v62 }
 0x2cb   : > { %v3075_v43 = vsel %vm1170_vm3, %v11550_v22, %v12031_v19  ;;  %v3078_v46 = vmax.f32 %v2982_v0, %v3074_v48  ;;  %v3079_v57 = vmax.f32 %v2951_v17, %v3073_v30  ;;  %v3081_v12 = vmax.f32 %v2953_v39, %v3071_v59 }
 0x2cc   : > { %v3077_v26 = vmax.f32 %v2949_v56, %v3075_v43  ;;  %v3145_v6 = vrot.slane %v10184_v53, 7  ;;  %v3201_v61 = vsel %vm1219_vm1, %v3143_v16, %v12032_v60  ;;  %v3112_v19 = vsel %vm1170_vm3, %v3080_v40, %v2984_v45 }
 0x2cd   : > { %v3110_v42 = vsel %vm1170_vm3, %v3078_v46, %v2982_v0  ;;  %v12033_v48 = vrot.slane %v9519_v5, 7  ;;  %v3269_v17 = vrot.slane %v10202_v28, 6  ;;  %v12034_v56 = vrot.slane %v9528_v51, 7 }
 0x2ce   : > { %v3200_v46 = vsel %vm1219_vm1, %v12032_v60, %v3145_v6  ;;  %v3208_v43 = vmax.f32 %v3112_v19, %v3201_v61  ;;  %v3271_v22 = vrot.slane %v10179_v7, 6  ;;  %v12038_v61 = vld [vmem:[#allocation8_spill] sm:$0xff]  ;;  %v12040_v19 = vrot.slane %v9528_v51, 6 }
 0x2cf   : > { %v3202_v39 = vsel %vm1219_vm1, %v12033_v48, %v3143_v16  ;;  %v3199_v59 = vsel %vm1219_vm1, %v3145_v6, %v12034_v56  ;;  %v12035_v62 = vmov %v12033_v48  ;;  %v3204_v16 = vsel %vm1219_vm1, %v3172_v36, %v3141_v15 }
 0x2d0   : > { %v3203_v40 = vsel %vm1219_vm1, %v3141_v15, %v12035_v62  ;;  %v3205_v45 = vmax.f32 %v3077_v26, %v3204_v16  ;;  %v3207_v30 = vmax.f32 %v3079_v57, %v3202_v39  ;;  %v3209_v48 = vmax.f32 %v3081_v12, %v3200_v46 }
 0x2d1   : > { %v3206_v0 = vmax.f32 %v3110_v42, %v3203_v40  ;;  %v3210_v56 = vmax.f32 %v9608_v44, %v3199_v59  ;;  %v3273_v6 = vrot.slane %v10184_v53, 6  ;;  %v3331_v15 = vsel %vm1268_vm0, %v3269_v17, %v12037_v1 }
 0x2d2   : > { %v3237_v60 = vsel %vm12036_vm6, %v3205_v45, %v3077_v26  ;;  %v3239_v62 = vsel %vm7026_vm5, %v3207_v30, %v3079_v57  ;;  %v3332_v44 = vsel %vm1268_vm0, %v3300_v38, %v3269_v17  ;;  %vm12039_vm9 = vcmp.eq.s32.totalorder %v12038_v61, 2  ;;  %vm12044_vm5 = vmmov %vm12019_vm15 }
 0x2d3   : > { %v3241_v42 = vsel %vm12039_vm9, %v3209_v48, %v3081_v12  ;;  %v3327_v49 = vsel %vm1268_vm0, %v3273_v6, %v12040_v19  ;;  %v12041_v21 = vrot.slane %v9537_v14, 6  ;;  %v12043_v39 = vrot.slane %v9519_v5, 6 }
 0x2d4   : > { %v3333_v17 = vmax.f32 %v3237_v60, %v3332_v44  ;;  %v3334_v51 = vmax.f32 %v3206_v0, %v3331_v15  ;;  %v10334_v16 = vmax.f32 %v3210_v56, %v3327_v49  ;;  %v5610_v45 = vpack.c.bf16 %v10179_v7, %v10179_v7  ;;  %v12046_v0 = vld [vmem:[#allocation33_spill] sm:$0xff]  ;;  %v12049_v7 = vld [vmem:[#allocation10_spill] sm:$0xff] }
 0x2d5   : > { %v3328_v26 = vsel %vm1268_vm0, %v12041_v21, %v3273_v6  ;;  %v12042_v1 = vmov %v12041_v21  ;;  %v3330_v12 = vsel %vm1268_vm0, %v12043_v39, %v3271_v22  ;;  %v5612_v5 = vpack.c.bf16 %v10184_v53, %v10184_v53  ;;  %v12052_v44 = vld [vmem:[#allocation22_spill] sm:$0xff]  ;;  %v12054_v21 = vld [vmem:[#allocation25_spill] sm:$0xff] }
 0x2d6   : > { %v3329_v57 = vsel %vm1268_vm0, %v3271_v22, %v12042_v1  ;;  %v3335_v46 = vmax.f32 %v3239_v62, %v3330_v12  ;;  %v3337_v40 = vmax.f32 %v3241_v42, %v3328_v26  ;;  %v3365_v14 = vsel %vm12044_vm5, %v3333_v17, %v3237_v60  ;;  %2855 = vst [vmem:[#allocation2 + $0x28] sm:$0xf] %v5610_v45  ;;  %v12051_v60 = vld [vmem:[#allocation49_spill] sm:$0xff] }
 0x2d7   : > { %v3336_v59 = vmax.f32 %v3208_v43, %v3329_v57  ;;  %v12045_v22 = vmax.f32 %v9793_v10, %v9766_v31  ;;  %vm12047_vm8 = vcmp.eq.s32.totalorder %v12046_v0, 5  ;;  %vm12050_vm12 = vcmp.eq.s32.totalorder %v12049_v7, 2  ;;  %2857 = vst [vmem:[#allocation2 + $0x48] sm:$0xf] %v5612_v5 }
 0x2d8   : > { %v3367_v56 = vsel %vm7055_vm7, %v3335_v46, %v3239_v62  ;;  %v3369_v4 = vsel %vm12050_vm12, %v3337_v40, %v3241_v42  ;;  %v3398_v6 = vmax.f32 %v3334_v51, %v10334_v16  ;;  %v3402_v53 = vmax.f32 %v10334_v16, %v12051_v60 }
 0x2d9   : > { %v3400_v30 = vmax.f32 %v3336_v59, %v9659_v54  ;;  %v10349_v43 = vsel %vm12047_vm8, %v12045_v22, %v9793_v10  ;;  %v3397_v15 = vmax.f32 %v3365_v14, %v3369_v4  ;;  %v3399_v61 = vmax.f32 %v3367_v56, %v12052_v44  ;;  %v12053_v10 = vld [vmem:[#allocation19_spill] sm:$0xff] }
 0x2da   : > { %v3401_v19 = vmax.f32 %v3369_v4, %v12053_v10  ;;  %v3426_v49 = vmax.f32 %v3398_v6, %v3336_v59  ;;  %v3430_v62 = vmax.f32 %v3402_v53, %v9659_v54  ;;  %v3403_v42 = vmax.f32 %v12052_v44, %v10349_v43  ;;  %v12055_v53 = vld [vmem:[#allocation74_spill] sm:$0xff] }
 0x2db   : > { %v3428_v31 = vmax.f32 %v3400_v30, %v10334_v16  ;;  %v3460_v26 = vmax.f32 %v12054_v21, %v10334_v16  ;;  %v3425_v1 = vmax.f32 %v3397_v15, %v3367_v56  ;;  %v3427_v57 = vmax.f32 %v3399_v61, %v3369_v4 }
 0x2dc   : > { %v3429_v12 = vmax.f32 %v3401_v19, %v12052_v44  ;;  %v5641_v17 = vpack.c.bf16 %v3426_v49, %v3426_v49  ;;  %v3458_v46 = vmax.f32 %v3430_v62, %v3336_v59  ;;  %v3431_v40 = vmax.f32 %v3403_v42, %v12053_v10  ;;  %v12056_v19 = vld [vmem:[#allocation72_spill] sm:$0xff]  ;;  %v12057_v62 = vld [vmem:[#allocation58_spill] sm:$0xff] }
 0x2dd   : > { %v3456_v39 = vmax.f32 %v3428_v31, %v3334_v51  ;;  %v3486_v45 = vmax.f32 %v3460_v26, %v3336_v59  ;;  %v5640_v30 = vpack.c.bf16 %v3425_v1, %v3425_v1  ;;  %v3455_v5 = vmax.f32 %v3427_v57, %v3365_v14  ;;  %v12058_v57 = vld [vmem:[#allocation38_spill] sm:$0xff] }
 0x2de   : > { %v3457_v0 = vmax.f32 %v3429_v12, %v3367_v56  ;;  %3638 = vst [vmem:[#allocation2 + $0x1c] sm:$0xf] %v5641_v17  ;;  %v3484_v48 = vmax.f32 %v3458_v46, %v3334_v51  ;;  %v3459_v7 = vmax.f32 %v3431_v40, %v3369_v4  ;;  %v3405_v15 = vmax.f32 %v12053_v10, %v12055_v53  ;;  %v12060_v17 = vld [vmem:[#allocation14_spill] sm:$0xff] }
 0x2df   : > { %v5643_v22 = vpack.c.bf16 %v3456_v39, %v3456_v39  ;;  %v5647_v6 = vpack.c.bf16 %v3486_v45, %v3486_v45  ;;  %3637 = vst [vmem:[#allocation2 + $0xc] sm:$0xf] %v5640_v30  ;;  %v5642_v61 = vpack.c.bf16 %v3455_v5, %v3455_v5  ;;  %v3406_v49 = vmax.f32 %v12051_v60, %v12056_v19  ;;  %v12061_v45 = vld [vmem:[#allocation75_spill] sm:$0xff] }
 0x2e0   : > { %v3483_v31 = vmax.f32 %v3457_v0, %v3365_v14  ;;  %v5598_v59 = vpack.c.bf16 %v12057_v62, %v12057_v62  ;;  %v5645_v42 = vpack.c.bf16 %v3484_v48, %v3484_v48  ;;  %v3485_v21 = vmax.f32 %v3459_v7, %v3367_v56  ;;  %v12059_v14 = vld [vmem:[#allocation67_spill] sm:$0xff]  ;;  %v12063_v7 = vld [vmem:[#allocation30_spill] sm:$0xff] }
 0x2e1   : > { %3640 = vst [vmem:[#allocation2 + $0x3c] sm:$0xf] %v5643_v22  ;;  %3644 = vst [vmem:[#allocation2 + $0x7c] sm:$0xf] %v5647_v6  ;;  %v3433_v51 = vmax.f32 %v3405_v15, %v10349_v43  ;;  %v5599_v26 = vpack.c.bf16 %v11920_v33, %v11920_v33  ;;  %v3434_v39 = vmax.f32 %v3406_v49, %v12058_v57  ;;  %v12062_v33 = vld [vmem:[#allocation73_spill] sm:$0xff] }
 0x2e2   : > { %3639 = vst [vmem:[#allocation2 + $0x2c] sm:$0xf] %v5642_v61  ;;  %v5644_v1 = vpack.c.bf16 %v3483_v31, %v3483_v31  ;;  %2091 = vst [vmem:[#allocation2 + $0x164] sm:$0xf] %v5598_v59  ;;  %v5618_v12 = vpack.c.bf16 %v12059_v14, %v12059_v14  ;;  %v5619_v46 = vpack.c.bf16 %v12060_v17, %v12060_v17  ;;  %v12064_v49 = vld [vmem:[#allocation61_spill] sm:$0xff]  ;;  %v12067_v17 = vld [vmem:[#allocation71_spill] sm:$0xff] }
 0x2e3   : > { %3642 = vst [vmem:[#allocation2 + $0x5c] sm:$0xf] %v5645_v42  ;;  %v5646_v40 = vpack.c.bf16 %v3485_v21, %v3485_v21  ;;  %v3461_v56 = vmax.f32 %v3433_v51, %v12052_v44  ;;  %2092 = vst [vmem:[#allocation2 + $0x174] sm:$0xf] %v5599_v26  ;;  %v3407_v30 = vmax.f32 %v10349_v43, %v12061_v45  ;;  %v12066_v21 = vld [vmem:[#allocation69_spill] sm:$0xff] }
 0x2e4   : > { %v3408_v5 = vmax.f32 %v12058_v57, %v12062_v33  ;;  %3641 = vst [vmem:[#allocation2 + $0x4c] sm:$0xf] %v5644_v1  ;;  %v3462_v22 = vmax.f32 %v3434_v39, %v9659_v54  ;;  %2863 = vst [vmem:[#allocation2 + $0xa8] sm:$0xf] %v5618_v12  ;;  %v5600_v0 = vpack.c.bf16 %v9816_v20, %v9816_v20  ;;  %v12065_v20 = vld [vmem:[#allocation70_spill] sm:$0xff]  ;;  %v3157_v51 = vrot.slane %v12066_v21, 7 }
 0x2e5   : > { %2864 = vst [vmem:[#allocation2 + $0xb8] sm:$0xf] %v5619_v46  ;;  %v5601_v48 = vpack.c.bf16 %v9819_v32, %v9819_v32  ;;  %v5620_v6 = vpack.c.bf16 %v12063_v7, %v12063_v7  ;;  %3643 = vst [vmem:[#allocation2 + $0x6c] sm:$0xf] %v5646_v40  ;;  %v3487_v15 = vmax.f32 %v3461_v56, %v3369_v4  ;;  %v2902_v42 = vrot.slane %v12065_v20, 2 }
 0x2e6   : > { %v3435_v61 = vmax.f32 %v3407_v30, %v12055_v53  ;;  %v3436_v31 = vmax.f32 %v3408_v5, %v12056_v19  ;;  %v5621_v62 = vpack.c.bf16 %v12064_v49, %v12064_v49  ;;  %v3488_v59 = vmax.f32 %v3462_v22, %v10334_v16  ;;  %2093 = vst [vmem:[#allocation2 + $0x184] sm:$0xf] %v5600_v0  ;;  %v6226_v26 = vld [vmem:[#allocation2 + $0x8] ss:$16 sps:$4 sm:$0xff]   ;;  %v6228_v4 = vld [vmem:[#allocation2 + $0xc] ss:$16 sps:$4 sm:$0xff]  }
 0x2e7   : > { %2094 = vst [vmem:[#allocation2 + $0x194] sm:$0xf] %v5601_v48  ;;  %2865 = vst [vmem:[#allocation2 + $0xc8] sm:$0xf] %v5620_v6  ;;  %v3030_v32 = vrot.slane %v12065_v20, 1  ;;  %v5648_v1 = vpack.c.bf16 %v3487_v15, %v3487_v15  ;;  %v3158_v12 = vrot.slane %v12065_v20, 7  ;;  %4507 = vmatprep.mubr.bf16.mxu0 %v6228_v4 }
 0x2e8   : > { %v3463_v39 = vmax.f32 %v3435_v61, %v12053_v10  ;;  %v3464_v14 = vmax.f32 %v3436_v31, %v12051_v60  ;;  %2866 = vst [vmem:[#allocation2 + $0xd8] sm:$0xf] %v5621_v62  ;;  %v5649_v16 = vpack.c.bf16 %v3488_v59, %v3488_v59  ;;  %v12068_v46 = vrot.slane %v12067_v17, 2  ;;  %4508 = vmatmul.mubr.bf16.vlgmr.msra.gmra.mxu0 %v6226_v26  ;;  %v12072_v62 = vld [vmem:[#allocation68_spill] sm:$0xff] }
 0x2e9   : > { %v12069_v56 = vrot.slane %v12066_v21, 2  ;;  %v12070_v5 = vrot.slane %v12067_v17, 1  ;;  %v6232_v0 = vld [vmem:[#allocation2 + $0x2c] ss:$16 sps:$4 sm:$0xff]   ;;  %3645 = vst [vmem:[#allocation2 + $0x8c] sm:$0xf] %v5648_v1  ;;  %v3187_v49 = vsel %vm1219_vm1, %v3157_v51, %v3158_v12 }
 0x2ea   : > { %v2930_v40 = vsel %vm1121_vm2, %v2902_v42, %v12068_v46  ;;  %v3489_v48 = vmax.f32 %v3463_v39, %v12052_v44  ;;  %v3490_v7 = vmax.f32 %v3464_v14, %v9659_v54  ;;  %3646 = vst [vmem:[#allocation2 + $0x9c] sm:$0xf] %v5649_v16  ;;  %v12071_v61 = vrot.slane %v12066_v21, 1  ;;  %4515 = vmatprep.mubr.bf16.mxu0 %v6232_v0  ;;  %v12075_v46 = vld [vmem:[#allocation62_spill] sm:$0xff]  ;;  %v12077_v0 = vld [vmem:[#allocation43_spill] sm:$0xff] }
 0x2eb   : > { %v2931_v30 = vsel %vm1121_vm2, %v12069_v56, %v2902_v42  ;;  %v3058_v22 = vsel %vm1170_vm3, %v3030_v32, %v12070_v5  ;;  %v2966_v15 = vmax.f32 %v12065_v20, %v2930_v40  ;;  %v12073_v44 = vrot.slane %v12072_v62, 7  ;;  %v6254_v40 = vld [vmem:[#allocation2 + $0x164] ss:$16 sps:$4 sm:$0xff]  }
 0x2ec   : > { %v2965_v6 = vmax.f32 %v12066_v21, %v2931_v30  ;;  %v3059_v31 = vsel %vm1170_vm3, %v12071_v61, %v3030_v32  ;;  %v3285_v59 = vrot.slane %v12066_v21, 6  ;;  %v5650_v42 = vpack.c.bf16 %v3489_v48, %v3489_v48  ;;  %v12076_v30 = vld [vmem:[#allocation63_spill] sm:$0xff]  ;;  %4434 = vmatprep.mubr.bf16.mxu1 %v6254_v40 }
 0x2ed   : > { %v3188_v54 = vsel %vm1219_vm1, %v12073_v44, %v3157_v51  ;;  %v5651_v26 = vpack.c.bf16 %v3490_v7, %v3490_v7  ;;  %v2998_v4 = vsel %vm1121_vm2, %v2966_v15, %v12065_v20  ;;  %v3286_v39 = vrot.slane %v12065_v20, 6  ;;  %v12079_v7 = vld [vmem:[#allocation65_spill] sm:$0xff] }
 0x2ee   : > { %v3093_v32 = vmax.f32 %v2965_v6, %v3059_v31  ;;  %v3094_v1 = vmax.f32 %v2998_v4, %v3058_v22  ;;  %v12074_v14 = vrot.slane %v12072_v62, 6  ;;  %v5602_v51 = vpack.c.bf16 %v12075_v46, %v12075_v46  ;;  %3647 = vst [vmem:[#allocation2 + $0xac] sm:$0xf] %v5650_v42  ;;  %v6258_v15 = vld [vmem:[#allocation2 + $0x160] ss:$16 sps:$4 sm:$0xff]   ;;  %v12080_v42 = vld [vmem:[#allocation46_spill] sm:$0xff] }
 0x2ef   : > { %3648 = vst [vmem:[#allocation2 + $0xbc] sm:$0xf] %v5651_v26  ;;  %v5603_v5 = vpack.c.bf16 %v12076_v30, %v12076_v30  ;;  %v12078_v22 = vmax.f32 %v10018_v63, %v12013_v8  ;;  %v5622_v6 = vpack.c.bf16 %v12079_v7, %v12079_v7  ;;  %v3315_v31 = vsel %vm1268_vm0, %v3285_v59, %v3286_v39  ;;  %v6260_v8 = vld [vmem:[#allocation2 + $0x184] ss:$16 sps:$4 sm:$0xff]  }
 0x2f0   : > { %v3316_v16 = vsel %vm1268_vm0, %v12074_v14, %v3285_v59  ;;  %v3221_v56 = vmax.f32 %v3093_v32, %v3188_v54  ;;  %v3126_v61 = vsel %vm1170_vm3, %v3094_v1, %v2998_v4  ;;  %2095 = vst [vmem:[#allocation2 + $0x1a4] sm:$0xf] %v5602_v51  ;;  %v5623_v44 = vpack.c.bf16 %v12072_v62, %v12072_v62  ;;  %v6235_v1 = vld [vmem:[#allocation2 + $0x28] ss:$16 sps:$4 sm:$0xff]  }
 0x2f1   : > { %v10450_v48 = vmax.f32 %v12078_v22, %v12077_v0  ;;  %v2905_v54 = vrot.slane %v10033_v58, 2  ;;  %v3222_v63 = vmax.f32 %v3126_v61, %v3187_v49  ;;  %vm12081_vm7 = vcmp.eq.s32.totalorder %v12080_v42, 8  ;;  %2096 = vst [vmem:[#allocation2 + $0x1b4] sm:$0xf] %v5603_v5  ;;  %2867 = vst [vmem:[#allocation2 + $0xe8] sm:$0xf] %v5622_v6  ;;  %4435 = vmatmul.mubr.bf16.gmra.mxu1 %v6258_v15 }
 0x2f2   : > { %v3253_v26 = vsel %vm12081_vm7, %v3221_v56, %v3093_v32  ;;  %2868 = vst [vmem:[#allocation2 + $0xf8] sm:$0xf] %v5623_v44  ;;  %v3033_v62 = vrot.slane %v10033_v58, 1  ;;  %v3159_v46 = vrot.slane %v12067_v17, 7  ;;  %v6238_v49 = vld [vmem:[#allocation2 + $0x4c] ss:$16 sps:$4 sm:$0xff]   ;;  %4442 = vmatprep.mubr.bf16.mxu1 %v6260_v8  ;;  %4516 = vmatmul.mubr.bf16.gmra.mxu0 %v6235_v1 }
 0x2f3   : > { %v2904_v14 = vrot.slane %v10450_v48, 2  ;;  %v3032_v4 = vrot.slane %v10450_v48, 1  ;;  %v3349_v59 = vmax.f32 %v3253_v26, %v3316_v16  ;;  %v3160_v51 = vrot.slane %v10450_v48, 7  ;;  %v12084_v0 = vld [vmem:[#allocation48_spill] sm:$0xff]  ;;  %4523 = vmatprep.mubr.bf16.mxu0 %v6238_v49 }
 0x2f4   : > { %v10468_v40 = vmax.f32 %v3222_v63, %v3315_v31  ;;  %v12082_v56 = vrot.slane %v12067_v17, 2  ;;  %v12083_v30 = vrot.slane %v12067_v17, 1  ;;  %vm12085_vm13 = vcmp.eq.s32.totalorder %v12084_v0, 8  ;;  %v12086_v49 = vld [vmem:[#allocation24_spill] sm:$0xff] }
 0x2f5   : > { %v2928_v32 = vsel %vm1121_vm2, %v2904_v14, %v2905_v54  ;;  %v10484_v22 = vsel %vm12085_vm13, %v3349_v59, %v3253_v26  ;;  %v3056_v15 = vsel %vm1170_vm3, %v3032_v4, %v3033_v62  ;;  %v3185_v44 = vsel %vm1219_vm1, %v3159_v46, %v3160_v51 }
 0x2f6   : > { %v2929_v16 = vsel %vm1121_vm2, %v12082_v56, %v2904_v14  ;;  %v3057_v5 = vsel %vm1170_vm3, %v12083_v30, %v3032_v4  ;;  %v2968_v6 = vmax.f32 %v10450_v48, %v2928_v32  ;;  %v3409_v61 = vmax.f32 %v12055_v53, %v10484_v22  ;;  %v6264_v56 = vld [vmem:[#allocation2 + $0x180] ss:$16 sps:$4 sm:$0xff]   ;;  %v12087_v30 = vld [vmem:[#allocation64_spill] sm:$0xff] }
 0x2f7   : > { %v2967_v7 = vmax.f32 %v12067_v17, %v2929_v16  ;;  %v3410_v31 = vmax.f32 %v12056_v19, %v10468_v40  ;;  %v3186_v8 = vsel %vm1219_vm1, %v3158_v12, %v3159_v46  ;;  %v3287_v26 = vrot.slane %v12067_v17, 6 }
 0x2f8   : > { %v3000_v63 = vsel %vm1121_vm2, %v2968_v6, %v10450_v48  ;;  %v3288_v14 = vrot.slane %v10450_v48, 6  ;;  %v3437_v4 = vmax.f32 %v3409_v61, %v12061_v45  ;;  %v5604_v32 = vpack.c.bf16 %v12086_v49, %v12086_v49  ;;  %v6266_v6 = vld [vmem:[#allocation2 + $0x1a4] ss:$16 sps:$4 sm:$0xff]  }
 0x2f9   : > { %v3095_v42 = vmax.f32 %v2967_v7, %v3057_v5  ;;  %v3438_v1 = vmax.f32 %v3410_v31, %v12062_v33  ;;  %v3096_v59 = vmax.f32 %v3000_v63, %v3056_v15  ;;  %v3314_v46 = vsel %vm1268_vm0, %v3286_v39, %v3287_v26  ;;  %v6241_v31 = vld [vmem:[#allocation2 + $0x48] ss:$16 sps:$4 sm:$0xff]   ;;  %4443 = vmatmul.mubr.bf16.gmra.mxu1 %v6264_v56  ;;  %v12088_v49 = vld [vmem:[#allocation5_spill] sm:$0xff] }
 0x2fa   : > { %v3313_v12 = vsel %vm1268_vm0, %v3287_v26, %v3288_v14  ;;  %v5605_v5 = vpack.c.bf16 %v12087_v30, %v12087_v30  ;;  %v3465_v0 = vmax.f32 %v3437_v4, %v10349_v43  ;;  %2097 = vst [vmem:[#allocation2 + $0x1c4] sm:$0xf] %v5604_v32  ;;  %v5624_v61 = vpack.c.bf16 %v12066_v21, %v12066_v21  ;;  %v12090_v56 = vld [vmem:[#allocation6_spill] sm:$0xff] }
 0x2fb   : > { %v3223_v16 = vmax.f32 %v3095_v42, %v3186_v8  ;;  %v3466_v7 = vmax.f32 %v3438_v1, %v12058_v57  ;;  %v3128_v15 = vsel %vm1170_vm3, %v3096_v59, %v3000_v63  ;;  %vm12089_vm10 = vcmp.eq.s32.totalorder %v12088_v49, 9  ;;  %v6244_v1 = vld [vmem:[#allocation2 + $0x6c] ss:$16 sps:$4 sm:$0xff]   ;;  %4450 = vmatprep.mubr.bf16.mxu1 %v6266_v6  ;;  %4524 = vmatmul.mubr.bf16.gmra.mxu0 %v6241_v31  ;;  %v6270_v49 = vld [vmem:[#allocation2 + $0x1a0] ss:$16 sps:$4 sm:$0xff]  }
 0x2fc   : > { %v3224_v8 = vmax.f32 %v3128_v15, %v3185_v44  ;;  %2098 = vst [vmem:[#allocation2 + $0x1d4] sm:$0xf] %v5605_v5  ;;  %v5625_v26 = vpack.c.bf16 %v12065_v20, %v12065_v20  ;;  %v2906_v4 = vrot.slane %v10036_v41, 2  ;;  %v3491_v30 = vmax.f32 %v3465_v0, %v12053_v10  ;;  %2869 = vst [vmem:[#allocation2 + $0x108] sm:$0xf] %v5624_v61 }
 0x2fd   : > { %v3255_v39 = vsel %vm12089_vm10, %v3223_v16, %v3095_v42  ;;  %v3492_v63 = vmax.f32 %v3466_v7, %v12051_v60  ;;  %v2907_v21 = vrot.slane %v10039_v9, 2  ;;  %v3034_v42 = vrot.slane %v10036_v41, 1  ;;  %4531 = vmatprep.mubr.bf16.mxu0 %v6244_v1 }
 0x2fe   : > { %v3351_v59 = vmax.f32 %v3255_v39, %v3314_v46  ;;  %v10535_v44 = vmax.f32 %v3224_v8, %v3313_v12  ;;  %2870 = vst [vmem:[#allocation2 + $0x118] sm:$0xf] %v5625_v26  ;;  %v2927_v20 = vsel %vm1121_vm2, %v2905_v54, %v2906_v4  ;;  %v3035_v10 = vrot.slane %v10039_v9, 1 }
 0x2ff   : > { %v5652_v60 = vpack.c.bf16 %v3491_v30, %v3491_v30  ;;  %v5653_v32 = vpack.c.bf16 %v3492_v63, %v3492_v63  ;;  %vm12091_vm11 = vcmp.eq.s32.totalorder %v12090_v56, 9  ;;  %v2926_v12 = vsel %vm1121_vm2, %v2906_v4, %v2907_v21  ;;  %v6250_v56 = vld [vmem:[#allocation2 + $0x8c] ss:$16 sps:$4 sm:$0xff]  }
 0x300   : > { %v10545_v16 = vsel %vm12091_vm11, %v3351_v59, %v3255_v39  ;;  %v3412_v54 = vmax.f32 %v12062_v33, %v10535_v44  ;;  %v2969_v5 = vmax.f32 %v10033_v58, %v2927_v20  ;;  %v2970_v0 = vmax.f32 %v10036_v41, %v2926_v12  ;;  %v6247_v59 = vld [vmem:[#allocation2 + $0x68] ss:$16 sps:$4 sm:$0xff]  }
 0x301   : > { %v3411_v46 = vmax.f32 %v12061_v45, %v10545_v16  ;;  %3649 = vst [vmem:[#allocation2 + $0xcc] sm:$0xf] %v5652_v60  ;;  %3650 = vst [vmem:[#allocation2 + $0xdc] sm:$0xf] %v5653_v32  ;;  %v3054_v7 = vsel %vm1170_vm3, %v3034_v42, %v3035_v10  ;;  %v3055_v6 = vsel %vm1170_vm3, %v3033_v62, %v3034_v42  ;;  %v3161_v15 = vrot.slane %v10033_v58, 7 }
 0x302   : > { %v3162_v61 = vrot.slane %v10036_v41, 7  ;;  %v3440_v8 = vmax.f32 %v3412_v54, %v10468_v40  ;;  %v3002_v39 = vsel %vm1121_vm2, %v2970_v0, %v10036_v41  ;;  %v3097_v26 = vmax.f32 %v2969_v5, %v3055_v6  ;;  %4451 = vmatmul.mubr.bf16.gmra.mxu1 %v6270_v49  ;;  %v12093_v5 = vld [vmem:[#allocation53_spill] sm:$0xff] }
 0x303   : > { %v3439_v31 = vmax.f32 %v3411_v46, %v10484_v22  ;;  %v6272_v4 = vld [vmem:[#allocation2 + $0x1c4] ss:$16 sps:$4 sm:$0xff]   ;;  %v3098_v1 = vmax.f32 %v3002_v39, %v3054_v7  ;;  %v3184_v30 = vsel %vm1219_vm1, %v3160_v51, %v3161_v15  ;;  %v3289_v63 = vrot.slane %v10033_v58, 6  ;;  %v12092_v46 = vld [vmem:[#allocation54_spill] sm:$0xff]  ;;  %4532 = vmatmul.mubr.bf16.gmra.mxu0 %v6247_v59 }
 0x304   : > { %v3183_v62 = vsel %vm1219_vm1, %v3161_v15, %v3162_v61  ;;  %v3468_v42 = vmax.f32 %v3440_v8, %v12056_v19  ;;  %v3225_v60 = vmax.f32 %v3097_v26, %v3184_v30  ;;  %v3290_v32 = vrot.slane %v10036_v41, 6  ;;  %4458 = vmatprep.mubr.bf16.mxu1 %v6272_v4  ;;  %4539 = vmatprep.mubr.bf16.mxu0 %v6250_v56 }
 0x305   : > { %v3467_v20 = vmax.f32 %v3439_v31, %v12055_v53  ;;  %v3130_v12 = vsel %vm1170_vm3, %v3098_v1, %v3002_v39  ;;  %v3312_v51 = vsel %vm1268_vm0, %v3288_v14, %v3289_v63  ;;  %v5606_v54 = vpack.c.bf16 %v12092_v46, %v12092_v46  ;;  %v12094_v31 = vld [vmem:[#allocation12_spill] sm:$0xff] }
 0x306   : > { %v5607_v0 = vpack.c.bf16 %v12093_v5, %v12093_v5  ;;  %v3494_v6 = vmax.f32 %v3468_v42, %v12058_v57  ;;  %v3226_v15 = vmax.f32 %v3130_v12, %v3183_v62  ;;  %vm12095_vm14 = vcmp.eq.s32.totalorder %v12094_v31, 10  ;;  %v6276_v42 = vld [vmem:[#allocation2 + $0x1c0] ss:$16 sps:$4 sm:$0xff]   ;;  %v6253_v5 = vld [vmem:[#allocation2 + $0x88] ss:$16 sps:$4 sm:$0xff]  }
 0x307   : > { %v3493_v7 = vmax.f32 %v3467_v20, %v10349_v43  ;;  %v3257_v8 = vsel %vm12095_vm14, %v3225_v60, %v3097_v26  ;;  %v3311_v49 = vsel %vm1268_vm0, %v3289_v63, %v3290_v32  ;;  %2099 = vst [vmem:[#allocation2 + $0x1e4] sm:$0xf] %v5606_v54  ;;  %v5626_v39 = vpack.c.bf16 %v12067_v17, %v12067_v17  ;;  %v12096_v26 = vld [vmem:[#allocation17_spill] sm:$0xff] }
 0x308   : > { %v3353_v14 = vmax.f32 %v3257_v8, %v3312_v51  ;;  %2100 = vst [vmem:[#allocation2 + $0x1f4] sm:$0xf] %v5607_v0  ;;  %v5627_v4 = vpack.c.bf16 %v10450_v48, %v10450_v48  ;;  %v5655_v1 = vpack.c.bf16 %v3494_v6, %v3494_v6  ;;  %v10604_v57 = vmax.f32 %v3226_v15, %v3311_v49  ;;  %v6256_v15 = vld [vmem:[#allocation2 + $0xac] ss:$16 sps:$4 sm:$0xff]  }
 0x309   : > { %v5654_v43 = vpack.c.bf16 %v3493_v7, %v3493_v7  ;;  %v2908_v62 = vrot.slane %v10042_v47, 2  ;;  %vm12097_vm15 = vcmp.eq.s32.totalorder %v12096_v26, 10  ;;  %2871 = vst [vmem:[#allocation2 + $0x128] sm:$0xf] %v5626_v39  ;;  %v2909_v63 = vrot.slane %v10045_v18, 2 }
 0x30a   : > { %v10609_v30 = vsel %vm12097_vm15, %v3353_v14, %v3257_v8  ;;  %2872 = vst [vmem:[#allocation2 + $0x138] sm:$0xf] %v5627_v4  ;;  %v3036_v59 = vrot.slane %v10042_v47, 1  ;;  %v3037_v17 = vrot.slane %v10045_v18, 1  ;;  %3652 = vst [vmem:[#allocation2 + $0xfc] sm:$0xf] %v5655_v1  ;;  %v3414_v20 = vmax.f32 %v10468_v40, %v10604_v57  ;;  %4459 = vmatmul.mubr.bf16.gmra.mxu1 %v6276_v42 }
 0x30b   : > { %3651 = vst [vmem:[#allocation2 + $0xec] sm:$0xf] %v5654_v43  ;;  %v3413_v48 = vmax.f32 %v10484_v22, %v10609_v30  ;;  %v2925_v60 = vsel %vm1121_vm2, %v2907_v21, %v2908_v62  ;;  %v3163_v56 = vrot.slane %v10039_v9, 7  ;;  %v2924_v12 = vsel %vm1121_vm2, %v2908_v62, %v2909_v63  ;;  %4540 = vmatmul.mubr.bf16.gmra.mxu0 %v6253_v5 }
 0x30c   : > { %v2971_v51 = vmax.f32 %v10039_v9, %v2925_v60  ;;  %v3052_v46 = vsel %vm1170_vm3, %v3036_v59, %v3037_v17  ;;  %v3053_v54 = vsel %vm1170_vm3, %v3035_v10, %v3036_v59  ;;  %v3442_v21 = vmax.f32 %v3414_v20, %v10535_v44  ;;  %4547 = vmatprep.mubr.bf16.mxu0 %v6256_v15 }
 0x30d   : > { %v3441_v0 = vmax.f32 %v3413_v48, %v10545_v16  ;;  %v2972_v7 = vmax.f32 %v10042_v47, %v2924_v12  ;;  %v3164_v6 = vrot.slane %v10042_v47, 7  ;;  %v3182_v8 = vsel %vm1219_vm1, %v3162_v61, %v3163_v56  ;;  %v12098_v12 = vld [vmem:[#allocation11_spill] sm:$0xff] }
 0x30e   : > { %v3099_v31 = vmax.f32 %v2971_v51, %v3053_v54  ;;  %v3291_v49 = vrot.slane %v10039_v9, 6  ;;  %v3292_v10 = vrot.slane %v10042_v47, 6  ;;  %v3470_v39 = vmax.f32 %v3442_v21, %v12062_v33 }
 0x30f   : > { %v3469_v14 = vmax.f32 %v3441_v0, %v12061_v45  ;;  %v6278_v4 = vld [vmem:[#allocation2 + $0x1e4] ss:$16 sps:$4 sm:$0xff]   ;;  %v3004_v43 = vsel %vm1121_vm2, %v2972_v7, %v10042_v47  ;;  %v3181_v1 = vsel %vm1219_vm1, %v3163_v56, %v3164_v6  ;;  %v5628_v42 = vpack.c.bf16 %v10033_v58, %v10033_v58  ;;  %v6282_v0 = vld [vmem:[#allocation2 + $0x1e0] ss:$16 sps:$4 sm:$0xff]  }
 0x310   : > { %v3100_v62 = vmax.f32 %v3004_v43, %v3052_v46  ;;  %v3227_v61 = vmax.f32 %v3099_v31, %v3182_v8  ;;  %v3309_v26 = vsel %vm1268_vm0, %v3291_v49, %v3292_v10  ;;  %v3310_v59 = vsel %vm1268_vm0, %v3290_v32, %v3291_v49  ;;  %4466 = vmatprep.mubr.bf16.mxu1 %v6278_v4  ;;  %v6259_v8 = vld [vmem:[#allocation2 + $0xa8] ss:$16 sps:$4 sm:$0xff]  }
 0x311   : > { %v3495_v48 = vmax.f32 %v3469_v14, %v12055_v53  ;;  %v3496_v20 = vmax.f32 %v3470_v39, %v12056_v19  ;;  %v5629_v60 = vpack.c.bf16 %v10036_v41, %v10036_v41  ;;  %vm12099_vm4 = vcmp.eq.s32.totalorder %v12098_v12, 11  ;;  %2873 = vst [vmem:[#allocation2 + $0x148] sm:$0xf] %v5628_v42  ;;  %v12102_v14 = vld [vmem:[#allocation13_spill] sm:$0xff] }
 0x312   : > { %v3132_v56 = vsel %vm1170_vm3, %v3100_v62, %v3004_v43  ;;  %v3259_v51 = vsel %vm12099_vm4, %v3227_v61, %v3099_v31  ;;  %v2910_v46 = vrot.slane %v10048_v13, 2  ;;  %v3038_v32 = vrot.slane %v10048_v13, 1  ;;  %4467 = vmatmul.mubr.bf16.gmra.mxu1 %v6282_v0  ;;  %v6262_v43 = vld [vmem:[#allocation2 + $0xcc] ss:$16 sps:$4 sm:$0xff]  }
 0x313   : > { %v5656_v53 = vpack.c.bf16 %v3495_v48, %v3495_v48  ;;  %v5657_v54 = vpack.c.bf16 %v3496_v20, %v3496_v20  ;;  %v3228_v19 = vmax.f32 %v3132_v56, %v3181_v1  ;;  %v3355_v5 = vmax.f32 %v3259_v51, %v3310_v59  ;;  %2874 = vst [vmem:[#allocation2 + $0x158] sm:$0xf] %v5629_v60 }
 0x314   : > { %v12100_v58 = vrot.slane %v10051_v23, 2  ;;  %v2923_v21 = vsel %vm1121_vm2, %v2909_v63, %v2910_v46  ;;  %v12101_v7 = vrot.slane %v10051_v23, 1  ;;  %v3051_v31 = vsel %vm1170_vm3, %v3037_v17, %v3038_v32  ;;  %4548 = vmatmul.mubr.bf16.gmra.mxu0 %v6259_v8 }
 0x315   : > { %3653 = vst [vmem:[#allocation2 + $0x10c] sm:$0xf] %v5656_v53  ;;  %3654 = vst [vmem:[#allocation2 + $0x11c] sm:$0xf] %v5657_v54  ;;  %v10677_v49 = vmax.f32 %v3228_v19, %v3309_v26  ;;  %vm12103_vm6 = vcmp.eq.s32.totalorder %v12102_v14, 11  ;;  %v2973_v63 = vmax.f32 %v10045_v18, %v2923_v21  ;;  %v3165_v17 = vrot.slane %v10045_v18, 7  ;;  %4555 = vmatprep.mubr.bf16.mxu0 %v6262_v43 }
 0x316   : > { %v2922_v41 = vsel %vm1121_vm2, %v2910_v46, %v12100_v58  ;;  %v3050_v15 = vsel %vm1170_vm3, %v3038_v32, %v12101_v7  ;;  %v10681_v39 = vsel %vm12103_vm6, %v3355_v5, %v3259_v51  ;;  %v3293_v62 = vrot.slane %v10045_v18, 6  ;;  %v12109_v7 = vld [vmem:[#allocation37_spill] sm:$0xff] }
 0x317   : > { %v2974_v4 = vmax.f32 %v10048_v13, %v2922_v41  ;;  %v3415_v1 = vmax.f32 %v10545_v16, %v10681_v39  ;;  %v5630_v61 = vpack.c.bf16 %v10039_v9, %v10039_v9  ;;  %v3416_v26 = vmax.f32 %v10535_v44, %v10677_v49 }
 0x318   : > { %v3101_v48 = vmax.f32 %v2973_v63, %v3051_v31  ;;  %v5631_v20 = vpack.c.bf16 %v10042_v47, %v10042_v47  ;;  %v12104_v56 = vrot.slane %v10048_v13, 7  ;;  %v3180_v12 = vsel %vm1219_vm1, %v3164_v6, %v3165_v17 }
 0x319   : > { %v3006_v59 = vsel %vm1121_vm2, %v2974_v4, %v10048_v13  ;;  %v3443_v42 = vmax.f32 %v3415_v1, %v10609_v30  ;;  %2875 = vst [vmem:[#allocation2 + $0x168] sm:$0xf] %v5630_v61  ;;  %v3444_v51 = vmax.f32 %v3416_v26, %v10604_v57  ;;  %v12105_v32 = vrot.slane %v10048_v13, 6  ;;  %v6265_v1 = vld [vmem:[#allocation2 + $0xc8] ss:$16 sps:$4 sm:$0xff]  }
 0x31a   : > { %v3102_v60 = vmax.f32 %v3006_v59, %v3050_v15  ;;  %v3179_v9 = vsel %vm1219_vm1, %v3165_v17, %v12104_v56  ;;  %v3229_v46 = vmax.f32 %v3101_v48, %v3180_v12  ;;  %v3308_v53 = vsel %vm1268_vm0, %v3292_v10, %v3293_v62  ;;  %2876 = vst [vmem:[#allocation2 + $0x178] sm:$0xf] %v5631_v20  ;;  %v6268_v61 = vld [vmem:[#allocation2 + $0xec] ss:$16 sps:$4 sm:$0xff]  }
 0x31b   : > { %v3307_v47 = vsel %vm1268_vm0, %v3293_v62, %v12105_v32  ;;  %v3471_v54 = vmax.f32 %v3443_v42, %v10484_v22  ;;  %v12106_v6 = vmax.f32 %v10053_v24, %v10089_v25  ;;  %v12107_v0 = vrot.slane %v10053_v24, 7 }
 0x31c   : > { %v3134_v19 = vsel %vm1170_vm3, %v3102_v60, %v3006_v59  ;;  %v12108_v58 = vrot.slane %v10051_v23, 7  ;;  %v3472_v41 = vmax.f32 %v3444_v51, %v10468_v40  ;;  %vm12110_vm9 = vcmp.eq.s32.totalorder %v12109_v7, 12  ;;  %v12113_v59 = vld [vmem:[#allocation40_spill] sm:$0xff]  ;;  %4556 = vmatmul.mubr.bf16.gmra.mxu0 %v6265_v1 }
 0x31d   : > { %v3008_v5 = vsel %vm1121_vm2, %v12106_v6, %v10053_v24  ;;  %v3230_v21 = vmax.f32 %v3134_v19, %v3179_v9  ;;  %v3261_v15 = vsel %vm12110_vm9, %v3229_v46, %v3101_v48  ;;  %v3497_v25 = vmax.f32 %v3471_v54, %v12061_v45  ;;  %4563 = vmatprep.mubr.bf16.mxu0 %v6268_v61 }
 0x31e   : > { %v3177_v10 = vsel %vm1219_vm1, %v12108_v58, %v12107_v0  ;;  %v3104_v31 = vmax.f32 %v3008_v5, %v10106_v29  ;;  %v3357_v8 = vmax.f32 %v3261_v15, %v3308_v53  ;;  %v12111_v14 = vrot.slane %v10053_v24, 6 }
 0x31f   : > { %v12112_v63 = vrot.slane %v10051_v23, 6  ;;  %v3419_v43 = vmax.f32 %v10681_v39, %v10188_v27  ;;  %v3498_v17 = vmax.f32 %v3472_v41, %v12062_v33  ;;  %v10741_v62 = vmax.f32 %v3230_v21, %v3307_v47 }
 0x320   : > { %v3136_v29 = vsel %vm1170_vm3, %v3104_v31, %v3008_v5  ;;  %v5632_v45 = vpack.c.bf16 %v10045_v18, %v10045_v18  ;;  %v5658_v26 = vpack.c.bf16 %v3497_v25, %v3497_v25  ;;  %vm12114_vm5 = vcmp.eq.s32.totalorder %v12113_v59, 12 }
 0x321   : > { %v3305_v4 = vsel %vm1268_vm0, %v12112_v63, %v12111_v14  ;;  %v10749_v48 = vsel %vm12114_vm5, %v3357_v8, %v3261_v15  ;;  %v3232_v20 = vmax.f32 %v3136_v29, %v3177_v10  ;;  %v5633_v42 = vpack.c.bf16 %v10048_v13, %v10048_v13  ;;  %v6271_v63 = vld [vmem:[#allocation2 + $0xe8] ss:$16 sps:$4 sm:$0xff]  }
 0x322   : > { %v5659_v33 = vpack.c.bf16 %v3498_v17, %v3498_v17  ;;  %v3417_v60 = vmax.f32 %v10609_v30, %v10749_v48  ;;  %v3418_v56 = vmax.f32 %v10604_v57, %v10741_v62  ;;  %v3447_v18 = vmax.f32 %v3419_v43, %v10749_v48  ;;  %2877 = vst [vmem:[#allocation2 + $0x188] sm:$0xf] %v5632_v45  ;;  %v6274_v17 = vld [vmem:[#allocation2 + $0x10c] ss:$16 sps:$4 sm:$0xff]  }
 0x323   : > { %3655 = vst [vmem:[#allocation2 + $0x12c] sm:$0xf] %v5658_v26  ;;  %v10758_v9 = vmax.f32 %v3232_v20, %v3305_v4  ;;  %2878 = vst [vmem:[#allocation2 + $0x198] sm:$0xf] %v5633_v42  ;;  %v12115_v13 = vmax.f32 %v10059_v52, %v10083_v34  ;;  %v12116_v51 = vrot.slane %v10059_v52, 7  ;;  %v12117_v46 = vrot.slane %v10056_v55, 7 }
 0x324   : > { %v12118_v47 = vrot.slane %v10059_v52, 6  ;;  %v12119_v53 = vrot.slane %v10056_v55, 6  ;;  %3656 = vst [vmem:[#allocation2 + $0x13c] sm:$0xf] %v5659_v33  ;;  %v3445_v34 = vmax.f32 %v3417_v60, %v10681_v39  ;;  %v3446_v19 = vmax.f32 %v3418_v56, %v10677_v49  ;;  %4564 = vmatmul.mubr.bf16.gmra.mxu0 %v6271_v63 }
 0x325   : > { %v3010_v12 = vsel %vm1121_vm2, %v12115_v13, %v10059_v52  ;;  %v3175_v32 = vsel %vm1219_vm1, %v12117_v46, %v12116_v51  ;;  %v3475_v6 = vmax.f32 %v3447_v18, %v10609_v30  ;;  %v3420_v0 = vmax.f32 %v10677_v49, %v10758_v9  ;;  %4571 = vmatprep.mubr.bf16.mxu0 %v6274_v17 }
 0x326   : > { %v3303_v54 = vsel %vm1268_vm0, %v12119_v53, %v12118_v47  ;;  %v3106_v5 = vmax.f32 %v3010_v12, %v10100_v37  ;;  %v3421_v58 = vmax.f32 %v10749_v48, %v10192_v11  ;;  %v5634_v10 = vpack.c.bf16 %v10051_v23, %v10051_v23 }
 0x327   : > { %v5635_v41 = vpack.c.bf16 %v10053_v24, %v10053_v24  ;;  %v3473_v21 = vmax.f32 %v3445_v34, %v10545_v16  ;;  %v3474_v7 = vmax.f32 %v3446_v19, %v10535_v44  ;;  %v3501_v15 = vmax.f32 %v3475_v6, %v10545_v16 }
 0x328   : > { %v3138_v37 = vsel %vm1170_vm3, %v3106_v5, %v3010_v12  ;;  %v3448_v31 = vmax.f32 %v3420_v0, %v10741_v62  ;;  %v3449_v8 = vmax.f32 %v3421_v58, %v10188_v27  ;;  %2879 = vst [vmem:[#allocation2 + $0x1a8] sm:$0xf] %v5634_v10  ;;  %v12120_v23 = vrot.slane %v10202_v28, 2  ;;  %v6277_v0 = vld [vmem:[#allocation2 + $0x108] ss:$16 sps:$4 sm:$0xff]  }
 0x329   : > { %v3234_v25 = vmax.f32 %v3138_v37, %v3175_v32  ;;  %2880 = vst [vmem:[#allocation2 + $0x1b8] sm:$0xf] %v5635_v41  ;;  %v12121_v24 = vrot.slane %v10030_v50, 2  ;;  %v3499_v16 = vmax.f32 %v3473_v21, %v10484_v22  ;;  %v3500_v4 = vmax.f32 %v3474_v7, %v10468_v40 }
 0x32a   : > { %v5662_v43 = vpack.c.bf16 %v3501_v15, %v3501_v15  ;;  %v3476_v29 = vmax.f32 %v3448_v31, %v10604_v57  ;;  %v3477_v61 = vmax.f32 %v3449_v8, %v10681_v39  ;;  %v12122_v22 = vrot.slane %v10202_v28, 1  ;;  %v10856_v15 = vpop.f32.mrf.mxu1  ;;  %v6283_v8 = vld [vmem:[#allocation2 + $0x128] ss:$16 sps:$4 sm:$0xff]  }
 0x32b   : > { %v2948_v14 = vsel %vm1121_vm2, %v12121_v24, %v12120_v23  ;;  %v3362_v45 = vmax.f32 %v3234_v25, %v3303_v54  ;;  %v5660_v26 = vpack.c.bf16 %v3499_v16, %v3499_v16  ;;  %v5661_v59 = vpack.c.bf16 %v3500_v4, %v3500_v4  ;;  %v6280_v10 = vld [vmem:[#allocation2 + $0x12c] ss:$16 sps:$4 sm:$0xff]   ;;  %v6286_v4 = vld [vmem:[#allocation2 + $0x148] ss:$16 sps:$4 sm:$0xff]  }
 0x32c   : > { %v2980_v1 = vmax.f32 %v10030_v50, %v2948_v14  ;;  %3659 = vst [vmem:[#allocation2 + $0x16c] sm:$0xf] %v5662_v43  ;;  %v12123_v40 = vrot.slane %v10030_v50, 1  ;;  %v3502_v33 = vmax.f32 %v3476_v29, %v10535_v44  ;;  %v3503_v56 = vmax.f32 %v3477_v61, %v10609_v30  ;;  %4572 = vmatmul.mubr.bf16.gmra.mxu0 %v6277_v0  ;;  %v6292_v61 = vld [vmem:[#allocation2 + $0x188] ss:$16 sps:$4 sm:$0xff]  }
 0x32d   : > { %v3422_v60 = vmax.f32 %v10741_v62, %v3362_v45  ;;  %3657 = vst [vmem:[#allocation2 + $0x14c] sm:$0xf] %v5660_v26  ;;  %3658 = vst [vmem:[#allocation2 + $0x15c] sm:$0xf] %v5661_v59  ;;  %v12124_v13 = vrot.slane %v10028_v2, 7  ;;  %v12125_v12 = vmax.f32 %v10188_v27, %v10199_v35  ;;  %v5636_v44 = vpack.c.bf16 %v10056_v55, %v10056_v55 }
 0x32e   : > { %v3012_v20 = vsel %vm1121_vm2, %v2980_v1, %v10030_v50  ;;  %v3076_v42 = vsel %vm1170_vm3, %v12123_v40, %v12122_v22  ;;  %v5637_v30 = vpack.c.bf16 %v10059_v52, %v10059_v52  ;;  %v5663_v46 = vpack.c.bf16 %v3502_v33, %v3502_v33  ;;  %4579 = vmatprep.mubr.bf16.mxu0 %v6280_v10 }
 0x32f   : > { %v3108_v18 = vmax.f32 %v3012_v20, %v3076_v42  ;;  %v3173_v28 = vsel %vm1219_vm1, %v12124_v13, %v3172_v36  ;;  %v3451_v51 = vmax.f32 %v12125_v12, %v10192_v11  ;;  %v3450_v32 = vmax.f32 %v3422_v60, %v10758_v9  ;;  %2881 = vst [vmem:[#allocation2 + $0x1c8] sm:$0xf] %v5636_v44 }
 0x330   : > { %v5664_v47 = vpack.c.bf16 %v3503_v56, %v3503_v56  ;;  %2882 = vst [vmem:[#allocation2 + $0x1d8] sm:$0xf] %v5637_v30  ;;  %v3453_v34 = vmax.f32 %v10192_v11, %v10199_v35  ;;  %v5638_v55 = vpack.c.bf16 %v10028_v2, %v10028_v2  ;;  %3660 = vst [vmem:[#allocation2 + $0x17c] sm:$0xf] %v5663_v46  ;;  %v12126_v19 = vrot.slane %v10028_v2, 6 }
 0x331   : > { %v3140_v53 = vsel %vm1170_vm3, %v3108_v18, %v3012_v20  ;;  %v3479_v36 = vmax.f32 %v3451_v51, %v10749_v48  ;;  %v3478_v52 = vmax.f32 %v3450_v32, %v10677_v49  ;;  %v5639_v5 = vpack.c.bf16 %v10030_v50, %v10030_v50  ;;  %v6295_v22 = vld [vmem:[#allocation2 + $0x1a8] ss:$16 sps:$4 sm:$0xff]  }
 0x332   : > { %v3236_v54 = vmax.f32 %v3140_v53, %v3173_v28  ;;  %3661 = vst [vmem:[#allocation2 + $0x18c] sm:$0xf] %v5664_v47  ;;  %v3301_v6 = vsel %vm1268_vm0, %v12126_v19, %v3300_v38  ;;  %v3481_v35 = vmax.f32 %v3453_v34, %v10188_v27  ;;  %2883 = vst [vmem:[#allocation2 + $0x1e8] sm:$0xf] %v5638_v55 }
 0x333   : > { %v3505_v11 = vmax.f32 %v3479_v36, %v10681_v39  ;;  %v3504_v41 = vmax.f32 %v3478_v52, %v10604_v57  ;;  %2884 = vst [vmem:[#allocation2 + $0x1f8] sm:$0xf] %v5639_v5  ;;  %v10859_v57 = vpop.f32.mrf.mxu1 }
 0x334   : > { %v3364_v58 = vmax.f32 %v3236_v54, %v3301_v6  ;;  %v3507_v38 = vmax.f32 %v3481_v35, %v10749_v48  ;;  %v5670_v7 = vpack.c.bf16 %v3481_v35, %v3481_v35  ;;  %v6284_v14 = vld [vmem:[#allocation2 + $0x14c] ss:$16 sps:$4 sm:$0xff]   ;;  %4580 = vmatmul.mubr.bf16.gmra.mxu0 %v6283_v8 }
 0x335   : > { %v5666_v21 = vpack.c.bf16 %v3505_v11, %v3505_v11  ;;  %v5665_v50 = vpack.c.bf16 %v3504_v41, %v3504_v41  ;;  %v10864_v63 = vpop.f32.mrf.mxu1  ;;  %4587 = vmatprep.mubr.bf16.mxu0 %v6284_v14  ;;  %v5841_v41 = vadd.f32 %v10859_v57, %v10856_v15 }
 0x336   : > { %v3424_v2 = vmax.f32 %v10758_v9, %v3364_v58  ;;  %v3454_v3 = vmax.f32 %v3362_v45, %v3364_v58  ;;  %v5668_v37 = vpack.c.bf16 %v3507_v38, %v3507_v38  ;;  %3667 = vst [vmem:[#allocation2 + $0x1ec] sm:$0xf] %v5670_v7  ;;  %v10936_v7 = vld [vmem:[%s11263_s6] ss:$0 sm:$0xff] }
 0x337   : > { %3663 = vst [vmem:[#allocation2 + $0x1ac] sm:$0xf] %v5666_v21  ;;  %3662 = vst [vmem:[#allocation2 + $0x19c] sm:$0xf] %v5665_v50  ;;  %v5843_v16 = vpop.f32.mrf.mxu1  ;;  %v6287_v43 = vld [vmem:[#allocation2 + $0x16c] ss:$16 sps:$4 sm:$0xff]  }
 0x338   : > { %v3452_v39 = vmax.f32 %v3424_v2, %v3362_v45  ;;  %v3482_v27 = vmax.f32 %v3454_v3, %v10758_v9  ;;  %3665 = vst [vmem:[#allocation2 + $0x1cc] sm:$0xf] %v5668_v37  ;;  %v6298_v60 = vld [vmem:[#allocation2 + $0x1c8] ss:$16 sps:$4 sm:$0xff]   ;;  %v10931_v3 = vld [vmem:[%s11262_s5] ss:$0 sm:$0xff] }
 0x339   : > { %v10866_v1 = vpop.f32.mrf.mxu1 }
 0x33a   : > { %v3480_v31 = vmax.f32 %v3452_v39, %v10741_v62  ;;  %v3508_v25 = vmax.f32 %v3482_v27, %v10741_v62  ;;  %v5671_v48 = vpack.c.bf16 %v3482_v27, %v3482_v27  ;;  %v6301_v28 = vld [vmem:[#allocation2 + $0x1e8] ss:$16 sps:$4 sm:$0xff]   ;;  %v5844_v27 = vadd.f32 %v5843_v16, %v10864_v63 }
 0x33b   : > { %v10868_v62 = vpop.f32.mrf.mxu1 }
 0x33c   : > { %v3506_v23 = vmax.f32 %v3480_v31, %v10677_v49  ;;  %v5669_v24 = vpack.c.bf16 %v3508_v25, %v3508_v25  ;;  %3668 = vst [vmem:[#allocation2 + $0x1fc] sm:$0xf] %v5671_v48  ;;  %4588 = vmatmul.mubr.bf16.gmra.mxu0 %v6286_v4  ;;  %v6289_v49 = vld [vmem:[#allocation2 + $0x168] ss:$16 sps:$4 sm:$0xff]  }
 0x33d   : > { %4595 = vmatprep.mubr.bf16.mxu0 %v6287_v43  ;;  %v10870_v29 = vpop.f32.mrf.mxu1 }
 0x33e   : > { %v5667_v9 = vpack.c.bf16 %v3506_v23, %v3506_v23  ;;  %3666 = vst [vmem:[#allocation2 + $0x1dc] sm:$0xf] %v5669_v24  ;;  %v6290_v17 = vld [vmem:[#allocation2 + $0x18c] ss:$16 sps:$4 sm:$0xff]   ;;  %v5847_v23 = vadd.f32 %v10868_v62, %v10866_v1 }
 0x33f   : > { %v10872_v45 = vpop.f32.mrf.mxu1 }
 0x340   : > { %3664 = vst [vmem:[#allocation2 + $0x1bc] sm:$0xf] %v5667_v9 }
 0x341   : > { %v10874_v59 = vpop.f32.mrf.mxu1 }
 0x343   : > { %v10876_v20 = vpop.f32.mrf.mxu1  ;;  %v6299_v56 = vld [vmem:[#allocation2 + $0x1ec] ss:$16 sps:$4 sm:$0xff]  }
 0x344   : > { %4596 = vmatmul.mubr.bf16.gmra.mxu0 %v6289_v49 }
 0x345   : > { %4603 = vmatprep.mubr.bf16.mxu0 %v6290_v17  ;;  %v6296_v40 = vld [vmem:[#allocation2 + $0x1cc] ss:$16 sps:$4 sm:$0xff]   ;;  %v10878_v42 = vpop.f32.mrf.mxu1  ;;  %v5850_v17 = vadd.f32 %v10872_v45, %v10870_v29 }
 0x347   : > { %v6293_v26 = vld [vmem:[#allocation2 + $0x1ac] ss:$16 sps:$4 sm:$0xff]   ;;  %v10880_v33 = vpop.f32.mrf.mxu1 }
 0x349   : > { %v10882_v18 = vpop.f32.mrf.mxu1 }
 0x34b   : > { %v10884_v13 = vpop.f32.mrf.mxu1 }
 0x34c   : > { %4604 = vmatmul.mubr.bf16.gmra.mxu0 %v6292_v61 }
 0x34d   : > { %4611 = vmatprep.mubr.bf16.mxu0 %v6293_v26  ;;  %v10886_v12 = vpop.f32.mrf.mxu1 }
 0x34f   : > { %v10888_v51 = vpop.f32.mrf.mxu1 }
 0x351   : > { %v10890_v44 = vpop.f32.mrf.mxu1 }
 0x353   : > { %v10892_v30 = vpop.f32.mrf.mxu1 }
 0x354   : > { %4612 = vmatmul.mubr.bf16.gmra.mxu0 %v6295_v22 }
 0x355   : > { %4619 = vmatprep.mubr.bf16.mxu0 %v6296_v40  ;;  %v10894_v46 = vpop.f32.mrf.mxu1 }
 0x357   : > { %v10896_v32 = vpop.f32.mrf.mxu1 }
 0x359   : > { %v10898_v47 = vpop.f32.mrf.mxu1 }
 0x35b   : > { %v10900_v53 = vpop.f32.mrf.mxu1 }
 0x35c   : > { %4620 = vmatmul.mubr.bf16.gmra.mxu0 %v6298_v60 }
 0x35d   : > { %4627 = vmatprep.mubr.bf16.mxu0 %v6299_v56  ;;  %v10902_v54 = vpop.f32.mrf.mxu1 }
 0x35f   : > { %v10904_v36 = vpop.f32.mrf.mxu1 }
 0x361   : > { %v10906_v34 = vpop.f32.mrf.mxu1 }
 0x363   : > { %v10908_v55 = vpop.f32.mrf.mxu1 }
 0x364   : > { %4628 = vmatmul.mubr.bf16.gmra.mxu0 %v6301_v28  ;;  %v5853_v28 = vadd.f32 %v10876_v20, %v10874_v59 }
 0x365   : > { %v10910_v52 = vpop.f32.mrf.mxu1 }
 0x367   : > { %v10912_v19 = vpop.f32.mrf.mxu1 }
 0x369   : > { %v10914_v6 = vpop.f32.mrf.mxu1 }
 0x36b   : > { %v10916_v5 = vpop.f32.mrf.mxu1 }
 0x36d   : > { %v10918_v0 = vpop.f32.mrf.mxu1 }
 0x36f   : > { %v10920_v58 = vpop.f32.mrf.mxu1 }
 0x371   : > { %v10922_v11 = vpop.f32.mrf.mxu1 }
 0x373   : > { %v10926_v21 = vpop.f32.mrf.mxu1 }
 0x375   : > { %v10940_v57 = vpop.f32.mrf.mxu1 }
 0x377   : > { %v10949_v63 = vpop.f32.mrf.mxu1 }
 0x379   : > { %v10958_v26 = vpop.f32.mrf.mxu1 }
 0x3a8   : > { %v5951_v35 = vpop.f32.mrf.mxu0 }
 0x3aa   : > { %v5952_v10 = vpop.f32.mrf.mxu0 }
 0x3ab   : > { %v5953_v2 = vadd.f32 %v5952_v10, %v5951_v35  ;;  %v10967_v10 = vpop.f32.mrf.mxu1 }
 0x3ac   : > { %v5954_v38 = vpop.f32.mrf.mxu0 }
 0x3ad   : > { %v4510_v50 = vadd.f32 %v5953_v2, %v5841_v41 }
 0x3ae   : > { %v5955_v39 = vpop.f32.mrf.mxu0 }
 0x3af   : > { %v4644_v15 = vmul.f32 %v10931_v3, %v4510_v50  ;;  %v5956_v37 = vadd.f32 %v5955_v39, %v5954_v38  ;;  %v5856_v39 = vadd.f32 %v10880_v33, %v10878_v42 }
 0x3b1   : > { %v10943_v25 = vadd.f32 %v10936_v7, %v4644_v15  ;;  %v4513_v48 = vadd.f32 %v5956_v37, %v5844_v27  ;;  %v10976_v15 = vpop.f32.mrf.mxu1 }
 0x3b2   : > { %v5957_v31 = vpop.f32.mrf.mxu0 }
 0x3b3   : > { %v5476_v24 = vmul.f32 -1.442695, %v10943_v25  ;;  %v4645_v14 = vmul.f32 %v10931_v3, %v4513_v48 }
 0x3b4   : > { %v5958_v8 = vpop.f32.mrf.mxu0 }
 0x3b5   : > { %v5959_v9 = vadd.f32 %v5958_v8, %v5957_v31  ;;  %6430 = vpow2.f32 %v5476_v24  ;;  %v10952_v4 = vadd.f32 %v10936_v7, %v4645_v14 }
 0x3b6   : > { %v5960_v16 = vpop.f32.mrf.mxu0 }
 0x3b7   : > { %v4518_v43 = vadd.f32 %v5959_v9, %v5847_v23  ;;  %v5477_v61 = vmul.f32 -1.442695, %v10952_v4  ;;  %v5859_v23 = vadd.f32 %v10884_v13, %v10882_v18 }
 0x3b8   : > { %v5961_v49 = vpop.f32.mrf.mxu0 }
 0x3b9   : > { %v4646_v1 = vmul.f32 %v10931_v3, %v4518_v43  ;;  %v5962_v62 = vadd.f32 %v5961_v49, %v5960_v16  ;;  %6432 = vpow2.f32 %v5477_v61  ;;  %v10985_v16 = vpop.f32.mrf.mxu1 }
 0x3bb   : > { %v5963_v22 = vpop.f32.mrf.mxu0  ;;  %v10961_v40 = vadd.f32 %v10936_v7, %v4646_v1  ;;  %v4521_v60 = vadd.f32 %v5962_v62, %v5850_v17  ;;  %v5862_v1 = vadd.f32 %v10888_v51, %v10886_v12  ;;  %v5865_v12 = vadd.f32 %v10892_v30, %v10890_v44 }
 0x3bc   : > { %v5868_v44 = vadd.f32 %v10896_v32, %v10894_v46  ;;  %v5871_v32 = vadd.f32 %v10900_v53, %v10898_v47 }
 0x3bd   : > { %v5964_v56 = vpop.f32.mrf.mxu0  ;;  %v5478_v35 = vmul.f32 -1.442695, %v10961_v40  ;;  %v4647_v29 = vmul.f32 %v10931_v3, %v4521_v60 }
 0x3be   : > { %v5965_v45 = vadd.f32 %v5964_v56, %v5963_v22  ;;  %v10994_v56 = vpop.f32.mrf.mxu1 }
 0x3bf   : > { %v5966_v41 = vpop.f32.mrf.mxu0  ;;  %6434 = vpow2.f32 %v5478_v35  ;;  %v10970_v2 = vadd.f32 %v10936_v7, %v4647_v29 }
 0x3c0   : > { %v4526_v38 = vadd.f32 %v5965_v45, %v5853_v28 }
 0x3c1   : > { %v5967_v50 = vpop.f32.mrf.mxu0  ;;  %v5479_v27 = vmul.f32 -1.442695, %v10970_v2 }
 0x3c2   : > { %v4648_v59 = vmul.f32 %v10931_v3, %v4526_v38  ;;  %v5968_v20 = vadd.f32 %v5967_v50, %v5966_v41  ;;  %v6431_v8 = vpop.eup %6430 }
 0x3c3   : > { %v5969_v37 = vpop.f32.mrf.mxu0  ;;  %6436 = vpow2.f32 %v5479_v27  ;;  %v4812_v14 = vadd.f32 1.0, %v6431_v8 }
 0x3c4   : > { %v10979_v31 = vadd.f32 %v10936_v7, %v4648_v59  ;;  %v4529_v48 = vadd.f32 %v5968_v20, %v5856_v39  ;;  %v11003_v39 = vpop.f32.mrf.mxu1 }
 0x3c5   : > { %v5970_v24 = vpop.f32.mrf.mxu0  ;;  %6438 = vrcp.f32 %v4812_v14 }
 0x3c6   : > { %v5480_v42 = vmul.f32 -1.442695, %v10979_v31  ;;  %v4649_v33 = vmul.f32 %v10931_v3, %v4529_v48  ;;  %v5971_v9 = vadd.f32 %v5970_v24, %v5969_v37  ;;  %v6433_v61 = vpop.eup %6432  ;;  %v11012_v14 = vpop.f32.mrf.mxu1 }
 0x3c7   : > { %v5972_v43 = vpop.f32.mrf.mxu0  ;;  %v4813_v13 = vadd.f32 1.0, %v6433_v61 }
 0x3c8   : > { %v10988_v49 = vadd.f32 %v10936_v7, %v4649_v33  ;;  %v4534_v17 = vadd.f32 %v5971_v9, %v5859_v23  ;;  %6440 = vpow2.f32 %v5480_v42 }
 0x3c9   : > { %v5973_v18 = vpop.f32.mrf.mxu0  ;;  %6442 = vrcp.f32 %v4813_v13 }
 0x3ca   : > { %v5481_v62 = vmul.f32 -1.442695, %v10988_v49  ;;  %v4650_v22 = vmul.f32 %v10931_v3, %v4534_v17  ;;  %v5974_v60 = vadd.f32 %v5973_v18, %v5972_v43  ;;  %v11020_v18 = vpop.f32.mrf.mxu1 }
 0x3cb   : > { %v5975_v28 = vpop.f32.mrf.mxu0 }
 0x3cc   : > { %v10997_v35 = vadd.f32 %v10936_v7, %v4650_v22  ;;  %v4537_v29 = vadd.f32 %v5974_v60, %v5862_v1  ;;  %v6435_v45 = vpop.eup %6434  ;;  %6444 = vpow2.f32 %v5481_v62 }
 0x3cd   : > { %v5976_v51 = vpop.f32.mrf.mxu0  ;;  %v4814_v41 = vadd.f32 1.0, %v6435_v45 }
 0x3ce   : > { %v5482_v38 = vmul.f32 -1.442695, %v10997_v35  ;;  %v4651_v50 = vmul.f32 %v10931_v3, %v4537_v29  ;;  %v5977_v27 = vadd.f32 %v5976_v51, %v5975_v28 }
 0x3cf   : > { %v5978_v59 = vpop.f32.mrf.mxu0  ;;  %6446 = vrcp.f32 %v4814_v41 }
 0x3d0   : > { %v11006_v20 = vadd.f32 %v10936_v7, %v4651_v50  ;;  %v4542_v37 = vadd.f32 %v5977_v27, %v5865_v12  ;;  %v6437_v48 = vpop.eup %6436  ;;  %6448 = vpow2.f32 %v5482_v38  ;;  %v5874_v12 = vadd.f32 %v10904_v36, %v10902_v54  ;;  %v11031_v50 = vpop.f32.mrf.mxu1 }
 0x3d1   : > { %v5979_v30 = vpop.f32.mrf.mxu0  ;;  %v4815_v8 = vadd.f32 1.0, %v6437_v48 }
 0x3d2   : > { %v5483_v23 = vmul.f32 -1.442695, %v11006_v20  ;;  %v4652_v24 = vmul.f32 %v10931_v3, %v4542_v37  ;;  %v5980_v42 = vadd.f32 %v5979_v30, %v5978_v59  ;;  %v6439_v17 = vpop.eup %6438 }
 0x3d3   : > { %6450 = vrcp.f32 %v4815_v8  ;;  %v4908_v47 = vmul.f32 %v6439_v17, %v10943_v25  ;;  %v5877_v8 = vadd.f32 %v10908_v55, %v10906_v34 }
 0x3d4   : > { %v5981_v33 = vpop.f32.mrf.mxu0  ;;  %v11015_v9 = vadd.f32 %v10936_v7, %v4652_v24  ;;  %v4545_v43 = vadd.f32 %v5980_v42, %v5868_v44  ;;  %6452 = vpow2.f32 %v5483_v23  ;;  %v11047_v23 = vpop.f32.mrf.mxu1 }
 0x3d5   : > { %v6441_v46 = vpop.eup %6440 }
 0x3d6   : > { %v5982_v61 = vpop.f32.mrf.mxu0  ;;  %v5484_v1 = vmul.f32 -1.442695, %v11015_v9  ;;  %v4653_v13 = vmul.f32 %v10931_v3, %v4545_v43  ;;  %v4816_v22 = vadd.f32 1.0, %v6441_v46  ;;  %v6443_v45 = vpop.eup %6442 }
 0x3d7   : > { %v5983_v62 = vadd.f32 %v5982_v61, %v5981_v33  ;;  %v4909_v41 = vmul.f32 %v6443_v45, %v10952_v4 }
 0x3d8   : > { %v5984_v60 = vpop.f32.mrf.mxu0  ;;  %6454 = vpow2.f32 %v5484_v1  ;;  %v11024_v28 = vadd.f32 %v10936_v7, %v4653_v13  ;;  %v5880_v1 = vadd.f32 %v10912_v19, %v10910_v52 }
 0x3d9   : > { %v4550_v29 = vadd.f32 %v5983_v62, %v5871_v32  ;;  %v6445_v51 = vpop.eup %6444  ;;  %6456 = vrcp.f32 %v4816_v22  ;;  %v5707_v25 = vpack.c.bf16 %v4909_v41, %v4908_v47  ;;  %v11058_v22 = vpop.f32.mrf.mxu1 }
 0x3da   : > { %v5985_v53 = vpop.f32.mrf.mxu0  ;;  %v5485_v38 = vmul.f32 -1.442695, %v11024_v28  ;;  %v4817_v54 = vadd.f32 1.0, %v6445_v51 }
 0x3db   : > { %v4654_v27 = vmul.f32 %v10931_v3, %v4550_v29  ;;  %v5986_v59 = vadd.f32 %v5985_v53, %v5984_v60  ;;  %5708 = vst [vmem:[%s11039_s13] sm:$0xff] %v5707_v25  }
 0x3dc   : > { %v5987_v36 = vpop.f32.mrf.mxu0  ;;  %6458 = vpow2.f32 %v5485_v38  ;;  %v6447_v48 = vpop.eup %6446 }
 0x3dd   : > { %v11042_v4 = vadd.f32 %v10936_v7, %v4654_v27  ;;  %v4553_v37 = vadd.f32 %v5986_v59, %v5874_v12  ;;  %6460 = vrcp.f32 %v4817_v54  ;;  %v6449_v30 = vpop.eup %6448  ;;  %v4910_v34 = vmul.f32 %v6447_v48, %v10961_v40  ;;  %v11068_v38 = vpop.f32.mrf.mxu1 }
 0x3de   : > { %v5988_v44 = vpop.f32.mrf.mxu0  ;;  %v4818_v43 = vadd.f32 1.0, %v6449_v30 }
 0x3df   : > { %v5486_v24 = vmul.f32 -1.442695, %v11042_v4  ;;  %v4655_v42 = vmul.f32 %v10931_v3, %v4553_v37  ;;  %v5989_v33 = vadd.f32 %v5988_v44, %v5987_v36 }
 0x3e0   : > { %v5990_v17 = vpop.f32.mrf.mxu0  ;;  %v6451_v32 = vpop.eup %6450 }
 0x3e1   : > { %6462 = vpow2.f32 %v5486_v24  ;;  %v11052_v61 = vadd.f32 %v10936_v7, %v4655_v42  ;;  %v4558_v46 = vadd.f32 %v5989_v33, %v5877_v8  ;;  %v6453_v13 = vpop.eup %6452  ;;  %v4911_v62 = vmul.f32 %v6451_v32, %v10970_v2  ;;  %v11077_v24 = vpop.f32.mrf.mxu1 }
 0x3e2   : > { %v5991_v55 = vpop.f32.mrf.mxu0  ;;  %6464 = vrcp.f32 %v4818_v43  ;;  %v4819_v12 = vadd.f32 1.0, %v6453_v13  ;;  %v5883_v2 = vadd.f32 %v10916_v5, %v10914_v6  ;;  %v5886_v6 = vadd.f32 %v10920_v58, %v10918_v0 }
 0x3e3   : > { %v5487_v60 = vmul.f32 -1.442695, %v11052_v61  ;;  %v4656_v29 = vmul.f32 %v10931_v3, %v4558_v46  ;;  %v5992_v45 = vadd.f32 %v5991_v55, %v5990_v17  ;;  %v5712_v53 = vpack.c.bf16 %v4911_v62, %v4910_v34 }
 0x3e4   : > { %v5993_v47 = vpop.f32.mrf.mxu0  ;;  %v5889_v34 = vadd.f32 %v10926_v21, %v10922_v11  ;;  %v5892_v21 = vadd.f32 %v10949_v63, %v10940_v57 }
 0x3e5   : > { %6466 = vpow2.f32 %v5487_v60  ;;  %v11063_v52 = vadd.f32 %v10936_v7, %v4656_v29  ;;  %v4561_v19 = vadd.f32 %v5992_v45, %v5880_v1  ;;  %v6455_v40 = vpop.eup %6454  ;;  %5784 = vst [vmem:[%s11039_s13 + $0x8] sm:$0xff] %v5712_v53   ;;  %v11088_v60 = vpop.f32.mrf.mxu1 }
 0x3e6   : > { %6468 = vrcp.f32 %v4819_v12  ;;  %v5994_v51 = vpop.f32.mrf.mxu0  ;;  %v4820_v41 = vadd.f32 1.0, %v6455_v40  ;;  %v6457_v25 = vpop.eup %6456 }
 0x3e7   : > { %v5488_v27 = vmul.f32 -1.442695, %v11063_v52  ;;  %v4657_v59 = vmul.f32 %v10931_v3, %v4561_v19  ;;  %v5995_v54 = vadd.f32 %v5994_v51, %v5993_v47  ;;  %v4912_v17 = vmul.f32 %v6457_v25, %v10979_v31  ;;  %v11098_v51 = vpop.f32.mrf.mxu1 }
 0x3e8   : > { %v5996_v36 = vpop.f32.mrf.mxu0  ;;  %6470 = vrcp.f32 %v4820_v41 }
 0x3e9   : > { %v11073_v37 = vadd.f32 %v10936_v7, %v4657_v59  ;;  %v4566_v48 = vadd.f32 %v5995_v54, %v5883_v2  ;;  %v6459_v44 = vpop.eup %6458  ;;  %6472 = vpow2.f32 %v5488_v27 }
 0x3ea   : > { %v5997_v5 = vpop.f32.mrf.mxu0  ;;  %v6461_v30 = vpop.eup %6460  ;;  %v4821_v8 = vadd.f32 1.0, %v6459_v44 }
 0x3eb   : > { %v5489_v42 = vmul.f32 -1.442695, %v11073_v37  ;;  %v4658_v33 = vmul.f32 %v10931_v3, %v4566_v48  ;;  %v5998_v43 = vadd.f32 %v5997_v5, %v5996_v36  ;;  %v4913_v46 = vmul.f32 %v6461_v30, %v10988_v49 }
 0x3ec   : > { %v5999_v32 = vpop.f32.mrf.mxu0  ;;  %6474 = vrcp.f32 %v4821_v8  ;;  %v5895_v30 = vadd.f32 %v10967_v10, %v10958_v26  ;;  %v11109_v8 = vpop.f32.mrf.mxu1 }
 0x3ed   : > { %v11084_v0 = vadd.f32 %v10936_v7, %v4658_v33  ;;  %v4569_v58 = vadd.f32 %v5998_v43, %v5886_v6  ;;  %v5717_v55 = vpack.c.bf16 %v4913_v46, %v4912_v17  ;;  %6476 = vpow2.f32 %v5489_v42 }
 0x3ee   : > { %v6463_v1 = vpop.eup %6462  ;;  %v6000_v13 = vpop.f32.mrf.mxu0 }
 0x3ef   : > { %v4822_v62 = vadd.f32 1.0, %v6463_v1  ;;  %v5490_v31 = vmul.f32 -1.442695, %v11084_v0  ;;  %v4659_v49 = vmul.f32 %v10931_v3, %v4569_v58  ;;  %v6001_v29 = vadd.f32 %v6000_v13, %v5999_v32  ;;  %5785 = vst [vmem:[%s11039_s13 + $0x10] sm:$0xff] %v5717_v55   ;;  %v6465_v12 = vpop.eup %6464  ;;  %v11121_v55 = vpop.f32.mrf.mxu1 }
 0x3f0   : > { %v6002_v45 = vpop.f32.mrf.mxu0  ;;  %v4914_v54 = vmul.f32 %v6465_v12, %v10997_v35  ;;  %v5898_v58 = vadd.f32 %v10985_v16, %v10976_v15 }
 0x3f1   : > { %6478 = vrcp.f32 %v4822_v62  ;;  %v11094_v47 = vadd.f32 %v10936_v7, %v4659_v49  ;;  %v4574_v53 = vadd.f32 %v6001_v29, %v5889_v34 }
 0x3f2   : > { %v6467_v11 = vpop.eup %6466  ;;  %6480 = vpow2.f32 %v5490_v31  ;;  %v6003_v19 = vpop.f32.mrf.mxu0 }
 0x3f3   : > { %v6469_v40 = vpop.eup %6468  ;;  %v4823_v2 = vadd.f32 1.0, %v6467_v11  ;;  %v5491_v41 = vmul.f32 -1.442695, %v11094_v47  ;;  %v4660_v27 = vmul.f32 %v10931_v3, %v4574_v53  ;;  %v6004_v59 = vadd.f32 %v6003_v19, %v6002_v45  ;;  %v11131_v11 = vpop.f32.mrf.mxu1 }
 0x3f4   : > { %v4915_v36 = vmul.f32 %v6469_v40, %v11006_v20  ;;  %v6005_v25 = vpop.f32.mrf.mxu0  ;;  %v5901_v53 = vadd.f32 %v11003_v39, %v10994_v56 }
 0x3f5   : > { %6482 = vrcp.f32 %v4823_v2  ;;  %v11105_v57 = vadd.f32 %v10936_v7, %v4660_v27  ;;  %v4577_v63 = vadd.f32 %v6004_v59, %v5892_v21  ;;  %v6471_v48 = vpop.eup %6470 }
 0x3f6   : > { %v5722_v44 = vpack.c.bf16 %v4915_v36, %v4914_v54  ;;  %6484 = vpow2.f32 %v5491_v41  ;;  %v6006_v6 = vpop.f32.mrf.mxu0  ;;  %v6473_v5 = vpop.eup %6472  ;;  %v4916_v26 = vmul.f32 %v6471_v48, %v11015_v9  ;;  %v5904_v36 = vadd.f32 %v11020_v18, %v11012_v14 }
 0x3f7   : > { %v5492_v35 = vmul.f32 -1.442695, %v11105_v57  ;;  %v4661_v20 = vmul.f32 %v10931_v3, %v4577_v63  ;;  %v6007_v42 = vadd.f32 %v6006_v6, %v6005_v25  ;;  %v4824_v33 = vadd.f32 1.0, %v6473_v5  ;;  %v11142_v48 = vpop.f32.mrf.mxu1 }
 0x3f8   : > { %5786 = vst [vmem:[%s11039_s13 + $0x18] sm:$0xff] %v5722_v44   ;;  %v6008_v43 = vpop.f32.mrf.mxu0 }
 0x3f9   : > { %6486 = vpow2.f32 %v5492_v35  ;;  %v11115_v17 = vadd.f32 %v10936_v7, %v4661_v20  ;;  %v4582_v46 = vadd.f32 %v6007_v42, %v5895_v30  ;;  %v6475_v32 = vpop.eup %6474 }
 0x3fa   : > { %v6009_v10 = vpop.f32.mrf.mxu0  ;;  %v6477_v1 = vpop.eup %6476  ;;  %v4917_v34 = vmul.f32 %v6475_v32, %v11024_v28  ;;  %6488 = vrcp.f32 %v4824_v33 }
 0x3fb   : > { %v5493_v13 = vmul.f32 -1.442695, %v11115_v17  ;;  %v4662_v62 = vmul.f32 %v10931_v3, %v4582_v46  ;;  %v6010_v31 = vadd.f32 %v6009_v10, %v6008_v43  ;;  %v4825_v49 = vadd.f32 1.0, %v6477_v1  ;;  %v11152_v33 = vpop.f32.mrf.mxu1 }
 0x3fc   : > { %v6011_v29 = vpop.f32.mrf.mxu0  ;;  %v5727_v45 = vpack.c.bf16 %v4917_v34, %v4916_v26 }
 0x3fd   : > { %6490 = vpow2.f32 %v5493_v13  ;;  %v11126_v15 = vadd.f32 %v10936_v7, %v4662_v62  ;;  %v4585_v16 = vadd.f32 %v6010_v31, %v5898_v58  ;;  %v11161_v31 = vpop.f32.mrf.mxu1 }
 0x3fe   : > { %v6479_v9 = vpop.eup %6478  ;;  %6492 = vrcp.f32 %v4825_v49  ;;  %v6012_v28 = vpop.f32.mrf.mxu0  ;;  %5787 = vst [vmem:[%s11039_s13 + $0x20] sm:$0xff] %v5727_v45  }
 0x3ff   : > { %v6481_v12 = vpop.eup %6480  ;;  %v5494_v21 = vmul.f32 -1.442695, %v11126_v15  ;;  %v4663_v19 = vmul.f32 %v10931_v3, %v4585_v16  ;;  %v6013_v40 = vadd.f32 %v6012_v28, %v6011_v29  ;;  %v4918_v56 = vmul.f32 %v6479_v9, %v11042_v4 }
 0x400   : > { %v4826_v2 = vadd.f32 1.0, %v6481_v12  ;;  %v6014_v41 = vpop.f32.mrf.mxu0 }
 0x401   : > { %6494 = vpow2.f32 %v5494_v21  ;;  %v11136_v27 = vadd.f32 %v10936_v7, %v4663_v19  ;;  %v4590_v59 = vadd.f32 %v6013_v40, %v5901_v53  ;;  %v5913_v21 = vadd.f32 %v11088_v60, %v11077_v24 }
 0x402   : > { %v6483_v54 = vpop.eup %6482  ;;  %v6015_v39 = vpop.f32.mrf.mxu0  ;;  %6496 = vrcp.f32 %v4826_v2  ;;  %v5916_v60 = vadd.f32 %v11109_v8, %v11098_v51 }
 0x403   : > { %v6485_v25 = vpop.eup %6484  ;;  %v4919_v63 = vmul.f32 %v6483_v54, %v11052_v61  ;;  %v5495_v44 = vmul.f32 -1.442695, %v11136_v27  ;;  %v4664_v6 = vmul.f32 %v10931_v3, %v4590_v59  ;;  %v6016_v5 = vadd.f32 %v6015_v39, %v6014_v41  ;;  %v11172_v2 = vpop.f32.mrf.mxu1 }
 0x404   : > { %v4827_v30 = vadd.f32 1.0, %v6485_v25  ;;  %v6017_v35 = vpop.f32.mrf.mxu0  ;;  %v5907_v61 = vadd.f32 %v11047_v23, %v11031_v50  ;;  %v5910_v50 = vadd.f32 %v11068_v38, %v11058_v22 }
 0x405   : > { %v5732_v20 = vpack.c.bf16 %v4919_v63, %v4918_v56  ;;  %6498 = vpow2.f32 %v5495_v44  ;;  %v11147_v14 = vadd.f32 %v10936_v7, %v4664_v6  ;;  %v4593_v18 = vadd.f32 %v6016_v5, %v5904_v36  ;;  %v5926_v44 = vpop.f32.mrf.mxu1 }
 0x406   : > { %v6487_v4 = vpop.eup %6486  ;;  %6500 = vrcp.f32 %v4827_v30  ;;  %v6018_v42 = vpop.f32.mrf.mxu0 }
 0x407   : > { %5788 = vst [vmem:[%s11039_s13 + $0x28] sm:$0xff] %v5732_v20   ;;  %v4828_v43 = vadd.f32 1.0, %v6487_v4  ;;  %v5496_v46 = vmul.f32 -1.442695, %v11147_v14  ;;  %v4665_v32 = vmul.f32 %v10931_v3, %v4593_v18  ;;  %v6019_v58 = vadd.f32 %v6018_v42, %v6017_v35  ;;  %v6489_v10 = vpop.eup %6488 }
 0x408   : > { %v6020_v26 = vpop.f32.mrf.mxu0  ;;  %v4920_v9 = vmul.f32 %v6489_v10, %v11063_v52 }
 0x409   : > { %6502 = vrcp.f32 %v4828_v43  ;;  %v11157_v1 = vadd.f32 %v10936_v7, %v4665_v32  ;;  %v4598_v34 = vadd.f32 %v6019_v58, %v5907_v61  ;;  %v5919_v32 = vadd.f32 %v11131_v11, %v11121_v55  ;;  %v5927_v58 = vpop.f32.mrf.mxu1 }
 0x40a   : > { %v6491_v13 = vpop.eup %6490  ;;  %6504 = vpow2.f32 %v5496_v46  ;;  %v6021_v23 = vpop.f32.mrf.mxu0 }
 0x40b   : > { %v6493_v62 = vpop.eup %6492  ;;  %v4829_v49 = vadd.f32 1.0, %v6491_v13  ;;  %v5497_v29 = vmul.f32 -1.442695, %v11157_v1  ;;  %v4666_v45 = vmul.f32 %v10931_v3, %v4598_v34  ;;  %v6022_v16 = vadd.f32 %v6021_v23, %v6020_v26 }
 0x40c   : > { %v4921_v28 = vmul.f32 %v6493_v62, %v11073_v37  ;;  %v6023_v12 = vpop.f32.mrf.mxu0  ;;  %v5922_v62 = vadd.f32 %v11152_v33, %v11142_v48 }
 0x40d   : > { %6506 = vrcp.f32 %v4829_v49  ;;  %v11168_v22 = vadd.f32 %v10936_v7, %v4666_v45  ;;  %v4601_v38 = vadd.f32 %v6022_v16, %v5910_v50  ;;  %v5929_v45 = vpop.f32.mrf.mxu1 }
 0x40e   : > { %v6495_v53 = vpop.eup %6494  ;;  %v5737_v19 = vpack.c.bf16 %v4921_v28, %v4920_v9  ;;  %6508 = vpow2.f32 %v5497_v29  ;;  %v6024_v40 = vpop.f32.mrf.mxu0 }
 0x40f   : > { %v4830_v41 = vadd.f32 1.0, %v6495_v53  ;;  %v5498_v52 = vmul.f32 -1.442695, %v11168_v22  ;;  %v4667_v37 = vmul.f32 %v10931_v3, %v4601_v38  ;;  %v6025_v59 = vadd.f32 %v6024_v40, %v6023_v12  ;;  %v6497_v36 = vpop.eup %6496  ;;  %v5930_v40 = vpop.f32.mrf.mxu1 }
 0x410   : > { %5789 = vst [vmem:[%s11039_s13 + $0x30] sm:$0xff] %v5737_v19   ;;  %v6026_v54 = vpop.f32.mrf.mxu0  ;;  %v4922_v20 = vmul.f32 %v6497_v36, %v11084_v0  ;;  %v5925_v19 = vadd.f32 %v11172_v2, %v11161_v31 }
 0x411   : > { %6510 = vrcp.f32 %v4830_v41  ;;  %v11178_v56 = vadd.f32 %v10936_v7, %v4667_v37  ;;  %v4606_v39 = vadd.f32 %v6025_v59, %v5913_v21  ;;  %v5932_v2 = vpop.f32.mrf.mxu1 }
 0x412   : > { %v6499_v24 = vpop.eup %6498  ;;  %6512 = vpow2.f32 %v5498_v52  ;;  %v6027_v25 = vpop.f32.mrf.mxu0 }
 0x413   : > { %v6501_v63 = vpop.eup %6500  ;;  %v4831_v6 = vadd.f32 1.0, %v6499_v24  ;;  %v5499_v5 = vmul.f32 -1.442695, %v11178_v56  ;;  %v4668_v30 = vmul.f32 %v10931_v3, %v4606_v39  ;;  %v6028_v35 = vadd.f32 %v6027_v25, %v6026_v54 }
 0x414   : > { %v4923_v18 = vmul.f32 %v6501_v63, %v11094_v47  ;;  %v6029_v4 = vpop.f32.mrf.mxu0 }
 0x415   : > { %6514 = vrcp.f32 %v4831_v6  ;;  %v11187_v61 = vadd.f32 %v10936_v7, %v4668_v30  ;;  %v4609_v51 = vadd.f32 %v6028_v35, %v5916_v60  ;;  %v5928_v60 = vadd.f32 %v5927_v58, %v5926_v44 }
 0x416   : > { %v6503_v8 = vpop.eup %6502  ;;  %v5742_v42 = vpack.c.bf16 %v4923_v18, %v4922_v20  ;;  %6516 = vpow2.f32 %v5499_v5  ;;  %v6030_v43 = vpop.f32.mrf.mxu0 }
 0x417   : > { %v6505_v46 = vpop.eup %6504  ;;  %v5500_v0 = vmul.f32 -1.442695, %v11187_v61  ;;  %v4669_v26 = vmul.f32 %v10931_v3, %v4609_v51  ;;  %v6031_v47 = vadd.f32 %v6030_v43, %v6029_v4  ;;  %v4924_v55 = vmul.f32 %v6503_v8, %v11105_v57 }
 0x418   : > { %5790 = vst [vmem:[%s11039_s13 + $0x38] sm:$0xff] %v5742_v42   ;;  %v4832_v10 = vadd.f32 1.0, %v6505_v46  ;;  %v6032_v34 = vpop.f32.mrf.mxu0  ;;  %v5931_v8 = vadd.f32 %v5930_v40, %v5929_v45 }
 0x419   : > { %6518 = vpow2.f32 %v5500_v0  ;;  %v11195_v13 = vadd.f32 %v10936_v7, %v4669_v26  ;;  %v4614_v50 = vadd.f32 %v6031_v47, %v5919_v32 }
 0x41a   : > { %v6507_v23 = vpop.eup %6506  ;;  %v6033_v11 = vpop.f32.mrf.mxu0  ;;  %6520 = vrcp.f32 %v4832_v10 }
 0x41b   : > { %v6509_v49 = vpop.eup %6508  ;;  %v4925_v29 = vmul.f32 %v6507_v23, %v11115_v17  ;;  %v5501_v16 = vmul.f32 -1.442695, %v11195_v13  ;;  %v4670_v9 = vmul.f32 %v10931_v3, %v4614_v50  ;;  %v6034_v28 = vadd.f32 %v6033_v11, %v6032_v34 }
 0x41c   : > { %v4833_v12 = vadd.f32 1.0, %v6509_v49  ;;  %v6035_v38 = vpop.f32.mrf.mxu0 }
 0x41d   : > { %v5747_v53 = vpack.c.bf16 %v4925_v29, %v4924_v55  ;;  %6522 = vpow2.f32 %v5501_v16  ;;  %v11204_v48 = vadd.f32 %v10936_v7, %v4670_v9  ;;  %v4617_v57 = vadd.f32 %v6034_v28, %v5922_v62 }
 0x41e   : > { %v6511_v33 = vpop.eup %6510  ;;  %6524 = vrcp.f32 %v4833_v12  ;;  %v6036_v21 = vpop.f32.mrf.mxu0 }
 0x41f   : > { %v6513_v17 = vpop.eup %6512  ;;  %5791 = vst [vmem:[%s11039_s13 + $0x40] sm:$0xff] %v5747_v53   ;;  %v5502_v41 = vmul.f32 -1.442695, %v11204_v48  ;;  %v4671_v52 = vmul.f32 %v10931_v3, %v4617_v57  ;;  %v6037_v37 = vadd.f32 %v6036_v21, %v6035_v38  ;;  %v4926_v25 = vmul.f32 %v6511_v33, %v11126_v15 }
 0x420   : > { %v4834_v59 = vadd.f32 1.0, %v6513_v17  ;;  %v6038_v54 = vpop.f32.mrf.mxu0 }
 0x421   : > { %6526 = vpow2.f32 %v5502_v41  ;;  %v11212_v36 = vadd.f32 %v10936_v7, %v4671_v52  ;;  %v4622_v39 = vadd.f32 %v6037_v37, %v5925_v19 }
 0x422   : > { %v6515_v24 = vpop.eup %6514  ;;  %v6039_v63 = vpop.f32.mrf.mxu0  ;;  %6528 = vrcp.f32 %v4834_v59 }
 0x423   : > { %v6517_v31 = vpop.eup %6516  ;;  %v4927_v6 = vmul.f32 %v6515_v24, %v11136_v27  ;;  %v5503_v5 = vmul.f32 -1.442695, %v11212_v36  ;;  %v4672_v30 = vmul.f32 %v10931_v3, %v4622_v39  ;;  %v6040_v35 = vadd.f32 %v6039_v63, %v6038_v54  ;;  %v5933_v27 = vpop.f32.mrf.mxu1 }
 0x424   : > { %v4835_v20 = vadd.f32 1.0, %v6517_v31  ;;  %v6041_v18 = vpop.f32.mrf.mxu0  ;;  %v5934_v50 = vadd.f32 %v5933_v27, %v5932_v2 }
 0x425   : > { %v5752_v4 = vpack.c.bf16 %v4927_v6, %v4926_v25  ;;  %6530 = vpow2.f32 %v5503_v5  ;;  %v11219_v44 = vadd.f32 %v10936_v7, %v4672_v30  ;;  %v4625_v15 = vadd.f32 %v6040_v35, %v5928_v60 }
 0x426   : > { %v6519_v51 = vpop.eup %6518  ;;  %6532 = vrcp.f32 %v4835_v20  ;;  %v6042_v42 = vpop.f32.mrf.mxu0 }
 0x427   : > { %5792 = vst [vmem:[%s11039_s13 + $0x48] sm:$0xff] %v5752_v4   ;;  %v4836_v43 = vadd.f32 1.0, %v6519_v51  ;;  %v5504_v46 = vmul.f32 -1.442695, %v11219_v44  ;;  %v4673_v32 = vmul.f32 %v10931_v3, %v4625_v15  ;;  %v6043_v58 = vadd.f32 %v6042_v42, %v6041_v18  ;;  %v6521_v26 = vpop.eup %6520 }
 0x428   : > { %v6044_v0 = vpop.f32.mrf.mxu0  ;;  %v4928_v45 = vmul.f32 %v6521_v26, %v11147_v14 }
 0x429   : > { %6534 = vrcp.f32 %v4836_v43  ;;  %v11225_v47 = vadd.f32 %v10936_v7, %v4673_v32  ;;  %v4630_v10 = vadd.f32 %v6043_v58, %v5931_v8 }
 0x42a   : > { %v6523_v34 = vpop.eup %6522  ;;  %6536 = vpow2.f32 %v5504_v46  ;;  %v6045_v23 = vpop.f32.mrf.mxu0 }
 0x42b   : > { %v6525_v62 = vpop.eup %6524  ;;  %v4837_v55 = vadd.f32 1.0, %v6523_v34  ;;  %v5505_v11 = vmul.f32 -1.442695, %v11225_v47  ;;  %v4674_v49 = vmul.f32 %v10931_v3, %v4630_v10  ;;  %v6046_v29 = vadd.f32 %v6045_v23, %v6044_v0 }
 0x42c   : > { %v4929_v16 = vmul.f32 %v6525_v62, %v11157_v1 }
 0x42d   : > { %6538 = vrcp.f32 %v4837_v55  ;;  %v4714_v9 = vadd.f32 %v10936_v7, %v4674_v49  ;;  %v4633_v28 = vadd.f32 %v6046_v29, %v5934_v50 }
 0x42e   : > { %v6527_v12 = vpop.eup %6526  ;;  %v5757_v38 = vpack.c.bf16 %v4929_v16, %v4928_v45  ;;  %6540 = vpow2.f32 %v5505_v11 }
 0x42f   : > { %v4838_v53 = vadd.f32 1.0, %v6527_v12  ;;  %v5506_v57 = vmul.f32 -1.442695, %v4714_v9  ;;  %v4675_v33 = vmul.f32 %v10931_v3, %v4633_v28  ;;  %v6529_v21 = vpop.eup %6528 }
 0x430   : > { %5793 = vst [vmem:[%s11039_s13 + $0x50] sm:$0xff] %v5757_v38   ;;  %v4930_v41 = vmul.f32 %v6529_v21, %v11168_v22 }
 0x431   : > { %v4715_v17 = vadd.f32 %v10936_v7, %v4675_v33  ;;  %6542 = vpow2.f32 %v5506_v57 }
 0x432   : > { %v6531_v19 = vpop.eup %6530  ;;  %6544 = vrcp.f32 %v4838_v53 }
 0x433   : > { %v6533_v14 = vpop.eup %6532  ;;  %v4839_v1 = vadd.f32 1.0, %v6531_v19  ;;  %v5507_v40 = vmul.f32 -1.442695, %v4715_v17 }
 0x434   : > { %v4931_v52 = vmul.f32 %v6533_v14, %v11178_v56 }
 0x435   : > { %6546 = vrcp.f32 %v4839_v1 }
 0x436   : > { %v6535_v37 = vpop.eup %6534  ;;  %v5762_v59 = vpack.c.bf16 %v4931_v52, %v4930_v41  ;;  %6548 = vpow2.f32 %v5507_v40 }
 0x437   : > { %v6537_v3 = vpop.eup %6536  ;;  %v4932_v24 = vmul.f32 %v6535_v37, %v11187_v61 }
 0x438   : > { %5794 = vst [vmem:[%s11039_s13 + $0x58] sm:$0xff] %v5762_v59   ;;  %v4840_v54 = vadd.f32 1.0, %v6537_v3 }
 0x43a   : > { %v6539_v39 = vpop.eup %6538  ;;  %6550 = vrcp.f32 %v4840_v54 }
 0x43b   : > { %v6541_v7 = vpop.eup %6540  ;;  %v4933_v60 = vmul.f32 %v6539_v39, %v11195_v13 }
 0x43c   : > { %v4841_v25 = vadd.f32 1.0, %v6541_v7 }
 0x43d   : > { %v5767_v22 = vpack.c.bf16 %v4933_v60, %v4932_v24 }
 0x43e   : > { %6552 = vrcp.f32 %v4841_v25  ;;  %v6543_v56 = vpop.eup %6542 }
 0x43f   : > { %5795 = vst [vmem:[%s11039_s13 + $0x60] sm:$0xff] %v5767_v22   ;;  %v6545_v63 = vpop.eup %6544  ;;  %v4842_v31 = vadd.f32 1.0, %v6543_v56 }
 0x440   : > { %v4934_v5 = vmul.f32 %v6545_v63, %v11204_v48 }
 0x441   : > { %6554 = vrcp.f32 %v4842_v31 }
 0x442   : > { %v6547_v2 = vpop.eup %6546 }
 0x443   : > { %v6549_v6 = vpop.eup %6548  ;;  %v4935_v30 = vmul.f32 %v6547_v2, %v11212_v36 }
 0x444   : > { %v4843_v61 = vadd.f32 1.0, %v6549_v6 }
 0x445   : > { %v5772_v13 = vpack.c.bf16 %v4935_v30, %v4934_v5 }
 0x446   : > { %6556 = vrcp.f32 %v4843_v61 }
 0x447   : > { %5796 = vst [vmem:[%s11039_s13 + $0x68] sm:$0xff] %v5772_v13   ;;  %v6551_v35 = vpop.eup %6550 }
 0x448   : > { %v4936_v18 = vmul.f32 %v6551_v35, %v11219_v44 }
 0x44b   : > { %v6553_v20 = vpop.eup %6552 }
 0x44c   : > { %v4937_v4 = vmul.f32 %v6553_v20, %v11225_v47 }
 0x44e   : > { %v5777_v15 = vpack.c.bf16 %v4937_v4, %v4936_v18  ;;  %v6555_v51 = vpop.eup %6554 }
 0x44f   : > { %v4938_v42 = vmul.f32 %v6555_v51, %v4714_v9 }
 0x450   : > { %5797 = vst [vmem:[%s11039_s13 + $0x70] sm:$0xff] %v5777_v15  }
 0x453   : > { %v6557_v8 = vpop.eup %6556 }
 0x454   : > { %v4939_v48 = vmul.f32 %v6557_v8, %v4715_v17 }
 0x456   : > { %v5782_v27 = vpack.c.bf16 %v4939_v48, %v4938_v42 }
 0x458   : > { %5798 = vst [vmem:[%s11039_s13 + $0x78] sm:$0xff] %v5782_v27  }
 0x459 PF: > { %s17_s26 = sadd.s32 1, %s6582_s26   ;;  %s12127_s24 = smov %s6578_s25 }
 0x45a   : > { %p14_p5 = scmp.ge.s32.totalorder %s17_s26, 4   ;;  %s12128_s25 = smov %s12130_s27 }
 0x45c   :  { %16 = sbr.rel (!%p14_p5) target bundleno = 2 (0x2), region = 85 }

// kernel: sppf_forward.1
= control target key start
LH: loop header
LB: loop body
LE: loop exit
PB: predicated region body
PF: predicated region fallthrough
CT: control target
= control target key end

     0   :  { %s7225_s24 = smov 0   ;;  %s7227_s25 = smov 0   ;;  %s10457_s0 = inlined_call_operand.vmem [shape: bf16[2,256,128], index: 0, kind: input, shape index: {}]   ;;  %s10458_s1 = inlined_call_operand.vmem [shape: bf16[128,128], index: 1, kind: input, shape index: {}]   ;;  %s10459_s2 = inlined_call_operand.vmem [shape: f32[1,128], index: 2, kind: input, shape index: {}]   ;;  %s10460_s3 = inlined_call_operand.vmem [shape: f32[1,128], index: 3, kind: input, shape index: {}]   ;;  %s10461_s4 = inlined_call_operand.vmem [shape: bf16[512,128], index: 4, kind: input, shape index: {}]   ;;  %s10462_s5 = inlined_call_operand.vmem [shape: f32[1,128], index: 5, kind: input, shape index: {}]   ;;  %s10463_s6 = inlined_call_operand.vmem [shape: f32[1,128], index: 6, kind: input, shape index: {}]   ;;  %s10464_s7 = inlined_call_operand.vmem [shape: bf16[2,256,128], index: 7, kind: output, shape index: {}]  }
   0x1   :  { %s7229_s26 = smov 0  }
   0x2 LB: > { %s29_s27 = sadd.s32 1, %s7178_s25  ;;  %p5801_p0 = scmp.ge.s32.totalorder %s7182_s26, 1  ;;  %s7182_s26 = sphi %s7229_s26, %s17_s26   ;;  %s7178_s25 = sphi %s7227_s25, %s10760_s25   ;;  %s7174_s24 = sphi %s7225_s24, %s10759_s24  }
   0x3   : > { %p31_p1 = scmp.ge.s32.totalorder %s29_s27, 2  ;;  %p251_p2 = scmp.lt.s32.totalorder %s7182_s26, 3 }
   0x5   : > { %s10762_s27 = smov (%p31_p1, %s29_s27), 0  ;;  %p252_p3 = pnand %p5801_p0, %p251_p2 }
   0x7   : > { %255 = sbr.rel (%p252_p3) target bundleno = 1118 (0x45e), region = 48 }
   0xc   : > { %v6750_v0 = vld [vmem:[%s10458_s1 + $0x38] sm:$0xff]   ;;  %p286_p4 = scmp.lt.s32.totalorder %s7174_s24, 1  ;;  %v6751_v1 = vld [vmem:[%s10458_s1 + $0x30] sm:$0xff]   ;;  %v6752_v2 = vld [vmem:[%s10458_s1 + $0x28] sm:$0xff]   ;;  %vm1151_vm0 = vcmask 1041408   ;;  %vm1313_vm1 = vcmask 1046528  }
   0xd   : > { %6661 = vmatprep.subr.bf16.mxu0 %v6750_v0  ;;  %6709 = vmatprep.subr.bf16.mxu1 %v6750_v0  ;;  %v6753_v3 = vld [vmem:[%s10458_s1 + $0x20] sm:$0xff]   ;;  %v6754_v6 = vld [vmem:[%s10458_s1 + $0x18] sm:$0xff]   ;;  %v6755_v7 = vld [vmem:[%s10458_s1 + $0x10] sm:$0xff]   ;;  %vm1462_vm2 = vcmask 1045504   ;;  %vm1611_vm3 = vcmask 1044480   ;;  %vm1760_vm4 = vcmask 1043456  }
   0xe   : > { %s10764_s24 = smov (!%p286_p4, %s7174_s24), 1  ;;  %6662 = vmatpush3.bf16.msra.mxu0 %v6750_v0  ;;  %6717 = vmatpush3.bf16.msra.mxu1 %v6750_v0  ;;  %v6756_v8 = vld [vmem:[%s10458_s1 + $0x8] sm:$0xff]   ;;  %v6757_v9 = vld [vmem:[%s10458_s1] sm:$0xff]  }
   0xf   : > { %6663 = vmatprep.subr.bf16.mxu0 %v6751_v1  ;;  %6710 = vmatprep.subr.bf16.mxu1 %v6751_v1  ;;  %s6156_s11 = sshll.u32 %s10764_s24, 7  ;;  %v7296_v24 = vld [vmem:[%s10459_s2] ss:$0 sm:$0xff] }
  0x10   : > { %s7260_s14 = scalar_lea.vmem %s10457_s0, %s6156_s11  ;;  %v7301_v26 = vld [vmem:[%s10460_s3] ss:$0 sm:$0xff]  ;;  %s10180_s13 = scalar_lea.vmem %s10464_s7, %s6156_s11 }
  0x11   : > { %v6758_v4 = vld [vmem:[%s7260_s14] sm:$0xff]   ;;  %v6760_v10 = vld [vmem:[%s7260_s14 + $0x8] sm:$0xff]   ;;  %v6762_v12 = vld [vmem:[%s7260_s14 + $0x10] sm:$0xff]  }
  0x12   : > { %6664 = vmatpush3.bf16.msra.mxu0 %v6751_v1  ;;  %6718 = vmatpush3.bf16.msra.mxu1 %v6751_v1  ;;  %v6759_v5 = vld [vmem:[%s7260_s14 + $0x40] sm:$0xff]   ;;  %v6761_v11 = vld [vmem:[%s7260_s14 + $0x48] sm:$0xff]   ;;  %v6763_v13 = vld [vmem:[%s7260_s14 + $0x50] sm:$0xff]  }
  0x13   : > { %6665 = vmatprep.subr.bf16.mxu0 %v6752_v2  ;;  %6711 = vmatprep.subr.bf16.mxu1 %v6752_v2  ;;  %v6764_v14 = vld [vmem:[%s7260_s14 + $0x18] sm:$0xff]   ;;  %v6766_v16 = vld [vmem:[%s7260_s14 + $0x20] sm:$0xff]   ;;  %v6768_v18 = vld [vmem:[%s7260_s14 + $0x28] sm:$0xff]  }
  0x14   : > { %6677 = vmatprep.mubr.bf16.mxu0 %v6758_v4  ;;  %6693 = vmatprep.mubr.bf16.mxu1 %v6759_v5  ;;  %v6765_v15 = vld [vmem:[%s7260_s14 + $0x58] sm:$0xff]   ;;  %v6767_v17 = vld [vmem:[%s7260_s14 + $0x60] sm:$0xff]   ;;  %v6769_v19 = vld [vmem:[%s7260_s14 + $0x68] sm:$0xff]  }
  0x15   : > { %v6770_v20 = vld [vmem:[%s7260_s14 + $0x30] sm:$0xff]   ;;  %v6772_v22 = vld [vmem:[%s7260_s14 + $0x38] sm:$0xff]  }
  0x16   : > { %6666 = vmatpush3.bf16.msra.mxu0 %v6752_v2  ;;  %6719 = vmatpush3.bf16.msra.mxu1 %v6752_v2  ;;  %v6771_v21 = vld [vmem:[%s7260_s14 + $0x70] sm:$0xff]   ;;  %v6773_v23 = vld [vmem:[%s7260_s14 + $0x78] sm:$0xff]  }
  0x17   : > { %6667 = vmatprep.subr.bf16.mxu0 %v6753_v3  ;;  %6712 = vmatprep.subr.bf16.mxu1 %v6753_v3 }
  0x1a   : > { %6668 = vmatpush3.bf16.msra.mxu0 %v6753_v3  ;;  %6720 = vmatpush3.bf16.msra.mxu1 %v6753_v3 }
  0x1b   : > { %6669 = vmatprep.subr.bf16.mxu0 %v6754_v6  ;;  %6713 = vmatprep.subr.bf16.mxu1 %v6754_v6 }
  0x1e   : > { %6670 = vmatpush3.bf16.msra.mxu0 %v6754_v6  ;;  %6721 = vmatpush3.bf16.msra.mxu1 %v6754_v6 }
  0x1f   : > { %6671 = vmatprep.subr.bf16.mxu0 %v6755_v7  ;;  %6714 = vmatprep.subr.bf16.mxu1 %v6755_v7 }
  0x22   : > { %6672 = vmatpush3.bf16.msra.mxu0 %v6755_v7  ;;  %6722 = vmatpush3.bf16.msra.mxu1 %v6755_v7 }
  0x23   : > { %6673 = vmatprep.subr.bf16.mxu0 %v6756_v8  ;;  %6715 = vmatprep.subr.bf16.mxu1 %v6756_v8 }
  0x26   : > { %6674 = vmatpush3.bf16.msra.mxu0 %v6756_v8  ;;  %6723 = vmatpush3.bf16.msra.mxu1 %v6756_v8 }
  0x27   : > { %6675 = vmatprep.subr.bf16.mxu0 %v6757_v9  ;;  %6716 = vmatprep.subr.bf16.mxu1 %v6757_v9 }
  0x2a   : > { %6676 = vmatpush3.bf16.msra.mxu0 %v6757_v9  ;;  %6724 = vmatpush3.bf16.msra.mxu1 %v6757_v9 }
  0x2d   : > { %6678 = vmatmul.mubr.bf16.vlgmr.msra.gmra.mxu0 %v6760_v10  ;;  %6694 = vmatmul.mubr.bf16.vlgmr.msra.gmra.mxu1 %v6761_v11 }
  0x2e   : > { %6681 = vmatprep.mubr.bf16.mxu0 %v6762_v12  ;;  %6697 = vmatprep.mubr.bf16.mxu1 %v6763_v13 }
  0x35   : > { %6682 = vmatmul.mubr.bf16.gmra.mxu0 %v6764_v14  ;;  %6698 = vmatmul.mubr.bf16.gmra.mxu1 %v6765_v15 }
  0x36   : > { %6685 = vmatprep.mubr.bf16.mxu0 %v6766_v16  ;;  %6701 = vmatprep.mubr.bf16.mxu1 %v6767_v17 }
  0x3d   : > { %6686 = vmatmul.mubr.bf16.gmra.mxu0 %v6768_v18  ;;  %6702 = vmatmul.mubr.bf16.gmra.mxu1 %v6769_v19 }
  0x3e   : > { %6689 = vmatprep.mubr.bf16.mxu0 %v6770_v20  ;;  %6705 = vmatprep.mubr.bf16.mxu1 %v6771_v21  ;;  %v7184_v21 = vmov -1e+30  }
  0x45   : > { %6690 = vmatmul.mubr.bf16.gmra.mxu0 %v6772_v22  ;;  %6706 = vmatmul.mubr.bf16.gmra.mxu1 %v6773_v23  ;;  %v1314_v22 = vrot.slane %v7184_v21, 1 }
  0xed   : > { %v6679_v25 = vpop.f32.mrf.mxu0  ;;  %v6695_v27 = vpop.f32.mrf.mxu1 }
  0xee   : > { %v666_v28 = vmul.f32 %v6679_v25, %v7296_v24  ;;  %v682_v29 = vmul.f32 %v6695_v27, %v7296_v24 }
  0xef   : > { %v530_v30 = vpop.f32.mrf.mxu0  ;;  %v594_v31 = vpop.f32.mrf.mxu1 }
  0xf0   : > { %v7306_v32 = vadd.f32 %v7301_v26, %v666_v28  ;;  %v7309_v33 = vadd.f32 %v7301_v26, %v682_v29  ;;  %v664_v34 = vmul.f32 %v7296_v24, %v530_v30  ;;  %v680_v35 = vmul.f32 %v7296_v24, %v594_v31 }
  0xf1   : > { %v6680_v36 = vpop.f32.mrf.mxu0  ;;  %v6696_v37 = vpop.f32.mrf.mxu1 }
  0xf2   : > { %v5834_v38 = vmul.f32 -1.442695, %v7306_v32  ;;  %v5850_v39 = vmul.f32 -1.442695, %v7309_v33  ;;  %v7316_v40 = vadd.f32 %v7301_v26, %v664_v34  ;;  %v7319_v41 = vadd.f32 %v7301_v26, %v680_v35 }
  0xf3   : > { %v667_v42 = vmul.f32 %v6680_v36, %v7296_v24  ;;  %v683_v43 = vmul.f32 %v6696_v37, %v7296_v24  ;;  %v533_v44 = vpop.f32.mrf.mxu0  ;;  %v597_v45 = vpop.f32.mrf.mxu1  ;;  %v1429_v36 = vmax.f32 %v1314_v22, -1e+30  ;;  %v1463_v37 = vrot.slane %v7184_v21, 2 }
  0xf4   : > { %6902 = vpow2.f32 %v5834_v38  ;;  %v5832_v46 = vmul.f32 -1.442695, %v7316_v40  ;;  %v5848_v47 = vmul.f32 -1.442695, %v7319_v41  ;;  %v665_v48 = vmul.f32 %v7296_v24, %v533_v44 }
  0xf5   : > { %6904 = vpow2.f32 %v5850_v39  ;;  %v7327_v49 = vadd.f32 %v7301_v26, %v667_v42  ;;  %v7330_v50 = vadd.f32 %v7301_v26, %v683_v43  ;;  %v681_v51 = vmul.f32 %v7296_v24, %v597_v45  ;;  %v6683_v52 = vpop.f32.mrf.mxu0  ;;  %v6699_v53 = vpop.f32.mrf.mxu1 }
  0xf6   : > { %6906 = vpow2.f32 %v5832_v46  ;;  %v7334_v54 = vadd.f32 %v7301_v26, %v665_v48  ;;  %v670_v55 = vmul.f32 %v6683_v52, %v7296_v24  ;;  %v686_v56 = vmul.f32 %v6699_v53, %v7296_v24 }
  0xf7   : > { %6908 = vpow2.f32 %v5848_v47  ;;  %v5835_v57 = vmul.f32 -1.442695, %v7327_v49  ;;  %v5851_v58 = vmul.f32 -1.442695, %v7330_v50  ;;  %v7341_v59 = vadd.f32 %v7301_v26, %v681_v51  ;;  %v546_v60 = vpop.f32.mrf.mxu0  ;;  %v610_v61 = vpop.f32.mrf.mxu1 }
  0xf8   : > { %v5833_v62 = vmul.f32 -1.442695, %v7334_v54  ;;  %v7345_v63 = vadd.f32 %v7301_v26, %v670_v55  ;;  %v7348_v0 = vadd.f32 %v7301_v26, %v686_v56  ;;  %v668_v1 = vmul.f32 %v7296_v24, %v546_v60 }
  0xf9   : > { %6910 = vpow2.f32 %v5835_v57  ;;  %v5849_v2 = vmul.f32 -1.442695, %v7341_v59  ;;  %v684_v3 = vmul.f32 %v7296_v24, %v610_v61  ;;  %v6684_v4 = vpop.f32.mrf.mxu0  ;;  %v6700_v8 = vpop.f32.mrf.mxu1  ;;  %v1578_v48 = vmax.f32 %v1429_v36, %v1463_v37 }
  0xfa   : > { %6912 = vpow2.f32 %v5851_v58  ;;  %v5838_v5 = vmul.f32 -1.442695, %v7345_v63  ;;  %v5854_v6 = vmul.f32 -1.442695, %v7348_v0  ;;  %v7356_v7 = vadd.f32 %v7301_v26, %v668_v1 }
  0xfb   : > { %6914 = vpow2.f32 %v5833_v62  ;;  %v7359_v9 = vadd.f32 %v7301_v26, %v684_v3  ;;  %v671_v10 = vmul.f32 %v6684_v4, %v7296_v24  ;;  %v687_v11 = vmul.f32 %v6700_v8, %v7296_v24  ;;  %v549_v12 = vpop.f32.mrf.mxu0  ;;  %v613_v29 = vpop.f32.mrf.mxu1 }
  0xfc   : > { %6916 = vpow2.f32 %v5849_v2  ;;  %v5836_v13 = vmul.f32 -1.442695, %v7356_v7  ;;  %v669_v14 = vmul.f32 %v7296_v24, %v549_v12  ;;  %v685_v39 = vmul.f32 %v7296_v24, %v613_v29 }
  0xfd   : > { %6918 = vpow2.f32 %v5838_v5  ;;  %v5852_v15 = vmul.f32 -1.442695, %v7359_v9  ;;  %v7367_v16 = vadd.f32 %v7301_v26, %v671_v10  ;;  %v7370_v17 = vadd.f32 %v7301_v26, %v687_v11  ;;  %v6687_v43 = vpop.f32.mrf.mxu0  ;;  %v6703_v57 = vpop.f32.mrf.mxu1 }
  0xfe   : > { %6920 = vpow2.f32 %v5854_v6  ;;  %v7373_v18 = vadd.f32 %v7301_v26, %v669_v14  ;;  %v1612_v51 = vrot.slane %v7184_v21, 3  ;;  %v7380_v55 = vadd.f32 %v7301_v26, %v685_v39 }
  0xff   : > { %6922 = vpow2.f32 %v5836_v13  ;;  %v5839_v19 = vmul.f32 -1.442695, %v7367_v16  ;;  %v5855_v20 = vmul.f32 -1.442695, %v7370_v17  ;;  %v674_v56 = vmul.f32 %v6687_v43, %v7296_v24  ;;  %v562_v2 = vpop.f32.mrf.mxu0 }
 0x100   : > { %6924 = vpow2.f32 %v5852_v15  ;;  %v5837_v23 = vmul.f32 -1.442695, %v7373_v18  ;;  %v690_v61 = vmul.f32 %v6703_v57, %v7296_v24  ;;  %v1727_v4 = vmax.f32 %v1578_v48, %v1612_v51 }
 0x101   : > { %v6903_v25 = vpop.eup %6902  ;;  %6926 = vpow2.f32 %v5839_v19  ;;  %v1761_v5 = vrot.slane %v7184_v21, 4  ;;  %v5853_v8 = vmul.f32 -1.442695, %v7380_v55  ;;  %v7386_v10 = vadd.f32 %v7301_v26, %v674_v56 }
 0x102   : > { %v6905_v27 = vpop.eup %6904  ;;  %v833_v28 = vadd.f32 1.0, %v6903_v25  ;;  %6928 = vpow2.f32 %v5855_v20  ;;  %v7389_v13 = vadd.f32 %v7301_v26, %v690_v61  ;;  %v672_v19 = vmul.f32 %v7296_v24, %v562_v2  ;;  %v6688_v20 = vpop.f32.mrf.mxu0 }
 0x103   : > { %v6907_v30 = vpop.eup %6906  ;;  %v849_v31 = vadd.f32 1.0, %v6905_v27  ;;  %6930 = vpow2.f32 %v5837_v23  ;;  %v7392_v21 = vmax.f32 %v1727_v4, %v1761_v5  ;;  %v626_v25 = vpop.f32.mrf.mxu1  ;;  %v7395_v29 = vmul.f32 -1.442695, %v7386_v10 }
 0x104   : > { %v6909_v34 = vpop.eup %6908  ;;  %6932 = vrcp.f32 %v833_v28  ;;  %v831_v35 = vadd.f32 1.0, %v6907_v30  ;;  %v7398_v30 = vmul.f32 %v7296_v24, %v626_v25  ;;  %v7407_v36 = vmul.f32 %v6688_v20, %v7296_v24 }
 0x105   : > { %6934 = vrcp.f32 %v849_v31  ;;  %v847_v38 = vadd.f32 1.0, %v6909_v34  ;;  %10547 = vst [vmem:[#allocation3_spill] sm:$0xff] %v7392_v21 }
 0x106   : > { %v6911_v42 = vpop.eup %6910  ;;  %6936 = vrcp.f32 %v831_v35  ;;  %v7404_v35 = vmul.f32 -1.442695, %v7389_v13 }
 0x107   : > { %v6913_v44 = vpop.eup %6912  ;;  %6938 = vrcp.f32 %v847_v38  ;;  %v834_v45 = vadd.f32 1.0, %v6911_v42  ;;  %v7413_v42 = vadd.f32 %v7301_v26, %v672_v19 }
 0x108   : > { %v6915_v46 = vpop.eup %6914  ;;  %v850_v47 = vadd.f32 1.0, %v6913_v44 }
 0x109   : > { %v6917_v52 = vpop.eup %6916  ;;  %6940 = vrcp.f32 %v834_v45  ;;  %v832_v53 = vadd.f32 1.0, %v6915_v46 }
 0x10a   : > { %v6919_v58 = vpop.eup %6918  ;;  %6942 = vrcp.f32 %v850_v47  ;;  %v848_v60 = vadd.f32 1.0, %v6917_v52 }
 0x10b   : > { %v6921_v62 = vpop.eup %6920  ;;  %6944 = vrcp.f32 %v832_v53  ;;  %v837_v1 = vadd.f32 1.0, %v6919_v58 }
 0x10c   : > { %v6923_v3 = vpop.eup %6922  ;;  %6946 = vrcp.f32 %v848_v60  ;;  %v853_v12 = vadd.f32 1.0, %v6921_v62 }
 0x10d   : > { %v6925_v6 = vpop.eup %6924  ;;  %6948 = vrcp.f32 %v837_v1  ;;  %v835_v15 = vadd.f32 1.0, %v6923_v3 }
 0x10e   : > { %v6927_v11 = vpop.eup %6926  ;;  %v851_v23 = vadd.f32 1.0, %v6925_v6  ;;  %6950 = vpow2.f32 %v5853_v8 }
 0x10f   : > { %v6929_v14 = vpop.eup %6928  ;;  %v838_v28 = vadd.f32 1.0, %v6927_v11  ;;  %6952 = vrcp.f32 %v853_v12 }
 0x110   : > { %v6931_v22 = vpop.eup %6930  ;;  %6954 = vrcp.f32 %v835_v15  ;;  %v854_v39 = vadd.f32 1.0, %v6929_v14 }
 0x111   : > { %v6933_v27 = vpop.eup %6932  ;;  %6956 = vrcp.f32 %v851_v23  ;;  %v7433_v53 = vadd.f32 1.0, %v6931_v22 }
 0x112   : > { %v6935_v31 = vpop.eup %6934  ;;  %v7401_v34 = vmul.f32 %v6933_v27, %v7306_v32  ;;  %6958 = vrcp.f32 %v838_v28 }
 0x113   : > { %v6937_v37 = vpop.eup %6936  ;;  %v7410_v38 = vmul.f32 %v6935_v31, %v7309_v33  ;;  %6960 = vrcp.f32 %v854_v39 }
 0x114   : > { %v6939_v43 = vpop.eup %6938  ;;  %v6160_v32 = vpack.c.bf16 %v7401_v34, %v7401_v34  ;;  %v1155_v44 = vrot.slane %v7401_v34, 6  ;;  %v7419_v45 = vmul.f32 %v6937_v37, %v7316_v40  ;;  %6962 = vrcp.f32 %v7433_v53 }
 0x115   : > { %v6176_v46 = vpack.c.bf16 %v7410_v38, %v7410_v38  ;;  %v1179_v33 = vrot.slane %v7410_v38, 6  ;;  %v7425_v47 = vmul.f32 %v6939_v43, %v7319_v41  ;;  %6964 = vpow2.f32 %v7395_v29 }
 0x116   : > { %v6941_v48 = vpop.eup %6940  ;;  %1089 = vst [vmem:[#allocation2 + $0x20] sm:$0xf] %v6160_v32  ;;  %v7428_v51 = vsel %vm1151_vm0, -1e+30, %v1155_v44  ;;  %v6158_v52 = vpack.c.bf16 %v7419_v45, %v7419_v45  ;;  %v1152_v40 = vrot.slane %v7419_v45, 6  ;;  %6966 = vpow2.f32 %v7404_v35 }
 0x117   : > { %v6943_v56 = vpop.eup %6942  ;;  %v1321_v57 = vrot.slane %v7428_v51, 1  ;;  %v1470_v58 = vrot.slane %v7428_v51, 2  ;;  %v1619_v41 = vrot.slane %v7428_v51, 3  ;;  %1105 = vst [vmem:[#allocation2 + $0x120] sm:$0xf] %v6176_v46  ;;  %v6174_v1 = vpack.c.bf16 %v7425_v47, %v7425_v47 }
 0x118   : > { %v6945_v60 = vpop.eup %6944  ;;  %v7439_v61 = vsel %vm1151_vm0, -1e+30, %v1179_v33  ;;  %1087 = vst [vmem:[#allocation2] sm:$0xf] %v6158_v52  ;;  %v7444_v62 = vsel %vm1151_vm0, -1e+30, %v1152_v40  ;;  %v930_v22 = vmul.f32 %v6941_v48, %v7327_v49  ;;  %v946_v23 = vmul.f32 %v6943_v56, %v7330_v50 }
 0x119   : > { %v10465_v2 = vrot.slane %v7425_v47, 6  ;;  %v1768_v3 = vrot.slane %v7428_v51, 4  ;;  %v1361_v4 = vrot.slane %v7439_v61, 1  ;;  %v1510_v5 = vrot.slane %v7439_v61, 2  ;;  %v6947_v8 = vpop.eup %6946  ;;  %1103 = vst [vmem:[#allocation2 + $0x100] sm:$0xf] %v6174_v1 }
 0x11a   : > { %v1659_v6 = vrot.slane %v7439_v61, 3  ;;  %v1808_v11 = vrot.slane %v7439_v61, 4  ;;  %v1316_v12 = vrot.slane %v7444_v62, 1  ;;  %v6949_v19 = vpop.eup %6948  ;;  %v7465_v25 = vmul.f32 %v6945_v60, %v7334_v54 }
 0x11b   : > { %v7460_v20 = vsel %vm1151_vm0, -1e+30, %v10465_v2  ;;  %v6161_v37 = vpack.c.bf16 %v930_v22, %v930_v22  ;;  %v1156_v38 = vrot.slane %v930_v22, 6  ;;  %v6177_v39 = vpack.c.bf16 %v946_v23, %v946_v23  ;;  %v7471_v32 = vpop.eup %6950 }
 0x11c   : > { %v1180_v43 = vrot.slane %v946_v23, 6  ;;  %v6159_v49 = vpack.c.bf16 %v7465_v25, %v7465_v25  ;;  %v1153_v50 = vrot.slane %v7465_v25, 6  ;;  %v7477_v54 = vmul.f32 %v6947_v8, %v7341_v59  ;;  %v7482_v48 = vpop.eup %6952 }
 0x11d   : > { %v7480_v46 = vmul.f32 %v6949_v19, %v7345_v63  ;;  %1090 = vst [vmem:[#allocation2 + $0x30] sm:$0xf] %v6161_v37  ;;  %v1157_v52 = vsel %vm1151_vm0, %v1155_v44, %v1156_v38  ;;  %v1265_v56 = vsel %vm1151_vm0, %v1156_v38, -1e+30  ;;  %1106 = vst [vmem:[#allocation2 + $0x130] sm:$0xf] %v6177_v39  ;;  %v7488_v22 = vpop.eup %6954 }
 0x11e   : > { %v1181_v60 = vsel %vm1151_vm0, %v1179_v33, %v1180_v43  ;;  %v1273_v1 = vsel %vm1151_vm0, %v1180_v43, -1e+30  ;;  %v1322_v23 = vrot.slane %v1157_v52, 1  ;;  %v1324_v59 = vrot.slane %v1265_v56, 1  ;;  %1088 = vst [vmem:[#allocation2 + $0x10] sm:$0xf] %v6159_v49  ;;  %v7490_v63 = vpop.eup %6956 }
 0x11f   : > { %v1471_v8 = vrot.slane %v1157_v52, 2  ;;  %v1473_v25 = vrot.slane %v1265_v56, 2  ;;  %v1620_v19 = vrot.slane %v1157_v52, 3  ;;  %v1622_v37 = vrot.slane %v1265_v56, 3  ;;  %v7492_v31 = vpop.eup %6958 }
 0x120   : > { %v1769_v34 = vrot.slane %v1157_v52, 4  ;;  %v1771_v44 = vrot.slane %v1265_v56, 4  ;;  %v1323_v33 = vsel %vm1313_vm1, %v1321_v57, %v1322_v23  ;;  %v1325_v38 = vsel %vm1313_vm1, %v1322_v23, %v1324_v59  ;;  %v7507_v27 = vpop.eup %6960 }
 0x121   : > { %v1472_v39 = vsel %vm1462_vm2, %v1470_v58, %v1471_v8  ;;  %v1474_v43 = vsel %vm1462_vm2, %v1471_v8, %v1473_v25  ;;  %v1432_v49 = vmax.f32 %v7428_v51, %v1323_v33  ;;  %v1433_v28 = vmax.f32 %v1157_v52, %v1325_v38  ;;  %v6963_v35 = vpop.eup %6962 }
 0x122   : > { %v1621_v56 = vsel %vm1611_vm3, %v1619_v41, %v1620_v19  ;;  %v1623_v2 = vsel %vm1611_vm3, %v1620_v19, %v1622_v37  ;;  %v1770_v57 = vsel %vm1760_vm4, %v1768_v3, %v1769_v34  ;;  %v1772_v23 = vsel %vm1760_vm4, %v1769_v34, %v1771_v44 }
 0x123   : > { %v1362_v59 = vrot.slane %v1181_v60, 1  ;;  %v1364_v15 = vrot.slane %v1273_v1, 1  ;;  %v1581_v58 = vmax.f32 %v1432_v49, %v1472_v39  ;;  %v1582_v14 = vmax.f32 %v1433_v28, %v1474_v43 }
 0x124   : > { %v1511_v8 = vrot.slane %v1181_v60, 2  ;;  %v1513_v25 = vrot.slane %v1273_v1, 2  ;;  %v1660_v52 = vrot.slane %v1181_v60, 3  ;;  %v1662_v19 = vrot.slane %v1273_v1, 3 }
 0x125   : > { %v1363_v51 = vsel %vm1313_vm1, %v1361_v4, %v1362_v59  ;;  %v1365_v41 = vsel %vm1313_vm1, %v1362_v59, %v1364_v15  ;;  %v1730_v37 = vmax.f32 %v1581_v58, %v1621_v56  ;;  %v1731_v33 = vmax.f32 %v1582_v14, %v1623_v2 }
 0x126   : > { %v1448_v3 = vmax.f32 %v7439_v61, %v1363_v51  ;;  %v1449_v38 = vmax.f32 %v1181_v60, %v1365_v41  ;;  %v1512_v34 = vsel %vm1462_vm2, %v1510_v5, %v1511_v8  ;;  %v1514_v28 = vsel %vm1462_vm2, %v1511_v8, %v1513_v25 }
 0x127   : > { %v1661_v44 = vsel %vm1611_vm3, %v1659_v6, %v1660_v52  ;;  %v1663_v4 = vsel %vm1611_vm3, %v1660_v52, %v1662_v19  ;;  %v7524_v15 = vmax.f32 %v1730_v37, %v1770_v57  ;;  %v7526_v39 = vmax.f32 %v1731_v33, %v1772_v23 }
 0x128   : > { %v1597_v2 = vmax.f32 %v1448_v3, %v1512_v34  ;;  %v1598_v14 = vmax.f32 %v1449_v38, %v1514_v28  ;;  %v1809_v43 = vrot.slane %v1181_v60, 4  ;;  %v1811_v49 = vrot.slane %v1273_v1, 4 }
 0x129   : > { %v1154_v5 = vsel %vm1151_vm0, %v1152_v40, %v1153_v50  ;;  %v1264_v56 = vsel %vm1151_vm0, %v1153_v50, -1e+30  ;;  %v10550_v61 = vrot.slane %v7444_v62, 2  ;;  %v1177_v28 = vrot.slane %v7477_v54, 6 }
 0x12a   : > { %v1746_v59 = vmax.f32 %v1597_v2, %v1661_v44  ;;  %v1747_v58 = vmax.f32 %v1598_v14, %v1663_v4  ;;  %v1317_v8 = vrot.slane %v1154_v5, 1  ;;  %v1319_v6 = vrot.slane %v1264_v56, 1 }
 0x12b   : > { %v1810_v57 = vsel %vm1760_vm4, %v1808_v11, %v1809_v43  ;;  %v1812_v23 = vsel %vm1760_vm4, %v1809_v43, %v1811_v49  ;;  %v1466_v25 = vrot.slane %v1154_v5, 2  ;;  %v1468_v51 = vrot.slane %v1264_v56, 2 }
 0x12c   : > { %v7536_v60 = vmax.f32 %v1746_v59, %v1810_v57  ;;  %v7538_v1 = vmax.f32 %v1747_v58, %v1812_v23  ;;  %v1318_v45 = vsel %vm1313_vm1, %v1316_v12, %v1317_v8  ;;  %v1320_v40 = vsel %vm1313_vm1, %v1317_v8, %v1319_v6 }
 0x12d   : > { %v1430_v50 = vmax.f32 %v7444_v62, %v1318_v45  ;;  %v1431_v41 = vmax.f32 %v1154_v5, %v1320_v40  ;;  %v1467_v11 = vsel %vm1462_vm2, %v10550_v61, %v1466_v25  ;;  %v1469_v52 = vsel %vm1462_vm2, %v1466_v25, %v1468_v51 }
 0x12e   : > { %10548 = vst [vmem:[#allocation4_spill] sm:$0xff] %v7536_v60  ;;  %10549 = vst [vmem:[#allocation5_spill] sm:$0xff] %v7538_v1  ;;  %v1615_v19 = vrot.slane %v1154_v5, 3  ;;  %v1617_v37 = vrot.slane %v1264_v56, 3  ;;  %v1764_v33 = vrot.slane %v1154_v5, 4  ;;  %v1766_v3 = vrot.slane %v1264_v56, 4 }
 0x12f   : > { %v1579_v38 = vmax.f32 %v1430_v50, %v1467_v11  ;;  %v1580_v34 = vmax.f32 %v1431_v41, %v1469_v52  ;;  %v6175_v12 = vpack.c.bf16 %v7477_v54, %v7477_v54  ;;  %v10551_v44 = vrot.slane %v7444_v62, 3 }
 0x130   : > { %v1618_v2 = vsel %vm1611_vm3, %v1615_v19, %v1617_v37  ;;  %v10552_v14 = vrot.slane %v7444_v62, 4  ;;  %v1767_v49 = vsel %vm1760_vm4, %v1764_v33, %v1766_v3  ;;  %v10553_v59 = vrot.slane %v7425_v47, 6 }
 0x131   : > { %v1616_v4 = vsel %vm1611_vm3, %v10551_v44, %v1615_v19  ;;  %v1729_v56 = vmax.f32 %v1580_v34, %v1618_v2  ;;  %1104 = vst [vmem:[#allocation2 + $0x110] sm:$0xf] %v6175_v12  ;;  %v1272_v54 = vsel %vm1151_vm0, %v1177_v28, -1e+30  ;;  %v10554_v40 = vrot.slane %v7460_v20, 1  ;;  %v6965_v19 = vpop.eup %6964 }
 0x132   : > { %v1765_v43 = vsel %vm1760_vm4, %v10552_v14, %v1764_v33  ;;  %v1728_v5 = vmax.f32 %v1579_v38, %v1616_v4  ;;  %v1178_v58 = vsel %vm1151_vm0, %v10553_v59, %v1177_v28  ;;  %v1359_v6 = vrot.slane %v1272_v54, 1 }
 0x133   : > { %v1357_v8 = vrot.slane %v1178_v58, 1  ;;  %v1506_v57 = vrot.slane %v1178_v58, 2  ;;  %v1508_v23 = vrot.slane %v1272_v54, 2  ;;  %v7566_v62 = vmax.f32 %v1729_v56, %v1767_v49  ;;  %v6704_v56 = vpop.f32.mrf.mxu1 }
 0x134   : > { %v7564_v25 = vmax.f32 %v1728_v5, %v1765_v43  ;;  %v1655_v51 = vrot.slane %v1178_v58, 3  ;;  %v1657_v45 = vrot.slane %v1272_v54, 3  ;;  %v10555_v41 = vrot.slane %v7460_v20, 2 }
 0x135   : > { %v1358_v50 = vsel %vm1313_vm1, %v10554_v40, %v1357_v8  ;;  %v1360_v47 = vsel %vm1313_vm1, %v1357_v8, %v1359_v6  ;;  %v1509_v11 = vsel %vm1462_vm2, %v1506_v57, %v1508_v23  ;;  %v1803_v52 = vrot.slane %v7460_v20, 4  ;;  %v565_v6 = vpop.f32.mrf.mxu0 }
 0x136   : > { %v1507_v61 = vsel %vm1462_vm2, %v10555_v41, %v1506_v57  ;;  %v1446_v33 = vmax.f32 %v7460_v20, %v1358_v50  ;;  %v1447_v3 = vmax.f32 %v1178_v58, %v1360_v47  ;;  %v10556_v38 = vrot.slane %v7460_v20, 3 }
 0x137   : > { %v1658_v12 = vsel %vm1611_vm3, %v1655_v51, %v1657_v45  ;;  %v1804_v28 = vrot.slane %v1178_v58, 4  ;;  %v1806_v44 = vrot.slane %v1272_v54, 4  ;;  %v7589_v4 = vadd.f32 %v7301_v26, %v7398_v30 }
 0x138   : > { %v1656_v34 = vsel %vm1611_vm3, %v10556_v38, %v1655_v51  ;;  %v7593_v2 = vadd.f32 %v7301_v26, %v7407_v36  ;;  %v1595_v53 = vmax.f32 %v1446_v33, %v1507_v61  ;;  %v1596_v14 = vmax.f32 %v1447_v3, %v1509_v11 }
 0x139   : > { %v6164_v43 = vpack.c.bf16 %v7480_v46, %v7480_v46  ;;  %v7598_v20 = vmul.f32 -1.442695, %v7413_v42  ;;  %v1805_v49 = vsel %vm1760_vm4, %v1803_v52, %v1804_v28  ;;  %v1807_v5 = vsel %vm1760_vm4, %v1804_v28, %v1806_v44 }
 0x13a   : > { %10557 = vst [vmem:[#allocation6_spill] sm:$0xff] %v7593_v2  ;;  %v7604_v30 = vmul.f32 %v7482_v48, %v7348_v0  ;;  %v7608_v36 = vmul.f32 %v7488_v22, %v7356_v7  ;;  %v1744_v59 = vmax.f32 %v1595_v53, %v1656_v34  ;;  %v1745_v58 = vmax.f32 %v1596_v14, %v1658_v12 }
 0x13b   : > { %1093 = vst [vmem:[#allocation2 + $0x60] sm:$0xf] %v6164_v43  ;;  %v1161_v54 = vrot.slane %v7480_v46, 6  ;;  %v691_v8 = vmul.f32 %v6704_v56, %v7296_v24  ;;  %v1909_v57 = vmax.f32 %v7392_v21, %v7564_v25  ;;  %v7616_v0 = vmul.f32 %v7490_v63, %v7359_v9 }
 0x13c   : > { %v7619_v48 = vmul.f32 -1.442695, %v7589_v4  ;;  %v7622_v7 = vmul.f32 -1.442695, %v7593_v2  ;;  %v7624_v22 = vmax.f32 %v1744_v59, %v1805_v49  ;;  %v7626_v23 = vmax.f32 %v1745_v58, %v1807_v5 }
 0x13d   : > { %v6180_v46 = vpack.c.bf16 %v7604_v30, %v7604_v30  ;;  %v1185_v51 = vrot.slane %v7604_v30, 6  ;;  %v1910_v45 = vmax.f32 %v7392_v21, %v7566_v62  ;;  %v6162_v9 = vpack.c.bf16 %v7608_v36, %v7608_v36 }
 0x13e   : > { %10558 = vst [vmem:[#allocation7_spill] sm:$0xff] %v7624_v22  ;;  %10559 = vst [vmem:[#allocation8_spill] sm:$0xff] %v7626_v23  ;;  %v6178_v63 = vpack.c.bf16 %v7616_v0, %v7616_v0  ;;  %v7638_v40 = vmul.f32 %v7296_v24, %v565_v6  ;;  %v7641_v50 = vsel %vm1151_vm0, -1e+30, %v1161_v54  ;;  %v10467_v47 = vrot.slane %v7608_v36, 6 }
 0x13f   : > { %1109 = vst [vmem:[#allocation2 + $0x160] sm:$0xf] %v6180_v46  ;;  %v934_v41 = vmul.f32 %v7492_v31, %v7367_v16  ;;  %v7648_v61 = vsel %vm1151_vm0, -1e+30, %v1185_v51  ;;  %1091 = vst [vmem:[#allocation2 + $0x40] sm:$0xf] %v6162_v9  ;;  %v7653_v52 = vadd.f32 %v7301_v26, %v691_v8  ;;  %v7656_v33 = vmax.f32 %v1909_v57, %v7524_v15  ;;  %v6967_v57 = vpop.eup %6966 }
 0x140   : > { %1107 = vst [vmem:[#allocation2 + $0x140] sm:$0xf] %v6178_v63  ;;  %v852_v11 = vadd.f32 1.0, %v7471_v32  ;;  %v10466_v3 = vrot.slane %v7616_v0, 6  ;;  %v7660_v29 = vmax.f32 %v1910_v45, %v7526_v39  ;;  %v1331_v38 = vrot.slane %v7641_v50, 1 }
 0x141   : > { %v6165_v16 = vpack.c.bf16 %v934_v41, %v934_v41  ;;  %v1162_v31 = vrot.slane %v934_v41, 6  ;;  %v1480_v34 = vrot.slane %v7641_v50, 2  ;;  %v1371_v12 = vrot.slane %v7648_v61, 1 }
 0x142   : > { %v1520_v28 = vrot.slane %v7648_v61, 2  ;;  %v7671_v44 = vsel %vm1151_vm0, -1e+30, %v10467_v47  ;;  %v1669_v53 = vrot.slane %v7648_v61, 3  ;;  %v1818_v14 = vrot.slane %v7648_v61, 4 }
 0x143   : > { %1094 = vst [vmem:[#allocation2 + $0x70] sm:$0xf] %v6165_v16  ;;  %v7676_v43 = vsel %vm1151_vm0, %v1161_v54, %v1162_v31  ;;  %v7679_v49 = vsel %vm1151_vm0, %v1162_v31, -1e+30  ;;  %v7684_v5 = vsel %vm1151_vm0, -1e+30, %v10466_v3  ;;  %v950_v59 = vmul.f32 %v7507_v27, %v7370_v17 }
 0x144   : > { %v1332_v30 = vrot.slane %v7676_v43, 1  ;;  %v1334_v56 = vrot.slane %v7679_v49, 1  ;;  %v1326_v58 = vrot.slane %v7671_v44, 1  ;;  %v932_v6 = vmul.f32 %v6963_v35, %v7373_v18 }
 0x145   : > { %v1481_v9 = vrot.slane %v7676_v43, 2  ;;  %v1483_v27 = vrot.slane %v7679_v49, 2  ;;  %v1630_v41 = vrot.slane %v7676_v43, 3  ;;  %v1632_v16 = vrot.slane %v7679_v49, 3 }
 0x146   : > { %v1333_v46 = vsel %vm1313_vm1, %v1331_v38, %v1332_v30  ;;  %v1335_v45 = vsel %vm1313_vm1, %v1332_v30, %v1334_v56  ;;  %v6181_v31 = vpack.c.bf16 %v950_v59, %v950_v59  ;;  %v1186_v35 = vrot.slane %v950_v59, 6 }
 0x147   : > { %v1436_v38 = vmax.f32 %v7641_v50, %v1333_v46  ;;  %v1437_v30 = vmax.f32 %v7676_v43, %v1335_v45  ;;  %v6163_v3 = vpack.c.bf16 %v932_v6, %v932_v6  ;;  %v1482_v63 = vsel %vm1462_vm2, %v1480_v34, %v1481_v9 }
 0x148   : > { %1110 = vst [vmem:[#allocation2 + $0x170] sm:$0xf] %v6181_v31  ;;  %v1187_v17 = vsel %vm1151_vm0, %v1185_v51, %v1186_v35  ;;  %v1275_v37 = vsel %vm1151_vm0, %v1186_v35, -1e+30  ;;  %6968 = vrcp.f32 %v852_v11  ;;  %v1484_v26 = vsel %vm1462_vm2, %v1481_v9, %v1483_v27 }
 0x149   : > { %v1372_v18 = vrot.slane %v1187_v17, 1  ;;  %v1374_v59 = vrot.slane %v1275_v37, 1  ;;  %1092 = vst [vmem:[#allocation2 + $0x50] sm:$0xf] %v6163_v3  ;;  %v1159_v46 = vrot.slane %v932_v6, 6  ;;  %v1521_v45 = vrot.slane %v1187_v17, 2 }
 0x14a   : > { %v1523_v8 = vrot.slane %v1275_v37, 2  ;;  %v1670_v56 = vrot.slane %v1187_v17, 3  ;;  %v1672_v54 = vrot.slane %v1275_v37, 3  ;;  %v1585_v32 = vmax.f32 %v1436_v38, %v1482_v63 }
 0x14b   : > { %v1586_v34 = vmax.f32 %v1437_v30, %v1484_v26  ;;  %v1373_v31 = vsel %vm1313_vm1, %v1371_v12, %v1372_v18  ;;  %v1375_v51 = vsel %vm1313_vm1, %v1372_v18, %v1374_v59  ;;  %v1522_v9 = vsel %vm1462_vm2, %v1520_v28, %v1521_v45 }
 0x14c   : > { %v1452_v11 = vmax.f32 %v7648_v61, %v1373_v31  ;;  %v1453_v35 = vmax.f32 %v1187_v17, %v1375_v51  ;;  %v1524_v27 = vsel %vm1462_vm2, %v1521_v45, %v1523_v8  ;;  %v1671_v3 = vsel %vm1611_vm3, %v1669_v53, %v1670_v56 }
 0x14d   : > { %v1673_v6 = vsel %vm1611_vm3, %v1670_v56, %v1672_v54  ;;  %v1819_v47 = vrot.slane %v1187_v17, 4  ;;  %v1821_v2 = vrot.slane %v1275_v37, 4  ;;  %v10560_v26 = vrot.slane %v7608_v36, 6 }
 0x14e   : > { %v1601_v21 = vmax.f32 %v1452_v11, %v1522_v9  ;;  %v1602_v63 = vmax.f32 %v1453_v35, %v1524_v27  ;;  %v1266_v18 = vsel %vm1151_vm0, %v1159_v46, -1e+30  ;;  %v10563_v51 = vrot.slane %v7671_v44, 2 }
 0x14f   : > { %v1160_v12 = vsel %vm1151_vm0, %v10560_v26, %v1159_v46  ;;  %v1820_v61 = vsel %vm1760_vm4, %v1818_v14, %v1819_v47  ;;  %v1822_v28 = vsel %vm1760_vm4, %v1819_v47, %v1821_v2  ;;  %v1329_v8 = vrot.slane %v1266_v18, 1 }
 0x150   : > { %v1327_v38 = vrot.slane %v1160_v12, 1  ;;  %v1750_v30 = vmax.f32 %v1601_v21, %v1671_v3  ;;  %v1751_v53 = vmax.f32 %v1602_v63, %v1673_v6  ;;  %v1476_v59 = vrot.slane %v1160_v12, 2 }
 0x151   : > { %v1478_v54 = vrot.slane %v1266_v18, 2  ;;  %v1625_v56 = vrot.slane %v1160_v12, 3  ;;  %v1627_v36 = vrot.slane %v1266_v18, 3  ;;  %v10562_v2 = vrot.slane %v7641_v50, 3 }
 0x152   : > { %v1328_v37 = vsel %vm1313_vm1, %v1326_v58, %v1327_v38  ;;  %v1330_v17 = vsel %vm1313_vm1, %v1327_v38, %v1329_v8  ;;  %v7726_v45 = vmax.f32 %v1750_v30, %v1820_v61  ;;  %v7728_v31 = vmax.f32 %v1751_v53, %v1822_v28 }
 0x153   : > { %v1434_v14 = vmax.f32 %v7671_v44, %v1328_v37  ;;  %v1435_v46 = vmax.f32 %v1160_v12, %v1330_v17  ;;  %v1631_v21 = vsel %vm1611_vm3, %v10562_v2, %v1630_v41  ;;  %v1633_v47 = vsel %vm1611_vm3, %v1630_v41, %v1632_v16 }
 0x154   : > { %10561 = vst [vmem:[#allocation9_spill] sm:$0xff] %v7726_v45  ;;  %v1477_v58 = vsel %vm1462_vm2, %v10563_v51, %v1476_v59  ;;  %v1479_v11 = vsel %vm1462_vm2, %v1476_v59, %v1478_v54  ;;  %v1774_v27 = vrot.slane %v1160_v12, 4  ;;  %v1776_v3 = vrot.slane %v1266_v18, 4 }
 0x155   : > { %v1583_v35 = vmax.f32 %v1434_v14, %v1477_v58  ;;  %v1584_v9 = vmax.f32 %v1435_v46, %v1479_v11  ;;  %v6969_v6 = vpop.eup %6968  ;;  %v1734_v63 = vmax.f32 %v1585_v32, %v1631_v21  ;;  %v10564_v26 = vrot.slane %v7671_v44, 3  ;;  %v629_v46 = vpop.f32.mrf.mxu1 }
 0x156   : > { %v1628_v28 = vsel %vm1611_vm3, %v1625_v56, %v1627_v36  ;;  %v841_v38 = vadd.f32 1.0, %v6965_v19  ;;  %v1735_v41 = vmax.f32 %v1586_v34, %v1633_v47  ;;  %v857_v30 = vadd.f32 1.0, %v6967_v57 }
 0x157   : > { %v1626_v61 = vsel %vm1611_vm3, %v10564_v26, %v1625_v56  ;;  %v1733_v8 = vmax.f32 %v1584_v9, %v1628_v28  ;;  %v1664_v53 = vrot.slane %v7684_v5, 3  ;;  %v10565_v59 = vrot.slane %v7671_v44, 4 }
 0x158   : > { %v1732_v16 = vmax.f32 %v1583_v35, %v1626_v61  ;;  %v1777_v18 = vsel %vm1760_vm4, %v1774_v27, %v1776_v3  ;;  %v948_v32 = vmul.f32 %v6969_v6, %v7380_v55  ;;  %v10566_v54 = vrot.slane %v7676_v43, 4 }
 0x159   : > { %v1775_v12 = vsel %vm1760_vm4, %v10565_v59, %v1774_v27  ;;  %v10567_v37 = vrot.slane %v7641_v50, 4  ;;  %v10568_v34 = vrot.slane %v7679_v49, 4  ;;  %v7761_v44 = vmax.f32 %v1733_v8, %v1777_v18 }
 0x15a   : > { %v10569_v57 = vmov %v10566_v54  ;;  %v7759_v56 = vmax.f32 %v1732_v16, %v1775_v12  ;;  %v6179_v14 = vpack.c.bf16 %v948_v32, %v948_v32  ;;  %v1183_v55 = vrot.slane %v948_v32, 6 }
 0x15b   : > { %v1780_v19 = vsel %vm1760_vm4, %v10567_v37, %v10566_v54  ;;  %v1782_v17 = vsel %vm1760_vm4, %v10569_v57, %v10568_v34  ;;  %6970 = vrcp.f32 %v841_v38  ;;  %v1914_v43 = vmax.f32 %v7526_v39, %v7761_v44 }
 0x15c   : > { %v7763_v36 = vmax.f32 %v1734_v63, %v1780_v19  ;;  %v7765_v2 = vmax.f32 %v1735_v41, %v1782_v17  ;;  %v1913_v50 = vmax.f32 %v7524_v15, %v7759_v56  ;;  %6972 = vrcp.f32 %v857_v30  ;;  %1108 = vst [vmem:[#allocation2 + $0x150] sm:$0xf] %v6179_v14 }
 0x15d   : > { %v10570_v49 = vmax.f32 %v7564_v25, %v7524_v15  ;;  %v10571_v47 = vmax.f32 %v7566_v62, %v7526_v39  ;;  %v1969_v58 = vmax.f32 %v7656_v33, %v7759_v56  ;;  %v1970_v11 = vmax.f32 %v7660_v29, %v7761_v44 }
 0x15e   : > { %v1813_v35 = vrot.slane %v7684_v5, 4  ;;  %v10572_v9 = vrot.slane %v7616_v0, 6  ;;  %6974 = vpow2.f32 %v7598_v20  ;;  %v7795_v62 = vmul.f32 %v7296_v24, %v629_v46 }
 0x15f   : > { %v7775_v21 = vmax.f32 %v10570_v49, %v7759_v56  ;;  %v7781_v51 = vmax.f32 %v10571_v47, %v7761_v44  ;;  %v1999_v27 = vmax.f32 %v1969_v58, %v7763_v36  ;;  %v2000_v33 = vmax.f32 %v1970_v11, %v7765_v2 }
 0x160   : > { %v7791_v25 = vsel %vm1151_vm0, %v10572_v9, %v1183_v55  ;;  %v7800_v3 = vsel %vm1151_vm0, %v1183_v55, -1e+30  ;;  %6976 = vpow2.f32 %v7619_v48  ;;  %v6190_v29 = vpack.c.bf16 %v1969_v58, %v1969_v58 }
 0x161   : > { %v6191_v6 = vpack.c.bf16 %v1970_v11, %v1970_v11  ;;  %v2221_v0 = vrot.slane %v1969_v58, 6  ;;  %v2222_v63 = vrot.slane %v1970_v11, 6  ;;  %v6192_v26 = vpack.c.bf16 %v1999_v27, %v1999_v27 }
 0x162   : > { %v6193_v61 = vpack.c.bf16 %v2000_v33, %v2000_v33  ;;  %v2224_v28 = vrot.slane %v1999_v27, 6  ;;  %v2225_v20 = vrot.slane %v2000_v33, 6  ;;  %2157 = vst [vmem:[#allocation2 + $0x4] sm:$0xf] %v6190_v29  ;;  %v1367_v48 = vrot.slane %v7791_v25, 1 }
 0x163   : > { %2158 = vst [vmem:[#allocation2 + $0x14] sm:$0xf] %v6191_v6  ;;  %v7804_v24 = vsel %vm1151_vm0, %v2221_v0, %v2222_v63  ;;  %v7807_v38 = vsel %vm1151_vm0, -1e+30, %v2221_v0  ;;  %v7810_v41 = vsel %vm1151_vm0, %v2222_v63, -1e+30 }
 0x164   : > { %2160 = vst [vmem:[#allocation2 + $0x34] sm:$0xf] %v6193_v61  ;;  %v7814_v16 = vsel %vm1151_vm0, %v2224_v28, %v2225_v20  ;;  %v7817_v8 = vsel %vm1151_vm0, -1e+30, %v2224_v28  ;;  %v7820_v30 = vsel %vm1151_vm0, %v2225_v20, -1e+30 }
 0x165   : > { %v2381_v59 = vrot.slane %v7807_v38, 1  ;;  %2159 = vst [vmem:[#allocation2 + $0x24] sm:$0xf] %v6192_v26  ;;  %v2382_v12 = vrot.slane %v7804_v24, 1  ;;  %v2384_v18 = vrot.slane %v7810_v41, 1  ;;  %v2386_v32 = vrot.slane %v7817_v8, 1 }
 0x166   : > { %v2387_v54 = vrot.slane %v7814_v16, 1  ;;  %v2389_v37 = vrot.slane %v7820_v30, 1  ;;  %v2525_v19 = vrot.slane %v7807_v38, 2  ;;  %v2526_v34 = vrot.slane %v7804_v24, 2 }
 0x167   : > { %v2528_v57 = vrot.slane %v7810_v41, 2  ;;  %v2383_v17 = vsel %vm1313_vm1, %v2381_v59, %v2382_v12  ;;  %v2385_v14 = vsel %vm1313_vm1, %v2382_v12, %v2384_v18  ;;  %v2530_v46 = vrot.slane %v7817_v8, 2 }
 0x168   : > { %v2388_v55 = vsel %vm1313_vm1, %v2386_v32, %v2387_v54  ;;  %v2390_v49 = vsel %vm1313_vm1, %v2387_v54, %v2389_v37  ;;  %v2493_v47 = vmax.f32 %v7807_v38, %v2383_v17  ;;  %v2494_v58 = vmax.f32 %v7804_v24, %v2385_v14  ;;  %v7839_v9 = vpop.eup %6970 }
 0x169   : > { %v2495_v11 = vmax.f32 %v7817_v8, %v2388_v55  ;;  %v2496_v27 = vmax.f32 %v7814_v16, %v2390_v49  ;;  %v2527_v33 = vsel %vm1462_vm2, %v2525_v19, %v2526_v34  ;;  %v2529_v29 = vsel %vm1462_vm2, %v2526_v34, %v2528_v57  ;;  %v6973_v0 = vpop.eup %6972 }
 0x16a   : > { %v2531_v6 = vrot.slane %v7814_v16, 2  ;;  %v2533_v63 = vrot.slane %v7820_v30, 2  ;;  %v2637_v26 = vmax.f32 %v2493_v47, %v2527_v33  ;;  %v2638_v61 = vmax.f32 %v2494_v58, %v2529_v29 }
 0x16b   : > { %v2669_v28 = vrot.slane %v7807_v38, 3  ;;  %v2670_v59 = vrot.slane %v7804_v24, 3  ;;  %v2672_v12 = vrot.slane %v7810_v41, 3  ;;  %v2674_v18 = vrot.slane %v7817_v8, 3  ;;  %v6975_v32 = vpop.eup %6974 }
 0x16c   : > { %v2532_v20 = vsel %vm1462_vm2, %v2530_v46, %v2531_v6  ;;  %v2534_v54 = vsel %vm1462_vm2, %v2531_v6, %v2533_v63  ;;  %v2675_v19 = vrot.slane %v7814_v16, 3  ;;  %v2677_v34 = vrot.slane %v7820_v30, 3 }
 0x16d   : > { %v7852_v37 = vmax.f32 %v2495_v11, %v2532_v20  ;;  %v6977_v57 = vpop.eup %6976  ;;  %v2640_v17 = vmax.f32 %v2496_v27, %v2534_v54  ;;  %v2671_v14 = vsel %vm1611_vm3, %v2669_v28, %v2670_v59  ;;  %v2673_v55 = vsel %vm1611_vm3, %v2670_v59, %v2672_v12  ;;  %v6691_v12 = vpop.f32.mrf.mxu0 }
 0x16e   : > { %v2813_v46 = vrot.slane %v7807_v38, 4  ;;  %v7860_v49 = vsel %vm1611_vm3, %v2674_v18, %v2675_v19  ;;  %v2678_v47 = vsel %vm1611_vm3, %v2675_v19, %v2677_v34  ;;  %v2781_v58 = vmax.f32 %v2637_v26, %v2671_v14 }
 0x16f   : > { %10573 = vst [vmem:[#allocation10_spill] sm:$0xff] %v7852_v37  ;;  %10574 = vst [vmem:[#allocation11_spill] sm:$0xff] %v7860_v49  ;;  %v2782_v11 = vmax.f32 %v2638_v61, %v2673_v55  ;;  %v2784_v29 = vmax.f32 %v2640_v17, %v2678_v47  ;;  %v2814_v6 = vrot.slane %v7804_v24, 4  ;;  %v2816_v27 = vrot.slane %v7810_v41, 4  ;;  %v7158_v47 = vld [vmem:[%s10459_s2] ss:$0 sm:$0xff] }
 0x170   : > { %v2818_v63 = vrot.slane %v7817_v8, 4  ;;  %v2819_v28 = vrot.slane %v7814_v16, 4  ;;  %v2821_v38 = vrot.slane %v7820_v30, 4  ;;  %v10575_v20 = vrot.slane %v7684_v5, 1 }
 0x171   : > { %v2815_v61 = vsel %vm1760_vm4, %v2813_v46, %v2814_v6  ;;  %v2817_v59 = vsel %vm1760_vm4, %v2814_v6, %v2816_v27  ;;  %v1369_v24 = vrot.slane %v7800_v3, 1  ;;  %v1516_v34 = vrot.slane %v7791_v25, 2 }
 0x172   : > { %v1368_v26 = vsel %vm1313_vm1, %v10575_v20, %v1367_v48  ;;  %v7880_v8 = vsel %vm1760_vm4, %v2818_v63, %v2819_v28  ;;  %v2822_v16 = vsel %vm1760_vm4, %v2819_v28, %v2821_v38  ;;  %v7883_v30 = vmax.f32 %v2781_v58, %v2815_v61 }
 0x173   : > { %v1450_v41 = vmax.f32 %v7684_v5, %v1368_v26  ;;  %10576 = vst [vmem:[#allocation12_spill] sm:$0xff] %v7880_v8  ;;  %v7885_v18 = vmax.f32 %v2782_v11, %v2817_v59  ;;  %v7887_v54 = vmax.f32 %v2784_v29, %v2822_v16  ;;  %v1370_v19 = vsel %vm1313_vm1, %v1367_v48, %v1369_v24  ;;  %v6707_v11 = vpop.f32.mrf.mxu1 }
 0x174   : > { %10577 = vst [vmem:[#allocation13_spill] sm:$0xff] %v7883_v30  ;;  %v1518_v17 = vrot.slane %v7800_v3, 2  ;;  %v1451_v14 = vmax.f32 %v7791_v25, %v1370_v19  ;;  %v1665_v55 = vrot.slane %v7791_v25, 3  ;;  %v1667_v46 = vrot.slane %v7800_v3, 3 }
 0x175   : > { %10578 = vst [vmem:[#allocation14_spill] sm:$0xff] %v7885_v18  ;;  %10579 = vst [vmem:[#allocation15_spill] sm:$0xff] %v7887_v54  ;;  %v678_v58 = vmul.f32 %v7158_v47, %v6691_v12  ;;  %v10580_v48 = vrot.slane %v7684_v5, 2  ;;  %v1814_v63 = vrot.slane %v7791_v25, 4  ;;  %v1816_v59 = vrot.slane %v7800_v3, 4 }
 0x176   : > { %v1519_v27 = vsel %vm1462_vm2, %v1516_v34, %v1518_v17  ;;  %v1666_v20 = vsel %vm1611_vm3, %v1664_v53, %v1665_v55  ;;  %v1668_v26 = vsel %vm1611_vm3, %v1665_v55, %v1667_v46  ;;  %v7917_v24 = vmul.f32 %v7839_v9, %v7386_v10  ;;  %v578_v53 = vpop.f32.mrf.mxu0 }
 0x177   : > { %v1517_v6 = vsel %vm1462_vm2, %v10580_v48, %v1516_v34  ;;  %v1600_v38 = vmax.f32 %v1451_v14, %v1519_v27  ;;  %v1815_v61 = vsel %vm1760_vm4, %v1813_v35, %v1814_v63  ;;  %v7920_v25 = vmul.f32 %v6973_v0, %v7389_v13  ;;  %v642_v34 = vpop.f32.mrf.mxu1  ;;  %v7159_v13 = vld [vmem:[%s10460_s3] ss:$0 sm:$0xff] }
 0x178   : > { %v1599_v28 = vmax.f32 %v1450_v41, %v1517_v6  ;;  %v839_v16 = vadd.f32 1.0, %v6975_v32  ;;  %v855_v19 = vadd.f32 1.0, %v6977_v57  ;;  %v1817_v17 = vsel %vm1760_vm4, %v1814_v63, %v1816_v59  ;;  %v6692_v55 = vpop.f32.mrf.mxu0 }
 0x179   : > { %v1749_v12 = vmax.f32 %v1600_v38, %v1668_v26  ;;  %v6168_v5 = vpack.c.bf16 %v7917_v24, %v7917_v24  ;;  %v6184_v35 = vpack.c.bf16 %v7920_v25, %v7920_v25  ;;  %v694_v3 = vmul.f32 %v7158_v47, %v6707_v11  ;;  %v6708_v46 = vpop.f32.mrf.mxu1 }
 0x17a   : > { %v1748_v41 = vmax.f32 %v1599_v28, %v1666_v20  ;;  %6978 = vrcp.f32 %v839_v16  ;;  %v7935_v0 = vadd.f32 %v7159_v13, %v7638_v40  ;;  %v7938_v32 = vadd.f32 %v7159_v13, %v7795_v62  ;;  %v581_v27 = vpop.f32.mrf.mxu0 }
 0x17b   : > { %v7929_v9 = vmax.f32 %v1749_v12, %v1817_v17  ;;  %1097 = vst [vmem:[#allocation2 + $0xa0] sm:$0xf] %v6168_v5  ;;  %1113 = vst [vmem:[#allocation2 + $0x1a0] sm:$0xf] %v6184_v35  ;;  %6980 = vrcp.f32 %v855_v19  ;;  %v5859_v57 = vmul.f32 -1.442695, %v7653_v52  ;;  %v7941_v14 = vadd.f32 %v7159_v13, %v678_v58  ;;  %v645_v62 = vpop.f32.mrf.mxu1 }
 0x17c   : > { %v7927_v10 = vmax.f32 %v1748_v41, %v1815_v61  ;;  %v7943_v11 = vadd.f32 %v7159_v13, %v694_v3  ;;  %6982 = vpow2.f32 %v7622_v7  ;;  %v5841_v48 = vmul.f32 -1.442695, %v7935_v0 }
 0x17d   : > { %10582 = vst [vmem:[#allocation17_spill] sm:$0xff] %v7929_v9  ;;  %v5857_v40 = vmul.f32 -1.442695, %v7938_v32  ;;  %6984 = vpow2.f32 %v5859_v57  ;;  %v5846_v6 = vmul.f32 -1.442695, %v7941_v14  ;;  %v676_v28 = vmul.f32 %v7158_v47, %v578_v53 }
 0x17e   : > { %10581 = vst [vmem:[#allocation16_spill] sm:$0xff] %v7927_v10  ;;  %v5862_v63 = vmul.f32 -1.442695, %v7943_v11  ;;  %6986 = vpow2.f32 %v5841_v48  ;;  %v692_v58 = vmul.f32 %v7158_v47, %v642_v34  ;;  %v679_v38 = vmul.f32 %v7158_v47, %v6692_v55 }
 0x17f   : > { %v695_v20 = vmul.f32 %v7158_v47, %v6708_v46  ;;  %6988 = vpow2.f32 %v5857_v40  ;;  %v7950_v26 = vadd.f32 %v7159_v13, %v676_v28  ;;  %v677_v7 = vmul.f32 %v7158_v47, %v581_v27 }
 0x180   : > { %v693_v61 = vmul.f32 %v7158_v47, %v645_v62  ;;  %6990 = vpow2.f32 %v5846_v6  ;;  %v7952_v59 = vadd.f32 %v7159_v13, %v692_v58  ;;  %v7954_v41 = vadd.f32 %v7159_v13, %v679_v38 }
 0x181   : > { %v7956_v12 = vadd.f32 %v7159_v13, %v695_v20  ;;  %6992 = vpow2.f32 %v5862_v63  ;;  %v5844_v16 = vmul.f32 -1.442695, %v7950_v26  ;;  %v7959_v19 = vadd.f32 %v7159_v13, %v677_v7 }
 0x182   : > { %v7961_v53 = vadd.f32 %v7159_v13, %v693_v61  ;;  %v5860_v34 = vmul.f32 -1.442695, %v7952_v59  ;;  %v5847_v17 = vmul.f32 -1.442695, %v7954_v41  ;;  %v10472_v27 = vrot.slane %v7917_v24, 6 }
 0x183   : > { %v5863_v47 = vmul.f32 -1.442695, %v7956_v12  ;;  %6994 = vpow2.f32 %v5844_v16  ;;  %v5845_v35 = vmul.f32 -1.442695, %v7959_v19  ;;  %v1927_v63 = vmax.f32 %v7624_v22, %v7536_v60 }
 0x184   : > { %6996 = vpow2.f32 %v5860_v34  ;;  %v5861_v55 = vmul.f32 -1.442695, %v7961_v53  ;;  %v1928_v28 = vmax.f32 %v7626_v23, %v7538_v1  ;;  %v7991_v7 = vmax.f32 %v1913_v50, %v7763_v36 }
 0x185   : > { %6998 = vpow2.f32 %v5847_v17  ;;  %v10471_v61 = vrot.slane %v7920_v25, 6  ;;  %v7998_v34 = vmax.f32 %v1914_v43, %v7765_v2  ;;  %v8007_v15 = vsel %vm1151_vm0, -1e+30, %v10472_v27 }
 0x186   : > { %7000 = vpow2.f32 %v5863_v47  ;;  %v1929_v39 = vmax.f32 %v7536_v60, %v7927_v10  ;;  %v1930_v43 = vmax.f32 %v7538_v1, %v7929_v9 }
 0x187   : > { %v6979_v5 = vpop.eup %6978  ;;  %7002 = vpow2.f32 %v5845_v35 }
 0x188   : > { %v6981_v3 = vpop.eup %6980  ;;  %v7968_v57 = vmul.f32 %v6979_v5, %v7413_v42  ;;  %7004 = vpow2.f32 %v5861_v55 }
 0x189   : > { %v7972_v13 = vmul.f32 %v6981_v3, %v7589_v4  ;;  %v6983_v48 = vpop.eup %6982 }
 0x18a   : > { %v6166_v46 = vpack.c.bf16 %v7968_v57, %v7968_v57  ;;  %v842_v6 = vadd.f32 1.0, %v6983_v48  ;;  %v6985_v42 = vpop.eup %6984  ;;  %v8020_v48 = vmax.f32 %v1927_v63, %v7927_v10  ;;  %v10473_v63 = vrot.slane %v7968_v57, 6 }
 0x18b   : > { %v6182_v40 = vpack.c.bf16 %v7972_v13, %v7972_v13  ;;  %v858_v4 = vadd.f32 1.0, %v6985_v42  ;;  %v6987_v62 = vpop.eup %6986  ;;  %v8023_v42 = vmax.f32 %v1928_v28, %v7929_v9  ;;  %v10474_v47 = vrot.slane %v7972_v13, 6 }
 0x18c   : > { %1095 = vst [vmem:[#allocation2 + $0x80] sm:$0xf] %v6166_v46  ;;  %7006 = vrcp.f32 %v842_v6  ;;  %v6989_v38 = vpop.eup %6988  ;;  %v840_v3 = vadd.f32 1.0, %v6987_v62  ;;  %v8029_v62 = vsel %vm1151_vm0, -1e+30, %v10471_v61 }
 0x18d   : > { %1111 = vst [vmem:[#allocation2 + $0x180] sm:$0xf] %v6182_v40  ;;  %7008 = vrcp.f32 %v858_v4  ;;  %v6991_v16 = vpop.eup %6990  ;;  %v856_v40 = vadd.f32 1.0, %v6989_v38 }
 0x18e   : > { %v6993_v50 = vpop.eup %6992  ;;  %v845_v35 = vadd.f32 1.0, %v6991_v16  ;;  %7010 = vrcp.f32 %v840_v3  ;;  %v8043_v3 = vsel %vm1151_vm0, -1e+30, %v10473_v63 }
 0x18f   : > { %v861_v38 = vadd.f32 1.0, %v6993_v50  ;;  %7012 = vrcp.f32 %v856_v40  ;;  %v8054_v40 = vmax.f32 %v1930_v43, %v7728_v31 }
 0x190   : > { %v6995_v6 = vpop.eup %6994  ;;  %7014 = vrcp.f32 %v845_v35 }
 0x191   : > { %v6997_v33 = vpop.eup %6996  ;;  %v843_v17 = vadd.f32 1.0, %v6995_v6  ;;  %v8046_v6 = vmax.f32 %v1929_v39, %v7726_v45  ;;  %7016 = vrcp.f32 %v861_v38 }
 0x192   : > { %v6999_v29 = vpop.eup %6998  ;;  %v859_v61 = vadd.f32 1.0, %v6997_v33  ;;  %v8051_v33 = vsel %vm1151_vm0, -1e+30, %v10474_v47  ;;  %v10584_v47 = vld [vmem:[#allocation6_spill] sm:$0xff] }
 0x193   : > { %v7001_v20 = vpop.eup %7000  ;;  %v846_v50 = vadd.f32 1.0, %v6999_v29  ;;  %7018 = vrcp.f32 %v843_v17 }
 0x194   : > { %v7003_v55 = vpop.eup %7002  ;;  %v862_v16 = vadd.f32 1.0, %v7001_v20  ;;  %7020 = vrcp.f32 %v859_v61 }
 0x195   : > { %v7005_v27 = vpop.eup %7004  ;;  %v844_v29 = vadd.f32 1.0, %v7003_v55  ;;  %7022 = vrcp.f32 %v846_v50  ;;  %v10585_v50 = vrot.slane %v7917_v24, 6 }
 0x196   : > { %v860_v38 = vadd.f32 1.0, %v7005_v27  ;;  %7024 = vrcp.f32 %v862_v16 }
 0x197   : > { %7026 = vrcp.f32 %v844_v29 }
 0x198   : > { %7028 = vrcp.f32 %v860_v38 }
 0x199   : > { %v7007_v35 = vpop.eup %7006 }
 0x19a   : > { %v938_v46 = vmul.f32 %v7007_v35, %v10584_v47  ;;  %v7009_v43 = vpop.eup %7008 }
 0x19b   : > { %v954_v61 = vmul.f32 %v7009_v43, %v7653_v52  ;;  %v7011_v47 = vpop.eup %7010 }
 0x19c   : > { %v6169_v63 = vpack.c.bf16 %v938_v46, %v938_v46  ;;  %v1168_v28 = vrot.slane %v938_v46, 6  ;;  %v7013_v20 = vpop.eup %7012 }
 0x19d   : > { %v6185_v16 = vpack.c.bf16 %v954_v61, %v954_v61  ;;  %v1192_v55 = vrot.slane %v954_v61, 6  ;;  %v7015_v8 = vpop.eup %7014 }
 0x19e   : > { %1098 = vst [vmem:[#allocation2 + $0xb0] sm:$0xf] %v6169_v63  ;;  %v1169_v35 = vsel %vm1151_vm0, %v10585_v50, %v1168_v28  ;;  %v1269_v58 = vsel %vm1151_vm0, %v1168_v28, -1e+30  ;;  %v10586_v63 = vrot.slane %v8007_v15, 1  ;;  %v10587_v28 = vrot.slane %v8007_v15, 2 }
 0x19f   : > { %v1342_v46 = vrot.slane %v1169_v35, 1  ;;  %v1344_v17 = vrot.slane %v1269_v58, 1  ;;  %v1491_v52 = vrot.slane %v1169_v35, 2  ;;  %v1493_v29 = vrot.slane %v1269_v58, 2  ;;  %1114 = vst [vmem:[#allocation2 + $0x1b0] sm:$0xf] %v6185_v16 }
 0x1a0   : > { %v1640_v43 = vrot.slane %v1169_v35, 3  ;;  %v1642_v27 = vrot.slane %v1269_v58, 3  ;;  %v1789_v4 = vrot.slane %v1169_v35, 4  ;;  %v1791_v39 = vrot.slane %v1269_v58, 4 }
 0x1a1   : > { %v1343_v24 = vsel %vm1313_vm1, %v10586_v63, %v1342_v46  ;;  %v1345_v38 = vsel %vm1313_vm1, %v1342_v46, %v1344_v17  ;;  %v1492_v61 = vsel %vm1462_vm2, %v10587_v28, %v1491_v52  ;;  %v1494_v50 = vsel %vm1462_vm2, %v1491_v52, %v1493_v29 }
 0x1a2   : > { %v1440_v30 = vmax.f32 %v8007_v15, %v1343_v24  ;;  %v1441_v49 = vmax.f32 %v1169_v35, %v1345_v38  ;;  %v10588_v58 = vrot.slane %v8007_v15, 3  ;;  %v1643_v37 = vsel %vm1611_vm3, %v1640_v43, %v1642_v27  ;;  %v7017_v35 = vpop.eup %7016 }
 0x1a3   : > { %v10589_v63 = vrot.slane %v8007_v15, 4  ;;  %v1792_v46 = vsel %vm1760_vm4, %v1789_v4, %v1791_v39  ;;  %v10590_v28 = vrot.slane %v7920_v25, 6  ;;  %v1277_v29 = vsel %vm1151_vm0, %v1192_v55, -1e+30  ;;  %v8095_v9 = vpop.eup %7018 }
 0x1a4   : > { %v1641_v16 = vsel %vm1611_vm3, %v10588_v58, %v1640_v43  ;;  %v1589_v24 = vmax.f32 %v1440_v30, %v1492_v61  ;;  %v1590_v38 = vmax.f32 %v1441_v49, %v1494_v50  ;;  %v1384_v58 = vrot.slane %v1277_v29, 1 }
 0x1a5   : > { %v1790_v17 = vsel %vm1760_vm4, %v10589_v63, %v1789_v4  ;;  %v1193_v52 = vsel %vm1151_vm0, %v10590_v28, %v1192_v55  ;;  %v1533_v43 = vrot.slane %v1277_v29, 2  ;;  %v1682_v10 = vrot.slane %v1277_v29, 3  ;;  %v8097_v63 = vpop.eup %7020 }
 0x1a6   : > { %v1382_v5 = vrot.slane %v1193_v52, 1  ;;  %v1531_v27 = vrot.slane %v1193_v52, 2  ;;  %v1680_v15 = vrot.slane %v1193_v52, 3  ;;  %v1738_v4 = vmax.f32 %v1589_v24, %v1641_v16  ;;  %v8103_v30 = vpop.eup %7022 }
 0x1a7   : > { %v1739_v39 = vmax.f32 %v1590_v38, %v1643_v37  ;;  %v10591_v25 = vrot.slane %v8029_v62, 1  ;;  %v10592_v50 = vrot.slane %v8029_v62, 2  ;;  %v8110_v23 = vpop.eup %7024  ;;  %v10593_v24 = vrot.slane %v8029_v62, 3 }
 0x1a8   : > { %v1385_v55 = vsel %vm1313_vm1, %v1382_v5, %v1384_v58  ;;  %v1534_v60 = vsel %vm1462_vm2, %v1531_v27, %v1533_v43  ;;  %v8112_v37 = vmax.f32 %v1738_v4, %v1790_v17  ;;  %v1683_v38 = vsel %vm1611_vm3, %v1680_v15, %v1682_v10  ;;  %v8120_v58 = vpop.eup %7026 }
 0x1a9   : > { %v1383_v28 = vsel %vm1313_vm1, %v10591_v25, %v1382_v5  ;;  %v1457_v61 = vmax.f32 %v1193_v52, %v1385_v55  ;;  %v1532_v1 = vsel %vm1462_vm2, %v10592_v50, %v1531_v27  ;;  %v8114_v16 = vmax.f32 %v1739_v39, %v1792_v46  ;;  %v8122_v22 = vpop.eup %7028 }
 0x1aa   : > { %v1456_v49 = vmax.f32 %v8029_v62, %v1383_v28  ;;  %v1681_v5 = vsel %vm1611_vm3, %v10593_v24, %v1680_v15  ;;  %v1829_v55 = vrot.slane %v1193_v52, 4  ;;  %v1831_v50 = vrot.slane %v1277_v29, 4 }
 0x1ab   : > { %v1606_v28 = vmax.f32 %v1457_v61, %v1534_v60  ;;  %v936_v27 = vmul.f32 %v7011_v47, %v7935_v0  ;;  %v952_v17 = vmul.f32 %v7013_v20, %v7938_v32  ;;  %v8127_v46 = vmul.f32 %v7015_v8, %v7941_v14 }
 0x1ac   : > { %v1605_v25 = vmax.f32 %v1456_v49, %v1532_v1  ;;  %v8130_v43 = vmul.f32 %v7017_v35, %v7943_v11  ;;  %v10594_v15 = vrot.slane %v8029_v62, 4  ;;  %v1832_v1 = vsel %vm1760_vm4, %v1829_v55, %v1831_v50 }
 0x1ad   : > { %v1755_v10 = vmax.f32 %v1606_v28, %v1683_v38  ;;  %v6167_v52 = vpack.c.bf16 %v936_v27, %v936_v27  ;;  %v1165_v29 = vrot.slane %v936_v27, 6  ;;  %v6183_v39 = vpack.c.bf16 %v952_v17, %v952_v17 }
 0x1ae   : > { %v1754_v4 = vmax.f32 %v1605_v25, %v1681_v5  ;;  %v1830_v60 = vsel %vm1760_vm4, %v10594_v15, %v1829_v55  ;;  %v1189_v0 = vrot.slane %v952_v17, 6  ;;  %v6172_v8 = vpack.c.bf16 %v8127_v46, %v8127_v46 }
 0x1af   : > { %v8138_v32 = vmax.f32 %v1755_v10, %v1832_v1  ;;  %v10490_v14 = vrot.slane %v8127_v46, 6  ;;  %1096 = vst [vmem:[#allocation2 + $0x90] sm:$0xf] %v6167_v52  ;;  %v10597_v11 = vrot.slane %v7968_v57, 6  ;;  %v1268_v20 = vsel %vm1151_vm0, %v1165_v29, -1e+30 }
 0x1b0   : > { %v8136_v47 = vmax.f32 %v1754_v4, %v1830_v60  ;;  %1112 = vst [vmem:[#allocation2 + $0x190] sm:$0xf] %v6183_v39  ;;  %v10598_v35 = vrot.slane %v7972_v13, 6  ;;  %v8153_v61 = vsel %vm1151_vm0, %v1189_v0, -1e+30  ;;  %v1339_v5 = vrot.slane %v1268_v20, 1 }
 0x1b1   : > { %10596 = vst [vmem:[#allocation18_spill] sm:$0xff] %v8138_v32  ;;  %v1166_v62 = vsel %vm1151_vm0, %v10597_v11, %v1165_v29  ;;  %v1488_v25 = vrot.slane %v1268_v20, 2  ;;  %1101 = vst [vmem:[#allocation2 + $0xe0] sm:$0xf] %v6172_v8  ;;  %v1637_v57 = vrot.slane %v1268_v20, 3  ;;  %v1786_v50 = vrot.slane %v1268_v20, 4 }
 0x1b2   : > { %10595 = vst [vmem:[#allocation6_spill] sm:$0xff] %v8136_v47  ;;  %v8150_v49 = vsel %vm1151_vm0, %v10598_v35, %v1189_v0  ;;  %v1337_v24 = vrot.slane %v1166_v62, 1  ;;  %v1486_v38 = vrot.slane %v1166_v62, 2  ;;  %v1635_v28 = vrot.slane %v1166_v62, 3  ;;  %v6774_v60 = vld [vmem:[%s10461_s4 + $0x78] sm:$0xff]  }
 0x1b3   : > { %v1784_v55 = vrot.slane %v1166_v62, 4  ;;  %v10599_v27 = vrot.slane %v8043_v3, 1  ;;  %v10600_v4 = vrot.slane %v8043_v3, 2  ;;  %v10601_v29 = vrot.slane %v8043_v3, 3  ;;  %v6775_v8 = vld [vmem:[%s10461_s4 + $0x38] sm:$0xff]   ;;  %6437 = vmatprep.subr.bf16.mxu1 %v6774_v60  ;;  %v6777_v60 = vld [vmem:[%s10461_s4 + $0x30] sm:$0xff]  }
 0x1b4   : > { %v1340_v13 = vsel %vm1313_vm1, %v1337_v24, %v1339_v5  ;;  %v1489_v15 = vsel %vm1462_vm2, %v1486_v38, %v1488_v25  ;;  %v1638_v0 = vsel %vm1611_vm3, %v1635_v28, %v1637_v57  ;;  %v10602_v11 = vrot.slane %v8043_v3, 4  ;;  %6438 = vmatpush3.bf16.msra.mxu1 %v6775_v8 }
 0x1b5   : > { %v1338_v17 = vsel %vm1313_vm1, %v10599_v27, %v1337_v24  ;;  %v1487_v10 = vsel %vm1462_vm2, %v10600_v4, %v1486_v38  ;;  %v1439_v52 = vmax.f32 %v1166_v62, %v1340_v13  ;;  %v1636_v39 = vsel %vm1611_vm3, %v10601_v29, %v1635_v28 }
 0x1b6   : > { %v1438_v1 = vmax.f32 %v8043_v3, %v1338_v17  ;;  %v1785_v20 = vsel %vm1760_vm4, %v10602_v11, %v1784_v55  ;;  %v1787_v35 = vsel %vm1760_vm4, %v1784_v55, %v1786_v50  ;;  %v1377_v24 = vrot.slane %v8150_v49, 1  ;;  %v6776_v17 = vld [vmem:[%s10461_s4 + $0x70] sm:$0xff]  }
 0x1b7   : > { %v1379_v62 = vrot.slane %v8153_v61, 1  ;;  %v1588_v38 = vmax.f32 %v1439_v52, %v1489_v15  ;;  %v1526_v25 = vrot.slane %v8150_v49, 2  ;;  %v1528_v28 = vrot.slane %v8153_v61, 2  ;;  %6439 = vmatprep.subr.bf16.mxu1 %v6776_v17 }
 0x1b8   : > { %v1587_v5 = vmax.f32 %v1438_v1, %v1487_v10  ;;  %v10603_v57 = vrot.slane %v8051_v33, 1  ;;  %v1675_v55 = vrot.slane %v8150_v49, 3  ;;  %v1677_v50 = vrot.slane %v8153_v61, 3  ;;  %6440 = vmatpush3.bf16.msra.mxu1 %v6777_v60 }
 0x1b9   : > { %v1380_v27 = vsel %vm1313_vm1, %v1377_v24, %v1379_v62  ;;  %v1737_v4 = vmax.f32 %v1588_v38, %v1638_v0  ;;  %v10604_v1 = vrot.slane %v8051_v33, 2  ;;  %v1529_v29 = vsel %vm1462_vm2, %v1526_v25, %v1528_v28 }
 0x1ba   : > { %v1378_v3 = vsel %vm1313_vm1, %v10603_v57, %v1377_v24  ;;  %v1736_v13 = vmax.f32 %v1587_v5, %v1636_v39  ;;  %v1455_v15 = vmax.f32 %v8150_v49, %v1380_v27  ;;  %v10605_v8 = vrot.slane %v8051_v33, 3  ;;  %v6779_v27 = vld [vmem:[%s10461_s4 + $0x28] sm:$0xff]  }
 0x1bb   : > { %v1454_v10 = vmax.f32 %v8051_v33, %v1378_v3  ;;  %v1527_v52 = vsel %vm1462_vm2, %v10604_v1, %v1526_v25  ;;  %v1678_v39 = vsel %vm1611_vm3, %v1675_v55, %v1677_v50  ;;  %v8206_v24 = vmax.f32 %v1737_v4, %v1787_v35 }
 0x1bc   : > { %v1676_v11 = vsel %vm1611_vm3, %v10605_v8, %v1675_v55  ;;  %v8204_v0 = vmax.f32 %v1736_v13, %v1785_v20  ;;  %v1604_v5 = vmax.f32 %v1455_v15, %v1529_v29  ;;  %v1824_v38 = vrot.slane %v8150_v49, 4  ;;  %v6778_v20 = vld [vmem:[%s10461_s4 + $0x68] sm:$0xff]  }
 0x1bd   : > { %v1603_v62 = vmax.f32 %v1454_v10, %v1527_v52  ;;  %v1826_v57 = vrot.slane %v8153_v61, 4  ;;  %v8213_v25 = vsel %vm1151_vm0, -1e+30, %v10490_v14  ;;  %v6188_v28 = vpack.c.bf16 %v8130_v43, %v8130_v43  ;;  %6441 = vmatprep.subr.bf16.mxu1 %v6778_v20 }
 0x1be   : > { %v10606_v55 = vmax.f32 %v7759_v56, %v7763_v36  ;;  %v10607_v17 = vmax.f32 %v7761_v44, %v7765_v2  ;;  %v1973_v4 = vmax.f32 %v7991_v7, %v8204_v0  ;;  %v1974_v10 = vmax.f32 %v7998_v34, %v8206_v24  ;;  %6442 = vmatpush3.bf16.msra.mxu1 %v6779_v27 }
 0x1bf   : > { %1117 = vst [vmem:[#allocation2 + $0x1e0] sm:$0xf] %v6188_v28  ;;  %v10608_v56 = vmax.f32 %v7775_v21, %v7763_v36  ;;  %v10609_v60 = vmax.f32 %v7781_v51, %v7765_v2  ;;  %v1752_v1 = vmax.f32 %v1603_v62, %v1676_v11  ;;  %v1753_v52 = vmax.f32 %v1604_v5, %v1678_v39  ;;  %v6780_v28 = vld [vmem:[%s10461_s4 + $0x60] sm:$0xff]  }
 0x1c0   : > { %v8235_v50 = vmax.f32 %v10606_v55, %v8204_v0  ;;  %v8241_v13 = vmax.f32 %v10607_v17, %v8206_v24  ;;  %v8256_v7 = vmax.f32 %v1973_v4, %v8112_v37  ;;  %v2004_v34 = vmax.f32 %v1974_v10, %v8114_v16  ;;  %v6781_v62 = vld [vmem:[%s10461_s4 + $0x20] sm:$0xff]   ;;  %6443 = vmatprep.subr.bf16.mxu1 %v6780_v28 }
 0x1c1   : > { %v2001_v15 = vmax.f32 %v10608_v56, %v8204_v0  ;;  %v2002_v44 = vmax.f32 %v10609_v60, %v8206_v24  ;;  %v10611_v29 = vrot.slane %v8051_v33, 4  ;;  %v1827_v21 = vsel %vm1760_vm4, %v1824_v38, %v1826_v57 }
 0x1c2   : > { %10610 = vst [vmem:[#allocation19_spill] sm:$0xff] %v8256_v7  ;;  %v6197_v5 = vpack.c.bf16 %v2004_v34, %v2004_v34  ;;  %v2230_v27 = vrot.slane %v8256_v7, 6  ;;  %v2231_v33 = vrot.slane %v2004_v34, 6  ;;  %v8281_v4 = vmax.f32 %v1753_v52, %v1827_v21  ;;  %6444 = vmatpush3.bf16.msra.mxu1 %v6781_v62 }
 0x1c3   : > { %v1825_v8 = vsel %vm1760_vm4, %v10611_v29, %v1824_v38  ;;  %v6194_v51 = vpack.c.bf16 %v2001_v15, %v2001_v15  ;;  %v6195_v20 = vpack.c.bf16 %v2002_v44, %v2002_v44  ;;  %v2227_v11 = vrot.slane %v2001_v15, 6 }
 0x1c4   : > { %v2228_v39 = vrot.slane %v2002_v44, 6  ;;  %v8270_v55 = vmax.f32 %v1752_v1, %v1825_v8  ;;  %10612 = vst [vmem:[#allocation20_spill] sm:$0xff] %v8281_v4  ;;  %2164 = vst [vmem:[#allocation2 + $0x74] sm:$0xf] %v6197_v5  ;;  %v8284_v10 = vsel %vm1151_vm0, %v2230_v27, %v2231_v33  ;;  %v8287_v56 = vsel %vm1151_vm0, -1e+30, %v2230_v27 }
 0x1c5   : > { %2162 = vst [vmem:[#allocation2 + $0x54] sm:$0xf] %v6195_v20  ;;  %v8276_v57 = vsel %vm1151_vm0, -1e+30, %v2227_v11  ;;  %2161 = vst [vmem:[#allocation2 + $0x44] sm:$0xf] %v6194_v51 }
 0x1c6   : > { %v8273_v38 = vsel %vm1151_vm0, %v2227_v11, %v2228_v39  ;;  %v8279_v17 = vsel %vm1151_vm0, %v2228_v39, -1e+30  ;;  %v8290_v15 = vsel %vm1151_vm0, %v2231_v33, -1e+30  ;;  %v2391_v60 = vrot.slane %v8276_v57, 1  ;;  %v6782_v44 = vld [vmem:[%s10461_s4 + $0x58] sm:$0xff]  }
 0x1c7   : > { %v2392_v1 = vrot.slane %v8273_v38, 1  ;;  %v2394_v52 = vrot.slane %v8279_v17, 1  ;;  %v2396_v34 = vrot.slane %v8287_v56, 1  ;;  %v2397_v29 = vrot.slane %v8284_v10, 1  ;;  %v6783_v8 = vld [vmem:[%s10461_s4 + $0x18] sm:$0xff]   ;;  %6445 = vmatprep.subr.bf16.mxu1 %v6782_v44  ;;  %v6784_v44 = vld [vmem:[%s10461_s4 + $0x50] sm:$0xff]  }
 0x1c8   : > { %v2399_v21 = vrot.slane %v8290_v15, 1  ;;  %v2535_v28 = vrot.slane %v8276_v57, 2  ;;  %v2536_v51 = vrot.slane %v8273_v38, 2  ;;  %v2538_v20 = vrot.slane %v8279_v17, 2  ;;  %6446 = vmatpush3.bf16.msra.mxu1 %v6783_v8 }
 0x1c9   : > { %v2393_v11 = vsel %vm1313_vm1, %v2391_v60, %v2392_v1  ;;  %v2395_v39 = vsel %vm1313_vm1, %v2392_v1, %v2394_v52  ;;  %v2398_v62 = vsel %vm1313_vm1, %v2396_v34, %v2397_v29  ;;  %v2540_v5 = vrot.slane %v8287_v56, 2  ;;  %6447 = vmatprep.subr.bf16.mxu1 %v6784_v44 }
 0x1ca   : > { %v2400_v27 = vsel %vm1313_vm1, %v2397_v29, %v2399_v21  ;;  %v2497_v33 = vmax.f32 %v8276_v57, %v2393_v11  ;;  %v2498_v3 = vmax.f32 %v8273_v38, %v2395_v39  ;;  %v2499_v61 = vmax.f32 %v8287_v56, %v2398_v62  ;;  %v6785_v29 = vld [vmem:[%s10461_s4 + $0x10] sm:$0xff]  }
 0x1cb   : > { %v2500_v60 = vmax.f32 %v8284_v10, %v2400_v27  ;;  %v2537_v1 = vsel %vm1462_vm2, %v2535_v28, %v2536_v51  ;;  %v2539_v52 = vsel %vm1462_vm2, %v2536_v51, %v2538_v20  ;;  %v2541_v34 = vrot.slane %v8284_v10, 2 }
 0x1cc   : > { %v2543_v8 = vrot.slane %v8290_v15, 2  ;;  %v2641_v21 = vmax.f32 %v2497_v33, %v2537_v1  ;;  %v2642_v11 = vmax.f32 %v2498_v3, %v2539_v52  ;;  %v2679_v39 = vrot.slane %v8276_v57, 3  ;;  %6448 = vmatpush3.bf16.msra.mxu1 %v6785_v29  ;;  %v6786_v3 = vld [vmem:[%s10461_s4 + $0x48] sm:$0xff]  }
 0x1cd   : > { %v2542_v62 = vsel %vm1462_vm2, %v2540_v5, %v2541_v34  ;;  %v2680_v27 = vrot.slane %v8273_v38, 3  ;;  %v2682_v28 = vrot.slane %v8279_v17, 3  ;;  %v2684_v51 = vrot.slane %v8287_v56, 3  ;;  %6449 = vmatprep.subr.bf16.mxu1 %v6786_v3 }
 0x1ce   : > { %v2544_v20 = vsel %vm1462_vm2, %v2541_v34, %v2543_v8  ;;  %v2643_v14 = vmax.f32 %v2499_v61, %v2542_v62  ;;  %v2685_v49 = vrot.slane %v8284_v10, 3  ;;  %v2687_v33 = vrot.slane %v8290_v15, 3  ;;  %v6787_v34 = vld [vmem:[%s10461_s4 + $0x8] sm:$0xff]  }
 0x1cf   : > { %v2644_v44 = vmax.f32 %v2500_v60, %v2544_v20  ;;  %v2681_v5 = vsel %vm1611_vm3, %v2679_v39, %v2680_v27  ;;  %v2683_v1 = vsel %vm1611_vm3, %v2680_v27, %v2682_v28  ;;  %v2823_v52 = vrot.slane %v8276_v57, 4 }
 0x1d0   : > { %v2686_v61 = vsel %vm1611_vm3, %v2684_v51, %v2685_v49  ;;  %v2688_v29 = vsel %vm1611_vm3, %v2685_v49, %v2687_v33  ;;  %v2785_v8 = vmax.f32 %v2641_v21, %v2681_v5  ;;  %v2786_v62 = vmax.f32 %v2642_v11, %v2683_v1  ;;  %6450 = vmatpush3.bf16.msra.mxu1 %v6787_v34  ;;  %v6788_v49 = vld [vmem:[%s10461_s4 + $0x40] sm:$0xff]  }
 0x1d1   : > { %v2787_v35 = vmax.f32 %v2643_v14, %v2686_v61  ;;  %v2788_v7 = vmax.f32 %v2644_v44, %v2688_v29  ;;  %v2824_v60 = vrot.slane %v8273_v38, 4  ;;  %v2826_v39 = vrot.slane %v8279_v17, 4  ;;  %6451 = vmatprep.subr.bf16.mxu1 %v6788_v49  ;;  %v6790_v5 = vld [vmem:[#allocation2] ss:$16 sps:$4 sm:$0xff]   ;;  %v6792_v1 = vld [vmem:[#allocation2 + $0x4] ss:$16 sps:$4 sm:$0xff]  }
 0x1d2   : > { %v2828_v57 = vrot.slane %v8287_v56, 4  ;;  %v2829_v27 = vrot.slane %v8284_v10, 4  ;;  %v2831_v28 = vrot.slane %v8290_v15, 4  ;;  %v1989_v51 = vmax.f32 %v8046_v6, %v8270_v55  ;;  %v6789_v6 = vld [vmem:[%s10461_s4] sm:$0xff]   ;;  %4962 = vmatprep.mubr.bf16.mxu1 %v6792_v1 }
 0x1d3   : > { %v2825_v14 = vsel %vm1760_vm4, %v2823_v52, %v2824_v60  ;;  %v2827_v38 = vsel %vm1760_vm4, %v2824_v60, %v2826_v39  ;;  %v1990_v17 = vmax.f32 %v8054_v40, %v8281_v4  ;;  %v10613_v10 = vmax.f32 %v8020_v48, %v7726_v45  ;;  %v6793_v60 = vld [vmem:[#allocation2 + $0x24] ss:$16 sps:$4 sm:$0xff]  }
 0x1d4   : > { %v2830_v15 = vsel %vm1760_vm4, %v2828_v57, %v2829_v27  ;;  %v2832_v21 = vsel %vm1760_vm4, %v2829_v27, %v2831_v28  ;;  %v8368_v11 = vmax.f32 %v2785_v8, %v2825_v14  ;;  %v8370_v20 = vmax.f32 %v2786_v62, %v2827_v38  ;;  %6452 = vmatpush3.bf16.msra.mxu1 %v6789_v6  ;;  %v6795_v57 = vld [vmem:[#allocation2 + $0x20] ss:$16 sps:$4 sm:$0xff]  }
 0x1d5   : > { %v2017_v56 = vmax.f32 %v10613_v10, %v8270_v55  ;;  %v8372_v33 = vmax.f32 %v2787_v35, %v2830_v15  ;;  %v8374_v40 = vmax.f32 %v2788_v7, %v2832_v21  ;;  %v10614_v48 = vmax.f32 %v8023_v42, %v7728_v31 }
 0x1d6   : > { %v8381_v44 = vmax.f32 %v1989_v51, %v8136_v47  ;;  %v2962_v52 = vmax.f32 %v7887_v54, %v8370_v20  ;;  %v10616_v35 = vmax.f32 %v7885_v18, %v7887_v54  ;;  %v2020_v34 = vmax.f32 %v1990_v17, %v8138_v32 }
 0x1d7   : > { %v2018_v3 = vmax.f32 %v10614_v48, %v8281_v4  ;;  %v6210_v61 = vpack.c.bf16 %v2017_v56, %v2017_v56  ;;  %v2251_v62 = vrot.slane %v2017_v56, 6  ;;  %4963 = vmatmul.mubr.bf16.vlgmr.msra.gmra.mxu1 %v6790_v5 }
 0x1d8   : > { %10615 = vst [vmem:[#allocation21_spill] sm:$0xff] %v8381_v44  ;;  %v8389_v7 = vmax.f32 %v10616_v35, %v8370_v20  ;;  %v8397_v39 = vmax.f32 %v2962_v52, %v8374_v40  ;;  %v6213_v27 = vpack.c.bf16 %v2020_v34, %v2020_v34  ;;  %v2254_v51 = vrot.slane %v8381_v44, 6  ;;  %4970 = vmatprep.mubr.bf16.mxu1 %v6793_v60  ;;  %v6796_v44 = vld [vmem:[#allocation2 + $0x44] ss:$16 sps:$4 sm:$0xff]  }
 0x1d9   : > { %v6211_v8 = vpack.c.bf16 %v2018_v3, %v2018_v3  ;;  %v2252_v28 = vrot.slane %v2018_v3, 6  ;;  %2177 = vst [vmem:[#allocation2 + $0x144] sm:$0xf] %v6210_v61  ;;  %v2255_v49 = vrot.slane %v2020_v34, 6  ;;  %v8403_v14 = vsel %vm1151_vm0, -1e+30, %v2251_v62 }
 0x1da   : > { %2180 = vst [vmem:[#allocation2 + $0x174] sm:$0xf] %v6213_v27  ;;  %v2431_v56 = vrot.slane %v8403_v14, 1  ;;  %v2575_v6 = vrot.slane %v8403_v14, 2  ;;  %v2328_v21 = vsel %vm1151_vm0, -1e+30, %v2254_v51 }
 0x1db   : > { %2178 = vst [vmem:[#allocation2 + $0x154] sm:$0xf] %v6211_v8  ;;  %v2253_v17 = vsel %vm1151_vm0, %v2251_v62, %v2252_v28  ;;  %v2343_v10 = vsel %vm1151_vm0, %v2252_v28, -1e+30  ;;  %v2256_v15 = vsel %vm1151_vm0, %v2254_v51, %v2255_v49  ;;  %v2344_v48 = vsel %vm1151_vm0, %v2255_v49, -1e+30 }
 0x1dc   : > { %v2432_v3 = vrot.slane %v2253_v17, 1  ;;  %v2434_v5 = vrot.slane %v2343_v10, 1  ;;  %v2436_v1 = vrot.slane %v2328_v21, 1  ;;  %v2437_v52 = vrot.slane %v2256_v15, 1 }
 0x1dd   : > { %v2439_v35 = vrot.slane %v2344_v48, 1  ;;  %v2576_v61 = vrot.slane %v2253_v17, 2  ;;  %v2578_v8 = vrot.slane %v2343_v10, 2  ;;  %v2580_v62 = vrot.slane %v2328_v21, 2 }
 0x1de   : > { %v2433_v34 = vsel %vm1313_vm1, %v2431_v56, %v2432_v3  ;;  %v2435_v60 = vsel %vm1313_vm1, %v2432_v3, %v2434_v5  ;;  %v2438_v27 = vsel %vm1313_vm1, %v2436_v1, %v2437_v52  ;;  %v2581_v18 = vrot.slane %v2256_v15, 2 }
 0x1df   : > { %v2440_v28 = vsel %vm1313_vm1, %v2437_v52, %v2439_v35  ;;  %v2513_v51 = vmax.f32 %v8403_v14, %v2433_v34  ;;  %v2514_v49 = vmax.f32 %v2253_v17, %v2435_v60  ;;  %v2515_v29 = vmax.f32 %v2328_v21, %v2438_v27  ;;  %4971 = vmatmul.mubr.bf16.gmra.mxu1 %v6795_v57 }
 0x1e0   : > { %v2516_v42 = vmax.f32 %v2256_v15, %v2440_v28  ;;  %v2577_v38 = vsel %vm1462_vm2, %v2575_v6, %v2576_v61  ;;  %v2579_v56 = vsel %vm1462_vm2, %v2576_v61, %v2578_v8  ;;  %v2583_v54 = vrot.slane %v2344_v48, 2  ;;  %4978 = vmatprep.mubr.bf16.mxu1 %v6796_v44 }
 0x1e1   : > { %v2657_v32 = vmax.f32 %v2513_v51, %v2577_v38  ;;  %v2658_v3 = vmax.f32 %v2514_v49, %v2579_v56  ;;  %v2719_v5 = vrot.slane %v8403_v14, 3  ;;  %v2720_v1 = vrot.slane %v2253_v17, 3 }
 0x1e2   : > { %v2722_v52 = vrot.slane %v2343_v10, 3  ;;  %v2582_v35 = vsel %vm1462_vm2, %v2580_v62, %v2581_v18  ;;  %v2584_v34 = vsel %vm1462_vm2, %v2581_v18, %v2583_v54  ;;  %v2724_v60 = vrot.slane %v2328_v21, 3 }
 0x1e3   : > { %v2725_v27 = vrot.slane %v2256_v15, 3  ;;  %v2659_v6 = vmax.f32 %v2515_v29, %v2582_v35  ;;  %v2660_v28 = vmax.f32 %v2516_v42, %v2584_v34  ;;  %v2721_v61 = vsel %vm1611_vm3, %v2719_v5, %v2720_v1  ;;  %v6798_v42 = vld [vmem:[%s10461_s4 + $0xf8] sm:$0xff]  }
 0x1e4   : > { %v2723_v8 = vsel %vm1611_vm3, %v2720_v1, %v2722_v52  ;;  %v2727_v38 = vrot.slane %v2344_v48, 3  ;;  %v2801_v51 = vmax.f32 %v2657_v32, %v2721_v61  ;;  %v2863_v44 = vrot.slane %v8403_v14, 4  ;;  %v6799_v52 = vld [vmem:[#allocation2 + $0x40] ss:$16 sps:$4 sm:$0xff]   ;;  %v6800_v14 = vld [vmem:[%s10461_s4 + $0xb8] sm:$0xff]   ;;  %6549 = vmatprep.subr.bf16.mxu0 %v6798_v42 }
 0x1e5   : > { %v2726_v57 = vsel %vm1611_vm3, %v2724_v60, %v2725_v27  ;;  %v2802_v49 = vmax.f32 %v2658_v3, %v2723_v8  ;;  %v2864_v47 = vrot.slane %v2253_v17, 4  ;;  %v2866_v62 = vrot.slane %v2343_v10, 4  ;;  %6550 = vmatpush3.bf16.msra.mxu0 %v6800_v14 }
 0x1e6   : > { %v2803_v56 = vmax.f32 %v2659_v6, %v2726_v57  ;;  %v2728_v18 = vsel %vm1611_vm3, %v2725_v27, %v2727_v38  ;;  %v2868_v54 = vrot.slane %v2328_v21, 4  ;;  %v2869_v4 = vrot.slane %v2256_v15, 4 }
 0x1e7   : > { %v2871_v29 = vrot.slane %v2344_v48, 4  ;;  %v2804_v5 = vmax.f32 %v2660_v28, %v2728_v18  ;;  %v2865_v1 = vsel %vm1760_vm4, %v2863_v44, %v2864_v47  ;;  %v2867_v32 = vsel %vm1760_vm4, %v2864_v47, %v2866_v62  ;;  %4979 = vmatmul.mubr.bf16.gmra.mxu1 %v6799_v52 }
 0x1e8   : > { %v1500_v3 = vrot.slane %v8213_v25, 2  ;;  %v2870_v17 = vsel %vm1760_vm4, %v2868_v54, %v2869_v4  ;;  %v8439_v15 = vmax.f32 %v2801_v51, %v2865_v1  ;;  %v8441_v21 = vmax.f32 %v2802_v49, %v2867_v32 }
 0x1e9   : > { %v2872_v10 = vsel %vm1760_vm4, %v2869_v4, %v2871_v29  ;;  %v8443_v48 = vmax.f32 %v2803_v56, %v2870_v17  ;;  %v1649_v47 = vrot.slane %v8213_v25, 3  ;;  %v1798_v34 = vrot.slane %v8213_v25, 4 }
 0x1ea   : > { %v8445_v35 = vmax.f32 %v2804_v5, %v2872_v10  ;;  %v1197_v60 = vrot.slane %v8130_v43, 6  ;;  %v8452_v4 = vmul.f32 %v8095_v9, %v7950_v26  ;;  %v8456_v27 = vmul.f32 %v8097_v63, %v7952_v59  ;;  %v6807_v43 = vld [vmem:[%s10461_s4 + $0xa8] sm:$0xff]  }
 0x1eb   : > { %v942_v6 = vmul.f32 %v8103_v30, %v7954_v41  ;;  %v958_v28 = vmul.f32 %v8110_v23, %v7956_v12  ;;  %v8464_v61 = vmul.f32 %v8120_v58, %v7959_v19  ;;  %v10617_v8 = vmax.f32 %v7763_v36, %v8204_v0 }
 0x1ec   : > { %v10618_v26 = vmax.f32 %v7765_v2, %v8206_v24  ;;  %v8481_v23 = vsel %vm1151_vm0, -1e+30, %v1197_v60  ;;  %v6170_v41 = vpack.c.bf16 %v8452_v4, %v8452_v4  ;;  %v1170_v12 = vrot.slane %v8452_v4, 6  ;;  %v6814_v4 = vld [vmem:[%s10461_s4 + $0x98] sm:$0xff]  }
 0x1ed   : > { %v8470_v9 = vmax.f32 %v10617_v8, %v8112_v37  ;;  %v6186_v36 = vpack.c.bf16 %v8456_v27, %v8456_v27  ;;  %v1391_v19 = vrot.slane %v8481_v23, 1  ;;  %v1540_v63 = vrot.slane %v8481_v23, 2 }
 0x1ee   : > { %v8476_v59 = vmax.f32 %v10618_v26, %v8114_v16  ;;  %v1689_v2 = vrot.slane %v8481_v23, 3  ;;  %v1838_v30 = vrot.slane %v8481_v23, 4  ;;  %1099 = vst [vmem:[#allocation2 + $0xc0] sm:$0xf] %v6170_v41  ;;  %v8495_v58 = vsel %vm1151_vm0, -1e+30, %v1170_v12 }
 0x1ef   : > { %1115 = vst [vmem:[#allocation2 + $0x1c0] sm:$0xf] %v6186_v36  ;;  %v10501_v57 = vrot.slane %v8456_v27, 6  ;;  %v6173_v38 = vpack.c.bf16 %v942_v6, %v942_v6  ;;  %v1174_v51 = vrot.slane %v942_v6, 6  ;;  %v1346_v49 = vrot.slane %v8495_v58, 1 }
 0x1f0   : > { %v1495_v56 = vrot.slane %v8495_v58, 2  ;;  %v10619_v54 = vrot.slane %v8127_v46, 6  ;;  %v6189_v5 = vpack.c.bf16 %v958_v28, %v958_v28  ;;  %v1198_v44 = vrot.slane %v958_v28, 6 }
 0x1f1   : > { %v8505_v18 = vsel %vm1151_vm0, -1e+30, %v10501_v57  ;;  %1102 = vst [vmem:[#allocation2 + $0xf0] sm:$0xf] %v6173_v38  ;;  %v1271_v42 = vsel %vm1151_vm0, %v1174_v51, -1e+30  ;;  %v1975_v28 = vmax.f32 %v8235_v50, %v8112_v37 }
 0x1f2   : > { %v1175_v29 = vsel %vm1151_vm0, %v10619_v54, %v1174_v51  ;;  %v1354_v10 = vrot.slane %v1271_v42, 1  ;;  %v1503_v8 = vrot.slane %v1271_v42, 2  ;;  %1118 = vst [vmem:[#allocation2 + $0x1f0] sm:$0xf] %v6189_v5  ;;  %v1652_v46 = vrot.slane %v1271_v42, 3 }
 0x1f3   : > { %v1352_v17 = vrot.slane %v1175_v29, 1  ;;  %v1501_v6 = vrot.slane %v1175_v29, 2  ;;  %v1650_v26 = vrot.slane %v1175_v29, 3  ;;  %v1799_v41 = vrot.slane %v1175_v29, 4 }
 0x1f4   : > { %v1801_v36 = vrot.slane %v1271_v42, 4  ;;  %v10620_v38 = vrot.slane %v8213_v25, 1 }
 0x1f5   : > { %v1355_v54 = vsel %vm1313_vm1, %v1352_v17, %v1354_v10  ;;  %v1502_v32 = vsel %vm1462_vm2, %v1500_v3, %v1501_v6  ;;  %v1504_v52 = vsel %vm1462_vm2, %v1501_v6, %v1503_v8  ;;  %v1651_v57 = vsel %vm1611_vm3, %v1649_v47, %v1650_v26  ;;  %v6803_v3 = vld [vmem:[%s10461_s4 + $0xf0] sm:$0xff]   ;;  %v6805_v47 = vld [vmem:[%s10461_s4 + $0xe8] sm:$0xff]  }
 0x1f6   : > { %v1353_v51 = vsel %vm1313_vm1, %v10620_v38, %v1352_v17  ;;  %v1445_v1 = vmax.f32 %v1175_v29, %v1355_v54  ;;  %v1653_v5 = vsel %vm1611_vm3, %v1650_v26, %v1652_v46  ;;  %v1800_v62 = vsel %vm1760_vm4, %v1798_v34, %v1799_v41  ;;  %6551 = vmatprep.subr.bf16.mxu0 %v6803_v3  ;;  %v10621_v3 = vld [vmem:[#allocation7_spill] sm:$0xff] }
 0x1f7   : > { %v1444_v14 = vmax.f32 %v8213_v25, %v1353_v51  ;;  %v1802_v42 = vsel %vm1760_vm4, %v1799_v41, %v1801_v36  ;;  %v6171_v38 = vpack.c.bf16 %v8464_v61, %v8464_v61  ;;  %v6804_v25 = vld [vmem:[%s10461_s4 + $0xb0] sm:$0xff]   ;;  %v1171_v17 = vrot.slane %v8464_v61, 6 }
 0x1f8   : > { %v1594_v34 = vmax.f32 %v1445_v1, %v1504_v52  ;;  %v1199_v10 = vsel %vm1151_vm0, %v1197_v60, %v1198_v44  ;;  %v1279_v6 = vsel %vm1151_vm0, %v1198_v44, -1e+30  ;;  %v1976_v8 = vmax.f32 %v8241_v13, %v8114_v16  ;;  %6552 = vmatpush3.bf16.msra.mxu0 %v6804_v25 }
 0x1f9   : > { %v1593_v29 = vmax.f32 %v1444_v14, %v1502_v32  ;;  %1100 = vst [vmem:[#allocation2 + $0xd0] sm:$0xf] %v6171_v38  ;;  %v8548_v26 = vmul.f32 %v8122_v22, %v7961_v53  ;;  %v1392_v32 = vrot.slane %v1199_v10, 1  ;;  %v1394_v52 = vrot.slane %v1279_v6, 1  ;;  %6553 = vmatprep.subr.bf16.mxu0 %v6805_v47  ;;  %v6810_v22 = vld [vmem:[%s10461_s4 + $0xe0] sm:$0xff]  }
 0x1fa   : > { %v1743_v61 = vmax.f32 %v1594_v34, %v1653_v5  ;;  %v1541_v60 = vrot.slane %v1199_v10, 2  ;;  %v1543_v44 = vrot.slane %v1279_v6, 2  ;;  %v1690_v14 = vrot.slane %v1199_v10, 3 }
 0x1fb   : > { %v1742_v1 = vmax.f32 %v1593_v29, %v1651_v57  ;;  %v1692_v46 = vrot.slane %v1279_v6, 3  ;;  %v1393_v41 = vsel %vm1313_vm1, %v1391_v19, %v1392_v32  ;;  %v1395_v36 = vsel %vm1313_vm1, %v1392_v32, %v1394_v52  ;;  %v6811_v29 = vld [vmem:[%s10461_s4 + $0xa0] sm:$0xff]   ;;  %v6812_v32 = vld [vmem:[%s10461_s4 + $0xd8] sm:$0xff]   ;;  %v10623_v52 = vld [vmem:[#allocation4_spill] sm:$0xff] }
 0x1fc   : > { %v8558_v57 = vmax.f32 %v1743_v61, %v1802_v42  ;;  %v1460_v51 = vmax.f32 %v8481_v23, %v1393_v41  ;;  %v1461_v54 = vmax.f32 %v1199_v10, %v1395_v36  ;;  %v1542_v5 = vsel %vm1462_vm2, %v1540_v63, %v1541_v60  ;;  %v10622_v42 = vld [vmem:[#allocation8_spill] sm:$0xff]  ;;  %6554 = vmatpush3.bf16.msra.mxu0 %v6807_v43 }
 0x1fd   : > { %v8556_v53 = vmax.f32 %v1742_v1, %v1800_v62  ;;  %v1544_v38 = vsel %vm1462_vm2, %v1541_v60, %v1543_v44  ;;  %v1691_v19 = vsel %vm1611_vm3, %v1689_v2, %v1690_v14  ;;  %v1693_v47 = vsel %vm1611_vm3, %v1690_v14, %v1692_v46  ;;  %6555 = vmatprep.subr.bf16.mxu0 %v6810_v22  ;;  %v10625_v2 = vld [vmem:[#allocation5_spill] sm:$0xff]  ;;  %v10626_v22 = vld [vmem:[#allocation16_spill] sm:$0xff] }
 0x1fe   : > { %v1926_v25 = vmax.f32 %v8558_v57, %v10622_v42  ;;  %v1609_v63 = vmax.f32 %v1460_v51, %v1542_v5  ;;  %v1610_v34 = vmax.f32 %v1461_v54, %v1544_v38  ;;  %v1839_v1 = vrot.slane %v1199_v10, 4  ;;  %v10627_v51 = vld [vmem:[#allocation17_spill] sm:$0xff] }
 0x1ff   : > { %v1925_v62 = vmax.f32 %v8556_v53, %v10621_v3  ;;  %v1841_v61 = vrot.slane %v1279_v6, 4  ;;  %v1172_v43 = vsel %vm1151_vm0, %v1170_v12, %v1171_v17  ;;  %v1270_v14 = vsel %vm1151_vm0, %v1171_v17, -1e+30 }
 0x200   : > { %v1956_v44 = vmax.f32 %v1926_v25, %v10625_v2  ;;  %v1758_v46 = vmax.f32 %v1609_v63, %v1691_v19  ;;  %v1759_v41 = vmax.f32 %v1610_v34, %v1693_v47  ;;  %v1840_v10 = vsel %vm1760_vm4, %v1838_v30, %v1839_v1  ;;  %6556 = vmatpush3.bf16.msra.mxu0 %v6811_v29 }
 0x201   : > { %v8584_v60 = vmax.f32 %v1925_v62, %v10623_v52  ;;  %v1842_v6 = vsel %vm1760_vm4, %v1839_v1, %v1841_v61  ;;  %v1347_v5 = vrot.slane %v1172_v43, 1  ;;  %v1349_v38 = vrot.slane %v1270_v14, 1  ;;  %6557 = vmatprep.subr.bf16.mxu0 %v6812_v32  ;;  %v6817_v62 = vld [vmem:[%s10461_s4 + $0xd0] sm:$0xff]  }
 0x202   : > { %v1986_v54 = vmax.f32 %v1956_v44, %v10627_v51  ;;  %v8601_v12 = vmax.f32 %v1758_v46, %v1840_v10  ;;  %v8603_v17 = vmax.f32 %v1759_v41, %v1842_v6  ;;  %v1496_v23 = vrot.slane %v1172_v43, 2  ;;  %v6818_v10 = vld [vmem:[%s10461_s4 + $0x90] sm:$0xff]  }
 0x203   : > { %10624 = vst [vmem:[#allocation8_spill] sm:$0xff] %v8584_v60  ;;  %v1498_v30 = vrot.slane %v1270_v14, 2  ;;  %v1348_v19 = vsel %vm1313_vm1, %v1346_v49, %v1347_v5  ;;  %v1350_v47 = vsel %vm1313_vm1, %v1347_v5, %v1349_v38  ;;  %v1645_v29 = vrot.slane %v1172_v43, 3  ;;  %v6819_v38 = vld [vmem:[%s10461_s4 + $0xc8] sm:$0xff]  }
 0x204   : > { %v8609_v25 = vmax.f32 %v1986_v54, %v7728_v31  ;;  %v1442_v63 = vmax.f32 %v8495_v58, %v1348_v19  ;;  %v1443_v34 = vmax.f32 %v1172_v43, %v1350_v47  ;;  %v1497_v1 = vsel %vm1462_vm2, %v1495_v56, %v1496_v23  ;;  %6558 = vmatpush3.bf16.msra.mxu0 %v6814_v4 }
 0x205   : > { %v1499_v61 = vsel %vm1462_vm2, %v1496_v23, %v1498_v30  ;;  %v10629_v44 = vrot.slane %v8495_v58, 3  ;;  %v1647_v41 = vrot.slane %v1270_v14, 3  ;;  %v1794_v49 = vrot.slane %v1172_v43, 4  ;;  %6559 = vmatprep.subr.bf16.mxu0 %v6817_v62 }
 0x206   : > { %10628 = vst [vmem:[#allocation5_spill] sm:$0xff] %v8609_v25  ;;  %v10502_v32 = vrot.slane %v8609_v25, 6  ;;  %v1591_v6 = vmax.f32 %v1442_v63, %v1497_v1  ;;  %v1592_v54 = vmax.f32 %v1443_v34, %v1499_v61  ;;  %v1796_v5 = vrot.slane %v1270_v14, 4 }
 0x207   : > { %v1646_v46 = vsel %vm1611_vm3, %v10629_v44, %v1645_v29  ;;  %v6187_v56 = vpack.c.bf16 %v8548_v26, %v8548_v26  ;;  %v1648_v4 = vsel %vm1611_vm3, %v1645_v29, %v1647_v41  ;;  %v10631_v23 = vrot.slane %v8495_v58, 4 }
 0x208   : > { %v8635_v43 = vsel %vm1151_vm0, %v10502_v32, -1e+30  ;;  %v1195_v14 = vrot.slane %v8548_v26, 6  ;;  %v1740_v34 = vmax.f32 %v1591_v6, %v1646_v46  ;;  %v1741_v1 = vmax.f32 %v1592_v54, %v1648_v4  ;;  %6560 = vmatpush3.bf16.msra.mxu0 %v6818_v10  ;;  %v6821_v26 = vld [vmem:[%s10461_s4 + $0x88] sm:$0xff]  }
 0x209   : > { %10630 = vst [vmem:[#allocation16_spill] sm:$0xff] %v8635_v43  ;;  %v1795_v30 = vsel %vm1760_vm4, %v10631_v23, %v1794_v49  ;;  %1116 = vst [vmem:[#allocation2 + $0x1d0] sm:$0xf] %v6187_v56  ;;  %v1797_v61 = vsel %vm1760_vm4, %v1794_v49, %v1796_v5  ;;  %v10632_v29 = vrot.slane %v8456_v27, 6  ;;  %6561 = vmatprep.subr.bf16.mxu0 %v6819_v38  ;;  %v6824_v27 = vld [vmem:[%s10461_s4 + $0xc0] sm:$0xff]   ;;  %v10633_v56 = vrot.slane %v8505_v18, 1 }
 0x20a   : > { %v8656_v44 = vsel %vm1151_vm0, %v1195_v14, -1e+30  ;;  %v1889_v49 = vmax.f32 %v1740_v34, %v1795_v30  ;;  %v1890_v10 = vmax.f32 %v1741_v1, %v1797_v61  ;;  %v10634_v38 = vrot.slane %v8505_v18, 2 }
 0x20b   : > { %v8650_v58 = vsel %vm1151_vm0, %v10632_v29, %v1195_v14  ;;  %v1389_v54 = vrot.slane %v8656_v44, 1  ;;  %v10635_v30 = vrot.slane %v8505_v18, 3  ;;  %v10636_v63 = vmax.f32 %v8204_v0, %v8112_v37 }
 0x20c   : > { %v1387_v41 = vrot.slane %v8650_v58, 1  ;;  %v10506_v46 = vrot.slane %v8650_v58, 2  ;;  %v10503_v6 = vrot.slane %v8650_v58, 3  ;;  %v1921_v1 = vmax.f32 %v8112_v37, %v1889_v49  ;;  %6562 = vmatpush3.bf16.msra.mxu0 %v6821_v26 }
 0x20d   : > { %v1922_v61 = vmax.f32 %v8114_v16, %v1890_v10  ;;  %v1923_v29 = vmax.f32 %v1889_v49, %v8556_v53  ;;  %v10637_v47 = vmax.f32 %v8206_v24, %v8114_v16  ;;  %v1977_v19 = vmax.f32 %v8470_v9, %v1889_v49  ;;  %6563 = vmatprep.subr.bf16.mxu0 %v6824_v27 }
 0x20e   : > { %v8671_v4 = vsel %vm1313_vm1, %v10633_v56, %v1387_v41  ;;  %v8678_v23 = vsel %vm1462_vm2, %v10634_v38, %v10506_v46  ;;  %v8685_v14 = vsel %vm1611_vm3, %v10635_v30, %v10503_v6  ;;  %v1924_v56 = vmax.f32 %v1890_v10, %v8558_v57  ;;  %v6825_v38 = vld [vmem:[%s10461_s4 + $0x80] sm:$0xff]  }
 0x20f   : > { %v1949_v30 = vmax.f32 %v10636_v63, %v1889_v49  ;;  %v1950_v62 = vmax.f32 %v10637_v47, %v1890_v10  ;;  %v1978_v32 = vmax.f32 %v8476_v59, %v1890_v10  ;;  %v8704_v36 = vmax.f32 %v1921_v1, %v8556_v53 }
 0x210   : > { %v1952_v26 = vmax.f32 %v1922_v61, %v8558_v57  ;;  %v8708_v6 = vmax.f32 %v1923_v29, %v10621_v3  ;;  %v1954_v0 = vmax.f32 %v1924_v56, %v10622_v42  ;;  %v2005_v9 = vmax.f32 %v1975_v28, %v1889_v49  ;;  %6564 = vmatpush3.bf16.msra.mxu0 %v6825_v38 }
 0x211   : > { %10638 = vst [vmem:[#allocation17_spill] sm:$0xff] %v8704_v36  ;;  %v1979_v63 = vmax.f32 %v1949_v30, %v8556_v53  ;;  %v1980_v24 = vmax.f32 %v1950_v62, %v8558_v57  ;;  %v2006_v59 = vmax.f32 %v1976_v8, %v1890_v10  ;;  %v8726_v62 = vmax.f32 %v1977_v19, %v8556_v53 }
 0x212   : > { %10639 = vst [vmem:[#allocation22_spill] sm:$0xff] %v8708_v6  ;;  %v1982_v27 = vmax.f32 %v1952_v26, %v10622_v42  ;;  %v1984_v61 = vmax.f32 %v1954_v0, %v10625_v2  ;;  %v2008_v37 = vmax.f32 %v1978_v32, %v8558_v57  ;;  %v6198_v8 = vpack.c.bf16 %v2005_v9, %v2005_v9 }
 0x213   : > { %v8730_v50 = vmax.f32 %v1979_v63, %v10621_v3  ;;  %v2010_v16 = vmax.f32 %v1980_v24, %v10622_v42  ;;  %v6199_v49 = vpack.c.bf16 %v2006_v59, %v2006_v59  ;;  %v2233_v56 = vrot.slane %v2005_v9, 6 }
 0x214   : > { %v8734_v13 = vmax.f32 %v1982_v27, %v10625_v2  ;;  %v8737_v28 = vmax.f32 %v1984_v61, %v10627_v51  ;;  %v6201_v10 = vpack.c.bf16 %v2008_v37, %v2008_v37  ;;  %v2234_v53 = vrot.slane %v2006_v59, 6  ;;  %2165 = vst [vmem:[#allocation2 + $0x84] sm:$0xf] %v6198_v8 }
 0x215   : > { %v6203_v29 = vpack.c.bf16 %v2010_v16, %v2010_v16  ;;  %2166 = vst [vmem:[#allocation2 + $0x94] sm:$0xf] %v6199_v49  ;;  %v2236_v57 = vrot.slane %v8726_v62, 6  ;;  %v2237_v32 = vrot.slane %v2008_v37, 6  ;;  %v2239_v19 = vrot.slane %v8730_v50, 6 }
 0x216   : > { %10640 = vst [vmem:[#allocation23_spill] sm:$0xff] %v8734_v13  ;;  %10641 = vst [vmem:[#allocation24_spill] sm:$0xff] %v8737_v28  ;;  %v2240_v38 = vrot.slane %v2010_v16, 6  ;;  %v8742_v42 = vsel %vm1151_vm0, %v2233_v56, %v2234_v53  ;;  %v10505_v2 = vrot.slane %v8734_v13, 6  ;;  %v10504_v30 = vrot.slane %v8737_v28, 6 }
 0x217   : > { %2168 = vst [vmem:[#allocation2 + $0xb4] sm:$0xf] %v6201_v10  ;;  %v8747_v26 = vsel %vm1151_vm0, -1e+30, %v2233_v56  ;;  %2170 = vst [vmem:[#allocation2 + $0xd4] sm:$0xf] %v6203_v29  ;;  %v8750_v0 = vsel %vm1151_vm0, %v2236_v57, %v2237_v32  ;;  %v8773_v37 = vsel %vm1313_vm1, %v1387_v41, %v1389_v54 }
 0x218   : > { %v8753_v63 = vsel %vm1151_vm0, %v2239_v19, %v2240_v38  ;;  %v8756_v24 = vsel %vm1151_vm0, -1e+30, %v2236_v57  ;;  %v8759_v9 = vsel %vm1151_vm0, -1e+30, %v2239_v19  ;;  %v8762_v59 = vsel %vm1151_vm0, %v2234_v53, -1e+30 }
 0x219   : > { %v8765_v27 = vsel %vm1151_vm0, %v2237_v32, -1e+30  ;;  %v8768_v61 = vsel %vm1151_vm0, %v2240_v38, -1e+30  ;;  %v8778_v16 = vsel %vm1151_vm0, %v10505_v2, -1e+30 }
 0x21a   : > { %v8783_v8 = vsel %vm1151_vm0, %v10504_v30, -1e+30  ;;  %v2401_v49 = vrot.slane %v8747_v26, 1  ;;  %v2402_v10 = vrot.slane %v8742_v42, 1  ;;  %v2404_v29 = vrot.slane %v8762_v59, 1 }
 0x21b   : > { %v2406_v56 = vrot.slane %v8756_v24, 1  ;;  %v2407_v41 = vrot.slane %v8750_v0, 1  ;;  %v2409_v54 = vrot.slane %v8765_v27, 1  ;;  %v2411_v57 = vrot.slane %v8759_v9, 1 }
 0x21c   : > { %v2403_v53 = vsel %vm1313_vm1, %v2401_v49, %v2402_v10  ;;  %v2412_v32 = vrot.slane %v8753_v63, 1  ;;  %v2414_v19 = vrot.slane %v8768_v61, 1  ;;  %v2405_v38 = vsel %vm1313_vm1, %v2402_v10, %v2404_v29 }
 0x21d   : > { %v2408_v30 = vsel %vm1313_vm1, %v2406_v56, %v2407_v41  ;;  %v2410_v2 = vsel %vm1313_vm1, %v2407_v41, %v2409_v54  ;;  %v2501_v46 = vmax.f32 %v8747_v26, %v2403_v53  ;;  %v2502_v5 = vmax.f32 %v8742_v42, %v2405_v38 }
 0x21e   : > { %v2413_v47 = vsel %vm1313_vm1, %v2411_v57, %v2412_v32  ;;  %v2415_v34 = vsel %vm1313_vm1, %v2412_v32, %v2414_v19  ;;  %v2503_v43 = vmax.f32 %v8756_v24, %v2408_v30  ;;  %v2504_v10 = vmax.f32 %v8750_v0, %v2410_v2 }
 0x21f   : > { %v2505_v29 = vmax.f32 %v8759_v9, %v2413_v47  ;;  %v2506_v56 = vmax.f32 %v8753_v63, %v2415_v34  ;;  %v2545_v41 = vrot.slane %v8747_v26, 2  ;;  %v2546_v54 = vrot.slane %v8742_v42, 2 }
 0x220   : > { %v2548_v57 = vrot.slane %v8762_v59, 2  ;;  %v2550_v32 = vrot.slane %v8756_v24, 2  ;;  %v2551_v53 = vrot.slane %v8750_v0, 2  ;;  %v2553_v19 = vrot.slane %v8765_v27, 2 }
 0x221   : > { %v2555_v30 = vrot.slane %v8759_v9, 2  ;;  %v2547_v2 = vsel %vm1462_vm2, %v2545_v41, %v2546_v54  ;;  %v2556_v34 = vrot.slane %v8753_v63, 2  ;;  %v2558_v38 = vrot.slane %v8768_v61, 2 }
 0x222   : > { %v2549_v47 = vsel %vm1462_vm2, %v2546_v54, %v2548_v57  ;;  %v2552_v49 = vsel %vm1462_vm2, %v2550_v32, %v2551_v53  ;;  %v2554_v1 = vsel %vm1462_vm2, %v2551_v53, %v2553_v19  ;;  %v2645_v13 = vmax.f32 %v2501_v46, %v2547_v2 }
 0x223   : > { %v2557_v28 = vsel %vm1462_vm2, %v2555_v30, %v2556_v34  ;;  %v2559_v6 = vsel %vm1462_vm2, %v2556_v34, %v2558_v38  ;;  %v2646_v41 = vmax.f32 %v2502_v5, %v2549_v47  ;;  %v2647_v3 = vmax.f32 %v2503_v43, %v2552_v49 }
 0x224   : > { %v2648_v54 = vmax.f32 %v2504_v10, %v2554_v1  ;;  %v2649_v57 = vmax.f32 %v2505_v29, %v2557_v28  ;;  %v2650_v36 = vmax.f32 %v2506_v56, %v2559_v6  ;;  %v2689_v52 = vrot.slane %v8747_v26, 3 }
 0x225   : > { %v2690_v32 = vrot.slane %v8742_v42, 3  ;;  %v2692_v53 = vrot.slane %v8762_v59, 3  ;;  %v2694_v19 = vrot.slane %v8756_v24, 3  ;;  %v2695_v60 = vrot.slane %v8750_v0, 3 }
 0x226   : > { %v2697_v30 = vrot.slane %v8765_v27, 3  ;;  %v2699_v34 = vrot.slane %v8759_v9, 3  ;;  %v2700_v46 = vrot.slane %v8753_v63, 3  ;;  %v2702_v5 = vrot.slane %v8768_v61, 3 }
 0x227   : > { %v2691_v43 = vsel %vm1611_vm3, %v2689_v52, %v2690_v32  ;;  %v2693_v6 = vsel %vm1611_vm3, %v2690_v32, %v2692_v53  ;;  %v2696_v28 = vsel %vm1611_vm3, %v2694_v19, %v2695_v60  ;;  %v2833_v53 = vrot.slane %v8747_v26, 4 }
 0x228   : > { %v2698_v49 = vsel %vm1611_vm3, %v2695_v60, %v2697_v30  ;;  %v2701_v10 = vsel %vm1611_vm3, %v2699_v34, %v2700_v46  ;;  %v2703_v56 = vsel %vm1611_vm3, %v2700_v46, %v2702_v5  ;;  %v2789_v2 = vmax.f32 %v2645_v13, %v2691_v43 }
 0x229   : > { %v2790_v47 = vmax.f32 %v2646_v41, %v2693_v6  ;;  %v2791_v38 = vmax.f32 %v2647_v3, %v2696_v28  ;;  %v2792_v52 = vmax.f32 %v2648_v54, %v2698_v49  ;;  %v2793_v25 = vmax.f32 %v2649_v57, %v2701_v10 }
 0x22a   : > { %v2794_v32 = vmax.f32 %v2650_v36, %v2703_v56  ;;  %v2834_v1 = vrot.slane %v8742_v42, 4  ;;  %v2836_v19 = vrot.slane %v8762_v59, 4  ;;  %v2838_v60 = vrot.slane %v8756_v24, 4 }
 0x22b   : > { %v2839_v30 = vrot.slane %v8750_v0, 4  ;;  %v2841_v34 = vrot.slane %v8765_v27, 4  ;;  %v2843_v46 = vrot.slane %v8759_v9, 4  ;;  %v2844_v13 = vrot.slane %v8753_v63, 4 }
 0x22c   : > { %v2846_v3 = vrot.slane %v8768_v61, 4  ;;  %v2835_v36 = vsel %vm1760_vm4, %v2833_v53, %v2834_v1  ;;  %v2837_v26 = vsel %vm1760_vm4, %v2834_v1, %v2836_v19  ;;  %v1458_v6 = vmax.f32 %v8505_v18, %v8671_v4 }
 0x22d   : > { %v2840_v42 = vsel %vm1760_vm4, %v2838_v60, %v2839_v30  ;;  %v2842_v24 = vsel %vm1760_vm4, %v2839_v30, %v2841_v34  ;;  %v2845_v0 = vsel %vm1760_vm4, %v2843_v46, %v2844_v13  ;;  %v8859_v41 = vmax.f32 %v2789_v2, %v2835_v36 }
 0x22e   : > { %v2847_v27 = vsel %vm1760_vm4, %v2844_v13, %v2846_v3  ;;  %v2934_v63 = vmax.f32 %v2790_v47, %v2837_v26  ;;  %v8861_v61 = vmax.f32 %v2791_v38, %v2840_v42  ;;  %v8863_v54 = vmax.f32 %v2792_v52, %v2842_v24 }
 0x22f   : > { %v8865_v57 = vmax.f32 %v2793_v25, %v2845_v0  ;;  %v8867_v43 = vmax.f32 %v2794_v32, %v2847_v27  ;;  %v1459_v5 = vmax.f32 %v8650_v58, %v8773_v37  ;;  %v2965_v1 = vmax.f32 %v8372_v33, %v8859_v41 }
 0x230   : > { %10642 = vst [vmem:[#allocation25_spill] sm:$0xff] %v8863_v54  ;;  %v2966_v28 = vmax.f32 %v8374_v40, %v2934_v63  ;;  %v2967_v49 = vmax.f32 %v8859_v41, %v8861_v61  ;;  %v2968_v10 = vmax.f32 %v2934_v63, %v8863_v54  ;;  %v10644_v4 = vmax.f32 %v8368_v11, %v8372_v33 }
 0x231   : > { %10643 = vst [vmem:[#allocation26_spill] sm:$0xff] %v8867_v43  ;;  %v10645_v2 = vmax.f32 %v8370_v20, %v8374_v40  ;;  %v8891_v38 = vmax.f32 %v2965_v1, %v8861_v61  ;;  %v3022_v19 = vmax.f32 %v8397_v39, %v2934_v63  ;;  %v10649_v34 = vmax.f32 %v8389_v7, %v8374_v40 }
 0x232   : > { %v2993_v37 = vmax.f32 %v10644_v4, %v8859_v41  ;;  %v8894_v52 = vmax.f32 %v2966_v28, %v8863_v54  ;;  %v8897_v32 = vmax.f32 %v2967_v49, %v8865_v57  ;;  %v8900_v53 = vmax.f32 %v2968_v10, %v8867_v43 }
 0x233   : > { %v2994_v47 = vmax.f32 %v10645_v2, %v2934_v63  ;;  %10646 = vst [vmem:[#allocation27_spill] sm:$0xff] %v8891_v38  ;;  %v8908_v46 = vmax.f32 %v10649_v34, %v2934_v63  ;;  %v10650_v36 = vrot.slane %v8656_v44, 2  ;;  %v10651_v26 = vrot.slane %v8650_v58, 2  ;;  %v10655_v2 = vld [vmem:[#allocation20_spill] sm:$0xff]  ;;  %v10658_v34 = vld [vmem:[#allocation18_spill] sm:$0xff] }
 0x234   : > { %10647 = vst [vmem:[#allocation28_spill] sm:$0xff] %v8894_v52  ;;  %10648 = vst [vmem:[#allocation29_spill] sm:$0xff] %v8900_v53  ;;  %v3023_v60 = vmax.f32 %v2993_v37, %v8861_v61  ;;  %v1607_v42 = vmax.f32 %v1458_v6, %v8678_v23  ;;  %v8921_v24 = vmax.f32 %v3022_v19, %v8863_v54  ;;  %v10653_v1 = vrot.slane %v8656_v44, 3 }
 0x235   : > { %v3024_v30 = vmax.f32 %v2994_v47, %v8863_v54  ;;  %v1539_v39 = vsel %vm1462_vm2, %v10651_v26, %v10650_v36  ;;  %v10654_v28 = vrot.slane %v8650_v58, 3  ;;  %v1834_v6 = vrot.slane %v8650_v58, 4 }
 0x236   : > { %v8924_v7 = vmax.f32 %v3023_v60, %v8865_v57  ;;  %v1608_v63 = vmax.f32 %v1459_v5, %v1539_v39  ;;  %v1756_v23 = vmax.f32 %v1607_v42, %v8685_v14  ;;  %v1836_v4 = vrot.slane %v8656_v44, 4 }
 0x237   : > { %v8927_v0 = vmax.f32 %v3024_v30, %v8867_v43  ;;  %v1688_v49 = vsel %vm1611_vm3, %v10654_v28, %v10653_v1  ;;  %v1933_v37 = vmax.f32 %v7726_v45, %v8270_v55  ;;  %v1934_v5 = vmax.f32 %v7728_v31, %v10655_v2  ;;  %v10657_v30 = vld [vmem:[#allocation6_spill] sm:$0xff] }
 0x238   : > { %v1757_v47 = vmax.f32 %v1608_v63, %v1688_v49  ;;  %v10656_v19 = vrot.slane %v8505_v18, 4  ;;  %v1935_v14 = vmax.f32 %v8270_v55, %v10657_v30  ;;  %v1936_v58 = vmax.f32 %v10655_v2, %v10658_v34 }
 0x239   : > { %10652 = vst [vmem:[#allocation30_spill] sm:$0xff] %v8927_v0  ;;  %v1837_v36 = vsel %vm1760_vm4, %v1834_v6, %v1836_v4  ;;  %v10659_v26 = vmax.f32 %v10626_v22, %v7726_v45  ;;  %v10660_v18 = vmax.f32 %v10627_v51, %v7728_v31  ;;  %v1963_v1 = vmax.f32 %v1933_v37, %v10657_v30 }
 0x23a   : > { %v1835_v60 = vsel %vm1760_vm4, %v10656_v19, %v1834_v6  ;;  %v1906_v63 = vmax.f32 %v1757_v47, %v1837_v36  ;;  %v1964_v28 = vmax.f32 %v1934_v5, %v10658_v34 }
 0x23b   : > { %v1905_v44 = vmax.f32 %v1756_v23, %v1835_v60  ;;  %v1961_v39 = vmax.f32 %v10659_v26, %v8270_v55  ;;  %v1962_v42 = vmax.f32 %v10660_v18, %v10655_v2 }
 0x23c   : > { %v1938_v19 = vmax.f32 %v10658_v34, %v1906_v63  ;;  %v1966_v60 = vmax.f32 %v1936_v58, %v1906_v63  ;;  %v1994_v51 = vmax.f32 %v1964_v28, %v1906_v63 }
 0x23d   : > { %v1937_v23 = vmax.f32 %v10657_v30, %v1905_v44  ;;  %v1965_v6 = vmax.f32 %v1935_v14, %v1905_v44  ;;  %v1991_v4 = vmax.f32 %v1961_v39, %v10657_v30  ;;  %v1992_v55 = vmax.f32 %v1962_v42, %v10658_v34  ;;  %v10661_v39 = vld [vmem:[#allocation3_spill] sm:$0xff] }
 0x23e   : > { %v1993_v31 = vmax.f32 %v1963_v1, %v1905_v44  ;;  %v1968_v36 = vmax.f32 %v1938_v19, %v8603_v17  ;;  %v1996_v26 = vmax.f32 %v1966_v60, %v8603_v17  ;;  %v2024_v30 = vmax.f32 %v1994_v51, %v8603_v17 }
 0x23f   : > { %v1967_v2 = vmax.f32 %v1937_v23, %v8601_v12  ;;  %v1995_v37 = vmax.f32 %v1965_v6, %v8601_v12  ;;  %v2021_v5 = vmax.f32 %v1991_v4, %v1905_v44  ;;  %v2022_v47 = vmax.f32 %v1992_v55, %v1906_v63 }
 0x240   : > { %v2023_v14 = vmax.f32 %v1993_v31, %v8601_v12  ;;  %v1998_v1 = vmax.f32 %v1968_v36, %v10661_v39  ;;  %v2026_v28 = vmax.f32 %v1996_v26, %v10661_v39  ;;  %v6217_v63 = vpack.c.bf16 %v2024_v30, %v2024_v30 }
 0x241   : > { %v1997_v18 = vmax.f32 %v1967_v2, %v10661_v39  ;;  %v2025_v34 = vmax.f32 %v1995_v37, %v10661_v39  ;;  %v6214_v58 = vpack.c.bf16 %v2021_v5, %v2021_v5  ;;  %v6215_v42 = vpack.c.bf16 %v2022_v47, %v2022_v47 }
 0x242   : > { %v6216_v44 = vpack.c.bf16 %v2023_v14, %v2023_v14  ;;  %v2257_v12 = vrot.slane %v2021_v5, 6  ;;  %v2258_v17 = vrot.slane %v2022_v47, 6  ;;  %v2028_v4 = vmax.f32 %v1998_v1, %v10661_v39  ;;  %2184 = vst [vmem:[#allocation2 + $0x1b4] sm:$0xf] %v6217_v63 }
 0x243   : > { %v8978_v23 = vmax.f32 %v1997_v18, %v10661_v39  ;;  %v6218_v6 = vpack.c.bf16 %v2025_v34, %v2025_v34  ;;  %2181 = vst [vmem:[#allocation2 + $0x184] sm:$0xf] %v6214_v58  ;;  %2182 = vst [vmem:[#allocation2 + $0x194] sm:$0xf] %v6215_v42  ;;  %v6219_v55 = vpack.c.bf16 %v2026_v28, %v2026_v28  ;;  %v2260_v19 = vrot.slane %v2023_v14, 6 }
 0x244   : > { %2183 = vst [vmem:[#allocation2 + $0x1a4] sm:$0xf] %v6216_v44  ;;  %v2261_v60 = vrot.slane %v2024_v30, 6  ;;  %v8982_v31 = vsel %vm1151_vm0, %v2257_v12, %v2258_v17  ;;  %v2263_v51 = vrot.slane %v2025_v34, 6  ;;  %v2264_v2 = vrot.slane %v2026_v28, 6 }
 0x245   : > { %10662 = vst [vmem:[#allocation20_spill] sm:$0xff] %v8978_v23  ;;  %v2266_v37 = vrot.slane %v8978_v23, 6  ;;  %2185 = vst [vmem:[#allocation2 + $0x1c4] sm:$0xf] %v6218_v6  ;;  %v6221_v36 = vpack.c.bf16 %v2028_v4, %v2028_v4  ;;  %v2267_v47 = vrot.slane %v2028_v4, 6  ;;  %v2442_v6 = vrot.slane %v8982_v31, 1 }
 0x246   : > { %2186 = vst [vmem:[#allocation2 + $0x1d4] sm:$0xf] %v6219_v55  ;;  %v8986_v5 = vsel %vm1151_vm0, %v2260_v19, %v2261_v60  ;;  %v8989_v26 = vsel %vm1151_vm0, -1e+30, %v2257_v12  ;;  %v8992_v14 = vsel %vm1151_vm0, %v2263_v51, %v2264_v2  ;;  %v8995_v30 = vsel %vm1151_vm0, -1e+30, %v2260_v19 }
 0x247   : > { %v8998_v18 = vsel %vm1151_vm0, -1e+30, %v2263_v51  ;;  %v9001_v34 = vsel %vm1151_vm0, -1e+30, %v2266_v37  ;;  %2188 = vst [vmem:[#allocation2 + $0x1f4] sm:$0xf] %v6221_v36  ;;  %v9004_v58 = vsel %vm1151_vm0, %v2266_v37, %v2267_v47 }
 0x248   : > { %v9007_v42 = vsel %vm1151_vm0, %v2258_v17, -1e+30  ;;  %v9010_v1 = vsel %vm1151_vm0, %v2261_v60, -1e+30  ;;  %v9013_v28 = vsel %vm1151_vm0, %v2264_v2, -1e+30 }
 0x249   : > { %v9016_v44 = vsel %vm1151_vm0, %v2267_v47, -1e+30  ;;  %v2441_v63 = vrot.slane %v8989_v26, 1  ;;  %v2444_v12 = vrot.slane %v9007_v42, 1  ;;  %v2446_v4 = vrot.slane %v8995_v30, 1 }
 0x24a   : > { %v2447_v17 = vrot.slane %v8986_v5, 1  ;;  %v2449_v55 = vrot.slane %v9010_v1, 1  ;;  %v2451_v19 = vrot.slane %v8998_v18, 1  ;;  %v2452_v2 = vrot.slane %v8992_v14, 1 }
 0x24b   : > { %v2443_v60 = vsel %vm1313_vm1, %v2441_v63, %v2442_v6  ;;  %v2445_v51 = vsel %vm1313_vm1, %v2442_v6, %v2444_v12  ;;  %v2454_v37 = vrot.slane %v9013_v28, 1  ;;  %v2456_v56 = vrot.slane %v9001_v34, 1 }
 0x24c   : > { %v2448_v36 = vsel %vm1313_vm1, %v2446_v4, %v2447_v17  ;;  %v2450_v47 = vsel %vm1313_vm1, %v2447_v17, %v2449_v55  ;;  %v2457_v3 = vrot.slane %v9004_v58, 1  ;;  %v2453_v13 = vsel %vm1313_vm1, %v2451_v19, %v2452_v2 }
 0x24d   : > { %v2455_v9 = vsel %vm1313_vm1, %v2452_v2, %v2454_v37  ;;  %v2459_v63 = vrot.slane %v9016_v44, 1  ;;  %v2517_v6 = vmax.f32 %v8989_v26, %v2443_v60  ;;  %v2518_v29 = vmax.f32 %v8982_v31, %v2445_v51 }
 0x24e   : > { %v2458_v12 = vsel %vm1313_vm1, %v2456_v56, %v2457_v3  ;;  %v2519_v4 = vmax.f32 %v8995_v30, %v2448_v36  ;;  %v2520_v17 = vmax.f32 %v8986_v5, %v2450_v47  ;;  %v2521_v25 = vmax.f32 %v8998_v18, %v2453_v13 }
 0x24f   : > { %v2460_v55 = vsel %vm1313_vm1, %v2457_v3, %v2459_v63  ;;  %v2522_v19 = vmax.f32 %v8992_v14, %v2455_v9  ;;  %v2523_v2 = vmax.f32 %v9001_v34, %v2458_v12  ;;  %v2585_v60 = vrot.slane %v8989_v26, 2 }
 0x250   : > { %v2524_v37 = vmax.f32 %v9004_v58, %v2460_v55  ;;  %v2586_v56 = vrot.slane %v8982_v31, 2  ;;  %v2588_v51 = vrot.slane %v9007_v42, 2  ;;  %v2590_v36 = vrot.slane %v8995_v30, 2 }
 0x251   : > { %v2591_v47 = vrot.slane %v8986_v5, 2  ;;  %v2593_v3 = vrot.slane %v9010_v1, 2  ;;  %v2595_v13 = vrot.slane %v8998_v18, 2  ;;  %v2596_v12 = vrot.slane %v8992_v14, 2 }
 0x252   : > { %v2587_v9 = vsel %vm1462_vm2, %v2585_v60, %v2586_v56  ;;  %v2589_v63 = vsel %vm1462_vm2, %v2586_v56, %v2588_v51  ;;  %v2598_v55 = vrot.slane %v9013_v28, 2  ;;  %v2600_v27 = vrot.slane %v9001_v34, 2 }
 0x253   : > { %v2592_v59 = vsel %vm1462_vm2, %v2590_v36, %v2591_v47  ;;  %v2594_v10 = vsel %vm1462_vm2, %v2591_v47, %v2593_v3  ;;  %v2601_v49 = vrot.slane %v9004_v58, 2  ;;  %v2597_v23 = vsel %vm1462_vm2, %v2595_v13, %v2596_v12 }
 0x254   : > { %v2599_v54 = vsel %vm1462_vm2, %v2596_v12, %v2598_v55  ;;  %v2603_v60 = vrot.slane %v9016_v44, 2  ;;  %v2661_v53 = vmax.f32 %v2517_v6, %v2587_v9  ;;  %v2662_v51 = vmax.f32 %v2518_v29, %v2589_v63 }
 0x255   : > { %v2602_v56 = vsel %vm1462_vm2, %v2600_v27, %v2601_v49  ;;  %v2663_v43 = vmax.f32 %v2519_v4, %v2592_v59  ;;  %v2664_v52 = vmax.f32 %v2520_v17, %v2594_v10  ;;  %v2665_v38 = vmax.f32 %v2521_v25, %v2597_v23 }
 0x256   : > { %v2604_v36 = vsel %vm1462_vm2, %v2601_v49, %v2603_v60  ;;  %v2666_v47 = vmax.f32 %v2522_v19, %v2599_v54  ;;  %v2667_v3 = vmax.f32 %v2523_v2, %v2602_v56  ;;  %v2729_v0 = vrot.slane %v8989_v26, 3 }
 0x257   : > { %v2668_v45 = vmax.f32 %v2524_v37, %v2604_v36  ;;  %v2730_v13 = vrot.slane %v8982_v31, 3  ;;  %v2732_v12 = vrot.slane %v9007_v42, 3  ;;  %v2734_v55 = vrot.slane %v8995_v30, 3 }
 0x258   : > { %v2735_v6 = vrot.slane %v8986_v5, 3  ;;  %v2737_v29 = vrot.slane %v9010_v1, 3  ;;  %v2739_v59 = vrot.slane %v8998_v18, 3  ;;  %v2740_v25 = vrot.slane %v8992_v14, 3 }
 0x259   : > { %v2731_v27 = vsel %vm1611_vm3, %v2729_v0, %v2730_v13  ;;  %v2733_v54 = vsel %vm1611_vm3, %v2730_v13, %v2732_v12  ;;  %v2742_v10 = vrot.slane %v9013_v28, 3  ;;  %v2744_v4 = vrot.slane %v9001_v34, 3 }
 0x25a   : > { %v2736_v49 = vsel %vm1611_vm3, %v2734_v55, %v2735_v6  ;;  %v2738_v23 = vsel %vm1611_vm3, %v2735_v6, %v2737_v29  ;;  %v2745_v17 = vrot.slane %v9004_v58, 3  ;;  %v2741_v19 = vsel %vm1611_vm3, %v2739_v59, %v2740_v25 }
 0x25b   : > { %v2743_v2 = vsel %vm1611_vm3, %v2740_v25, %v2742_v10  ;;  %v2747_v0 = vrot.slane %v9016_v44, 3  ;;  %v2805_v37 = vmax.f32 %v2661_v53, %v2731_v27  ;;  %v2806_v63 = vmax.f32 %v2662_v51, %v2733_v54 }
 0x25c   : > { %v2746_v9 = vsel %vm1611_vm3, %v2744_v4, %v2745_v17  ;;  %v2807_v60 = vmax.f32 %v2663_v43, %v2736_v49  ;;  %v2808_v56 = vmax.f32 %v2664_v52, %v2738_v23  ;;  %v2809_v13 = vmax.f32 %v2665_v38, %v2741_v19 }
 0x25d   : > { %v2748_v36 = vsel %vm1611_vm3, %v2745_v17, %v2747_v0  ;;  %v2810_v12 = vmax.f32 %v2666_v47, %v2743_v2  ;;  %v2811_v55 = vmax.f32 %v2667_v3, %v2746_v9  ;;  %v2873_v29 = vrot.slane %v8989_v26, 4 }
 0x25e   : > { %v2812_v6 = vmax.f32 %v2668_v45, %v2748_v36  ;;  %v2874_v59 = vrot.slane %v8982_v31, 4  ;;  %v2876_v25 = vrot.slane %v9007_v42, 4  ;;  %v2878_v10 = vrot.slane %v8995_v30, 4 }
 0x25f   : > { %v2879_v53 = vrot.slane %v8986_v5, 4  ;;  %v2881_v51 = vrot.slane %v9010_v1, 4  ;;  %v2883_v43 = vrot.slane %v8998_v18, 4  ;;  %v2884_v45 = vrot.slane %v8992_v14, 4 }
 0x260   : > { %v2875_v52 = vsel %vm1760_vm4, %v2873_v29, %v2874_v59  ;;  %v2877_v38 = vsel %vm1760_vm4, %v2874_v59, %v2876_v25  ;;  %v2886_v26 = vrot.slane %v9013_v28, 4  ;;  %v2888_v30 = vrot.slane %v9001_v34, 4 }
 0x261   : > { %v2880_v31 = vsel %vm1760_vm4, %v2878_v10, %v2879_v53  ;;  %v2882_v42 = vsel %vm1760_vm4, %v2879_v53, %v2881_v51  ;;  %v2889_v5 = vrot.slane %v9004_v58, 4  ;;  %v2885_v1 = vsel %vm1760_vm4, %v2883_v43, %v2884_v45 }
 0x262   : > { %v2887_v18 = vsel %vm1760_vm4, %v2884_v45, %v2886_v26  ;;  %v2891_v47 = vrot.slane %v9016_v44, 4  ;;  %v9104_v3 = vmax.f32 %v2805_v37, %v2875_v52  ;;  %v9107_v27 = vmax.f32 %v2806_v63, %v2877_v38  ;;  %v6806_v52 = vld [vmem:[#allocation2 + $0x60] ss:$16 sps:$4 sm:$0xff]  }
 0x263   : > { %v2890_v14 = vsel %vm1760_vm4, %v2888_v30, %v2889_v5  ;;  %v9109_v28 = vmax.f32 %v2807_v60, %v2880_v31  ;;  %v9111_v54 = vmax.f32 %v2808_v56, %v2882_v42  ;;  %v2953_v49 = vmax.f32 %v2809_v13, %v2885_v1 }
 0x264   : > { %v2892_v34 = vsel %vm1760_vm4, %v2889_v5, %v2891_v47  ;;  %v2954_v58 = vmax.f32 %v2810_v12, %v2887_v18  ;;  %v2955_v23 = vmax.f32 %v2811_v55, %v2890_v14  ;;  %v2980_v17 = vmax.f32 %v8441_v21, %v8445_v35  ;;  %v10673_v18 = vld [vmem:[#allocation19_spill] sm:$0xff] }
 0x265   : > { %10663 = vst [vmem:[#allocation6_spill] sm:$0xff] %v9111_v54  ;;  %v2956_v4 = vmax.f32 %v2812_v6, %v2892_v34  ;;  %v2981_v44 = vmax.f32 %v8443_v48, %v9104_v3  ;;  %v2982_v19 = vmax.f32 %v8445_v35, %v9107_v27  ;;  %v2983_v2 = vmax.f32 %v9104_v3, %v9109_v28 }
 0x266   : > { %v2984_v0 = vmax.f32 %v9107_v27, %v9111_v54  ;;  %v2985_v37 = vmax.f32 %v9109_v28, %v2953_v49  ;;  %v2986_v9 = vmax.f32 %v9111_v54, %v2954_v58  ;;  %v10664_v63 = vmax.f32 %v8439_v15, %v8443_v48 }
 0x267   : > { %v3010_v56 = vmax.f32 %v2980_v17, %v9107_v27  ;;  %v3011_v36 = vmax.f32 %v2981_v44, %v9109_v28  ;;  %v3012_v13 = vmax.f32 %v2982_v19, %v9111_v54  ;;  %v3013_v12 = vmax.f32 %v2983_v2, %v2953_v49 }
 0x268   : > { %v3009_v60 = vmax.f32 %v10664_v63, %v9104_v3  ;;  %v3014_v55 = vmax.f32 %v2984_v0, %v2954_v58  ;;  %v9133_v6 = vmax.f32 %v2985_v37, %v2955_v23  ;;  %v3016_v29 = vmax.f32 %v2986_v9, %v2956_v4  ;;  %v10681_v63 = vld [vmem:[#allocation10_spill] sm:$0xff] }
 0x269   : > { %v3040_v25 = vmax.f32 %v3010_v56, %v9111_v54  ;;  %v3041_v10 = vmax.f32 %v3011_v36, %v2953_v49  ;;  %v3042_v53 = vmax.f32 %v3012_v13, %v2954_v58  ;;  %v3043_v51 = vmax.f32 %v3013_v12, %v2955_v23  ;;  %v10684_v13 = vld [vmem:[#allocation13_spill] sm:$0xff] }
 0x26a   : > { %10665 = vst [vmem:[#allocation18_spill] sm:$0xff] %v9133_v6  ;;  %v3039_v59 = vmax.f32 %v3009_v60, %v9109_v28  ;;  %v3044_v43 = vmax.f32 %v3014_v55, %v2956_v4  ;;  %v3046_v38 = vmax.f32 %v3016_v29, %v10661_v39  ;;  %v6196_v47 = vpack.c.bf16 %v10673_v18, %v10673_v18  ;;  %v10682_v60 = vld [vmem:[#allocation11_spill] sm:$0xff] }
 0x26b   : > { %v9142_v26 = vmax.f32 %v3040_v25, %v2954_v58  ;;  %v9144_v31 = vmax.f32 %v3041_v10, %v2955_v23  ;;  %v9146_v42 = vmax.f32 %v3042_v53, %v2956_v4  ;;  %v9149_v30 = vmax.f32 %v3043_v51, %v10661_v39  ;;  %v6813_v55 = vld [vmem:[#allocation2 + $0x80] ss:$16 sps:$4 sm:$0xff]  }
 0x26c   : > { %v9140_v45 = vmax.f32 %v3039_v59, %v2953_v49  ;;  %v9152_v5 = vmax.f32 %v3044_v43, %v10661_v39  ;;  %v9155_v1 = vmax.f32 %v3046_v38, %v10661_v39  ;;  %2163 = vst [vmem:[#allocation2 + $0x64] sm:$0xf] %v6196_v47  ;;  %v6200_v17 = vpack.c.bf16 %v8726_v62, %v8726_v62  ;;  %v10685_v43 = vld [vmem:[#allocation15_spill] sm:$0xff]  ;;  %v10686_v38 = vld [vmem:[#allocation14_spill] sm:$0xff] }
 0x26d   : > { %10667 = vst [vmem:[#allocation31_spill] sm:$0xff] %v9142_v26  ;;  %10668 = vst [vmem:[#allocation32_spill] sm:$0xff] %v9144_v31  ;;  %v3306_v34 = vrot.slane %v9142_v26, 6  ;;  %v3308_v49 = vrot.slane %v9144_v31, 6  ;;  %v3309_v58 = vrot.slane %v9146_v42, 6  ;;  %v6202_v44 = vpack.c.bf16 %v8730_v50, %v8730_v50  ;;  %v10680_v50 = vld [vmem:[#allocation12_spill] sm:$0xff] }
 0x26e   : > { %10666 = vst [vmem:[#allocation3_spill] sm:$0xff] %v9140_v45  ;;  %10669 = vst [vmem:[#allocation33_spill] sm:$0xff] %v9146_v42  ;;  %v3305_v14 = vrot.slane %v9140_v45, 6  ;;  %v10683_v56 = vmax.f32 %v10681_v63, %v10682_v60  ;;  %v2957_v12 = vmax.f32 %v10661_v39, %v10684_v13  ;;  %v10687_v18 = vmax.f32 %v10661_v39, %v10686_v38  ;;  %v10693_v63 = vld [vmem:[#allocation23_spill] sm:$0xff] }
 0x26f   : > { %10670 = vst [vmem:[#allocation34_spill] sm:$0xff] %v9149_v30  ;;  %10671 = vst [vmem:[#allocation35_spill] sm:$0xff] %v9152_v5  ;;  %v9173_v2 = vsel %vm1151_vm0, %v3308_v49, %v3309_v58  ;;  %v9179_v37 = vsel %vm1151_vm0, -1e+30, %v3308_v49  ;;  %v9182_v9 = vsel %vm1151_vm0, %v3306_v34, -1e+30  ;;  %v6205_v60 = vpack.c.bf16 %v10693_v63, %v10693_v63 }
 0x270   : > { %10672 = vst [vmem:[#allocation36_spill] sm:$0xff] %v9155_v1  ;;  %v9170_v19 = vsel %vm1151_vm0, %v3305_v14, %v3306_v34  ;;  %10675 = vst [vmem:[#allocation37_spill] sm:$0xff] %v9173_v2  ;;  %v9176_v0 = vsel %vm1151_vm0, -1e+30, %v3305_v14  ;;  %v9185_v62 = vsel %vm1151_vm0, %v3309_v58, -1e+30  ;;  %v2927_v36 = vmax.f32 %v10683_v56, %v10680_v50 }
 0x271   : > { %10674 = vst [vmem:[#allocation19_spill] sm:$0xff] %v9170_v19  ;;  %10676 = vst [vmem:[#allocation38_spill] sm:$0xff] %v9176_v0  ;;  %v2988_v47 = vmax.f32 %v10687_v18, %v10685_v43  ;;  %v10688_v14 = vrot.slane %v8908_v46, 6  ;;  %v10689_v49 = vld [vmem:[#allocation4_spill] sm:$0xff]  ;;  %v10690_v58 = vld [vmem:[#allocation17_spill] sm:$0xff]  ;;  %v10694_v56 = vrot.slane %v8921_v24, 6 }
 0x272   : > { %10677 = vst [vmem:[#allocation39_spill] sm:$0xff] %v9179_v37  ;;  %10678 = vst [vmem:[#allocation40_spill] sm:$0xff] %v9182_v9  ;;  %v2959_v10 = vmax.f32 %v10684_v13, %v2927_v36  ;;  %v2961_v53 = vmax.f32 %v2927_v36, %v8368_v11  ;;  %v2987_v51 = vmax.f32 %v2957_v12, %v2927_v36  ;;  %v6820_v19 = vld [vmem:[#allocation2 + $0xa0] ss:$16 sps:$4 sm:$0xff]  }
 0x273   : > { %10679 = vst [vmem:[#allocation41_spill] sm:$0xff] %v9185_v62  ;;  %2167 = vst [vmem:[#allocation2 + $0xa4] sm:$0xf] %v6200_v17  ;;  %v9206_v34 = vsel %vm1151_vm0, %v10688_v14, -1e+30  ;;  %v10691_v17 = vld [vmem:[#allocation7_spill] sm:$0xff]  ;;  %v3018_v38 = vmax.f32 %v2988_v47, %v8370_v20 }
 0x274   : > { %2169 = vst [vmem:[#allocation2 + $0xc4] sm:$0xf] %v6202_v44  ;;  %v10692_v44 = vmax.f32 %v10690_v58, %v10691_v17  ;;  %v9219_v36 = vsel %vm1151_vm0, %v10694_v56, -1e+30  ;;  %v2989_v13 = vmax.f32 %v2959_v10, %v8368_v11  ;;  %v2991_v12 = vmax.f32 %v2961_v53, %v8372_v33  ;;  %v6801_v18 = vld [vmem:[#allocation2 + $0x64] ss:$16 sps:$4 sm:$0xff]  }
 0x275   : > { %v3017_v43 = vmax.f32 %v2987_v51, %v8368_v11  ;;  %v3442_v14 = vrot.slane %v9206_v34, 1  ;;  %2172 = vst [vmem:[#allocation2 + $0xf4] sm:$0xf] %v6205_v60  ;;  %v10695_v17 = vld [vmem:[#allocation22_spill] sm:$0xff]  ;;  %v10697_v10 = vld [vmem:[#allocation24_spill] sm:$0xff]  ;;  %v9242_v47 = vmax.f32 %v3018_v38, %v8374_v40  ;;  %4986 = vmatprep.mubr.bf16.mxu1 %v6801_v18 }
 0x276   : > { %v9212_v50 = vmax.f32 %v10692_v44, %v10689_v49  ;;  %v10696_v44 = vmax.f32 %v10695_v17, %v10689_v49  ;;  %v6207_v53 = vpack.c.bf16 %v10697_v10, %v10697_v10  ;;  %v3019_v11 = vmax.f32 %v2989_v13, %v8372_v33  ;;  %v6808_v60 = vld [vmem:[#allocation2 + $0x84] ss:$16 sps:$4 sm:$0xff]   ;;  %4987 = vmatmul.mubr.bf16.gmra.mxu1 %v6806_v52 }
 0x277   : > { %v3021_v20 = vmax.f32 %v2991_v12, %v8859_v41  ;;  %v9239_v51 = vmax.f32 %v3017_v43, %v8372_v33  ;;  %v6222_v23 = vpack.c.bf16 %v3017_v43, %v3017_v43  ;;  %v6223_v49 = vpack.c.bf16 %v3018_v38, %v3018_v38  ;;  %4994 = vmatprep.mubr.bf16.mxu1 %v6808_v60 }
 0x278   : > { %v6204_v58 = vpack.c.bf16 %v9212_v50, %v9212_v50  ;;  %v9232_v56 = vmax.f32 %v10696_v44, %v10626_v22  ;;  %v3269_v17 = vrot.slane %v3017_v43, 6  ;;  %2174 = vst [vmem:[#allocation2 + $0x114] sm:$0xf] %v6207_v53  ;;  %v9247_v13 = vmax.f32 %v3019_v11, %v8859_v41 }
 0x279   : > { %v9250_v33 = vmax.f32 %v3021_v20, %v8861_v61  ;;  %v3270_v12 = vrot.slane %v3018_v38, 6  ;;  %v3272_v40 = vrot.slane %v9239_v51, 6  ;;  %3205 = vst [vmem:[#allocation2 + $0x8] sm:$0xf] %v6222_v23  ;;  %3206 = vst [vmem:[#allocation2 + $0x18] sm:$0xf] %v6223_v49 }
 0x27a   : > { %2171 = vst [vmem:[#allocation2 + $0xe4] sm:$0xf] %v6204_v58  ;;  %v6206_v44 = vpack.c.bf16 %v9232_v56, %v9232_v56  ;;  %v3273_v43 = vrot.slane %v9242_v47, 6  ;;  %v9255_v18 = vsel %vm1151_vm0, -1e+30, %v3269_v17  ;;  %v3586_v58 = vrot.slane %v9206_v34, 2 }
 0x27b   : > { %v9260_v41 = vsel %vm1151_vm0, %v3269_v17, %v3270_v12  ;;  %v3275_v38 = vrot.slane %v9247_v13, 6  ;;  %v9265_v23 = vsel %vm1151_vm0, -1e+30, %v3272_v40  ;;  %v9271_v20 = vsel %vm1151_vm0, %v3270_v12, -1e+30 }
 0x27c   : > { %2173 = vst [vmem:[#allocation2 + $0x104] sm:$0xf] %v6206_v44  ;;  %v9268_v11 = vsel %vm1151_vm0, %v3272_v40, %v3273_v43  ;;  %v9274_v60 = vsel %vm1151_vm0, %v3273_v43, -1e+30  ;;  %v3429_v49 = vrot.slane %v9255_v18, 1  ;;  %v10698_v17 = vrot.slane %v8908_v46, 6 }
 0x27d   : > { %v9283_v4 = vsel %vm1151_vm0, -1e+30, %v3275_v38  ;;  %v3430_v25 = vrot.slane %v9260_v41, 1  ;;  %v3432_v40 = vrot.slane %v9271_v20, 1  ;;  %v3434_v12 = vrot.slane %v9265_v23, 1 }
 0x27e   : > { %v9280_v44 = vsel %vm1151_vm0, %v3275_v38, %v10698_v17  ;;  %v3435_v29 = vrot.slane %v9268_v11, 1  ;;  %v3437_v43 = vrot.slane %v9274_v60, 1  ;;  %v3439_v59 = vrot.slane %v9283_v4, 1  ;;  %v6815_v1 = vld [vmem:[#allocation2 + $0xa4] ss:$16 sps:$4 sm:$0xff]   ;;  %4995 = vmatmul.mubr.bf16.gmra.mxu1 %v6813_v55 }
 0x27f   : > { %v3431_v53 = vsel %vm1313_vm1, %v3429_v49, %v3430_v25  ;;  %v3433_v17 = vsel %vm1313_vm1, %v3430_v25, %v3432_v40  ;;  %v3440_v38 = vrot.slane %v9280_v44, 1  ;;  %v3573_v52 = vrot.slane %v9255_v18, 2  ;;  %5002 = vmatprep.mubr.bf16.mxu1 %v6815_v1  ;;  %v6822_v54 = vld [vmem:[#allocation2 + $0xc4] ss:$16 sps:$4 sm:$0xff]  }
 0x280   : > { %v3436_v42 = vsel %vm1313_vm1, %v3434_v12, %v3435_v29  ;;  %v3438_v31 = vsel %vm1313_vm1, %v3435_v29, %v3437_v43  ;;  %v3541_v6 = vmax.f32 %v9255_v18, %v3431_v53  ;;  %v3542_v30 = vmax.f32 %v9260_v41, %v3433_v17 }
 0x281   : > { %v3441_v5 = vsel %vm1313_vm1, %v3439_v59, %v3440_v38  ;;  %v3443_v49 = vsel %vm1313_vm1, %v3440_v38, %v3442_v14  ;;  %v3543_v25 = vmax.f32 %v9265_v23, %v3436_v42  ;;  %v3544_v40 = vmax.f32 %v9268_v11, %v3438_v31 }
 0x282   : > { %v3545_v26 = vmax.f32 %v9283_v4, %v3441_v5  ;;  %v3546_v12 = vmax.f32 %v9280_v44, %v3443_v49  ;;  %v3574_v29 = vrot.slane %v9260_v41, 2  ;;  %v3576_v53 = vrot.slane %v9271_v20, 2 }
 0x283   : > { %v3578_v43 = vrot.slane %v9265_v23, 2  ;;  %v3579_v55 = vrot.slane %v9268_v11, 2  ;;  %v3581_v59 = vrot.slane %v9274_v60, 2  ;;  %v3583_v14 = vrot.slane %v9283_v4, 2 }
 0x284   : > { %v3575_v42 = vsel %vm1462_vm2, %v3573_v52, %v3574_v29  ;;  %v3577_v31 = vsel %vm1462_vm2, %v3574_v29, %v3576_v53  ;;  %v3584_v5 = vrot.slane %v9280_v44, 2  ;;  %v3717_v1 = vrot.slane %v9255_v18, 3 }
 0x285   : > { %v3580_v17 = vsel %vm1462_vm2, %v3578_v43, %v3579_v55  ;;  %v3582_v38 = vsel %vm1462_vm2, %v3579_v55, %v3581_v59  ;;  %v3685_v49 = vmax.f32 %v3541_v6, %v3575_v42  ;;  %v3686_v45 = vmax.f32 %v3542_v30, %v3577_v31 }
 0x286   : > { %v3585_v62 = vsel %vm1462_vm2, %v3583_v14, %v3584_v5  ;;  %v3587_v2 = vsel %vm1462_vm2, %v3584_v5, %v3586_v58  ;;  %v3687_v37 = vmax.f32 %v3543_v25, %v3580_v17  ;;  %v3688_v9 = vmax.f32 %v3544_v40, %v3582_v38  ;;  %5003 = vmatmul.mubr.bf16.gmra.mxu1 %v6820_v19 }
 0x287   : > { %v3689_v52 = vmax.f32 %v3545_v26, %v3585_v62  ;;  %v3690_v0 = vmax.f32 %v3546_v12, %v3587_v2  ;;  %v3718_v29 = vrot.slane %v9260_v41, 3  ;;  %v3720_v53 = vrot.slane %v9271_v20, 3  ;;  %5010 = vmatprep.mubr.bf16.mxu1 %v6822_v54 }
 0x288   : > { %v3722_v43 = vrot.slane %v9265_v23, 3  ;;  %v3723_v55 = vrot.slane %v9268_v11, 3  ;;  %v3725_v6 = vrot.slane %v9274_v60, 3  ;;  %v3727_v30 = vrot.slane %v9283_v4, 3 }
 0x289   : > { %v3719_v58 = vsel %vm1611_vm3, %v3717_v1, %v3718_v29  ;;  %v3721_v25 = vsel %vm1611_vm3, %v3718_v29, %v3720_v53  ;;  %v3728_v26 = vrot.slane %v9280_v44, 3  ;;  %v3861_v2 = vrot.slane %v9255_v18, 4 }
 0x28a   : > { %v3724_v62 = vsel %vm1611_vm3, %v3722_v43, %v3723_v55  ;;  %v3726_v40 = vsel %vm1611_vm3, %v3723_v55, %v3725_v6  ;;  %v3829_v12 = vmax.f32 %v3685_v49, %v3719_v58  ;;  %v3830_v59 = vmax.f32 %v3686_v45, %v3721_v25 }
 0x28b   : > { %v3729_v14 = vsel %vm1611_vm3, %v3727_v30, %v3728_v26  ;;  %v10699_v42 = vrot.slane %v9206_v34, 3  ;;  %v3831_v31 = vmax.f32 %v3687_v37, %v3724_v62  ;;  %v3832_v5 = vmax.f32 %v3688_v9, %v3726_v40 }
 0x28c   : > { %v3833_v1 = vmax.f32 %v3689_v52, %v3729_v14  ;;  %v3862_v38 = vrot.slane %v9260_v41, 4  ;;  %v3864_v54 = vrot.slane %v9271_v20, 4  ;;  %v3866_v18 = vrot.slane %v9265_v23, 4 }
 0x28d   : > { %v3731_v19 = vsel %vm1611_vm3, %v3728_v26, %v10699_v42  ;;  %v3867_v29 = vrot.slane %v9268_v11, 4  ;;  %v3869_v45 = vrot.slane %v9274_v60, 4  ;;  %v3871_v49 = vrot.slane %v9283_v4, 4  ;;  %v6829_v11 = vld [vmem:[#allocation2 + $0xc0] ss:$16 sps:$4 sm:$0xff]  }
 0x28e   : > { %v3834_v17 = vmax.f32 %v3690_v0, %v3731_v19  ;;  %v3863_v53 = vsel %vm1760_vm4, %v3861_v2, %v3862_v38  ;;  %v3865_v43 = vsel %vm1760_vm4, %v3862_v38, %v3864_v54  ;;  %v3872_v37 = vrot.slane %v9280_v44, 4  ;;  %v6830_v44 = vld [vmem:[#allocation2 + $0xe4] ss:$16 sps:$4 sm:$0xff]   ;;  %5011 = vmatmul.mubr.bf16.gmra.mxu1 %v6829_v11 }
 0x28f   : > { %v3874_v0 = vrot.slane %v9206_v34, 4  ;;  %v3868_v9 = vsel %vm1760_vm4, %v3866_v18, %v3867_v29  ;;  %v3870_v41 = vsel %vm1760_vm4, %v3867_v29, %v3869_v45  ;;  %v9347_v20 = vmax.f32 %v3829_v12, %v3863_v53  ;;  %5018 = vmatprep.mubr.bf16.mxu1 %v6830_v44 }
 0x290   : > { %v9349_v23 = vmax.f32 %v3830_v59, %v3865_v43  ;;  %v3873_v60 = vsel %vm1760_vm4, %v3871_v49, %v3872_v37  ;;  %v9353_v52 = vmax.f32 %v3831_v31, %v3868_v9  ;;  %v9355_v55 = vmax.f32 %v3832_v5, %v3870_v41  ;;  %v6834_v41 = vld [vmem:[#allocation2 + $0xe0] ss:$16 sps:$4 sm:$0xff]  }
 0x291   : > { %v3875_v4 = vsel %vm1760_vm4, %v3872_v37, %v3874_v0  ;;  %v9357_v6 = vmax.f32 %v3833_v1, %v3873_v60  ;;  %v4005_v30 = vmax.f32 %v10661_v39, %v9347_v20  ;;  %v2242_v25 = vrot.slane %v9212_v50, 6 }
 0x292   : > { %v9359_v34 = vmax.f32 %v3834_v17, %v3875_v4  ;;  %v4006_v58 = vmax.f32 %v10661_v39, %v9349_v23  ;;  %v6224_v26 = vpack.c.bf16 %v9239_v51, %v9239_v51  ;;  %v6225_v2 = vpack.c.bf16 %v9242_v47, %v9242_v47 }
 0x293   : > { %v10700_v62 = vrot.slane %v8921_v24, 6  ;;  %v10701_v40 = vrot.slane %v9250_v33, 6  ;;  %v4035_v59 = vmax.f32 %v4005_v30, %v9353_v52  ;;  %v10703_v47 = vrot.slane %v10693_v63, 6 }
 0x294   : > { %v4036_v14 = vmax.f32 %v4006_v58, %v9355_v55  ;;  %v2324_v31 = vsel %vm1151_vm0, -1e+30, %v2242_v25  ;;  %3207 = vst [vmem:[#allocation2 + $0x28] sm:$0xf] %v6224_v26  ;;  %3208 = vst [vmem:[#allocation2 + $0x38] sm:$0xf] %v6225_v2 }
 0x295   : > { %v9375_v12 = vsel %vm1151_vm0, %v10701_v40, %v10700_v62  ;;  %v10702_v50 = vmov %v10701_v40  ;;  %v2244_v19 = vsel %vm1151_vm0, %v2242_v25, %v10703_v47  ;;  %v3447_v1 = vrot.slane %v9219_v36, 1  ;;  %v6836_v58 = vld [vmem:[#allocation2 + $0x104] ss:$16 sps:$4 sm:$0xff]  }
 0x296   : > { %v9382_v42 = vsel %vm1151_vm0, -1e+30, %v10702_v50  ;;  %v3445_v51 = vrot.slane %v9375_v12, 1  ;;  %v9392_v17 = vmax.f32 %v4035_v59, %v9357_v6  ;;  %v9395_v38 = vmax.f32 %v4036_v14, %v9359_v34  ;;  %5019 = vmatmul.mubr.bf16.gmra.mxu1 %v6834_v41 }
 0x297   : > { %v3444_v5 = vrot.slane %v9382_v42, 1  ;;  %v2416_v54 = vrot.slane %v2324_v31, 1  ;;  %v2417_v18 = vrot.slane %v2244_v19, 1  ;;  %v2560_v29 = vrot.slane %v2324_v31, 2  ;;  %5026 = vmatprep.mubr.bf16.mxu1 %v6836_v58 }
 0x298   : > { %v2561_v63 = vrot.slane %v2244_v19, 2  ;;  %v2704_v45 = vrot.slane %v2324_v31, 3  ;;  %v2705_v49 = vrot.slane %v2244_v19, 3  ;;  %v6254_v53 = vpack.c.bf16 %v9392_v17, %v9392_v17 }
 0x299   : > { %v6255_v43 = vpack.c.bf16 %v9395_v38, %v9395_v38  ;;  %v2418_v37 = vsel %vm1313_vm1, %v2416_v54, %v2417_v18  ;;  %v10704_v0 = vrot.slane %v8778_v16, 1  ;;  %v10705_v44 = vrot.slane %v8778_v16, 2 }
 0x29a   : > { %v2507_v11 = vmax.f32 %v2324_v31, %v2418_v37  ;;  %v2562_v4 = vsel %vm1462_vm2, %v2560_v29, %v2561_v63  ;;  %4253 = vst [vmem:[#allocation2 + $0xc] sm:$0xf] %v6254_v53  ;;  %v2706_v25 = vsel %vm1611_vm3, %v2704_v45, %v2705_v49  ;;  %v10706_v26 = vrot.slane %v8778_v16, 3 }
 0x29b   : > { %v2420_v9 = vsel %vm1313_vm1, %v2417_v18, %v10704_v0  ;;  %v2564_v30 = vsel %vm1462_vm2, %v2561_v63, %v10705_v44  ;;  %4254 = vst [vmem:[#allocation2 + $0x1c] sm:$0xf] %v6255_v43  ;;  %v2848_v62 = vrot.slane %v2324_v31, 4  ;;  %v2849_v40 = vrot.slane %v2244_v19, 4  ;;  %v6840_v44 = vld [vmem:[#allocation2 + $0x100] ss:$16 sps:$4 sm:$0xff]  }
 0x29c   : > { %v2508_v60 = vmax.f32 %v2244_v19, %v2420_v9  ;;  %v2708_v2 = vsel %vm1611_vm3, %v2705_v49, %v10706_v26  ;;  %v2651_v59 = vmax.f32 %v2507_v11, %v2562_v4  ;;  %v3446_v50 = vsel %vm1313_vm1, %v3444_v5, %v3445_v51 }
 0x29d   : > { %v3448_v47 = vsel %vm1313_vm1, %v3445_v51, %v3447_v1  ;;  %v2850_v54 = vsel %vm1760_vm4, %v2848_v62, %v2849_v40  ;;  %v10707_v18 = vrot.slane %v8778_v16, 4  ;;  %v3547_v63 = vmax.f32 %v9382_v42, %v3446_v50 }
 0x29e   : > { %v2652_v14 = vmax.f32 %v2508_v60, %v2564_v30  ;;  %v3548_v45 = vmax.f32 %v9375_v12, %v3448_v47  ;;  %v2795_v31 = vmax.f32 %v2651_v59, %v2706_v25  ;;  %v3588_v49 = vrot.slane %v9382_v42, 2  ;;  %v6826_v30 = vld [vmem:[#allocation2 + $0x8] ss:$16 sps:$4 sm:$0xff]   ;;  %5027 = vmatmul.mubr.bf16.gmra.mxu1 %v6840_v44 }
 0x29f   : > { %v2852_v29 = vsel %vm1760_vm4, %v2849_v40, %v10707_v18  ;;  %v3589_v53 = vrot.slane %v9375_v12, 2  ;;  %v3591_v5 = vrot.slane %v9219_v36, 2  ;;  %v3732_v51 = vrot.slane %v9382_v42, 3 }
 0x2a0   : > { %v2796_v19 = vmax.f32 %v2652_v14, %v2708_v2  ;;  %v3733_v1 = vrot.slane %v9375_v12, 3  ;;  %v3735_v16 = vrot.slane %v9219_v36, 3  ;;  %v9427_v43 = vmax.f32 %v2795_v31, %v2850_v54 }
 0x2a1   : > { %v3590_v0 = vsel %vm1462_vm2, %v3588_v49, %v3589_v53  ;;  %v3876_v9 = vrot.slane %v9382_v42, 4  ;;  %v3592_v41 = vsel %vm1462_vm2, %v3589_v53, %v3591_v5  ;;  %v10708_v25 = vmax.f32 %v8861_v61, %v8865_v57 }
 0x2a2   : > { %v9429_v37 = vmax.f32 %v2796_v19, %v2852_v29  ;;  %v3691_v11 = vmax.f32 %v3547_v63, %v3590_v0  ;;  %v3734_v60 = vsel %vm1611_vm3, %v3732_v51, %v3733_v1  ;;  %v3736_v4 = vsel %vm1611_vm3, %v3733_v1, %v3735_v16  ;;  %v6828_v62 = vld [vmem:[#allocation2 + $0xc] ss:$16 sps:$4 sm:$0xff]  }
 0x2a3   : > { %v2971_v58 = vmax.f32 %v8865_v57, %v9427_v43  ;;  %v9442_v26 = vmax.f32 %v10708_v25, %v9427_v43  ;;  %v3027_v42 = vmax.f32 %v8897_v32, %v9427_v43  ;;  %v3692_v2 = vmax.f32 %v3548_v45, %v3592_v41  ;;  %5123 = vmatprep.mubr.bf16.mxu0 %v6828_v62 }
 0x2a4   : > { %v3835_v40 = vmax.f32 %v3691_v11, %v3734_v60  ;;  %v3877_v59 = vrot.slane %v9375_v12, 4  ;;  %v3879_v14 = vrot.slane %v9219_v36, 4  ;;  %v2245_v50 = vrot.slane %v9232_v56, 6  ;;  %5124 = vmatmul.mubr.bf16.vlgmr.msra.gmra.mxu0 %v6826_v30 }
 0x2a5   : > { %v3836_v47 = vmax.f32 %v3692_v2, %v3736_v4  ;;  %v6226_v54 = vpack.c.bf16 %v9247_v13, %v9247_v13  ;;  %v6227_v61 = vpack.c.bf16 %v8908_v46, %v8908_v46  ;;  %v3281_v18 = vrot.slane %v8924_v7, 6 }
 0x2a6   : > { %v3878_v29 = vsel %vm1760_vm4, %v3876_v9, %v3877_v59  ;;  %v3880_v63 = vsel %vm1760_vm4, %v3877_v59, %v3879_v14  ;;  %v10709_v12 = vrot.slane %v10697_v10, 6  ;;  %v2325_v56 = vsel %vm1151_vm0, -1e+30, %v2245_v50  ;;  %v10713_v14 = vld [vmem:[#allocation30_spill] sm:$0xff] }
 0x2a7   : > { %v9460_v45 = vmax.f32 %v3835_v40, %v3878_v29  ;;  %v9462_v13 = vmax.f32 %v3836_v47, %v3880_v63  ;;  %v2421_v31 = vrot.slane %v2325_v56, 1  ;;  %3209 = vst [vmem:[#allocation2 + $0x48] sm:$0xf] %v6226_v54  ;;  %3210 = vst [vmem:[#allocation2 + $0x58] sm:$0xf] %v6227_v61  ;;  %v2565_v19 = vrot.slane %v2325_v56, 2 }
 0x2a8   : > { %v2247_v36 = vsel %vm1151_vm0, %v2245_v50, %v10709_v12  ;;  %v2709_v53 = vrot.slane %v2325_v56, 3  ;;  %v10710_v16 = vrot.slane %v8783_v8, 1  ;;  %v10711_v60 = vrot.slane %v8783_v8, 2 }
 0x2a9   : > { %v2422_v46 = vrot.slane %v2247_v36, 1  ;;  %v2566_v49 = vrot.slane %v2247_v36, 2  ;;  %v2710_v5 = vrot.slane %v2247_v36, 3  ;;  %v4095_v10 = vmax.f32 %v9392_v17, %v9460_v45 }
 0x2aa   : > { %v4096_v51 = vmax.f32 %v9395_v38, %v9462_v13  ;;  %v10712_v38 = vrot.slane %v8783_v8, 3  ;;  %v2853_v40 = vrot.slane %v2325_v56, 4  ;;  %v2854_v59 = vrot.slane %v2247_v36, 4 }
 0x2ab   : > { %v2423_v1 = vsel %vm1313_vm1, %v2421_v31, %v2422_v46  ;;  %v2425_v0 = vsel %vm1313_vm1, %v2422_v46, %v10710_v16  ;;  %v2567_v11 = vsel %vm1462_vm2, %v2565_v19, %v2566_v49  ;;  %v2569_v4 = vsel %vm1462_vm2, %v2566_v49, %v10711_v60 }
 0x2ac   : > { %v2509_v9 = vmax.f32 %v2325_v56, %v2423_v1  ;;  %v2510_v41 = vmax.f32 %v2247_v36, %v2425_v0  ;;  %v6256_v44 = vpack.c.bf16 %v4095_v10, %v4095_v10  ;;  %v6257_v30 = vpack.c.bf16 %v4096_v51, %v4096_v51 }
 0x2ad   : > { %v2711_v17 = vsel %vm1611_vm3, %v2709_v53, %v2710_v5  ;;  %v2713_v25 = vsel %vm1611_vm3, %v2710_v5, %v10712_v38  ;;  %v3282_v50 = vrot.slane %v10713_v14, 6  ;;  %v3369_v47 = vsel %vm1151_vm0, -1e+30, %v3281_v18 }
 0x2ae   : > { %v2653_v2 = vmax.f32 %v2509_v9, %v2567_v11  ;;  %v2654_v62 = vmax.f32 %v2510_v41, %v2569_v4  ;;  %4255 = vst [vmem:[#allocation2 + $0x2c] sm:$0xf] %v6256_v44  ;;  %4256 = vst [vmem:[#allocation2 + $0x3c] sm:$0xf] %v6257_v30  ;;  %v4007_v54 = vmax.f32 %v9347_v20, %v9353_v52  ;;  %v10714_v31 = vrot.slane %v8783_v8, 4 }
 0x2af   : > { %v4008_v61 = vmax.f32 %v9349_v23, %v9355_v55  ;;  %v2855_v12 = vsel %vm1760_vm4, %v2853_v40, %v2854_v59  ;;  %v3283_v56 = vsel %vm1151_vm0, %v3281_v18, %v3282_v50  ;;  %v3385_v46 = vsel %vm1151_vm0, %v3282_v50, -1e+30 }
 0x2b0   : > { %v2797_v29 = vmax.f32 %v2653_v2, %v2711_v17  ;;  %v2798_v63 = vmax.f32 %v2654_v62, %v2713_v25  ;;  %v2857_v36 = vsel %vm1760_vm4, %v2854_v59, %v10714_v31  ;;  %v3449_v19 = vrot.slane %v3369_v47, 1  ;;  %v10716_v31 = vld [vmem:[#allocation8_spill] sm:$0xff] }
 0x2b1   : > { %v3593_v49 = vrot.slane %v3369_v47, 2  ;;  %v3450_v5 = vrot.slane %v3283_v56, 1  ;;  %v3452_v23 = vrot.slane %v3385_v46, 1  ;;  %v3594_v10 = vrot.slane %v3283_v56, 2 }
 0x2b2   : > { %v9492_v53 = vmax.f32 %v2797_v29, %v2855_v12  ;;  %v9494_v20 = vmax.f32 %v2798_v63, %v2857_v36  ;;  %v3596_v51 = vrot.slane %v3385_v46, 2  ;;  %v3737_v1 = vrot.slane %v3369_v47, 3  ;;  %v10715_v12 = vld [vmem:[#allocation9_spill] sm:$0xff] }
 0x2b3   : > { %v3738_v16 = vrot.slane %v3283_v56, 3  ;;  %v3451_v9 = vsel %vm1313_vm1, %v3449_v19, %v3450_v5  ;;  %v3453_v41 = vsel %vm1313_vm1, %v3450_v5, %v3452_v23  ;;  %v3595_v60 = vsel %vm1462_vm2, %v3593_v49, %v3594_v10 }
 0x2b4   : > { %v2973_v8 = vmax.f32 %v9427_v43, %v9492_v53  ;;  %v9502_v18 = vmax.f32 %v2971_v58, %v9492_v53  ;;  %v3029_v0 = vmax.f32 %v9442_v26, %v9492_v53  ;;  %v3549_v11 = vmax.f32 %v3369_v47, %v3451_v9  ;;  %v6835_v58 = vld [vmem:[#allocation2 + $0x28] ss:$16 sps:$4 sm:$0xff]  }
 0x2b5   : > { %v3597_v4 = vsel %vm1462_vm2, %v3594_v10, %v3596_v51  ;;  %v6832_v44 = vld [vmem:[#allocation2 + $0x2c] ss:$16 sps:$4 sm:$0xff]   ;;  %v3550_v30 = vmax.f32 %v3283_v56, %v3453_v41  ;;  %v3739_v17 = vsel %vm1611_vm3, %v3737_v1, %v3738_v16  ;;  %v3740_v38 = vrot.slane %v3385_v46, 3  ;;  %v10718_v10 = vld [vmem:[#allocation5_spill] sm:$0xff] }
 0x2b6   : > { %v3881_v25 = vrot.slane %v3369_v47, 4  ;;  %v3693_v2 = vmax.f32 %v3549_v11, %v3595_v60  ;;  %v3882_v62 = vrot.slane %v3283_v56, 4  ;;  %v3884_v40 = vrot.slane %v3385_v46, 4  ;;  %5131 = vmatprep.mubr.bf16.mxu0 %v6832_v44  ;;  %v10721_v41 = vld [vmem:[#allocation28_spill] sm:$0xff]  ;;  %v10722_v11 = vld [vmem:[#allocation26_spill] sm:$0xff] }
 0x2b7   : > { %v4037_v59 = vmax.f32 %v4007_v54, %v9357_v6  ;;  %v3694_v50 = vmax.f32 %v3550_v30, %v3597_v4  ;;  %v3741_v29 = vsel %vm1611_vm3, %v3738_v16, %v3740_v38  ;;  %v4038_v63 = vmax.f32 %v4008_v61, %v9359_v34  ;;  %5132 = vmatmul.mubr.bf16.gmra.mxu0 %v6835_v58 }
 0x2b8   : > { %v10717_v36 = vmax.f32 %v10716_v31, %v10626_v22  ;;  %v3837_v49 = vmax.f32 %v3693_v2, %v3739_v17  ;;  %v3883_v47 = vsel %vm1760_vm4, %v3881_v25, %v3882_v62  ;;  %v3885_v56 = vsel %vm1760_vm4, %v3882_v62, %v3884_v40  ;;  %v10719_v22 = vld [vmem:[#allocation27_spill] sm:$0xff] }
 0x2b9   : > { %v4067_v46 = vmax.f32 %v4037_v59, %v9460_v45  ;;  %v3838_v54 = vmax.f32 %v3694_v50, %v3741_v29  ;;  %v4068_v5 = vmax.f32 %v4038_v63, %v9462_v13  ;;  %v6209_v61 = vpack.c.bf16 %v10718_v10, %v10718_v10 }
 0x2ba   : > { %v2015_v19 = vmax.f32 %v10717_v36, %v10715_v12  ;;  %v9524_v51 = vmax.f32 %v3837_v49, %v3883_v47  ;;  %v10720_v16 = vmax.f32 %v10719_v22, %v8865_v57  ;;  %v10723_v60 = vmax.f32 %v10721_v41, %v10722_v11 }
 0x2bb   : > { %v9538_v44 = vmax.f32 %v3838_v54, %v3885_v56  ;;  %2176 = vst [vmem:[#allocation2 + $0x134] sm:$0xf] %v6209_v61  ;;  %v6228_v30 = vpack.c.bf16 %v9250_v33, %v9250_v33  ;;  %v6229_v17 = vpack.c.bf16 %v8921_v24, %v8921_v24  ;;  %v4009_v57 = vmax.f32 %v9353_v52, %v9357_v6 }
 0x2bc   : > { %v6208_v23 = vpack.c.bf16 %v2015_v19, %v2015_v19  ;;  %v2248_v1 = vrot.slane %v2015_v19, 6  ;;  %v9530_v9 = vmax.f32 %v10720_v16, %v9427_v43  ;;  %v9536_v4 = vmax.f32 %v10723_v60, %v9429_v37  ;;  %v10725_v19 = vld [vmem:[#allocation16_spill] sm:$0xff] }
 0x2bd   : > { %v4097_v38 = vmax.f32 %v4067_v46, %v9524_v51  ;;  %v10724_v25 = vrot.slane %v10718_v10, 6  ;;  %v4098_v40 = vmax.f32 %v4068_v5, %v9538_v44  ;;  %3211 = vst [vmem:[#allocation2 + $0x68] sm:$0xf] %v6228_v30  ;;  %3212 = vst [vmem:[#allocation2 + $0x78] sm:$0xf] %v6229_v17  ;;  %v10726_v49 = vrot.slane %v10725_v19, 1 }
 0x2be   : > { %2175 = vst [vmem:[#allocation2 + $0x124] sm:$0xf] %v6208_v23  ;;  %v2326_v2 = vsel %vm1151_vm0, -1e+30, %v2248_v1  ;;  %v3284_v62 = vrot.slane %v9530_v9, 6  ;;  %v10727_v23 = vrot.slane %v10725_v19, 2  ;;  %v6231_v32 = vpack.c.bf16 %v10713_v14, %v10713_v14 }
 0x2bf   : > { %v2250_v58 = vsel %vm1151_vm0, %v2248_v1, %v10724_v25  ;;  %v2426_v59 = vrot.slane %v2326_v2, 1  ;;  %v2570_v50 = vrot.slane %v2326_v2, 2  ;;  %v6258_v24 = vpack.c.bf16 %v4097_v38, %v4097_v38 }
 0x2c0   : > { %v2427_v33 = vrot.slane %v2250_v58, 1  ;;  %v2571_v29 = vrot.slane %v2250_v58, 2  ;;  %v2714_v63 = vrot.slane %v2326_v2, 3  ;;  %v2715_v12 = vrot.slane %v2250_v58, 3  ;;  %3214 = vst [vmem:[#allocation2 + $0x98] sm:$0xf] %v6231_v32 }
 0x2c1   : > { %v6259_v31 = vpack.c.bf16 %v4098_v40, %v4098_v40  ;;  %v2858_v56 = vrot.slane %v2326_v2, 4  ;;  %4257 = vst [vmem:[#allocation2 + $0x4c] sm:$0xf] %v6258_v24  ;;  %v10728_v1 = vrot.slane %v10725_v19, 3  ;;  %v2859_v16 = vrot.slane %v2250_v58, 4 }
 0x2c2   : > { %v2428_v36 = vsel %vm1313_vm1, %v2426_v59, %v2427_v33  ;;  %v2430_v47 = vsel %vm1313_vm1, %v2427_v33, %v10726_v49  ;;  %v2572_v5 = vsel %vm1462_vm2, %v2570_v50, %v2571_v29  ;;  %v2574_v10 = vsel %vm1462_vm2, %v2571_v29, %v10727_v23  ;;  %v6846_v50 = vld [vmem:[#allocation2 + $0x120] ss:$16 sps:$4 sm:$0xff]  }
 0x2c3   : > { %v2511_v46 = vmax.f32 %v2326_v2, %v2428_v36  ;;  %v2512_v54 = vmax.f32 %v2250_v58, %v2430_v47  ;;  %4258 = vst [vmem:[#allocation2 + $0x5c] sm:$0xf] %v6259_v31  ;;  %v2716_v61 = vsel %vm1611_vm3, %v2714_v63, %v2715_v12  ;;  %v2718_v22 = vsel %vm1611_vm3, %v2715_v12, %v10728_v1  ;;  %v6848_v31 = vld [vmem:[#allocation2 + $0x144] ss:$16 sps:$4 sm:$0xff]  }
 0x2c4   : > { %v3285_v41 = vrot.slane %v9536_v4, 6  ;;  %v3370_v38 = vsel %vm1151_vm0, -1e+30, %v3284_v62  ;;  %v4010_v25 = vmax.f32 %v9355_v55, %v9359_v34  ;;  %v2860_v2 = vsel %vm1760_vm4, %v2858_v56, %v2859_v16 }
 0x2c5   : > { %v2655_v60 = vmax.f32 %v2511_v46, %v2572_v5  ;;  %v2656_v30 = vmax.f32 %v2512_v54, %v2574_v10  ;;  %v6842_v17 = vld [vmem:[#allocation2 + $0x124] ss:$16 sps:$4 sm:$0xff]   ;;  %v10729_v40 = vrot.slane %v10725_v19, 4  ;;  %v3454_v63 = vrot.slane %v3370_v38, 1 }
 0x2c6   : > { %v3286_v33 = vsel %vm1151_vm0, %v3284_v62, %v3285_v41  ;;  %v3386_v58 = vsel %vm1151_vm0, %v3285_v41, -1e+30  ;;  %5034 = vmatprep.mubr.bf16.mxu1 %v6842_v17  ;;  %v3598_v49 = vrot.slane %v3370_v38, 2  ;;  %v3742_v46 = vrot.slane %v3370_v38, 3 }
 0x2c7   : > { %v2862_v59 = vsel %vm1760_vm4, %v2859_v16, %v10729_v40  ;;  %v2799_v24 = vmax.f32 %v2655_v60, %v2716_v61  ;;  %v2800_v29 = vmax.f32 %v2656_v30, %v2718_v22  ;;  %v3455_v12 = vrot.slane %v3286_v33, 1  ;;  %5035 = vmatmul.mubr.bf16.gmra.mxu1 %v6846_v50  ;;  %v6841_v60 = vld [vmem:[#allocation2 + $0x48] ss:$16 sps:$4 sm:$0xff]  }
 0x2c8   : > { %v3457_v36 = vrot.slane %v3386_v58, 1  ;;  %v3599_v55 = vrot.slane %v3286_v33, 2  ;;  %v3601_v47 = vrot.slane %v3386_v58, 2  ;;  %5042 = vmatprep.mubr.bf16.mxu1 %v6848_v31  ;;  %v3745_v40 = vrot.slane %v3386_v58, 3 }
 0x2c9   : > { %v9575_v56 = vmax.f32 %v2799_v24, %v2860_v2  ;;  %v9577_v19 = vmax.f32 %v2800_v29, %v2862_v59  ;;  %v3456_v62 = vsel %vm1313_vm1, %v3454_v63, %v3455_v12  ;;  %v3743_v2 = vrot.slane %v3286_v33, 3 }
 0x2ca   : > { %v3458_v54 = vsel %vm1313_vm1, %v3455_v12, %v3457_v36  ;;  %v3551_v5 = vmax.f32 %v3370_v38, %v3456_v62  ;;  %v3600_v23 = vsel %vm1462_vm2, %v3598_v49, %v3599_v55  ;;  %v3602_v10 = vsel %vm1462_vm2, %v3599_v55, %v3601_v47  ;;  %v6838_v61 = vld [vmem:[#allocation2 + $0x4c] ss:$16 sps:$4 sm:$0xff]   ;;  %v6852_v36 = vld [vmem:[#allocation2 + $0x140] ss:$16 sps:$4 sm:$0xff]  }
 0x2cb   : > { %v2975_v1 = vmax.f32 %v9492_v53, %v9575_v56  ;;  %v2977_v22 = vmax.f32 %v9575_v56, %v8439_v15  ;;  %v9591_v16 = vmax.f32 %v2973_v8, %v9575_v56  ;;  %v3031_v41 = vmax.f32 %v9502_v18, %v9575_v56  ;;  %5139 = vmatprep.mubr.bf16.mxu0 %v6838_v61 }
 0x2cc   : > { %v3552_v30 = vmax.f32 %v3286_v33, %v3458_v54  ;;  %v3695_v17 = vmax.f32 %v3551_v5, %v3600_v23  ;;  %v3886_v24 = vrot.slane %v3370_v38, 4  ;;  %v3887_v29 = vrot.slane %v3286_v33, 4  ;;  %5140 = vmatmul.mubr.bf16.gmra.mxu0 %v6841_v60  ;;  %v10730_v54 = vld [vmem:[#allocation29_spill] sm:$0xff] }
 0x2cd   : > { %v9596_v59 = vmax.f32 %v2975_v1, %v8439_v15  ;;  %v9599_v50 = vmax.f32 %v2977_v22, %v8443_v48  ;;  %v3744_v63 = vsel %vm1611_vm3, %v3742_v46, %v3743_v2  ;;  %v3746_v12 = vsel %vm1611_vm3, %v3743_v2, %v3745_v40 }
 0x2ce   : > { %v3696_v8 = vmax.f32 %v3552_v30, %v3602_v10  ;;  %v3889_v31 = vrot.slane %v3386_v58, 4  ;;  %v3839_v49 = vmax.f32 %v3695_v17, %v3744_v63  ;;  %v3888_v55 = vsel %vm1760_vm4, %v3886_v24, %v3887_v29  ;;  %v10732_v17 = vld [vmem:[#allocation25_spill] sm:$0xff] }
 0x2cf   : > { %v4039_v47 = vmax.f32 %v4009_v57, %v9460_v45  ;;  %v4040_v62 = vmax.f32 %v4010_v25, %v9462_v13  ;;  %v3028_v46 = vmax.f32 %v10730_v54, %v9429_v37  ;;  %v9616_v58 = vmax.f32 %v3027_v42, %v9492_v53  ;;  %5043 = vmatmul.mubr.bf16.gmra.mxu1 %v6852_v36  ;;  %v6860_v53 = vld [vmem:[#allocation2 + $0x184] ss:$16 sps:$4 sm:$0xff]  }
 0x2d0   : > { %v3840_v38 = vmax.f32 %v3696_v8, %v3746_v12  ;;  %v3890_v33 = vsel %vm1760_vm4, %v3887_v29, %v3889_v31  ;;  %v9618_v5 = vmax.f32 %v3839_v49, %v3888_v55  ;;  %v6230_v25 = vpack.c.bf16 %v8924_v7, %v8924_v7  ;;  %v10731_v7 = vld [vmem:[#allocation21_spill] sm:$0xff] }
 0x2d1   : > { %v4069_v52 = vmax.f32 %v4039_v47, %v9524_v51  ;;  %v4070_v57 = vmax.f32 %v4040_v62, %v9538_v44  ;;  %v9627_v10 = vmax.f32 %v3028_v46, %v9494_v20  ;;  %v3287_v43 = vrot.slane %v9616_v58, 6 }
 0x2d2   : > { %v9624_v23 = vmax.f32 %v3840_v38, %v3890_v33  ;;  %3213 = vst [vmem:[#allocation2 + $0x88] sm:$0xf] %v6230_v25  ;;  %v4011_v61 = vmax.f32 %v9357_v6, %v9460_v45  ;;  %v4012_v1 = vmax.f32 %v9359_v34, %v9462_v13  ;;  %v6212_v22 = vpack.c.bf16 %v10731_v7, %v10731_v7 }
 0x2d3   : > { %v4099_v42 = vmax.f32 %v4069_v52, %v9618_v5  ;;  %v3288_v30 = vrot.slane %v9627_v10, 6  ;;  %v3371_v14 = vsel %vm1151_vm0, -1e+30, %v3287_v43  ;;  %v10733_v2 = vmax.f32 %v10732_v17, %v10722_v11 }
 0x2d4   : > { %v4100_v60 = vmax.f32 %v4070_v57, %v9624_v23  ;;  %v3459_v6 = vrot.slane %v3371_v14, 1  ;;  %v3603_v29 = vrot.slane %v3371_v14, 2  ;;  %v3747_v8 = vrot.slane %v3371_v14, 3  ;;  %2179 = vst [vmem:[#allocation2 + $0x164] sm:$0xf] %v6212_v22 }
 0x2d5   : > { %v3000_v40 = vmax.f32 %v10733_v2, %v9429_v37  ;;  %v6260_v24 = vpack.c.bf16 %v4099_v42, %v4099_v42  ;;  %v3289_v63 = vsel %vm1151_vm0, %v3287_v43, %v3288_v30  ;;  %v3387_v12 = vsel %vm1151_vm0, %v3288_v30, -1e+30 }
 0x2d6   : > { %v6261_v34 = vpack.c.bf16 %v4100_v60, %v4100_v60  ;;  %v3891_v31 = vrot.slane %v3371_v14, 4  ;;  %v3460_v36 = vrot.slane %v3289_v63, 1  ;;  %v3462_v49 = vrot.slane %v3387_v12, 1 }
 0x2d7   : > { %4259 = vst [vmem:[#allocation2 + $0x6c] sm:$0xf] %v6260_v24  ;;  %v3604_v55 = vrot.slane %v3289_v63, 2  ;;  %v3606_v47 = vrot.slane %v3387_v12, 2  ;;  %v3748_v62 = vrot.slane %v3289_v63, 3  ;;  %v3750_v38 = vrot.slane %v3387_v12, 3 }
 0x2d8   : > { %4260 = vst [vmem:[#allocation2 + $0x7c] sm:$0xf] %v6261_v34  ;;  %v3892_v33 = vrot.slane %v3289_v63, 4  ;;  %v3894_v54 = vrot.slane %v3387_v12, 4  ;;  %v3461_v46 = vsel %vm1313_vm1, %v3459_v6, %v3460_v36  ;;  %v3463_v52 = vsel %vm1313_vm1, %v3460_v36, %v3462_v49 }
 0x2d9   : > { %v3605_v57 = vsel %vm1462_vm2, %v3603_v29, %v3604_v55  ;;  %v3607_v25 = vsel %vm1462_vm2, %v3604_v55, %v3606_v47  ;;  %v3553_v32 = vmax.f32 %v3371_v14, %v3461_v46  ;;  %v3554_v43 = vmax.f32 %v3289_v63, %v3463_v52  ;;  %v6858_v63 = vld [vmem:[#allocation2 + $0x160] ss:$16 sps:$4 sm:$0xff]   ;;  %v6847_v55 = vld [vmem:[#allocation2 + $0x68] ss:$16 sps:$4 sm:$0xff]  }
 0x2da   : > { %v3749_v42 = vsel %vm1611_vm3, %v3747_v8, %v3748_v62  ;;  %v3751_v7 = vsel %vm1611_vm3, %v3748_v62, %v3750_v38  ;;  %v3893_v22 = vsel %vm1760_vm4, %v3891_v31, %v3892_v33  ;;  %v3895_v60 = vsel %vm1760_vm4, %v3892_v33, %v3894_v54 }
 0x2db   : > { %v4041_v30 = vmax.f32 %v4011_v61, %v9524_v51  ;;  %v4042_v17 = vmax.f32 %v4012_v1, %v9538_v44  ;;  %v3697_v2 = vmax.f32 %v3553_v32, %v3605_v57  ;;  %v3698_v24 = vmax.f32 %v3554_v43, %v3607_v25  ;;  %v6854_v6 = vld [vmem:[#allocation2 + $0x164] ss:$16 sps:$4 sm:$0xff]  }
 0x2dc   : > { %v3030_v29 = vmax.f32 %v3000_v40, %v9494_v20  ;;  %v9663_v14 = vmax.f32 %v3029_v0, %v9575_v56  ;;  %v6232_v61 = vpack.c.bf16 %v9530_v9, %v9530_v9  ;;  %v6233_v1 = vpack.c.bf16 %v9536_v4, %v9536_v4  ;;  %5050 = vmatprep.mubr.bf16.mxu1 %v6854_v6 }
 0x2dd   : > { %v4071_v8 = vmax.f32 %v4041_v30, %v9618_v5  ;;  %v4072_v34 = vmax.f32 %v4042_v17, %v9624_v23  ;;  %v3841_v12 = vmax.f32 %v3697_v2, %v3749_v42  ;;  %v3842_v31 = vmax.f32 %v3698_v24, %v3751_v7  ;;  %5051 = vmatmul.mubr.bf16.gmra.mxu1 %v6858_v63  ;;  %v6864_v24 = vld [vmem:[#allocation2 + $0x180] ss:$16 sps:$4 sm:$0xff]  }
 0x2de   : > { %v9672_v40 = vmax.f32 %v3030_v29, %v9577_v19  ;;  %v3290_v26 = vrot.slane %v9663_v14, 6  ;;  %3215 = vst [vmem:[#allocation2 + $0xa8] sm:$0xf] %v6232_v61  ;;  %3216 = vst [vmem:[#allocation2 + $0xb8] sm:$0xf] %v6233_v1  ;;  %v4013_v36 = vmax.f32 %v9460_v45, %v9524_v51  ;;  %v4014_v9 = vmax.f32 %v9462_v13, %v9538_v44 }
 0x2df   : > { %v6844_v0 = vld [vmem:[#allocation2 + $0x6c] ss:$16 sps:$4 sm:$0xff]   ;;  %v2972_v4 = vmax.f32 %v10722_v11, %v9429_v37  ;;  %v9685_v49 = vmax.f32 %v3031_v41, %v8439_v15  ;;  %v9687_v47 = vmax.f32 %v3841_v12, %v3893_v22  ;;  %v9689_v62 = vmax.f32 %v3842_v31, %v3895_v60  ;;  %5058 = vmatprep.mubr.bf16.mxu1 %v6860_v53  ;;  %v6866_v61 = vld [vmem:[#allocation2 + $0x1a4] ss:$16 sps:$4 sm:$0xff]  }
 0x2e0   : > { %v3291_v45 = vrot.slane %v9672_v40, 6  ;;  %v3372_v38 = vsel %vm1151_vm0, -1e+30, %v3290_v26  ;;  %5147 = vmatprep.mubr.bf16.mxu0 %v6844_v0  ;;  %v4043_v12 = vmax.f32 %v4013_v36, %v9618_v5  ;;  %v4044_v31 = vmax.f32 %v4014_v9, %v9624_v23 }
 0x2e1   : > { %v3464_v13 = vrot.slane %v3372_v38, 1  ;;  %v3608_v33 = vrot.slane %v3372_v38, 2  ;;  %v3752_v11 = vrot.slane %v3372_v38, 3  ;;  %v3896_v54 = vrot.slane %v3372_v38, 4  ;;  %5148 = vmatmul.mubr.bf16.gmra.mxu0 %v6847_v55 }
 0x2e2   : > { %v4101_v18 = vmax.f32 %v4071_v8, %v9687_v47  ;;  %v4102_v56 = vmax.f32 %v4072_v34, %v9689_v62  ;;  %v3292_v41 = vsel %vm1151_vm0, %v3290_v26, %v3291_v45  ;;  %v3388_v46 = vsel %vm1151_vm0, %v3291_v45, -1e+30 }
 0x2e3   : > { %v3465_v52 = vrot.slane %v3292_v41, 1  ;;  %v3467_v57 = vrot.slane %v3388_v46, 1  ;;  %v3609_v25 = vrot.slane %v3292_v41, 2  ;;  %v3611_v32 = vrot.slane %v3388_v46, 2 }
 0x2e4   : > { %v6262_v43 = vpack.c.bf16 %v4101_v18, %v4101_v18  ;;  %v6263_v42 = vpack.c.bf16 %v4102_v56, %v4102_v56  ;;  %v3753_v7 = vrot.slane %v3292_v41, 3  ;;  %v3755_v22 = vrot.slane %v3388_v46, 3 }
 0x2e5   : > { %v3466_v60 = vsel %vm1313_vm1, %v3464_v13, %v3465_v52  ;;  %v3468_v30 = vsel %vm1313_vm1, %v3465_v52, %v3467_v57  ;;  %v3610_v17 = vsel %vm1462_vm2, %v3608_v33, %v3609_v25  ;;  %v3612_v2 = vsel %vm1462_vm2, %v3609_v25, %v3611_v32  ;;  %5059 = vmatmul.mubr.bf16.gmra.mxu1 %v6864_v24  ;;  %v6870_v57 = vld [vmem:[#allocation2 + $0x1a0] ss:$16 sps:$4 sm:$0xff]  }
 0x2e6   : > { %4261 = vst [vmem:[#allocation2 + $0x8c] sm:$0xf] %v6262_v43  ;;  %4262 = vst [vmem:[#allocation2 + $0x9c] sm:$0xf] %v6263_v42  ;;  %v3555_v6 = vmax.f32 %v3372_v38, %v3466_v60  ;;  %v3556_v29 = vmax.f32 %v3292_v41, %v3468_v30  ;;  %v3754_v8 = vsel %vm1611_vm3, %v3752_v11, %v3753_v7  ;;  %v3897_v1 = vrot.slane %v3292_v41, 4 }
 0x2e7   : > { %v3756_v34 = vsel %vm1611_vm3, %v3753_v7, %v3755_v22  ;;  %v3899_v63 = vrot.slane %v3388_v46, 4  ;;  %v3002_v0 = vmax.f32 %v2972_v4, %v9494_v20  ;;  %v6234_v55 = vpack.c.bf16 %v9616_v58, %v9616_v58  ;;  %5066 = vmatprep.mubr.bf16.mxu1 %v6866_v61  ;;  %v6853_v43 = vld [vmem:[#allocation2 + $0x88] ss:$16 sps:$4 sm:$0xff]  }
 0x2e8   : > { %v3699_v26 = vmax.f32 %v3555_v6, %v3610_v17  ;;  %v3700_v53 = vmax.f32 %v3556_v29, %v3612_v2  ;;  %v3898_v45 = vsel %vm1760_vm4, %v3896_v54, %v3897_v1  ;;  %v4073_v13 = vmax.f32 %v4043_v12, %v9687_v47 }
 0x2e9   : > { %v3900_v38 = vsel %vm1760_vm4, %v3897_v1, %v3899_v63  ;;  %v4074_v33 = vmax.f32 %v4044_v31, %v9689_v62  ;;  %v3032_v9 = vmax.f32 %v3002_v0, %v9577_v19  ;;  %v6235_v18 = vpack.c.bf16 %v9627_v10, %v9627_v10  ;;  %3217 = vst [vmem:[#allocation2 + $0xc8] sm:$0xf] %v6234_v55 }
 0x2ea   : > { %v3843_v36 = vmax.f32 %v3699_v26, %v3754_v8  ;;  %v3844_v11 = vmax.f32 %v3700_v53, %v3756_v34  ;;  %v3293_v4 = vrot.slane %v9685_v49, 6  ;;  %v4015_v58 = vmax.f32 %v9524_v51, %v9618_v5 }
 0x2eb   : > { %v4016_v54 = vmax.f32 %v9538_v44, %v9624_v23  ;;  %v2974_v56 = vmax.f32 %v9429_v37, %v9494_v20  ;;  %v9727_v52 = vmax.f32 %v3032_v9, %v8441_v21  ;;  %3218 = vst [vmem:[#allocation2 + $0xd8] sm:$0xf] %v6235_v18  ;;  %v3033_v10 = vmax.f32 %v9591_v16, %v8439_v15  ;;  %v6872_v16 = vld [vmem:[#allocation2 + $0x1c4] ss:$16 sps:$4 sm:$0xff]  }
 0x2ec   : > { %v9722_v41 = vmax.f32 %v3843_v36, %v3898_v45  ;;  %v9724_v46 = vmax.f32 %v3844_v11, %v3900_v38  ;;  %v3373_v51 = vsel %vm1151_vm0, -1e+30, %v3293_v4  ;;  %v9733_v44 = vmax.f32 %v4015_v58, %v9687_v47 }
 0x2ed   : > { %v6850_v25 = vld [vmem:[#allocation2 + $0x8c] ss:$16 sps:$4 sm:$0xff]   ;;  %v9736_v37 = vmax.f32 %v4016_v54, %v9689_v62  ;;  %v3004_v32 = vmax.f32 %v2974_v56, %v9577_v19  ;;  %v3294_v22 = vrot.slane %v9727_v52, 6  ;;  %v3469_v15 = vrot.slane %v3373_v51, 1  ;;  %5067 = vmatmul.mubr.bf16.gmra.mxu1 %v6870_v57  ;;  %v6876_v54 = vld [vmem:[#allocation2 + $0x1c0] ss:$16 sps:$4 sm:$0xff]  }
 0x2ee   : > { %v4103_v42 = vmax.f32 %v4073_v13, %v9722_v41  ;;  %v4104_v7 = vmax.f32 %v4074_v33, %v9724_v46  ;;  %5155 = vmatprep.mubr.bf16.mxu0 %v6850_v25  ;;  %v3613_v60 = vrot.slane %v3373_v51, 2  ;;  %v3757_v30 = vrot.slane %v3373_v51, 3  ;;  %5074 = vmatprep.mubr.bf16.mxu1 %v6872_v16  ;;  %v6859_v16 = vld [vmem:[#allocation2 + $0xa8] ss:$16 sps:$4 sm:$0xff]  }
 0x2ef   : > { %v3901_v17 = vrot.slane %v3373_v51, 4  ;;  %v4075_v2 = vmax.f32 %v9733_v44, %v9722_v41  ;;  %5156 = vmatmul.mubr.bf16.gmra.mxu0 %v6853_v43  ;;  %v3295_v29 = vsel %vm1151_vm0, %v3293_v4, %v3294_v22  ;;  %v3389_v8 = vsel %vm1151_vm0, %v3294_v22, -1e+30 }
 0x2f0   : > { %v6264_v24 = vpack.c.bf16 %v4103_v42, %v4103_v42  ;;  %v6265_v6 = vpack.c.bf16 %v4104_v7, %v4104_v7  ;;  %v3470_v34 = vrot.slane %v3295_v29, 1  ;;  %v3472_v61 = vrot.slane %v3389_v8, 1 }
 0x2f1   : > { %v3614_v1 = vrot.slane %v3295_v29, 2  ;;  %v3616_v63 = vrot.slane %v3389_v8, 2  ;;  %v3758_v12 = vrot.slane %v3295_v29, 3  ;;  %v3760_v31 = vrot.slane %v3389_v8, 3 }
 0x2f2   : > { %4263 = vst [vmem:[#allocation2 + $0xac] sm:$0xf] %v6264_v24  ;;  %4264 = vst [vmem:[#allocation2 + $0xbc] sm:$0xf] %v6265_v6  ;;  %v3902_v26 = vrot.slane %v3295_v29, 4  ;;  %v3904_v53 = vrot.slane %v3389_v8, 4  ;;  %v3471_v0 = vsel %vm1313_vm1, %v3469_v15, %v3470_v34  ;;  %v3473_v55 = vsel %vm1313_vm1, %v3470_v34, %v3472_v61 }
 0x2f3   : > { %v3615_v45 = vsel %vm1462_vm2, %v3613_v60, %v3614_v1  ;;  %v3617_v38 = vsel %vm1462_vm2, %v3614_v1, %v3616_v63  ;;  %v3557_v13 = vmax.f32 %v3373_v51, %v3471_v0  ;;  %v3558_v33 = vmax.f32 %v3295_v29, %v3473_v55 }
 0x2f4   : > { %v3759_v36 = vsel %vm1611_vm3, %v3757_v30, %v3758_v12  ;;  %v3761_v11 = vsel %vm1611_vm3, %v3758_v12, %v3760_v31  ;;  %v3903_v9 = vsel %vm1760_vm4, %v3901_v17, %v3902_v26  ;;  %v3905_v18 = vsel %vm1760_vm4, %v3902_v26, %v3904_v53 }
 0x2f5   : > { %v4076_v4 = vmax.f32 %v9736_v37, %v9724_v46  ;;  %v3034_v58 = vmax.f32 %v3004_v32, %v8441_v21  ;;  %v3701_v56 = vmax.f32 %v3557_v13, %v3615_v45  ;;  %v3702_v57 = vmax.f32 %v3558_v33, %v3617_v38  ;;  %5075 = vmatmul.mubr.bf16.gmra.mxu1 %v6876_v54 }
 0x2f6   : > { %v9758_v25 = vmax.f32 %v3033_v10, %v8443_v48  ;;  %v6236_v51 = vpack.c.bf16 %v9663_v14, %v9663_v14  ;;  %v6237_v43 = vpack.c.bf16 %v9672_v40, %v9672_v40  ;;  %v4017_v37 = vmax.f32 %v9618_v5, %v9687_v47 }
 0x2f7   : > { %v9763_v44 = vmax.f32 %v3034_v58, %v8445_v35  ;;  %v4018_v32 = vmax.f32 %v9624_v23, %v9689_v62  ;;  %v3845_v42 = vmax.f32 %v3701_v56, %v3759_v36  ;;  %v3846_v7 = vmax.f32 %v3702_v57, %v3761_v11 }
 0x2f8   : > { %3219 = vst [vmem:[#allocation2 + $0xe8] sm:$0xf] %v6236_v51  ;;  %v3296_v10 = vrot.slane %v9758_v25, 6  ;;  %v2976_v14 = vmax.f32 %v9494_v20, %v9577_v19  ;;  %3220 = vst [vmem:[#allocation2 + $0xf8] sm:$0xf] %v6237_v43  ;;  %v9776_v40 = vmax.f32 %v4017_v37, %v9722_v41  ;;  %v3035_v23 = vmax.f32 %v9596_v59, %v8443_v48 }
 0x2f9   : > { %v6856_v22 = vld [vmem:[#allocation2 + $0xac] ss:$16 sps:$4 sm:$0xff]   ;;  %v3297_v15 = vrot.slane %v9763_v44, 6  ;;  %v9779_v5 = vmax.f32 %v4018_v32, %v9724_v46  ;;  %v9783_v60 = vmax.f32 %v3845_v42, %v3903_v9  ;;  %v9785_v30 = vmax.f32 %v3846_v7, %v3905_v18 }
 0x2fa   : > { %v3374_v20 = vsel %vm1151_vm0, -1e+30, %v3296_v10  ;;  %v3006_v17 = vmax.f32 %v2976_v14, %v8441_v21  ;;  %5163 = vmatprep.mubr.bf16.mxu0 %v6856_v22  ;;  %v9807_v7 = vmax.f32 %v3035_v23, %v9104_v3  ;;  %v6238_v14 = vpack.c.bf16 %v9685_v49, %v9685_v49 }
 0x2fb   : > { %v3298_v24 = vsel %vm1151_vm0, %v3296_v10, %v3297_v15  ;;  %v3390_v6 = vsel %vm1151_vm0, %v3297_v15, -1e+30  ;;  %v3474_v29 = vrot.slane %v3374_v20, 1  ;;  %v3618_v8 = vrot.slane %v3374_v20, 2  ;;  %5164 = vmatmul.mubr.bf16.gmra.mxu0 %v6859_v16 }
 0x2fc   : > { %v4105_v34 = vmax.f32 %v4075_v2, %v9783_v60  ;;  %v4106_v48 = vmax.f32 %v4076_v4, %v9785_v30  ;;  %v3475_v59 = vrot.slane %v3298_v24, 1  ;;  %v3477_v61 = vrot.slane %v3390_v6, 1  ;;  %3221 = vst [vmem:[#allocation2 + $0x108] sm:$0xf] %v6238_v14 }
 0x2fd   : > { %v3619_v1 = vrot.slane %v3298_v24, 2  ;;  %v3621_v63 = vrot.slane %v3390_v6, 2  ;;  %v3762_v12 = vrot.slane %v3374_v20, 3  ;;  %v3763_v31 = vrot.slane %v3298_v24, 3 }
 0x2fe   : > { %v6266_v26 = vpack.c.bf16 %v4105_v34, %v4105_v34  ;;  %v6267_v53 = vpack.c.bf16 %v4106_v48, %v4106_v48  ;;  %v3476_v0 = vsel %vm1313_vm1, %v3474_v29, %v3475_v59  ;;  %v3478_v55 = vsel %vm1313_vm1, %v3475_v59, %v3477_v61  ;;  %v6865_v34 = vld [vmem:[#allocation2 + $0xc8] ss:$16 sps:$4 sm:$0xff]  }
 0x2ff   : > { %v3559_v45 = vmax.f32 %v3374_v20, %v3476_v0  ;;  %v3560_v38 = vmax.f32 %v3298_v24, %v3478_v55  ;;  %v3620_v13 = vsel %vm1462_vm2, %v3618_v8, %v3619_v1  ;;  %v3622_v2 = vsel %vm1462_vm2, %v3619_v1, %v3621_v63 }
 0x300   : > { %4265 = vst [vmem:[#allocation2 + $0xcc] sm:$0xf] %v6266_v26  ;;  %4266 = vst [vmem:[#allocation2 + $0xdc] sm:$0xf] %v6267_v53  ;;  %v3764_v33 = vsel %vm1611_vm3, %v3762_v12, %v3763_v31  ;;  %v3765_v36 = vrot.slane %v3390_v6, 3  ;;  %v3906_v11 = vrot.slane %v3374_v20, 4  ;;  %v4077_v54 = vmax.f32 %v9776_v40, %v9783_v60 }
 0x301   : > { %v3907_v9 = vrot.slane %v3298_v24, 4  ;;  %v3703_v18 = vmax.f32 %v3559_v45, %v3620_v13  ;;  %v3704_v4 = vmax.f32 %v3560_v38, %v3622_v2  ;;  %v3909_v58 = vrot.slane %v3390_v6, 4 }
 0x302   : > { %v3766_v56 = vsel %vm1611_vm3, %v3763_v31, %v3765_v36  ;;  %v4078_v51 = vmax.f32 %v9779_v5, %v9785_v30  ;;  %v3036_v43 = vmax.f32 %v3006_v17, %v8445_v35  ;;  %v6239_v22 = vpack.c.bf16 %v9727_v52, %v9727_v52  ;;  %v10734_v52 = vld [vmem:[#allocation20_spill] sm:$0xff] }
 0x303   : > { %v3908_v57 = vsel %vm1760_vm4, %v3906_v11, %v3907_v9  ;;  %v3847_v37 = vmax.f32 %v3703_v18, %v3764_v33  ;;  %v3848_v32 = vmax.f32 %v3704_v4, %v3766_v56  ;;  %v3910_v42 = vsel %vm1760_vm4, %v3907_v9, %v3909_v58 }
 0x304   : > { %v9810_v10 = vmax.f32 %v3036_v43, %v9107_v27  ;;  %v4019_v15 = vmax.f32 %v9687_v47, %v9722_v41  ;;  %v3299_v16 = vrot.slane %v9807_v7, 6  ;;  %v4020_v23 = vmax.f32 %v9689_v62, %v9724_v46  ;;  %3222 = vst [vmem:[#allocation2 + $0x118] sm:$0xf] %v6239_v22 }
 0x305   : > { %v9818_v40 = vmax.f32 %v3847_v37, %v3908_v57  ;;  %v9820_v5 = vmax.f32 %v3848_v32, %v3910_v42  ;;  %v6220_v17 = vpack.c.bf16 %v10734_v52, %v10734_v52  ;;  %v2978_v47 = vmax.f32 %v9577_v19, %v8441_v21 }
 0x306   : > { %v3300_v20 = vrot.slane %v9810_v10, 6  ;;  %v9827_v49 = vmax.f32 %v4019_v15, %v9783_v60  ;;  %v3375_v62 = vsel %vm1151_vm0, -1e+30, %v3299_v16  ;;  %v9837_v8 = vmax.f32 %v4020_v23, %v9785_v30 }
 0x307   : > { %v6862_v24 = vld [vmem:[#allocation2 + $0xcc] ss:$16 sps:$4 sm:$0xff]   ;;  %v4107_v6 = vmax.f32 %v4077_v54, %v9818_v40  ;;  %v4108_v29 = vmax.f32 %v4078_v51, %v9820_v5  ;;  %v3479_v61 = vrot.slane %v3375_v62, 1  ;;  %v3623_v1 = vrot.slane %v3375_v62, 2  ;;  %2187 = vst [vmem:[#allocation2 + $0x1e4] sm:$0xf] %v6220_v17 }
 0x308   : > { %v3301_v48 = vsel %vm1151_vm0, %v3299_v16, %v3300_v20  ;;  %v3391_v59 = vsel %vm1151_vm0, %v3300_v20, -1e+30  ;;  %5171 = vmatprep.mubr.bf16.mxu0 %v6862_v24  ;;  %v3767_v53 = vrot.slane %v3375_v62, 3  ;;  %v3911_v13 = vrot.slane %v3375_v62, 4  ;;  %v6882_v20 = vld [vmem:[#allocation2 + $0x1e0] ss:$16 sps:$4 sm:$0xff]  }
 0x309   : > { %v6268_v21 = vpack.c.bf16 %v4107_v6, %v4107_v6  ;;  %v6269_v19 = vpack.c.bf16 %v4108_v29, %v4108_v29  ;;  %v3480_v63 = vrot.slane %v3301_v48, 1  ;;  %v3482_v12 = vrot.slane %v3391_v59, 1  ;;  %5172 = vmatmul.mubr.bf16.gmra.mxu0 %v6865_v34 }
 0x30a   : > { %v3624_v31 = vrot.slane %v3301_v48, 2  ;;  %v3626_v26 = vrot.slane %v3391_v59, 2  ;;  %v3768_v0 = vrot.slane %v3301_v48, 3  ;;  %v3770_v38 = vrot.slane %v3391_v59, 3 }
 0x30b   : > { %4267 = vst [vmem:[#allocation2 + $0xec] sm:$0xf] %v6268_v21  ;;  %4268 = vst [vmem:[#allocation2 + $0xfc] sm:$0xf] %v6269_v19  ;;  %v3481_v55 = vsel %vm1313_vm1, %v3479_v61, %v3480_v63  ;;  %v3483_v45 = vsel %vm1313_vm1, %v3480_v63, %v3482_v12  ;;  %v3912_v4 = vrot.slane %v3301_v48, 4  ;;  %v3914_v58 = vrot.slane %v3391_v59, 4 }
 0x30c   : > { %v3561_v2 = vmax.f32 %v3375_v62, %v3481_v55  ;;  %v3562_v33 = vmax.f32 %v3301_v48, %v3483_v45  ;;  %v3625_v36 = vsel %vm1462_vm2, %v3623_v1, %v3624_v31  ;;  %v3627_v11 = vsel %vm1462_vm2, %v3624_v31, %v3626_v26 }
 0x30d   : > { %v3769_v9 = vsel %vm1611_vm3, %v3767_v53, %v3768_v0  ;;  %v3771_v18 = vsel %vm1611_vm3, %v3768_v0, %v3770_v38  ;;  %v4079_v57 = vmax.f32 %v9827_v49, %v9818_v40  ;;  %v4080_v51 = vmax.f32 %v9837_v8, %v9820_v5  ;;  %v10737_v8 = vld [vmem:[#allocation19_spill] sm:$0xff] }
 0x30e   : > { %v3705_v54 = vmax.f32 %v3561_v2, %v3625_v36  ;;  %v3706_v56 = vmax.f32 %v3562_v33, %v3627_v11  ;;  %v3913_v43 = vsel %vm1760_vm4, %v3911_v13, %v3912_v4  ;;  %v3915_v37 = vsel %vm1760_vm4, %v3912_v4, %v3914_v58  ;;  %v6878_v32 = vld [vmem:[#allocation2 + $0x1e4] ss:$16 sps:$4 sm:$0xff]  }
 0x30f   : > { %v3008_v42 = vmax.f32 %v2978_v47, %v8445_v35  ;;  %v3037_v14 = vmax.f32 %v9599_v50, %v9104_v3  ;;  %v6240_v16 = vpack.c.bf16 %v9758_v25, %v9758_v25  ;;  %v6241_v23 = vpack.c.bf16 %v9763_v44, %v9763_v44  ;;  %5082 = vmatprep.mubr.bf16.mxu1 %v6878_v32  ;;  %v6871_v44 = vld [vmem:[#allocation2 + $0xe8] ss:$16 sps:$4 sm:$0xff]  }
 0x310   : > { %v3849_v22 = vmax.f32 %v3705_v54, %v3769_v9  ;;  %v3850_v15 = vmax.f32 %v3706_v56, %v3771_v18  ;;  %v4021_v35 = vmax.f32 %v9722_v41, %v9783_v60  ;;  %v4022_v3 = vmax.f32 %v9724_v46, %v9785_v30  ;;  %5083 = vmatmul.mubr.bf16.gmra.mxu1 %v6882_v20  ;;  %v10735_v47 = vld [vmem:[#allocation6_spill] sm:$0xff] }
 0x311   : > { %v3038_v49 = vmax.f32 %v3008_v42, %v9107_v27  ;;  %v9862_v52 = vmax.f32 %v3037_v14, %v9109_v28  ;;  %3223 = vst [vmem:[#allocation2 + $0x128] sm:$0xf] %v6240_v16  ;;  %3224 = vst [vmem:[#allocation2 + $0x138] sm:$0xf] %v6241_v23  ;;  %v6242_v27 = vpack.c.bf16 %v9807_v7, %v9807_v7  ;;  %v3490_v34 = vrot.slane %v10737_v8, 1  ;;  %v10738_v42 = vld [vmem:[#allocation40_spill] sm:$0xff] }
 0x312   : > { %v6868_v50 = vld [vmem:[#allocation2 + $0xec] ss:$16 sps:$4 sm:$0xff]   ;;  %v9868_v17 = vmax.f32 %v3849_v22, %v3913_v43  ;;  %v9870_v25 = vmax.f32 %v3850_v15, %v3915_v37  ;;  %v6243_v28 = vpack.c.bf16 %v9810_v10, %v9810_v10  ;;  %v9881_v24 = vmax.f32 %v4021_v35, %v9818_v40 }
 0x313   : > { %v9877_v41 = vmax.f32 %v3038_v49, %v10735_v47  ;;  %v3302_v46 = vrot.slane %v9862_v52, 6  ;;  %v9884_v6 = vmax.f32 %v4022_v3, %v9820_v5  ;;  %5179 = vmatprep.mubr.bf16.mxu0 %v6868_v50  ;;  %3225 = vst [vmem:[#allocation2 + $0x148] sm:$0xf] %v6242_v27  ;;  %v10736_v10 = vld [vmem:[#allocation38_spill] sm:$0xff]  ;;  %v10739_v14 = vrot.slane %v10738_v42, 1 }
 0x314   : > { %v4109_v29 = vmax.f32 %v4079_v57, %v9868_v17  ;;  %v4110_v7 = vmax.f32 %v4080_v51, %v9870_v25  ;;  %3226 = vst [vmem:[#allocation2 + $0x158] sm:$0xf] %v6243_v28  ;;  %v3489_v62 = vrot.slane %v10736_v10, 1  ;;  %5180 = vmatmul.mubr.bf16.gmra.mxu0 %v6871_v44  ;;  %v4081_v61 = vmax.f32 %v9881_v24, %v9868_v17  ;;  %v6877_v24 = vld [vmem:[#allocation2 + $0x108] ss:$16 sps:$4 sm:$0xff]  }
 0x315   : > { %v3303_v48 = vrot.slane %v9877_v41, 6  ;;  %v3376_v59 = vsel %vm1151_vm0, -1e+30, %v3302_v46  ;;  %v4082_v1 = vmax.f32 %v9884_v6, %v9870_v25  ;;  %v3493_v22 = vsel %vm1313_vm1, %v3490_v34, %v10739_v14 }
 0x316   : > { %v6270_v21 = vpack.c.bf16 %v4109_v29, %v4109_v29  ;;  %v6271_v19 = vpack.c.bf16 %v4110_v7, %v4110_v7  ;;  %v3484_v63 = vrot.slane %v3376_v59, 1  ;;  %v3628_v12 = vrot.slane %v3376_v59, 2 }
 0x317   : > { %v3304_v31 = vsel %vm1151_vm0, %v3302_v46, %v3303_v48  ;;  %v3392_v26 = vsel %vm1151_vm0, %v3303_v48, -1e+30  ;;  %v3772_v53 = vrot.slane %v3376_v59, 3  ;;  %v3916_v0 = vrot.slane %v3376_v59, 4 }
 0x318   : > { %4269 = vst [vmem:[#allocation2 + $0x10c] sm:$0xf] %v6270_v21  ;;  %4270 = vst [vmem:[#allocation2 + $0x11c] sm:$0xf] %v6271_v19  ;;  %v3485_v55 = vrot.slane %v3304_v31, 1  ;;  %v3487_v45 = vrot.slane %v3392_v26, 1  ;;  %v3491_v32 = vsel %vm1313_vm1, %v3489_v62, %v3490_v34  ;;  %v3566_v20 = vmax.f32 %v10737_v8, %v3493_v22 }
 0x319   : > { %v3629_v38 = vrot.slane %v3304_v31, 2  ;;  %v3631_v13 = vrot.slane %v3392_v26, 2  ;;  %v3773_v2 = vrot.slane %v3304_v31, 3  ;;  %v3775_v33 = vrot.slane %v3392_v26, 3 }
 0x31a   : > { %v3917_v36 = vrot.slane %v3304_v31, 4  ;;  %v3919_v11 = vrot.slane %v3392_v26, 4  ;;  %v3486_v9 = vsel %vm1313_vm1, %v3484_v63, %v3485_v55  ;;  %v3488_v18 = vsel %vm1313_vm1, %v3485_v55, %v3487_v45 }
 0x31b   : > { %v3630_v4 = vsel %vm1462_vm2, %v3628_v12, %v3629_v38  ;;  %v3632_v58 = vsel %vm1462_vm2, %v3629_v38, %v3631_v13  ;;  %v3563_v54 = vmax.f32 %v3376_v59, %v3486_v9  ;;  %v3564_v56 = vmax.f32 %v3304_v31, %v3488_v18  ;;  %v10742_v18 = vld [vmem:[#allocation37_spill] sm:$0xff] }
 0x31c   : > { %v3774_v57 = vsel %vm1611_vm3, %v3772_v53, %v3773_v2  ;;  %v3776_v51 = vsel %vm1611_vm3, %v3773_v2, %v3775_v33  ;;  %v3918_v43 = vsel %vm1760_vm4, %v3916_v0, %v3917_v36  ;;  %v3920_v37 = vsel %vm1760_vm4, %v3917_v36, %v3919_v11 }
 0x31d   : > { %v3707_v15 = vmax.f32 %v3563_v54, %v3630_v4  ;;  %v3708_v16 = vmax.f32 %v3564_v56, %v3632_v58  ;;  %v3565_v23 = vmax.f32 %v10736_v10, %v3491_v32  ;;  %v3633_v49 = vrot.slane %v10736_v10, 2 }
 0x31e   : > { %v3634_v35 = vrot.slane %v10737_v8, 2  ;;  %v3777_v3 = vrot.slane %v10736_v10, 3  ;;  %v3778_v50 = vrot.slane %v10737_v8, 3  ;;  %v3780_v47 = vrot.slane %v10738_v42, 3 }
 0x31f   : > { %v6874_v27 = vld [vmem:[#allocation2 + $0x10c] ss:$16 sps:$4 sm:$0xff]   ;;  %v3851_v28 = vmax.f32 %v3707_v15, %v3774_v57  ;;  %v3852_v44 = vmax.f32 %v3708_v16, %v3776_v51  ;;  %v3921_v46 = vrot.slane %v10736_v10, 4  ;;  %v10740_v29 = vrot.slane %v10738_v42, 2  ;;  %v10743_v51 = vld [vmem:[#allocation41_spill] sm:$0xff] }
 0x320   : > { %v3635_v6 = vsel %vm1462_vm2, %v3633_v49, %v3634_v35  ;;  %v3779_v62 = vsel %vm1611_vm3, %v3777_v3, %v3778_v50  ;;  %v3922_v34 = vrot.slane %v10737_v8, 4  ;;  %5187 = vmatprep.mubr.bf16.mxu0 %v6874_v27  ;;  %v3781_v10 = vsel %vm1611_vm3, %v3778_v50, %v3780_v47 }
 0x321   : > { %v3637_v7 = vsel %vm1462_vm2, %v3634_v35, %v10740_v29  ;;  %v9924_v48 = vmax.f32 %v3851_v28, %v3918_v43  ;;  %v9926_v59 = vmax.f32 %v3852_v44, %v3920_v37  ;;  %v3709_v21 = vmax.f32 %v3565_v23, %v3635_v6  ;;  %5188 = vmatmul.mubr.bf16.gmra.mxu0 %v6877_v24 }
 0x322   : > { %v3710_v19 = vmax.f32 %v3566_v20, %v3637_v7  ;;  %v3923_v63 = vsel %vm1760_vm4, %v3921_v46, %v3922_v34  ;;  %v3924_v12 = vrot.slane %v10738_v42, 4  ;;  %v4023_v31 = vmax.f32 %v9783_v60, %v9818_v40  ;;  %v10746_v7 = vld [vmem:[#allocation3_spill] sm:$0xff] }
 0x323   : > { %v4111_v26 = vmax.f32 %v4081_v61, %v9924_v48  ;;  %v4112_v8 = vmax.f32 %v4082_v1, %v9926_v59  ;;  %v3853_v53 = vmax.f32 %v3709_v21, %v3779_v62  ;;  %v4024_v45 = vmax.f32 %v9785_v30, %v9820_v5  ;;  %v10741_v30 = vld [vmem:[#allocation39_spill] sm:$0xff] }
 0x324   : > { %v3854_v0 = vmax.f32 %v3710_v19, %v3781_v10  ;;  %v3925_v55 = vsel %vm1760_vm4, %v3922_v34, %v3924_v12  ;;  %v4053_v38 = vmax.f32 %v4023_v31, %v9868_v17  ;;  %v6244_v13 = vpack.c.bf16 %v9862_v52, %v9862_v52  ;;  %v6883_v31 = vld [vmem:[#allocation2 + $0x128] ss:$16 sps:$4 sm:$0xff]  }
 0x325   : > { %v6272_v2 = vpack.c.bf16 %v4111_v26, %v4111_v26  ;;  %v6273_v33 = vpack.c.bf16 %v4112_v8, %v4112_v8  ;;  %v9941_v36 = vmax.f32 %v3853_v53, %v3923_v63  ;;  %v4054_v61 = vmax.f32 %v4024_v45, %v9870_v25  ;;  %v10747_v63 = vld [vmem:[#allocation31_spill] sm:$0xff]  ;;  %v10750_v53 = vld [vmem:[#allocation34_spill] sm:$0xff] }
 0x326   : > { %v9943_v60 = vmax.f32 %v3854_v0, %v3925_v55  ;;  %v4083_v1 = vmax.f32 %v4053_v38, %v9924_v48  ;;  %v6245_v11 = vpack.c.bf16 %v9877_v41, %v9877_v41  ;;  %3227 = vst [vmem:[#allocation2 + $0x168] sm:$0xf] %v6244_v13  ;;  %v3494_v9 = vrot.slane %v10741_v30, 1  ;;  %v10748_v8 = vld [vmem:[#allocation35_spill] sm:$0xff] }
 0x327   : > { %4271 = vst [vmem:[#allocation2 + $0x12c] sm:$0xf] %v6272_v2  ;;  %4272 = vst [vmem:[#allocation2 + $0x13c] sm:$0xf] %v6273_v33  ;;  %v3495_v52 = vrot.slane %v10742_v18, 1  ;;  %v3638_v4 = vrot.slane %v10741_v30, 2  ;;  %v4084_v56 = vmax.f32 %v4054_v61, %v9926_v59  ;;  %v4025_v6 = vmax.f32 %v9818_v40, %v9868_v17 }
 0x328   : > { %v3639_v58 = vrot.slane %v10742_v18, 2  ;;  %v3782_v54 = vrot.slane %v10741_v30, 3  ;;  %v4113_v57 = vmax.f32 %v4083_v1, %v9941_v36  ;;  %3228 = vst [vmem:[#allocation2 + $0x178] sm:$0xf] %v6245_v11  ;;  %v3783_v41 = vrot.slane %v10742_v18, 3  ;;  %v10001_v11 = vpop.f32.mrf.mxu1 }
 0x329   : > { %v3785_v43 = vrot.slane %v10743_v51, 3  ;;  %v3496_v37 = vsel %vm1313_vm1, %v3494_v9, %v3495_v52  ;;  %v10744_v32 = vrot.slane %v10743_v51, 1  ;;  %v10745_v22 = vrot.slane %v10743_v51, 2 }
 0x32a   : > { %v3640_v14 = vsel %vm1462_vm2, %v3638_v4, %v3639_v58  ;;  %v4114_v16 = vmax.f32 %v4084_v56, %v9943_v60  ;;  %v6274_v23 = vpack.c.bf16 %v4113_v57, %v4113_v57  ;;  %v3567_v20 = vmax.f32 %v10741_v30, %v3496_v37 }
 0x32b   : > { %v3498_v42 = vsel %vm1313_vm1, %v3495_v52, %v10744_v32  ;;  %v3642_v15 = vsel %vm1462_vm2, %v3639_v58, %v10745_v22  ;;  %v3784_v35 = vsel %vm1611_vm3, %v3782_v54, %v3783_v41  ;;  %v3786_v3 = vsel %vm1611_vm3, %v3783_v41, %v3785_v43  ;;  %v10011_v22 = vpop.f32.mrf.mxu1 }
 0x32c   : > { %v3568_v49 = vmax.f32 %v10742_v18, %v3498_v42  ;;  %v3926_v50 = vrot.slane %v10741_v30, 4  ;;  %v3927_v27 = vrot.slane %v10742_v18, 4  ;;  %v6275_v28 = vpack.c.bf16 %v4114_v16, %v4114_v16  ;;  %4273 = vst [vmem:[#allocation2 + $0x14c] sm:$0xf] %v6274_v23 }
 0x32d   : > { %v3711_v44 = vmax.f32 %v3567_v20, %v3640_v14  ;;  %v3929_v46 = vrot.slane %v10743_v51, 4  ;;  %v4026_v29 = vmax.f32 %v9820_v5, %v9870_v25  ;;  %v6246_v62 = vpack.c.bf16 %v10746_v7, %v10746_v7  ;;  %v10754_v7 = vld [vmem:[#allocation18_spill] sm:$0xff] }
 0x32e   : > { %v3712_v47 = vmax.f32 %v3568_v49, %v3642_v15  ;;  %v3928_v24 = vsel %vm1760_vm4, %v3926_v50, %v3927_v27  ;;  %v6880_v34 = vld [vmem:[#allocation2 + $0x12c] ss:$16 sps:$4 sm:$0xff]   ;;  %4274 = vst [vmem:[#allocation2 + $0x15c] sm:$0xf] %v6275_v28  ;;  %v6247_v12 = vpack.c.bf16 %v10747_v63, %v10747_v63  ;;  %v4055_v26 = vmax.f32 %v4025_v6, %v9924_v48  ;;  %v6886_v28 = vld [vmem:[#allocation2 + $0x148] ss:$16 sps:$4 sm:$0xff]  }
 0x32f   : > { %v3855_v21 = vmax.f32 %v3711_v44, %v3784_v35  ;;  %v3930_v10 = vsel %vm1760_vm4, %v3927_v27, %v3929_v46  ;;  %v4056_v40 = vmax.f32 %v4026_v29, %v9926_v59  ;;  %3229 = vst [vmem:[#allocation2 + $0x188] sm:$0xf] %v6246_v62  ;;  %v10749_v5 = vrot.slane %v10748_v8, 6  ;;  %5195 = vmatprep.mubr.bf16.mxu0 %v6880_v34 }
 0x330   : > { %v3856_v19 = vmax.f32 %v3712_v47, %v3786_v3  ;;  %v10751_v0 = vrot.slane %v10750_v53, 6  ;;  %3230 = vst [vmem:[#allocation2 + $0x198] sm:$0xf] %v6247_v12  ;;  %5196 = vmatmul.mubr.bf16.gmra.mxu0 %v6883_v31  ;;  %v4085_v30 = vmax.f32 %v4055_v26, %v9941_v36  ;;  %v4027_v49 = vmax.f32 %v9868_v17, %v9924_v48  ;;  %v10756_v26 = vld [vmem:[#allocation32_spill] sm:$0xff] }
 0x331   : > { %v9994_v13 = vmax.f32 %v3855_v21, %v3928_v24  ;;  %v10753_v33 = vmov %v10749_v5  ;;  %v4086_v9 = vmax.f32 %v4056_v40, %v9943_v60  ;;  %v4028_v24 = vmax.f32 %v9870_v25, %v9926_v59  ;;  %v10026_v21 = vpop.f32.mrf.mxu1 }
 0x332   : > { %v3313_v55 = vsel %vm1151_vm0, %v10751_v0, %v10749_v5  ;;  %v10752_v45 = vmov %v10751_v0  ;;  %v9996_v2 = vmax.f32 %v3856_v19, %v3930_v10  ;;  %v3395_v61 = vsel %vm1151_vm0, %v10753_v33, -1e+30  ;;  %v10757_v5 = vld [vmem:[#allocation33_spill] sm:$0xff]  ;;  %v10758_v33 = vld [vmem:[#allocation36_spill] sm:$0xff] }
 0x333   : > { %v3379_v38 = vsel %vm1151_vm0, -1e+30, %v10752_v45  ;;  %v3500_v18 = vrot.slane %v3313_v55, 1  ;;  %v3502_v52 = vrot.slane %v3395_v61, 1  ;;  %v3644_v58 = vrot.slane %v3313_v55, 2 }
 0x334   : > { %v3499_v1 = vrot.slane %v3379_v38, 1  ;;  %v3643_v4 = vrot.slane %v3379_v38, 2  ;;  %v3646_v54 = vrot.slane %v3395_v61, 2  ;;  %v3787_v56 = vrot.slane %v3379_v38, 3 }
 0x335   : > { %v4115_v57 = vmax.f32 %v4085_v30, %v9994_v13  ;;  %v4116_v41 = vmax.f32 %v4086_v9, %v9996_v2  ;;  %v3503_v43 = vsel %vm1313_vm1, %v3500_v18, %v3502_v52  ;;  %v6884_v15 = vld [vmem:[#allocation2 + $0x14c] ss:$16 sps:$4 sm:$0xff]   ;;  %v3788_v20 = vrot.slane %v3313_v55, 3  ;;  %v10050_v52 = vpop.f32.mrf.mxu1 }
 0x336   : > { %v3501_v51 = vsel %vm1313_vm1, %v3499_v1, %v3500_v18  ;;  %v3570_v32 = vmax.f32 %v3313_v55, %v3503_v43  ;;  %v3645_v42 = vsel %vm1462_vm2, %v3643_v4, %v3644_v58  ;;  %v3647_v14 = vsel %vm1462_vm2, %v3644_v58, %v3646_v54  ;;  %5203 = vmatprep.mubr.bf16.mxu0 %v6884_v15 }
 0x337   : > { %v3569_v37 = vmax.f32 %v3379_v38, %v3501_v51  ;;  %v6276_v16 = vpack.c.bf16 %v4115_v57, %v4115_v57  ;;  %v6277_v23 = vpack.c.bf16 %v4116_v41, %v4116_v41  ;;  %v3790_v50 = vrot.slane %v3395_v61, 3 }
 0x338   : > { %v3714_v3 = vmax.f32 %v3570_v32, %v3647_v14  ;;  %v3931_v27 = vrot.slane %v3379_v38, 4  ;;  %v3789_v44 = vsel %vm1611_vm3, %v3787_v56, %v3788_v20  ;;  %v3932_v47 = vrot.slane %v3313_v55, 4  ;;  %5204 = vmatmul.mubr.bf16.gmra.mxu0 %v6886_v28 }
 0x339   : > { %v3713_v35 = vmax.f32 %v3569_v37, %v3645_v42  ;;  %4275 = vst [vmem:[#allocation2 + $0x16c] sm:$0xf] %v6276_v16  ;;  %4276 = vst [vmem:[#allocation2 + $0x17c] sm:$0xf] %v6277_v23  ;;  %v3934_v46 = vrot.slane %v3395_v61, 4  ;;  %v3791_v6 = vsel %vm1611_vm3, %v3788_v20, %v3790_v50  ;;  %v4057_v17 = vmax.f32 %v4027_v49, %v9941_v36  ;;  %v10058_v20 = vpop.f32.mrf.mxu1 }
 0x33a   : > { %v10755_v62 = vmax.f32 %v10754_v7, %v10661_v39  ;;  %v3858_v19 = vmax.f32 %v3714_v3, %v3791_v6  ;;  %v3933_v10 = vsel %vm1760_vm4, %v3931_v27, %v3932_v47  ;;  %v4058_v25 = vmax.f32 %v4028_v24, %v9943_v60 }
 0x33b   : > { %v3857_v29 = vmax.f32 %v3713_v35, %v3789_v44  ;;  %v3935_v63 = vsel %vm1760_vm4, %v3932_v47, %v3934_v46  ;;  %v4087_v31 = vmax.f32 %v4057_v17, %v9994_v13  ;;  %v6248_v40 = vpack.c.bf16 %v10756_v26, %v10756_v26 }
 0x33c   : > { %v10024_v34 = vmax.f32 %v10755_v62, %v10661_v39  ;;  %v6249_v0 = vpack.c.bf16 %v10757_v5, %v10757_v5  ;;  %v10038_v55 = vmax.f32 %v3858_v19, %v3935_v63  ;;  %v4088_v45 = vmax.f32 %v4058_v25, %v9996_v2 }
 0x33d   : > { %v10031_v12 = vmax.f32 %v3857_v29, %v3933_v10  ;;  %v3315_v61 = vrot.slane %v10758_v33, 6  ;;  %3231 = vst [vmem:[#allocation2 + $0x1a8] sm:$0xf] %v6248_v40  ;;  %v4029_v30 = vmax.f32 %v9924_v48, %v9941_v36  ;;  %v4030_v9 = vmax.f32 %v9926_v59, %v9943_v60  ;;  %v6889_v59 = vld [vmem:[#allocation2 + $0x168] ss:$16 sps:$4 sm:$0xff]   ;;  %v10069_v10 = vpop.f32.mrf.mxu1 }
 0x33e   : > { %v3314_v38 = vrot.slane %v10024_v34, 6  ;;  %3232 = vst [vmem:[#allocation2 + $0x1b8] sm:$0xf] %v6249_v0  ;;  %v6250_v18 = vpack.c.bf16 %v10750_v53, %v10750_v53  ;;  %v4118_v4 = vmax.f32 %v4088_v45, %v10038_v55  ;;  %v6251_v19 = vpack.c.bf16 %v10748_v8, %v10748_v8 }
 0x33f   : > { %v4117_v1 = vmax.f32 %v4087_v31, %v10031_v12  ;;  %v3396_v56 = vsel %vm1151_vm0, %v3315_v61, -1e+30  ;;  %v4059_v43 = vmax.f32 %v4029_v30, %v9994_v13  ;;  %v4060_v7 = vmax.f32 %v4030_v9, %v9996_v2 }
 0x340   : > { %v3316_v58 = vsel %vm1151_vm0, %v3314_v38, %v3315_v61  ;;  %v3380_v54 = vsel %vm1151_vm0, -1e+30, %v3314_v38  ;;  %v6887_v57 = vld [vmem:[#allocation2 + $0x16c] ss:$16 sps:$4 sm:$0xff]   ;;  %3233 = vst [vmem:[#allocation2 + $0x1c8] sm:$0xf] %v6250_v18  ;;  %v6279_v37 = vpack.c.bf16 %v4118_v4, %v4118_v4  ;;  %v4031_v26 = vmax.f32 %v9941_v36, %v9994_v13  ;;  %v10088_v18 = vpop.f32.mrf.mxu1 }
 0x341   : > { %v6278_v41 = vpack.c.bf16 %v4117_v1, %v4117_v1  ;;  %v3504_v51 = vrot.slane %v3380_v54, 1  ;;  %v3505_v48 = vrot.slane %v3316_v58, 1  ;;  %v3507_v53 = vrot.slane %v3396_v56, 1  ;;  %5211 = vmatprep.mubr.bf16.mxu0 %v6887_v57  ;;  %3234 = vst [vmem:[#allocation2 + $0x1d8] sm:$0xf] %v6251_v19 }
 0x342   : > { %v3648_v32 = vrot.slane %v3380_v54, 2  ;;  %v3649_v42 = vrot.slane %v3316_v58, 2  ;;  %v3651_v15 = vrot.slane %v3396_v56, 2  ;;  %v3792_v16 = vrot.slane %v3380_v54, 3  ;;  %5212 = vmatmul.mubr.bf16.gmra.mxu0 %v6889_v59  ;;  %4278 = vst [vmem:[#allocation2 + $0x19c] sm:$0xf] %v6279_v37 }
 0x343   : > { %4277 = vst [vmem:[#allocation2 + $0x18c] sm:$0xf] %v6278_v41  ;;  %v3506_v14 = vsel %vm1313_vm1, %v3504_v51, %v3505_v48  ;;  %v3793_v23 = vrot.slane %v3316_v58, 3  ;;  %v3508_v49 = vsel %vm1313_vm1, %v3505_v48, %v3507_v53  ;;  %v3795_v50 = vrot.slane %v3396_v56, 3  ;;  %v10094_v48 = vpop.f32.mrf.mxu1 }
 0x344   : > { %v3571_v35 = vmax.f32 %v3380_v54, %v3506_v14  ;;  %v3650_v3 = vsel %vm1462_vm2, %v3648_v32, %v3649_v42  ;;  %v3572_v27 = vmax.f32 %v3316_v58, %v3508_v49  ;;  %v3652_v28 = vsel %vm1462_vm2, %v3649_v42, %v3651_v15 }
 0x345   : > { %v3794_v44 = vsel %vm1611_vm3, %v3792_v16, %v3793_v23  ;;  %v3936_v47 = vrot.slane %v3380_v54, 4  ;;  %v3796_v24 = vsel %vm1611_vm3, %v3793_v23, %v3795_v50  ;;  %v3937_v6 = vrot.slane %v3316_v58, 4  ;;  %v10098_v14 = vpop.f32.mrf.mxu1  ;;  %v6895_v23 = vld [vmem:[#allocation2 + $0x1a8] ss:$16 sps:$4 sm:$0xff]  }
 0x346   : > { %v3715_v46 = vmax.f32 %v3571_v35, %v3650_v3  ;;  %v3939_v29 = vrot.slane %v3396_v56, 4  ;;  %v3716_v17 = vmax.f32 %v3572_v27, %v3652_v28  ;;  %v4089_v62 = vmax.f32 %v4059_v43, %v10031_v12 }
 0x347   : > { %v3938_v25 = vsel %vm1760_vm4, %v3936_v47, %v3937_v6  ;;  %v4090_v5 = vmax.f32 %v4060_v7, %v10038_v55  ;;  %v4032_v0 = vmax.f32 %v9943_v60, %v9996_v2  ;;  %v6252_v8 = vpack.c.bf16 %v10024_v34, %v10024_v34  ;;  %v6892_v34 = vld [vmem:[#allocation2 + $0x188] ss:$16 sps:$4 sm:$0xff]   ;;  %v10100_v15 = vpop.f32.mrf.mxu1  ;;  %v10119_v7 = vld [vmem:[%s10462_s5] ss:$0 sm:$0xff] }
 0x348   : > { %v3859_v63 = vmax.f32 %v3715_v46, %v3794_v44  ;;  %v3940_v31 = vsel %vm1760_vm4, %v3937_v6, %v3939_v29  ;;  %v3860_v40 = vmax.f32 %v3716_v17, %v3796_v24  ;;  %v4061_v38 = vmax.f32 %v4031_v26, %v10031_v12 }
 0x349   : > { %v6253_v61 = vpack.c.bf16 %v10758_v33, %v10758_v33  ;;  %v4033_v1 = vmax.f32 %v9994_v13, %v10031_v12  ;;  %v4062_v9 = vmax.f32 %v4032_v0, %v10038_v55  ;;  %3235 = vst [vmem:[#allocation2 + $0x1e8] sm:$0xf] %v6252_v8  ;;  %v4034_v60 = vmax.f32 %v9996_v2, %v10038_v55  ;;  %v10102_v35 = vpop.f32.mrf.mxu1 }
 0x34a   : > { %v4003_v45 = vmax.f32 %v3859_v63, %v3938_v25  ;;  %v6890_v36 = vld [vmem:[#allocation2 + $0x18c] ss:$16 sps:$4 sm:$0xff]   ;;  %v4004_v30 = vmax.f32 %v3860_v40, %v3940_v31  ;;  %v6455_v29 = vadd.f32 %v10011_v22, %v10001_v11  ;;  %v10126_v25 = vld [vmem:[%s10463_s6] ss:$0 sm:$0xff]  ;;  %v6458_v26 = vadd.f32 %v10050_v52, %v10026_v21 }
 0x34b   : > { %3236 = vst [vmem:[#allocation2 + $0x1f8] sm:$0xf] %v6253_v61  ;;  %5219 = vmatprep.mubr.bf16.mxu0 %v6890_v36  ;;  %v10104_v3 = vpop.f32.mrf.mxu1  ;;  %v6461_v52 = vadd.f32 %v10069_v10, %v10058_v20 }
 0x34c   : > { %v4119_v4 = vmax.f32 %v4089_v62, %v4003_v45  ;;  %v4091_v58 = vmax.f32 %v4061_v38, %v4003_v45  ;;  %v4063_v54 = vmax.f32 %v4033_v1, %v4003_v45  ;;  %v4120_v33 = vmax.f32 %v4090_v5, %v4004_v30  ;;  %5220 = vmatmul.mubr.bf16.gmra.mxu0 %v6892_v34 }
 0x34d   : > { %v4092_v56 = vmax.f32 %v4062_v9, %v4004_v30  ;;  %v4064_v57 = vmax.f32 %v4034_v60, %v4004_v30  ;;  %v10106_v27 = vpop.f32.mrf.mxu1 }
 0x34e   : > { %v6280_v13 = vpack.c.bf16 %v4119_v4, %v4119_v4  ;;  %v4121_v12 = vmax.f32 %v4091_v58, %v10661_v39  ;;  %v4093_v41 = vmax.f32 %v4063_v54, %v10661_v39  ;;  %v6281_v51 = vpack.c.bf16 %v4120_v33, %v4120_v33 }
 0x34f   : > { %v4122_v2 = vmax.f32 %v4092_v56, %v10661_v39  ;;  %v4094_v55 = vmax.f32 %v4064_v57, %v10661_v39  ;;  %v10108_v28 = vpop.f32.mrf.mxu1  ;;  %v6464_v54 = vadd.f32 %v10094_v48, %v10088_v18 }
 0x350   : > { %4279 = vst [vmem:[#allocation2 + $0x1ac] sm:$0xf] %v6280_v13  ;;  %v6282_v43 = vpack.c.bf16 %v4121_v12, %v4121_v12  ;;  %v4123_v59 = vmax.f32 %v4093_v41, %v10661_v39  ;;  %4280 = vst [vmem:[#allocation2 + $0x1bc] sm:$0xf] %v6281_v51 }
 0x351   : > { %v6283_v37 = vpack.c.bf16 %v4122_v2, %v4122_v2  ;;  %v4124_v53 = vmax.f32 %v4094_v55, %v10661_v39  ;;  %v6898_v39 = vld [vmem:[#allocation2 + $0x1c8] ss:$16 sps:$4 sm:$0xff]   ;;  %v10110_v47 = vpop.f32.mrf.mxu1 }
 0x352   : > { %4281 = vst [vmem:[#allocation2 + $0x1cc] sm:$0xf] %v6282_v43  ;;  %v6284_v32 = vpack.c.bf16 %v4123_v59, %v4123_v59  ;;  %v6901_v44 = vld [vmem:[#allocation2 + $0x1e8] ss:$16 sps:$4 sm:$0xff]  }
 0x353   : > { %4282 = vst [vmem:[#allocation2 + $0x1dc] sm:$0xf] %v6283_v37  ;;  %v6285_v42 = vpack.c.bf16 %v4124_v53, %v4124_v53  ;;  %v10112_v24 = vpop.f32.mrf.mxu1 }
 0x354   : > { %4283 = vst [vmem:[#allocation2 + $0x1ec] sm:$0xf] %v6284_v32 }
 0x355   : > { %4284 = vst [vmem:[#allocation2 + $0x1fc] sm:$0xf] %v6285_v42  ;;  %v10121_v19 = vpop.f32.mrf.mxu1  ;;  %v6467_v42 = vadd.f32 %v10100_v15, %v10098_v14 }
 0x357   : > { %v6893_v16 = vld [vmem:[#allocation2 + $0x1ac] ss:$16 sps:$4 sm:$0xff]   ;;  %v10131_v40 = vpop.f32.mrf.mxu1 }
 0x358   : > { %5227 = vmatprep.mubr.bf16.mxu0 %v6893_v16 }
 0x359   : > { %5228 = vmatmul.mubr.bf16.gmra.mxu0 %v6895_v23  ;;  %v10135_v38 = vpop.f32.mrf.mxu1 }
 0x35a   : > { %v6896_v49 = vld [vmem:[#allocation2 + $0x1cc] ss:$16 sps:$4 sm:$0xff]  }
 0x35b   : > { %5235 = vmatprep.mubr.bf16.mxu0 %v6896_v49  ;;  %v10138_v30 = vpop.f32.mrf.mxu1 }
 0x35c   : > { %v6899_v50 = vld [vmem:[#allocation2 + $0x1ec] ss:$16 sps:$4 sm:$0xff]  }
 0x35d   : > { %v10142_v34 = vpop.f32.mrf.mxu1 }
 0x35f   : > { %v10147_v57 = vpop.f32.mrf.mxu1 }
 0x361   : > { %5236 = vmatmul.mubr.bf16.gmra.mxu0 %v6898_v39  ;;  %v10154_v2 = vpop.f32.mrf.mxu1 }
 0x362   : > { %5243 = vmatprep.mubr.bf16.mxu0 %v6899_v50 }
 0x363   : > { %v10157_v59 = vpop.f32.mrf.mxu1 }
 0x364   : > { %v6565_v46 = vpop.f32.mrf.mxu0 }
 0x365   : > { %v10159_v53 = vpop.f32.mrf.mxu1 }
 0x366   : > { %v6566_v6 = vpop.f32.mrf.mxu0 }
 0x367   : > { %v6567_v17 = vadd.f32 %v6566_v6, %v6565_v46  ;;  %v10163_v39 = vpop.f32.mrf.mxu1 }
 0x368   : > { %v6568_v62 = vpop.f32.mrf.mxu0 }
 0x369   : > { %5244 = vmatmul.mubr.bf16.gmra.mxu0 %v6901_v44  ;;  %v5126_v63 = vadd.f32 %v6567_v17, %v6455_v29  ;;  %v6470_v44 = vadd.f32 %v10104_v3, %v10102_v35  ;;  %v10171_v15 = vpop.f32.mrf.mxu1 }
 0x36a   : > { %v6569_v31 = vpop.f32.mrf.mxu0 }
 0x36b   : > { %v5260_v11 = vmul.f32 %v10119_v7, %v5126_v63  ;;  %v6570_v22 = vadd.f32 %v6569_v31, %v6568_v62 }
 0x36d   : > { %v5300_v5 = vadd.f32 %v10126_v25, %v5260_v11  ;;  %v5129_v0 = vadd.f32 %v6570_v22, %v6458_v26 }
 0x36f   : > { %v6090_v8 = vmul.f32 -1.442695, %v5300_v5  ;;  %v5261_v45 = vmul.f32 %v10119_v7, %v5129_v0 }
 0x371   : > { %7030 = vpow2.f32 %v6090_v8  ;;  %v5301_v61 = vadd.f32 %v10126_v25, %v5261_v45  ;;  %v10185_v45 = vpop.f32.mrf.mxu1 }
 0x373   : > { %v6091_v1 = vmul.f32 -1.442695, %v5301_v61 }
 0x375   : > { %7032 = vpow2.f32 %v6091_v1 }
 0x377   : > { %v6571_v36 = vpop.f32.mrf.mxu0 }
 0x379   : > { %v6572_v21 = vpop.f32.mrf.mxu0 }
 0x37a   : > { %v6573_v9 = vadd.f32 %v6572_v21, %v6571_v36 }
 0x37b   : > { %v6574_v60 = vpop.f32.mrf.mxu0 }
 0x37c   : > { %v5134_v4 = vadd.f32 %v6573_v9, %v6461_v52  ;;  %v6473_v9 = vadd.f32 %v10108_v28, %v10106_v27 }
 0x37d   : > { %v6575_v58 = vpop.f32.mrf.mxu0 }
 0x37e   : > { %v5262_v33 = vmul.f32 %v10119_v7, %v5134_v4  ;;  %v6576_v56 = vadd.f32 %v6575_v58, %v6574_v60  ;;  %v7031_v41 = vpop.eup %7030 }
 0x37f   : > { %v5428_v20 = vadd.f32 1.0, %v7031_v41  ;;  %v6476_v41 = vadd.f32 %v10112_v24, %v10110_v47 }
 0x380   : > { %v10150_v13 = vadd.f32 %v10126_v25, %v5262_v33  ;;  %v5137_v12 = vadd.f32 %v6576_v56, %v6464_v54 }
 0x382   : > { %v6092_v10 = vmul.f32 -1.442695, %v10150_v13  ;;  %v5263_v51 = vmul.f32 %v10119_v7, %v5137_v12  ;;  %v7033_v18 = vpop.eup %7032 }
 0x383   : > { %v5429_v48 = vadd.f32 1.0, %v7033_v18 }
 0x384   : > { %v5303_v55 = vadd.f32 %v10126_v25, %v5263_v51  ;;  %7034 = vpow2.f32 %v6092_v10 }
 0x385   : > { %7036 = vrcp.f32 %v5428_v20 }
 0x386   : > { %v6093_v43 = vmul.f32 -1.442695, %v5303_v55  ;;  %7038 = vrcp.f32 %v5429_v48 }
 0x388   : > { %7040 = vpow2.f32 %v6093_v43 }
 0x38c   : > { %v6577_v37 = vpop.f32.mrf.mxu0 }
 0x38e   : > { %v6578_v32 = vpop.f32.mrf.mxu0 }
 0x38f   : > { %v6579_v16 = vadd.f32 %v6578_v32, %v6577_v37 }
 0x390   : > { %v6580_v23 = vpop.f32.mrf.mxu0 }
 0x391   : > { %v5142_v49 = vadd.f32 %v6579_v16, %v6467_v42  ;;  %v7035_v29 = vpop.eup %7034 }
 0x392   : > { %v6581_v50 = vpop.f32.mrf.mxu0  ;;  %v7037_v17 = vpop.eup %7036  ;;  %v5430_v62 = vadd.f32 1.0, %v7035_v29 }
 0x393   : > { %v5264_v46 = vmul.f32 %v10119_v7, %v5142_v49  ;;  %v6582_v6 = vadd.f32 %v6581_v50, %v6580_v23  ;;  %v7039_v31 = vpop.eup %7038  ;;  %v5524_v35 = vmul.f32 %v7037_v17, %v5300_v5 }
 0x394   : > { %v5525_v3 = vmul.f32 %v7039_v31, %v5301_v61  ;;  %7042 = vrcp.f32 %v5430_v62  ;;  %v10189_v61 = vpop.f32.mrf.mxu1 }
 0x395   : > { %v10169_v63 = vadd.f32 %v10126_v25, %v5264_v46  ;;  %v5145_v14 = vadd.f32 %v6582_v6, %v6470_v44  ;;  %v7041_v22 = vpop.eup %7040  ;;  %v6479_v44 = vadd.f32 %v10131_v40, %v10121_v19 }
 0x396   : > { %v5431_v0 = vadd.f32 1.0, %v7041_v22  ;;  %v6321_v1 = vpack.c.bf16 %v5525_v3, %v5524_v35  ;;  %v10191_v21 = vpop.f32.mrf.mxu1 }
 0x397   : > { %v6094_v26 = vmul.f32 -1.442695, %v10169_v63  ;;  %v5265_v11 = vmul.f32 %v10119_v7, %v5145_v14  ;;  %v6482_v14 = vadd.f32 %v10138_v30, %v10135_v38 }
 0x398   : > { %6322 = vst [vmem:[%s10180_s13] sm:$0xff] %v6321_v1   ;;  %v10195_v56 = vpop.f32.mrf.mxu1 }
 0x399   : > { %7044 = vpow2.f32 %v6094_v26  ;;  %v10183_v8 = vadd.f32 %v10126_v25, %v5265_v11 }
 0x39a   : > { %7046 = vrcp.f32 %v5431_v0  ;;  %v10204_v32 = vpop.f32.mrf.mxu1 }
 0x39b   : > { %v6095_v5 = vmul.f32 -1.442695, %v10183_v8 }
 0x39d   : > { %7048 = vpow2.f32 %v6095_v5 }
 0x3a1   : > { %v6583_v36 = vpop.f32.mrf.mxu0  ;;  %v7043_v58 = vpop.eup %7042 }
 0x3a2   : > { %v5526_v48 = vmul.f32 %v7043_v58, %v10150_v13  ;;  %v10212_v13 = vpop.f32.mrf.mxu1 }
 0x3a3   : > { %v6584_v52 = vpop.f32.mrf.mxu0 }
 0x3a4   : > { %v6585_v60 = vadd.f32 %v6584_v52, %v6583_v36  ;;  %v10217_v6 = vpop.f32.mrf.mxu1 }
 0x3a5   : > { %v6586_v4 = vpop.f32.mrf.mxu0 }
 0x3a6   : > { %v5150_v54 = vadd.f32 %v6585_v60, %v6473_v9  ;;  %v7045_v33 = vpop.eup %7044  ;;  %v10222_v11 = vpop.f32.mrf.mxu1 }
 0x3a7   : > { %v6587_v12 = vpop.f32.mrf.mxu0  ;;  %v5432_v20 = vadd.f32 1.0, %v7045_v33  ;;  %v7047_v18 = vpop.eup %7046 }
 0x3a8   : > { %v5266_v10 = vmul.f32 %v10119_v7, %v5150_v54  ;;  %v6588_v51 = vadd.f32 %v6587_v12, %v6586_v4  ;;  %v5527_v27 = vmul.f32 %v7047_v18, %v5303_v55  ;;  %v10229_v1 = vpop.f32.mrf.mxu1  ;;  %v6485_v4 = vadd.f32 %v10147_v57, %v10142_v34 }
 0x3a9   : > { %7050 = vrcp.f32 %v5432_v20 }
 0x3aa   : > { %v10202_v28 = vadd.f32 %v10126_v25, %v5266_v10  ;;  %v5153_v43 = vadd.f32 %v6588_v51, %v6476_v41  ;;  %v7049_v37 = vpop.eup %7048  ;;  %v6326_v42 = vpack.c.bf16 %v5527_v27, %v5526_v48  ;;  %v10239_v41 = vpop.f32.mrf.mxu1  ;;  %v6488_v51 = vadd.f32 %v10157_v59, %v10154_v2 }
 0x3ab   : > { %v5433_v16 = vadd.f32 1.0, %v7049_v37 }
 0x3ac   : > { %v6096_v47 = vmul.f32 -1.442695, %v10202_v28  ;;  %v5267_v24 = vmul.f32 %v10119_v7, %v5153_v43  ;;  %6398 = vst [vmem:[%s10180_s13 + $0x8] sm:$0xff] %v6326_v42   ;;  %v10245_v18 = vpop.f32.mrf.mxu1 }
 0x3ad   : > { %7052 = vrcp.f32 %v5433_v16 }
 0x3ae   : > { %v10210_v23 = vadd.f32 %v10126_v25, %v5267_v24  ;;  %7054 = vpow2.f32 %v6096_v47  ;;  %v10252_v42 = vpop.f32.mrf.mxu1 }
 0x3af   : > { %v6589_v55 = vpop.f32.mrf.mxu0 }
 0x3b0   : > { %v6097_v49 = vmul.f32 -1.442695, %v10210_v23 }
 0x3b1   : > { %v6590_v50 = vpop.f32.mrf.mxu0 }
 0x3b2   : > { %7056 = vpow2.f32 %v6097_v49  ;;  %v6591_v46 = vadd.f32 %v6590_v50, %v6589_v55  ;;  %v10258_v55 = vpop.f32.mrf.mxu1 }
 0x3b3   : > { %v6592_v29 = vpop.f32.mrf.mxu0 }
 0x3b4   : > { %v5158_v17 = vadd.f32 %v6591_v46, %v6479_v44  ;;  %v6491_v44 = vadd.f32 %v10163_v39, %v10159_v53 }
 0x3b5   : > { %v6593_v62 = vpop.f32.mrf.mxu0 }
 0x3b6   : > { %v5268_v31 = vmul.f32 %v10119_v7, %v5158_v17  ;;  %v6594_v26 = vadd.f32 %v6593_v62, %v6592_v29  ;;  %v7051_v22 = vpop.eup %7050 }
 0x3b7   : > { %v5528_v30 = vmul.f32 %v7051_v22, %v10169_v63 }
 0x3b8   : > { %v10225_v35 = vadd.f32 %v10126_v25, %v5268_v31  ;;  %v5161_v19 = vadd.f32 %v6594_v26, %v6482_v14  ;;  %v6494_v26 = vadd.f32 %v10185_v45, %v10171_v15 }
 0x3ba   : > { %v6098_v40 = vmul.f32 -1.442695, %v10225_v35  ;;  %v5269_v3 = vmul.f32 %v10119_v7, %v5161_v19  ;;  %v7053_v0 = vpop.eup %7052  ;;  %v10265_v19 = vpop.f32.mrf.mxu1 }
 0x3bb   : > { %v6595_v5 = vpop.f32.mrf.mxu0  ;;  %v7055_v38 = vpop.eup %7054  ;;  %v5529_v36 = vmul.f32 %v7053_v0, %v10183_v8 }
 0x3bc   : > { %7058 = vpow2.f32 %v6098_v40  ;;  %v10234_v52 = vadd.f32 %v10126_v25, %v5269_v3  ;;  %v5434_v9 = vadd.f32 1.0, %v7055_v38 }
 0x3bd   : > { %v6596_v60 = vpop.f32.mrf.mxu0  ;;  %v6331_v58 = vpack.c.bf16 %v5529_v36, %v5528_v30  ;;  %v10272_v30 = vpop.f32.mrf.mxu1 }
 0x3be   : > { %v6099_v54 = vmul.f32 -1.442695, %v10234_v52  ;;  %v6597_v33 = vadd.f32 %v6596_v60, %v6595_v5  ;;  %7060 = vrcp.f32 %v5434_v9  ;;  %v6497_v60 = vadd.f32 %v10191_v21, %v10189_v61 }
 0x3bf   : > { %v7057_v12 = vpop.eup %7056  ;;  %v6598_v63 = vpop.f32.mrf.mxu0  ;;  %6399 = vst [vmem:[%s10180_s13 + $0x10] sm:$0xff] %v6331_v58  }
 0x3c0   : > { %v5435_v8 = vadd.f32 1.0, %v7057_v12  ;;  %7062 = vpow2.f32 %v6099_v54  ;;  %v5166_v20 = vadd.f32 %v6597_v33, %v6485_v4  ;;  %v10282_v4 = vpop.f32.mrf.mxu1 }
 0x3c1   : > { %v6599_v10 = vpop.f32.mrf.mxu0 }
 0x3c2   : > { %7064 = vrcp.f32 %v5435_v8  ;;  %v5270_v34 = vmul.f32 %v10119_v7, %v5166_v20  ;;  %v6600_v57 = vadd.f32 %v6599_v10, %v6598_v63  ;;  %v6500_v20 = vadd.f32 %v10204_v32, %v10195_v56 }
 0x3c4   : > { %v10248_v48 = vadd.f32 %v10126_v25, %v5270_v34  ;;  %v5169_v27 = vadd.f32 %v6600_v57, %v6488_v51  ;;  %v10287_v34 = vpop.f32.mrf.mxu1 }
 0x3c6   : > { %v6100_v43 = vmul.f32 -1.442695, %v10248_v48  ;;  %v5271_v37 = vmul.f32 %v10119_v7, %v5169_v27  ;;  %v10295_v32 = vpop.f32.mrf.mxu1 }
 0x3c8   : > { %7066 = vpow2.f32 %v6100_v43  ;;  %v10255_v16 = vadd.f32 %v10126_v25, %v5271_v37 }
 0x3c9   : > { %v7059_v2 = vpop.eup %7058  ;;  %v6601_v59 = vpop.f32.mrf.mxu0 }
 0x3ca   : > { %v5436_v47 = vadd.f32 1.0, %v7059_v2  ;;  %v6101_v24 = vmul.f32 -1.442695, %v10255_v16 }
 0x3cb   : > { %v6602_v49 = vpop.f32.mrf.mxu0  ;;  %v7061_v50 = vpop.eup %7060 }
 0x3cc   : > { %v6603_v46 = vadd.f32 %v6602_v49, %v6601_v59  ;;  %7068 = vpow2.f32 %v6101_v24  ;;  %v5530_v22 = vmul.f32 %v7061_v50, %v10202_v28 }
 0x3cd   : > { %v7063_v29 = vpop.eup %7062  ;;  %v6604_v17 = vpop.f32.mrf.mxu0  ;;  %7070 = vrcp.f32 %v5436_v47 }
 0x3ce   : > { %v5437_v62 = vadd.f32 1.0, %v7063_v29  ;;  %v5174_v14 = vadd.f32 %v6603_v46, %v6491_v44  ;;  %v10303_v46 = vpop.f32.mrf.mxu1 }
 0x3cf   : > { %v7065_v31 = vpop.eup %7064  ;;  %v6605_v40 = vpop.f32.mrf.mxu0 }
 0x3d0   : > { %v5531_v3 = vmul.f32 %v7065_v31, %v10210_v23  ;;  %7072 = vrcp.f32 %v5437_v62  ;;  %v5272_v53 = vmul.f32 %v10119_v7, %v5174_v14  ;;  %v6606_v39 = vadd.f32 %v6605_v40, %v6604_v17  ;;  %v10310_v40 = vpop.f32.mrf.mxu1 }
 0x3d2   : > { %v6336_v0 = vpack.c.bf16 %v5531_v3, %v5530_v22  ;;  %v10270_v5 = vadd.f32 %v10126_v25, %v5272_v53  ;;  %v5177_v38 = vadd.f32 %v6606_v39, %v6494_v26  ;;  %v6506_v22 = vadd.f32 %v10229_v1, %v10222_v11 }
 0x3d4   : > { %6400 = vst [vmem:[%s10180_s13 + $0x18] sm:$0xff] %v6336_v0   ;;  %v6102_v15 = vmul.f32 -1.442695, %v10270_v5  ;;  %v5273_v45 = vmul.f32 %v10119_v7, %v5177_v38  ;;  %v6607_v28 = vpop.f32.mrf.mxu0 }
 0x3d5   : > { %v7067_v36 = vpop.eup %7066 }
 0x3d6   : > { %7074 = vpow2.f32 %v6102_v15  ;;  %v10278_v23 = vadd.f32 %v10126_v25, %v5273_v45  ;;  %v6608_v9 = vpop.f32.mrf.mxu0  ;;  %v5438_v58 = vadd.f32 1.0, %v7067_v36 }
 0x3d7   : > { %v6609_v54 = vadd.f32 %v6608_v9, %v6607_v28  ;;  %v10317_v28 = vpop.f32.mrf.mxu1 }
 0x3d8   : > { %v6103_v33 = vmul.f32 -1.442695, %v10278_v23  ;;  %v6610_v12 = vpop.f32.mrf.mxu0 }
 0x3d9   : > { %v5182_v63 = vadd.f32 %v6609_v54, %v6497_v60  ;;  %v7069_v8 = vpop.eup %7068  ;;  %v10326_v54 = vpop.f32.mrf.mxu1 }
 0x3da   : > { %7076 = vpow2.f32 %v6103_v33  ;;  %v6611_v10 = vpop.f32.mrf.mxu0  ;;  %v7071_v51 = vpop.eup %7070  ;;  %v5439_v57 = vadd.f32 1.0, %v7069_v8  ;;  %v6509_v8 = vadd.f32 %v10245_v18, %v10239_v41 }
 0x3db   : > { %7078 = vrcp.f32 %v5438_v58  ;;  %v5274_v61 = vmul.f32 %v10119_v7, %v5182_v63  ;;  %v6612_v21 = vadd.f32 %v6611_v10, %v6610_v12  ;;  %v5532_v2 = vmul.f32 %v7071_v51, %v10225_v35 }
 0x3dc   : > { %7080 = vrcp.f32 %v5439_v57 }
 0x3dd   : > { %v7073_v27 = vpop.eup %7072  ;;  %v10291_v43 = vadd.f32 %v10126_v25, %v5274_v61  ;;  %v5185_v37 = vadd.f32 %v6612_v21, %v6500_v20  ;;  %v10331_v20 = vpop.f32.mrf.mxu1 }
 0x3de   : > { %v5533_v56 = vmul.f32 %v7073_v27, %v10234_v52  ;;  %v6503_v52 = vadd.f32 %v10217_v6, %v10212_v13 }
 0x3df   : > { %v6104_v59 = vmul.f32 -1.442695, %v10291_v43  ;;  %v5275_v47 = vmul.f32 %v10119_v7, %v5185_v37 }
 0x3e0   : > { %v6341_v24 = vpack.c.bf16 %v5533_v56, %v5532_v2  ;;  %v6512_v2 = vadd.f32 %v10258_v55, %v10252_v42  ;;  %v10335_v56 = vpop.f32.mrf.mxu1  ;;  %v6515_v42 = vadd.f32 %v10272_v30, %v10265_v19  ;;  %v6518_v19 = vadd.f32 %v10287_v34, %v10282_v4 }
 0x3e1   : > { %7082 = vpow2.f32 %v6104_v59  ;;  %v10300_v49 = vadd.f32 %v10126_v25, %v5275_v47  ;;  %v6613_v50 = vpop.f32.mrf.mxu0 }
 0x3e2   : > { %6401 = vst [vmem:[%s10180_s13 + $0x20] sm:$0xff] %v6341_v24   ;;  %v10345_v55 = vpop.f32.mrf.mxu1 }
 0x3e3   : > { %v7075_v44 = vpop.eup %7074  ;;  %v6105_v35 = vmul.f32 -1.442695, %v10300_v49  ;;  %v6614_v29 = vpop.f32.mrf.mxu0 }
 0x3e4   : > { %v5440_v17 = vadd.f32 1.0, %v7075_v44  ;;  %v6615_v62 = vadd.f32 %v6614_v29, %v6613_v50  ;;  %v10355_v30 = vpop.f32.mrf.mxu1 }
 0x3e5   : > { %7084 = vpow2.f32 %v6105_v35  ;;  %v6616_v14 = vpop.f32.mrf.mxu0 }
 0x3e6   : > { %v5190_v31 = vadd.f32 %v6615_v62, %v6503_v52  ;;  %7086 = vrcp.f32 %v5440_v17 }
 0x3e7   : > { %v7077_v26 = vpop.eup %7076  ;;  %v6617_v3 = vpop.f32.mrf.mxu0 }
 0x3e8   : > { %v7079_v53 = vpop.eup %7078  ;;  %v5441_v39 = vadd.f32 1.0, %v7077_v26  ;;  %v5276_v0 = vmul.f32 %v10119_v7, %v5190_v31  ;;  %v6618_v38 = vadd.f32 %v6617_v3, %v6616_v14 }
 0x3e9   : > { %v7081_v13 = vpop.eup %7080  ;;  %v5534_v45 = vmul.f32 %v7079_v53, %v10248_v48 }
 0x3ea   : > { %7088 = vrcp.f32 %v5441_v39  ;;  %v10314_v6 = vadd.f32 %v10126_v25, %v5276_v0  ;;  %v5193_v15 = vadd.f32 %v6618_v38, %v6506_v22  ;;  %v5535_v11 = vmul.f32 %v7081_v13, %v10255_v16 }
 0x3ec   : > { %v6106_v1 = vmul.f32 -1.442695, %v10314_v6  ;;  %v5277_v36 = vmul.f32 %v10119_v7, %v5193_v15  ;;  %v6346_v9 = vpack.c.bf16 %v5535_v11, %v5534_v45 }
 0x3ee   : > { %v7083_v60 = vpop.eup %7082  ;;  %7090 = vpow2.f32 %v6106_v1  ;;  %v10323_v58 = vadd.f32 %v10126_v25, %v5277_v36  ;;  %6402 = vst [vmem:[%s10180_s13 + $0x28] sm:$0xff] %v6346_v9   ;;  %v6521_v36 = vadd.f32 %v10303_v46, %v10295_v32  ;;  %v10365_v9 = vpop.f32.mrf.mxu1  ;;  %v6524_v46 = vadd.f32 %v10317_v28, %v10310_v40 }
 0x3ef   : > { %v5442_v33 = vadd.f32 1.0, %v7083_v60 }
 0x3f0   : > { %v6107_v48 = vmul.f32 -1.442695, %v10323_v58  ;;  %v6619_v12 = vpop.f32.mrf.mxu0 }
 0x3f1   : > { %7092 = vrcp.f32 %v5442_v33 }
 0x3f2   : > { %v7085_v63 = vpop.eup %7084  ;;  %7094 = vpow2.f32 %v6107_v48  ;;  %v6620_v16 = vpop.f32.mrf.mxu0 }
 0x3f3   : > { %v5443_v10 = vadd.f32 1.0, %v7085_v63  ;;  %v6621_v51 = vadd.f32 %v6620_v16, %v6619_v12  ;;  %v7087_v61 = vpop.eup %7086 }
 0x3f4   : > { %v6622_v57 = vpop.f32.mrf.mxu0  ;;  %v5536_v41 = vmul.f32 %v7087_v61, %v10270_v5 }
 0x3f5   : > { %7096 = vrcp.f32 %v5443_v10  ;;  %v5198_v21 = vadd.f32 %v6621_v51, %v6509_v8  ;;  %v10375_v10 = vpop.f32.mrf.mxu1 }
 0x3f6   : > { %v6623_v27 = vpop.f32.mrf.mxu0 }
 0x3f7   : > { %v7089_v37 = vpop.eup %7088  ;;  %v5278_v59 = vmul.f32 %v10119_v7, %v5198_v21  ;;  %v6624_v47 = vadd.f32 %v6623_v27, %v6622_v57 }
 0x3f8   : > { %v5537_v18 = vmul.f32 %v7089_v37, %v10278_v23  ;;  %v6625_v24 = vpop.f32.mrf.mxu0 }
 0x3f9   : > { %v10341_v50 = vadd.f32 %v10126_v25, %v5278_v59  ;;  %v5201_v44 = vadd.f32 %v6624_v47, %v6512_v2  ;;  %v6535_v2 = vpop.f32.mrf.mxu1 }
 0x3fa   : > { %v6351_v35 = vpack.c.bf16 %v5537_v18, %v5536_v41  ;;  %v6626_v29 = vpop.f32.mrf.mxu0  ;;  %v6527_v18 = vadd.f32 %v10331_v20, %v10326_v54  ;;  %v6530_v20 = vadd.f32 %v10345_v55, %v10335_v56 }
 0x3fb   : > { %v7091_v52 = vpop.eup %7090  ;;  %v6108_v17 = vmul.f32 -1.442695, %v10341_v50  ;;  %v5279_v62 = vmul.f32 %v10119_v7, %v5201_v44  ;;  %v6627_v5 = vadd.f32 %v6626_v29, %v6625_v24 }
 0x3fc   : > { %6403 = vst [vmem:[%s10180_s13 + $0x30] sm:$0xff] %v6351_v35   ;;  %v5444_v23 = vadd.f32 1.0, %v7091_v52  ;;  %v6628_v14 = vpop.f32.mrf.mxu0 }
 0x3fd   : > { %7098 = vpow2.f32 %v6108_v17  ;;  %v10351_v31 = vadd.f32 %v10126_v25, %v5279_v62  ;;  %v5206_v26 = vadd.f32 %v6627_v5, %v6515_v42  ;;  %v6537_v42 = vpop.f32.mrf.mxu1 }
 0x3fe   : > { %v7093_v22 = vpop.eup %7092  ;;  %v6629_v3 = vpop.f32.mrf.mxu0  ;;  %7100 = vrcp.f32 %v5444_v23 }
 0x3ff   : > { %v7095_v53 = vpop.eup %7094  ;;  %v6109_v39 = vmul.f32 -1.442695, %v10351_v31  ;;  %v5280_v0 = vmul.f32 %v10119_v7, %v5206_v26  ;;  %v6630_v38 = vadd.f32 %v6629_v3, %v6628_v14  ;;  %v5538_v4 = vmul.f32 %v7093_v22, %v10291_v43 }
 0x400   : > { %v5445_v13 = vadd.f32 1.0, %v7095_v53 }
 0x401   : > { %7102 = vpow2.f32 %v6109_v39  ;;  %v10360_v45 = vadd.f32 %v10126_v25, %v5280_v0  ;;  %v5209_v11 = vadd.f32 %v6630_v38, %v6518_v19  ;;  %v6538_v19 = vpop.f32.mrf.mxu1 }
 0x402   : > { %v6631_v15 = vpop.f32.mrf.mxu0  ;;  %v7097_v1 = vpop.eup %7096  ;;  %7104 = vrcp.f32 %v5445_v13 }
 0x403   : > { %v5539_v60 = vmul.f32 %v7097_v1, %v10300_v49  ;;  %v6110_v33 = vmul.f32 -1.442695, %v10360_v45  ;;  %v5281_v48 = vmul.f32 %v10119_v7, %v5209_v11  ;;  %v6540_v56 = vpop.f32.mrf.mxu1 }
 0x404   : > { %v6632_v34 = vpop.f32.mrf.mxu0 }
 0x405   : > { %v6633_v12 = vadd.f32 %v6632_v34, %v6631_v15  ;;  %v6356_v16 = vpack.c.bf16 %v5539_v60, %v5538_v4  ;;  %7106 = vpow2.f32 %v6110_v33  ;;  %v10371_v8 = vadd.f32 %v10126_v25, %v5281_v48  ;;  %v6541_v33 = vpop.f32.mrf.mxu1 }
 0x406   : > { %v6634_v63 = vpop.f32.mrf.mxu0  ;;  %v6533_v4 = vadd.f32 %v10365_v9, %v10355_v30 }
 0x407   : > { %v5214_v32 = vadd.f32 %v6633_v12, %v6521_v36  ;;  %6404 = vst [vmem:[%s10180_s13 + $0x38] sm:$0xff] %v6356_v16   ;;  %v6111_v49 = vmul.f32 -1.442695, %v10371_v8 }
 0x408   : > { %v6635_v43 = vpop.f32.mrf.mxu0 }
 0x409   : > { %v5282_v51 = vmul.f32 %v10119_v7, %v5214_v32  ;;  %v6636_v57 = vadd.f32 %v6635_v43, %v6634_v63  ;;  %7108 = vpow2.f32 %v6111_v49 }
 0x40a   : > { %v7099_v27 = vpop.eup %7098 }
 0x40b   : > { %v10381_v61 = vadd.f32 %v10126_v25, %v5282_v51  ;;  %v5217_v21 = vadd.f32 %v6636_v57, %v6524_v46  ;;  %v5446_v59 = vadd.f32 1.0, %v7099_v27  ;;  %v7101_v41 = vpop.eup %7100  ;;  %v6536_v46 = vadd.f32 %v6535_v2, %v10375_v10 }
 0x40c   : > { %v6637_v37 = vpop.f32.mrf.mxu0  ;;  %v5540_v23 = vmul.f32 %v7101_v41, %v10314_v6 }
 0x40d   : > { %v6112_v47 = vmul.f32 -1.442695, %v10381_v61  ;;  %v5283_v40 = vmul.f32 %v10119_v7, %v5217_v21  ;;  %v6543_v21 = vpop.f32.mrf.mxu1 }
 0x40e   : > { %v6638_v28 = vpop.f32.mrf.mxu0  ;;  %v7103_v35 = vpop.eup %7102 }
 0x40f   : > { %v10388_v24 = vadd.f32 %v10126_v25, %v5283_v40  ;;  %v6639_v44 = vadd.f32 %v6638_v28, %v6637_v37  ;;  %7110 = vpow2.f32 %v6112_v47  ;;  %v7105_v52 = vpop.eup %7104  ;;  %v5447_v17 = vadd.f32 1.0, %v7103_v35 }
 0x410   : > { %v6640_v29 = vpop.f32.mrf.mxu0  ;;  %7112 = vrcp.f32 %v5446_v59  ;;  %v5541_v14 = vmul.f32 %v7105_v52, %v10323_v58  ;;  %v6539_v40 = vadd.f32 %v6538_v19, %v6537_v42 }
 0x411   : > { %v6113_v62 = vmul.f32 -1.442695, %v10388_v24  ;;  %v5222_v5 = vadd.f32 %v6639_v44, %v6527_v18  ;;  %7114 = vrcp.f32 %v5447_v17  ;;  %v6544_v44 = vpop.f32.mrf.mxu1 }
 0x412   : > { %v6641_v54 = vpop.f32.mrf.mxu0  ;;  %v7107_v3 = vpop.eup %7106  ;;  %v6361_v53 = vpack.c.bf16 %v5541_v14, %v5540_v23 }
 0x413   : > { %v5284_v26 = vmul.f32 %v10119_v7, %v5222_v5  ;;  %v6642_v22 = vadd.f32 %v6641_v54, %v6640_v29  ;;  %7116 = vpow2.f32 %v6113_v62  ;;  %v5448_v39 = vadd.f32 1.0, %v7107_v3 }
 0x414   : > { %6405 = vst [vmem:[%s10180_s13 + $0x40] sm:$0xff] %v6361_v53   ;;  %v6542_v5 = vadd.f32 %v6541_v33, %v6540_v56 }
 0x415   : > { %v10397_v0 = vadd.f32 %v10126_v25, %v5284_v26  ;;  %v5225_v38 = vadd.f32 %v6642_v22, %v6530_v20  ;;  %7118 = vrcp.f32 %v5448_v39  ;;  %v6546_v20 = vpop.f32.mrf.mxu1 }
 0x416   : > { %v7109_v13 = vpop.eup %7108 }
 0x417   : > { %v6114_v6 = vmul.f32 -1.442695, %v10397_v0  ;;  %v5285_v58 = vmul.f32 %v10119_v7, %v5225_v38  ;;  %v5449_v55 = vadd.f32 1.0, %v7109_v13  ;;  %v6545_v13 = vadd.f32 %v6544_v44, %v6543_v21 }
 0x419   : > { %7120 = vpow2.f32 %v6114_v6  ;;  %v10403_v15 = vadd.f32 %v10126_v25, %v5285_v58  ;;  %v6643_v11 = vpop.f32.mrf.mxu0 }
 0x41a   : > { %7122 = vrcp.f32 %v5449_v55 }
 0x41b   : > { %v6115_v1 = vmul.f32 -1.442695, %v10403_v15  ;;  %v6644_v36 = vpop.f32.mrf.mxu0 }
 0x41c   : > { %v6645_v34 = vadd.f32 %v6644_v36, %v6643_v11  ;;  %v7111_v60 = vpop.eup %7110  ;;  %v6547_v11 = vpop.f32.mrf.mxu1 }
 0x41d   : > { %7124 = vpow2.f32 %v6115_v1  ;;  %v6646_v48 = vpop.f32.mrf.mxu0  ;;  %v7113_v12 = vpop.eup %7112  ;;  %v5450_v63 = vadd.f32 1.0, %v7111_v60  ;;  %v6548_v60 = vadd.f32 %v6547_v11, %v6546_v20 }
 0x41e   : > { %v5230_v16 = vadd.f32 %v6645_v34, %v6533_v4  ;;  %v7115_v43 = vpop.eup %7114  ;;  %v5542_v27 = vmul.f32 %v7113_v12, %v10341_v50 }
 0x41f   : > { %v6647_v32 = vpop.f32.mrf.mxu0  ;;  %v5543_v30 = vmul.f32 %v7115_v43, %v10351_v31  ;;  %7126 = vrcp.f32 %v5450_v63 }
 0x420   : > { %v5286_v49 = vmul.f32 %v10119_v7, %v5230_v16  ;;  %v6648_v51 = vadd.f32 %v6647_v32, %v6646_v48  ;;  %v7117_v57 = vpop.eup %7116 }
 0x421   : > { %v6649_v9 = vpop.f32.mrf.mxu0  ;;  %v5451_v37 = vadd.f32 1.0, %v7117_v57  ;;  %v6366_v28 = vpack.c.bf16 %v5543_v30, %v5542_v27 }
 0x422   : > { %v10413_v59 = vadd.f32 %v10126_v25, %v5286_v49  ;;  %v5233_v47 = vadd.f32 %v6648_v51, %v6536_v46  ;;  %v7119_v50 = vpop.eup %7118 }
 0x423   : > { %v6650_v10 = vpop.f32.mrf.mxu0  ;;  %7128 = vrcp.f32 %v5451_v37  ;;  %6406 = vst [vmem:[%s10180_s13 + $0x48] sm:$0xff] %v6366_v28   ;;  %v5544_v26 = vmul.f32 %v7119_v50, %v10360_v45 }
 0x424   : > { %v6116_v2 = vmul.f32 -1.442695, %v10413_v59  ;;  %v5287_v41 = vmul.f32 %v10119_v7, %v5233_v47  ;;  %v6651_v18 = vadd.f32 %v6650_v10, %v6649_v9 }
 0x425   : > { %v6652_v31 = vpop.f32.mrf.mxu0 }
 0x426   : > { %v7121_v35 = vpop.eup %7120  ;;  %7130 = vpow2.f32 %v6116_v2  ;;  %v10419_v29 = vadd.f32 %v10126_v25, %v5287_v41  ;;  %v5238_v52 = vadd.f32 %v6651_v18, %v6539_v40 }
 0x427   : > { %v5452_v17 = vadd.f32 1.0, %v7121_v35  ;;  %v6653_v42 = vpop.f32.mrf.mxu0  ;;  %v7123_v62 = vpop.eup %7122 }
 0x428   : > { %v6117_v23 = vmul.f32 -1.442695, %v10419_v29  ;;  %v5288_v14 = vmul.f32 %v10119_v7, %v5238_v52  ;;  %v6654_v54 = vadd.f32 %v6653_v42, %v6652_v31  ;;  %v5545_v22 = vmul.f32 %v7123_v62, %v10371_v8 }
 0x429   : > { %v6655_v3 = vpop.f32.mrf.mxu0 }
 0x42a   : > { %v7125_v53 = vpop.eup %7124  ;;  %7132 = vpow2.f32 %v6117_v23  ;;  %v10426_v19 = vadd.f32 %v10126_v25, %v5288_v14  ;;  %v5241_v39 = vadd.f32 %v6654_v54, %v6542_v5  ;;  %v6371_v38 = vpack.c.bf16 %v5545_v22, %v5544_v26 }
 0x42b   : > { %7134 = vrcp.f32 %v5452_v17  ;;  %v5453_v6 = vadd.f32 1.0, %v7125_v53  ;;  %v6656_v58 = vpop.f32.mrf.mxu0 }
 0x42c   : > { %v6118_v56 = vmul.f32 -1.442695, %v10426_v19  ;;  %v5289_v55 = vmul.f32 %v10119_v7, %v5241_v39  ;;  %v6657_v45 = vadd.f32 %v6656_v58, %v6655_v3  ;;  %6407 = vst [vmem:[%s10180_s13 + $0x50] sm:$0xff] %v6371_v38   ;;  %v7127_v1 = vpop.eup %7126 }
 0x42d   : > { %7136 = vrcp.f32 %v5453_v6  ;;  %v6658_v8 = vpop.f32.mrf.mxu0  ;;  %v5546_v16 = vmul.f32 %v7127_v1, %v10381_v61 }
 0x42e   : > { %7138 = vpow2.f32 %v6118_v56  ;;  %v5329_v36 = vadd.f32 %v10126_v25, %v5289_v55  ;;  %v5246_v4 = vadd.f32 %v6657_v45, %v6545_v13 }
 0x42f   : > { %v6659_v34 = vpop.f32.mrf.mxu0 }
 0x430   : > { %v6119_v33 = vmul.f32 -1.442695, %v5329_v36  ;;  %v5290_v48 = vmul.f32 %v10119_v7, %v5246_v4  ;;  %v6660_v12 = vadd.f32 %v6659_v34, %v6658_v8  ;;  %v7129_v63 = vpop.eup %7128 }
 0x431   : > { %v5547_v32 = vmul.f32 %v7129_v63, %v10388_v24 }
 0x432   : > { %7140 = vpow2.f32 %v6119_v33  ;;  %v5330_v43 = vadd.f32 %v10126_v25, %v5290_v48  ;;  %v5249_v46 = vadd.f32 %v6660_v12, %v6548_v60 }
 0x433   : > { %v7131_v49 = vpop.eup %7130  ;;  %v6376_v51 = vpack.c.bf16 %v5547_v32, %v5546_v16 }
 0x434   : > { %v5454_v57 = vadd.f32 1.0, %v7131_v49  ;;  %v6120_v21 = vmul.f32 -1.442695, %v5330_v43  ;;  %v5291_v27 = vmul.f32 %v10119_v7, %v5249_v46 }
 0x435   : > { %6408 = vst [vmem:[%s10180_s13 + $0x58] sm:$0xff] %v6376_v51  }
 0x436   : > { %v5331_v30 = vadd.f32 %v10126_v25, %v5291_v27  ;;  %7142 = vpow2.f32 %v6120_v21 }
 0x437   : > { %v7133_v9 = vpop.eup %7132  ;;  %7144 = vrcp.f32 %v5454_v57 }
 0x438   : > { %v7135_v37 = vpop.eup %7134  ;;  %v5455_v61 = vadd.f32 1.0, %v7133_v9  ;;  %v6121_v24 = vmul.f32 -1.442695, %v5331_v30 }
 0x439   : > { %v5548_v28 = vmul.f32 %v7135_v37, %v10397_v0 }
 0x43a   : > { %v7137_v47 = vpop.eup %7136  ;;  %7146 = vrcp.f32 %v5455_v61 }
 0x43b   : > { %v7139_v40 = vpop.eup %7138  ;;  %v5549_v10 = vmul.f32 %v7137_v47, %v10403_v15  ;;  %7148 = vpow2.f32 %v6121_v24 }
 0x43c   : > { %v5456_v2 = vadd.f32 1.0, %v7139_v40 }
 0x43d   : > { %v6381_v7 = vpack.c.bf16 %v5549_v10, %v5548_v28 }
 0x43e   : > { %7150 = vrcp.f32 %v5456_v2 }
 0x43f   : > { %v7141_v41 = vpop.eup %7140  ;;  %6409 = vst [vmem:[%s10180_s13 + $0x60] sm:$0xff] %v6381_v7  }
 0x440   : > { %v5457_v25 = vadd.f32 1.0, %v7141_v41 }
 0x442   : > { %7152 = vrcp.f32 %v5457_v25 }
 0x443   : > { %v7143_v18 = vpop.eup %7142 }
 0x444   : > { %v7145_v50 = vpop.eup %7144  ;;  %v5458_v44 = vadd.f32 1.0, %v7143_v18 }
 0x445   : > { %v5550_v52 = vmul.f32 %v7145_v50, %v10413_v59 }
 0x446   : > { %7154 = vrcp.f32 %v5458_v44 }
 0x447   : > { %v7147_v31 = vpop.eup %7146 }
 0x448   : > { %v7149_v35 = vpop.eup %7148  ;;  %v5551_v0 = vmul.f32 %v7147_v31, %v10419_v29 }
 0x449   : > { %v5459_v15 = vadd.f32 1.0, %v7149_v35 }
 0x44a   : > { %v6386_v17 = vpack.c.bf16 %v5551_v0, %v5550_v52 }
 0x44b   : > { %7156 = vrcp.f32 %v5459_v15  ;;  %v7151_v42 = vpop.eup %7150 }
 0x44c   : > { %6410 = vst [vmem:[%s10180_s13 + $0x68] sm:$0xff] %v6386_v17   ;;  %v5552_v5 = vmul.f32 %v7151_v42, %v10426_v19 }
 0x44f   : > { %v7153_v62 = vpop.eup %7152 }
 0x450   : > { %v5553_v23 = vmul.f32 %v7153_v62, %v5329_v36 }
 0x452   : > { %v6391_v14 = vpack.c.bf16 %v5553_v23, %v5552_v5 }
 0x453   : > { %v7155_v54 = vpop.eup %7154 }
 0x454   : > { %6411 = vst [vmem:[%s10180_s13 + $0x70] sm:$0xff] %v6391_v14   ;;  %v5554_v26 = vmul.f32 %v7155_v54, %v5330_v43 }
 0x458   : > { %v7157_v20 = vpop.eup %7156 }
 0x459   : > { %v5555_v22 = vmul.f32 %v7157_v20, %v5331_v30 }
 0x45b   : > { %v6396_v59 = vpack.c.bf16 %v5555_v22, %v5554_v26 }
 0x45d   : > { %6412 = vst [vmem:[%s10180_s13 + $0x78] sm:$0xff] %v6396_v59  }
 0x45e PF: > { %s17_s26 = sadd.s32 1, %s7182_s26   ;;  %s10759_s24 = smov %s7178_s25 }
 0x45f   : > { %p14_p5 = scmp.ge.s32.totalorder %s17_s26, 4   ;;  %s10760_s25 = smov %s10762_s27 }
 0x461   :  { %16 = sbr.rel (!%p14_p5) target bundleno = 2 (0x2), region = 85 }

</bundles_post_ra>
